<compile_context>
chip_gen: v7x
topology: tpu7x:2x2x1
jax: 0.10.0
libtpu: 0.0.40
codegen_flags: <defaults>
</compile_context>

<pallas_src>
import jax
import jax.numpy as jnp
from jax.experimental import pallas as pl
from jax.experimental.pallas import tpu as pltpu


def _rrdb_kernel(x_ref, w_ref, b_ref, o_ref, pad_ref, patch_ref):
    """Fused RRDB forward for one image.

    x_ref:     (H, W, C)       input image (batch dim squeezed by BlockSpec)
    w_ref:     (3, 9*C, C)     im2col weight slabs, one per conv
    b_ref:     (3, 1, C)       biases
    o_ref:     (H, W*C)        lane-dense output block
    pad_ref:   VMEM (H+2, W+2, C)  zero-padded staging buffer
    patch_ref: VMEM (H*W, 9*C)     im2col patch matrix
    """
    H, W, C = x_ref.shape
    HW = H * W

    # Zero only the 1-pixel border; the interior is fully overwritten before
    # each conv, so the zero border persists across all three convolutions.
    pad_ref[0:1, :, :] = jnp.zeros((1, W + 2, C), jnp.float32)
    pad_ref[H + 1:H + 2, :, :] = jnp.zeros((1, W + 2, C), jnp.float32)
    pad_ref[:, 0:1, :] = jnp.zeros((H + 2, 1, C), jnp.float32)
    pad_ref[:, W + 1:W + 2, :] = jnp.zeros((H + 2, 1, C), jnp.float32)

    def conv3x3(act_hwc, idx):
        # Stage the activation into the interior of the padded buffer.
        pad_ref[1:H + 1, 1:W + 1, :] = act_hwc
        # Build the (H*W, 9C) im2col patch slab: one layout-preserving copy
        # per tap (explicit, instead of one hidden copy per tiny matmul).
        for dh in range(3):
            for dw in range(3):
                tap = 3 * dh + dw
                patch_ref[:, tap * C:(tap + 1) * C] = (
                    pad_ref[dh:dh + H, dw:dw + W, :].reshape(HW, C))
        # Single MXU contraction with K = 9*C (instead of nine K = C dots).
        acc = jnp.dot(patch_ref[...], w_ref[idx],
                      preferred_element_type=jnp.float32)
        return acc + b_ref[idx]                    # (H*W, C) + (1, C)

    def lrelu(v):                                   # LeakyReLU(0.2)
        return jnp.where(v > 0, v, 0.2 * v)

    x = x_ref[...].astype(jnp.float32)              # (H, W, C)
    h = lrelu(conv3x3(x, 0)).reshape(H, W, C)
    h = lrelu(conv3x3(h, 1)).reshape(H, W, C)
    h = conv3x3(h, 2).reshape(H, W, C) + x          # residual add (f32)

    # Emit lane-dense: lane group w of o_ref holds pixel (h, w)'s channels, so
    # the (H, W*C) output block DMAs back to HBM as one dense slab.
    for w in range(W):
        o_ref[:, w * C:(w + 1) * C] = h[:, w, :].astype(o_ref.dtype)


def rrdb_forward(x_nchw, params):
    """params = [(w1, b1), (w2, b2), (w3, b3)], w: (3,3,C,C) HWIO, b: (C,)."""
    (w1, b1), (w2, b2), (w3, b3) = params
    N, C, H, W = x_nchw.shape
    x = jnp.transpose(x_nchw, (0, 2, 3, 1))         # NCHW -> NHWC

    # Pack weights as im2col slabs: K index (3*dh + dw)*C + ci -> output co.
    w_slab = jnp.stack([w1.reshape(9 * C, C),
                        w2.reshape(9 * C, C),
                        w3.reshape(9 * C, C)])       # (3, 9C, C)
    b_slab = jnp.stack([b1, b2, b3]).reshape(3, 1, C)  # (3, 1, C)

    # NOTE: one image per grid step stays comfortably VMEM-resident for
    # realistic RRDB sizes (C=64, H=W=128 => ~10 MiB live); row-band spatial
    # tiling with a 3-row halo would be the next step for very large images.
    out = pl.pallas_call(
        _rrdb_kernel,
        grid=(N,),
        in_specs=[
            pl.BlockSpec((None, H, W, C), lambda n: (n, 0, 0, 0)),
            pl.BlockSpec((3, 9 * C, C), lambda n: (0, 0, 0)),
            pl.BlockSpec((3, 1, C), lambda n: (0, 0, 0)),
        ],
        out_specs=pl.BlockSpec((None, H, W * C), lambda n: (n, 0, 0)),
        out_shape=jax.ShapeDtypeStruct((N, H, W * C), x.dtype),
        scratch_shapes=[
            pltpu.VMEM((H + 2, W + 2, C), jnp.float32),   # padded activation
            pltpu.VMEM((H * W, 9 * C), jnp.float32),      # im2col patches
        ],
        compiler_params=pltpu.CompilerParams(
            dimension_semantics=("parallel",)),
    )(x, w_slab, b_slab)

    out = out.reshape(N, H, W, C)
    return jnp.transpose(out, (0, 3, 1, 2))          # NHWC -> NCHW


def rrdb_reference(x_nchw, params):
    """Pure-JAX reference (same math as the PyTorch module)."""
    (w1, b1), (w2, b2), (w3, b3) = params
    x = jnp.transpose(x_nchw, (0, 2, 3, 1))

    def conv(a, w, b):
        y = jax.lax.conv_general_dilated(
            a, w, window_strides=(1, 1), padding="SAME",
            dimension_numbers=("NHWC", "HWIO", "NHWC"))
        return y + b

    lrelu = lambda v: jnp.where(v > 0, v, 0.2 * v)
    h = lrelu(conv(x, w1, b1))
    h = lrelu(conv(h, w2, b2))
    h = conv(h, w3, b3)
    return jnp.transpose(h + x, (0, 3, 1, 2))


if __name__ == "__main__":
    N, C, H, W = 2, 4, 16, 16
    key = jax.random.PRNGKey(0)
    keys = jax.random.split(key, 7)

    x = jax.random.normal(keys[0], (N, C, H, W), jnp.float32)

    def init_conv(kw, kb):
        fan_in = C * 9
        w = jax.random.normal(kw, (3, 3, C, C), jnp.float32) / jnp.sqrt(fan_in)
        b = jax.random.normal(kb, (C,), jnp.float32) * 0.01
        return w, b

    params = [init_conv(keys[1], keys[2]),
              init_conv(keys[3], keys[4]),
              init_conv(keys[5], keys[6])]

    out = rrdb_forward(x, params)
    jax.block_until_ready(out)

    ref = rrdb_reference(x, params)
    assert out.shape == (N, C, H, W)
    err = float(jnp.max(jnp.abs(out - ref)))
    if err > 1e-4:
        raise AssertionError(f"Pallas RRDB mismatch vs reference, max abs err={err}")

    print("KERNEL_OK")
</pallas_src>

<mosaic_0001>
module attributes {stable_mosaic.version = 11 : i64} {
  func.func @_rrdb_kernel(%arg0: i32, %arg1: memref<1x16x16x4xf32, #tpu.memory_space<vmem>>, %arg2: memref<3x36x4xf32, #tpu.memory_space<vmem>>, %arg3: memref<3x1x4xf32, #tpu.memory_space<vmem>>, %arg4: memref<1x16x64xf32, #tpu.memory_space<vmem>>, %arg5: memref<18x18x4xf32, #tpu.memory_space<vmem>>, %arg6: memref<256x36xf32, #tpu.memory_space<vmem>>) attributes {dimension_semantics = [#tpu.dimension_semantics<parallel>], iteration_bounds = array<i64: 2>, scalar_prefetch = 0 : i64, scratch_operands = 2 : i64, tpu.core_type = #tpu.core_type<tc>, window_params = [{transform_indices = @transform_0, window_bounds = array<i64: 1, 16, 16, 4>}, {pipeline_mode = #tpu.pipeline_mode<synchronous>, transform_indices = @transform_1, window_bounds = array<i64: 3, 36, 4>}, {pipeline_mode = #tpu.pipeline_mode<synchronous>, transform_indices = @transform_2, window_bounds = array<i64: 3, 1, 4>}, {transform_indices = @transform_3, window_bounds = array<i64: 1, 16, 64>}]} {
    %cst = arith.constant 0.000000e+00 : f32
    %0 = vector.broadcast %cst : f32 to vector<1x18x4xf32>
    %c0 = arith.constant 0 : index
    %c0_0 = arith.constant 0 : index
    %c0_1 = arith.constant 0 : index
    %1 = vector.load %arg5[%c0, %c0_0, %c0_1] : memref<18x18x4xf32, #tpu.memory_space<vmem>>, vector<1x18x4xf32>
    tpu.vector_store %arg5[%c0, %c0_0, %c0_1], %0 {strides = array<i32>} : memref<18x18x4xf32, #tpu.memory_space<vmem>>, vector<1x18x4xf32>,
    %cst_2 = arith.constant 0.000000e+00 : f32
    %2 = vector.broadcast %cst_2 : f32 to vector<1x18x4xf32>
    %c17 = arith.constant 17 : index
    %c0_3 = arith.constant 0 : index
    %c0_4 = arith.constant 0 : index
    %3 = vector.load %arg5[%c17, %c0_3, %c0_4] : memref<18x18x4xf32, #tpu.memory_space<vmem>>, vector<1x18x4xf32>
    tpu.vector_store %arg5[%c17, %c0_3, %c0_4], %2 {strides = array<i32>} : memref<18x18x4xf32, #tpu.memory_space<vmem>>, vector<1x18x4xf32>,
    %cst_5 = arith.constant 0.000000e+00 : f32
    %4 = vector.broadcast %cst_5 : f32 to vector<18x1x4xf32>
    %c0_6 = arith.constant 0 : index
    %c0_7 = arith.constant 0 : index
    %c0_8 = arith.constant 0 : index
    %5 = vector.load %arg5[%c0_6, %c0_7, %c0_8] : memref<18x18x4xf32, #tpu.memory_space<vmem>>, vector<18x1x4xf32>
    tpu.vector_store %arg5[%c0_6, %c0_7, %c0_8], %4 {strides = array<i32>} : memref<18x18x4xf32, #tpu.memory_space<vmem>>, vector<18x1x4xf32>,
    %cst_9 = arith.constant 0.000000e+00 : f32
    %6 = vector.broadcast %cst_9 : f32 to vector<18x1x4xf32>
    %c0_10 = arith.constant 0 : index
    %c17_11 = arith.constant 17 : index
    %c0_12 = arith.constant 0 : index
    %7 = vector.load %arg5[%c0_10, %c17_11, %c0_12] : memref<18x18x4xf32, #tpu.memory_space<vmem>>, vector<18x1x4xf32>
    tpu.vector_store %arg5[%c0_10, %c17_11, %c0_12], %6 {strides = array<i32>} : memref<18x18x4xf32, #tpu.memory_space<vmem>>, vector<18x1x4xf32>,
    %c0_13 = arith.constant 0 : index
    %c0_14 = arith.constant 0 : index
    %c0_15 = arith.constant 0 : index
    %c0_16 = arith.constant 0 : index
    %8 = vector.load %arg1[%c0_13, %c0_14, %c0_15, %c0_16] : memref<1x16x16x4xf32, #tpu.memory_space<vmem>>, vector<1x16x16x4xf32>
    %9 = vector.shape_cast %8 : vector<1x16x16x4xf32> to vector<16x16x4xf32>
    %c1 = arith.constant 1 : index
    %c1_17 = arith.constant 1 : index
    %c0_18 = arith.constant 0 : index
    %10 = vector.load %arg5[%c1, %c1_17, %c0_18] : memref<18x18x4xf32, #tpu.memory_space<vmem>>, vector<16x16x4xf32>
    tpu.vector_store %arg5[%c1, %c1_17, %c0_18], %9 {strides = array<i32>} : memref<18x18x4xf32, #tpu.memory_space<vmem>>, vector<16x16x4xf32>,
    %c0_19 = arith.constant 0 : index
    %c0_20 = arith.constant 0 : index
    %c0_21 = arith.constant 0 : index
    %11 = vector.load %arg5[%c0_19, %c0_20, %c0_21] : memref<18x18x4xf32, #tpu.memory_space<vmem>>, vector<16x16x4xf32>
    %12 = vector.shape_cast %11 : vector<16x16x4xf32> to vector<256x4xf32>
    %c0_22 = arith.constant 0 : index
    %c0_23 = arith.constant 0 : index
    %13 = vector.load %arg6[%c0_22, %c0_23] : memref<256x36xf32, #tpu.memory_space<vmem>>, vector<256x4xf32>
    tpu.vector_store %arg6[%c0_22, %c0_23], %12 {strides = array<i32>} : memref<256x36xf32, #tpu.memory_space<vmem>>, vector<256x4xf32>,
    %c0_24 = arith.constant 0 : index
    %c1_25 = arith.constant 1 : index
    %c0_26 = arith.constant 0 : index
    %14 = vector.load %arg5[%c0_24, %c1_25, %c0_26] : memref<18x18x4xf32, #tpu.memory_space<vmem>>, vector<16x16x4xf32>
    %15 = vector.shape_cast %14 : vector<16x16x4xf32> to vector<256x4xf32>
    %c0_27 = arith.constant 0 : index
    %c4 = arith.constant 4 : index
    %16 = vector.load %arg6[%c0_27, %c4] : memref<256x36xf32, #tpu.memory_space<vmem>>, vector<256x4xf32>
    tpu.vector_store %arg6[%c0_27, %c4], %15 {strides = array<i32>} : memref<256x36xf32, #tpu.memory_space<vmem>>, vector<256x4xf32>,
    %c0_28 = arith.constant 0 : index
    %c2 = arith.constant 2 : index
    %c0_29 = arith.constant 0 : index
    %17 = vector.load %arg5[%c0_28, %c2, %c0_29] : memref<18x18x4xf32, #tpu.memory_space<vmem>>, vector<16x16x4xf32>
    %18 = vector.shape_cast %17 : vector<16x16x4xf32> to vector<256x4xf32>
    %c0_30 = arith.constant 0 : index
    %c8 = arith.constant 8 : index
    %19 = vector.load %arg6[%c0_30, %c8] : memref<256x36xf32, #tpu.memory_space<vmem>>, vector<256x4xf32>
    tpu.vector_store %arg6[%c0_30, %c8], %18 {strides = array<i32>} : memref<256x36xf32, #tpu.memory_space<vmem>>, vector<256x4xf32>,
    %c1_31 = arith.constant 1 : index
    %c0_32 = arith.constant 0 : index
    %c0_33 = arith.constant 0 : index
    %20 = vector.load %arg5[%c1_31, %c0_32, %c0_33] : memref<18x18x4xf32, #tpu.memory_space<vmem>>, vector<16x16x4xf32>
    %21 = vector.shape_cast %20 : vector<16x16x4xf32> to vector<256x4xf32>
    %c0_34 = arith.constant 0 : index
    %c12 = arith.constant 12 : index
    %22 = vector.load %arg6[%c0_34, %c12] : memref<256x36xf32, #tpu.memory_space<vmem>>, vector<256x4xf32>
    tpu.vector_store %arg6[%c0_34, %c12], %21 {strides = array<i32>} : memref<256x36xf32, #tpu.memory_space<vmem>>, vector<256x4xf32>,
    %c1_35 = arith.constant 1 : index
    %c1_36 = arith.constant 1 : index
    %c0_37 = arith.constant 0 : index
    %23 = vector.load %arg5[%c1_35, %c1_36, %c0_37] : memref<18x18x4xf32, #tpu.memory_space<vmem>>, vector<16x16x4xf32>
    %24 = vector.shape_cast %23 : vector<16x16x4xf32> to vector<256x4xf32>
    %c0_38 = arith.constant 0 : index
    %c16 = arith.constant 16 : index
    %25 = vector.load %arg6[%c0_38, %c16] : memref<256x36xf32, #tpu.memory_space<vmem>>, vector<256x4xf32>
    tpu.vector_store %arg6[%c0_38, %c16], %24 {strides = array<i32>} : memref<256x36xf32, #tpu.memory_space<vmem>>, vector<256x4xf32>,
    %c1_39 = arith.constant 1 : index
    %c2_40 = arith.constant 2 : index
    %c0_41 = arith.constant 0 : index
    %26 = vector.load %arg5[%c1_39, %c2_40, %c0_41] : memref<18x18x4xf32, #tpu.memory_space<vmem>>, vector<16x16x4xf32>
    %27 = vector.shape_cast %26 : vector<16x16x4xf32> to vector<256x4xf32>
    %c0_42 = arith.constant 0 : index
    %c20 = arith.constant 20 : index
    %28 = vector.load %arg6[%c0_42, %c20] : memref<256x36xf32, #tpu.memory_space<vmem>>, vector<256x4xf32>
    tpu.vector_store %arg6[%c0_42, %c20], %27 {strides = array<i32>} : memref<256x36xf32, #tpu.memory_space<vmem>>, vector<256x4xf32>,
    %c2_43 = arith.constant 2 : index
    %c0_44 = arith.constant 0 : index
    %c0_45 = arith.constant 0 : index
    %29 = vector.load %arg5[%c2_43, %c0_44, %c0_45] : memref<18x18x4xf32, #tpu.memory_space<vmem>>, vector<16x16x4xf32>
    %30 = vector.shape_cast %29 : vector<16x16x4xf32> to vector<256x4xf32>
    %c0_46 = arith.constant 0 : index
    %c24 = arith.constant 24 : index
    %31 = vector.load %arg6[%c0_46, %c24] : memref<256x36xf32, #tpu.memory_space<vmem>>, vector<256x4xf32>
    tpu.vector_store %arg6[%c0_46, %c24], %30 {strides = array<i32>} : memref<256x36xf32, #tpu.memory_space<vmem>>, vector<256x4xf32>,
    %c2_47 = arith.constant 2 : index
    %c1_48 = arith.constant 1 : index
    %c0_49 = arith.constant 0 : index
    %32 = vector.load %arg5[%c2_47, %c1_48, %c0_49] : memref<18x18x4xf32, #tpu.memory_space<vmem>>, vector<16x16x4xf32>
    %33 = vector.shape_cast %32 : vector<16x16x4xf32> to vector<256x4xf32>
    %c0_50 = arith.constant 0 : index
    %c28 = arith.constant 28 : index
    %34 = vector.load %arg6[%c0_50, %c28] : memref<256x36xf32, #tpu.memory_space<vmem>>, vector<256x4xf32>
    tpu.vector_store %arg6[%c0_50, %c28], %33 {strides = array<i32>} : memref<256x36xf32, #tpu.memory_space<vmem>>, vector<256x4xf32>,
    %c2_51 = arith.constant 2 : index
    %c2_52 = arith.constant 2 : index
    %c0_53 = arith.constant 0 : index
    %35 = vector.load %arg5[%c2_51, %c2_52, %c0_53] : memref<18x18x4xf32, #tpu.memory_space<vmem>>, vector<16x16x4xf32>
    %36 = vector.shape_cast %35 : vector<16x16x4xf32> to vector<256x4xf32>
    %c0_54 = arith.constant 0 : index
    %c32 = arith.constant 32 : index
    %37 = vector.load %arg6[%c0_54, %c32] : memref<256x36xf32, #tpu.memory_space<vmem>>, vector<256x4xf32>
    tpu.vector_store %arg6[%c0_54, %c32], %36 {strides = array<i32>} : memref<256x36xf32, #tpu.memory_space<vmem>>, vector<256x4xf32>,
    %c0_55 = arith.constant 0 : index
    %c0_56 = arith.constant 0 : index
    %38 = vector.load %arg6[%c0_55, %c0_56] : memref<256x36xf32, #tpu.memory_space<vmem>>, vector<256x36xf32>
    %c0_57 = arith.constant 0 : index
    %c0_58 = arith.constant 0 : index
    %c0_59 = arith.constant 0 : index
    %39 = vector.load %arg2[%c0_57, %c0_58, %c0_59] : memref<3x36x4xf32, #tpu.memory_space<vmem>>, vector<1x36x4xf32>
    %40 = vector.shape_cast %39 : vector<1x36x4xf32> to vector<36x4xf32>
    %cst_60 = arith.constant dense<0.000000e+00> : vector<256x4xf32>
    %41 = tpu.matmul %38, %40, %cst_60 {dimension_numbers = #tpu.dot_dimension_numbers<[1], [0], [0], [1], [0, 0, 1, 1], [], []>} : vector<256x36xf32>, vector<36x4xf32>, vector<256x4xf32> -> vector<256x4xf32>
    %c0_61 = arith.constant 0 : index
    %c0_62 = arith.constant 0 : index
    %c0_63 = arith.constant 0 : index
    %42 = vector.load %arg3[%c0_61, %c0_62, %c0_63] : memref<3x1x4xf32, #tpu.memory_space<vmem>>, vector<1x1x4xf32>
    %43 = vector.shape_cast %42 : vector<1x1x4xf32> to vector<1x4xf32>
    %44 = vector.broadcast %43 : vector<1x4xf32> to vector<256x4xf32>
    %45 = arith.addf %41, %44 : vector<256x4xf32>
    %cst_64 = arith.constant 0.000000e+00 : f32
    %46 = vector.broadcast %cst_64 : f32 to vector<256x4xf32>
    %47 = arith.cmpf ogt, %45, %46 : vector<256x4xf32>
    %cst_65 = arith.constant 2.000000e-01 : f32
    %48 = vector.broadcast %cst_65 : f32 to vector<256x4xf32>
    %49 = arith.mulf %48, %45 : vector<256x4xf32>
    %50 = arith.select %47, %45, %49 : vector<256x4xi1>, vector<256x4xf32>
    %51 = vector.shape_cast %50 : vector<256x4xf32> to vector<16x16x4xf32>
    %c1_66 = arith.constant 1 : index
    %c1_67 = arith.constant 1 : index
    %c0_68 = arith.constant 0 : index
    %52 = vector.load %arg5[%c1_66, %c1_67, %c0_68] : memref<18x18x4xf32, #tpu.memory_space<vmem>>, vector<16x16x4xf32>
    tpu.vector_store %arg5[%c1_66, %c1_67, %c0_68], %51 {strides = array<i32>} : memref<18x18x4xf32, #tpu.memory_space<vmem>>, vector<16x16x4xf32>,
    %c0_69 = arith.constant 0 : index
    %c0_70 = arith.constant 0 : index
    %c0_71 = arith.constant 0 : index
    %53 = vector.load %arg5[%c0_69, %c0_70, %c0_71] : memref<18x18x4xf32, #tpu.memory_space<vmem>>, vector<16x16x4xf32>
    %54 = vector.shape_cast %53 : vector<16x16x4xf32> to vector<256x4xf32>
    %c0_72 = arith.constant 0 : index
    %c0_73 = arith.constant 0 : index
    %55 = vector.load %arg6[%c0_72, %c0_73] : memref<256x36xf32, #tpu.memory_space<vmem>>, vector<256x4xf32>
    tpu.vector_store %arg6[%c0_72, %c0_73], %54 {strides = array<i32>} : memref<256x36xf32, #tpu.memory_space<vmem>>, vector<256x4xf32>,
    %c0_74 = arith.constant 0 : index
    %c1_75 = arith.constant 1 : index
    %c0_76 = arith.constant 0 : index
    %56 = vector.load %arg5[%c0_74, %c1_75, %c0_76] : memref<18x18x4xf32, #tpu.memory_space<vmem>>, vector<16x16x4xf32>
    %57 = vector.shape_cast %56 : vector<16x16x4xf32> to vector<256x4xf32>
    %c0_77 = arith.constant 0 : index
    %c4_78 = arith.constant 4 : index
    %58 = vector.load %arg6[%c0_77, %c4_78] : memref<256x36xf32, #tpu.memory_space<vmem>>, vector<256x4xf32>
    tpu.vector_store %arg6[%c0_77, %c4_78], %57 {strides = array<i32>} : memref<256x36xf32, #tpu.memory_space<vmem>>, vector<256x4xf32>,
    %c0_79 = arith.constant 0 : index
    %c2_80 = arith.constant 2 : index
    %c0_81 = arith.constant 0 : index
    %59 = vector.load %arg5[%c0_79, %c2_80, %c0_81] : memref<18x18x4xf32, #tpu.memory_space<vmem>>, vector<16x16x4xf32>
    %60 = vector.shape_cast %59 : vector<16x16x4xf32> to vector<256x4xf32>
    %c0_82 = arith.constant 0 : index
    %c8_83 = arith.constant 8 : index
    %61 = vector.load %arg6[%c0_82, %c8_83] : memref<256x36xf32, #tpu.memory_space<vmem>>, vector<256x4xf32>
    tpu.vector_store %arg6[%c0_82, %c8_83], %60 {strides = array<i32>} : memref<256x36xf32, #tpu.memory_space<vmem>>, vector<256x4xf32>,
    %c1_84 = arith.constant 1 : index
    %c0_85 = arith.constant 0 : index
    %c0_86 = arith.constant 0 : index
    %62 = vector.load %arg5[%c1_84, %c0_85, %c0_86] : memref<18x18x4xf32, #tpu.memory_space<vmem>>, vector<16x16x4xf32>
    %63 = vector.shape_cast %62 : vector<16x16x4xf32> to vector<256x4xf32>
    %c0_87 = arith.constant 0 : index
    %c12_88 = arith.constant 12 : index
    %64 = vector.load %arg6[%c0_87, %c12_88] : memref<256x36xf32, #tpu.memory_space<vmem>>, vector<256x4xf32>
    tpu.vector_store %arg6[%c0_87, %c12_88], %63 {strides = array<i32>} : memref<256x36xf32, #tpu.memory_space<vmem>>, vector<256x4xf32>,
    %c1_89 = arith.constant 1 : index
    %c1_90 = arith.constant 1 : index
    %c0_91 = arith.constant 0 : index
    %65 = vector.load %arg5[%c1_89, %c1_90, %c0_91] : memref<18x18x4xf32, #tpu.memory_space<vmem>>, vector<16x16x4xf32>
    %66 = vector.shape_cast %65 : vector<16x16x4xf32> to vector<256x4xf32>
    %c0_92 = arith.constant 0 : index
    %c16_93 = arith.constant 16 : index
    %67 = vector.load %arg6[%c0_92, %c16_93] : memref<256x36xf32, #tpu.memory_space<vmem>>, vector<256x4xf32>
    tpu.vector_store %arg6[%c0_92, %c16_93], %66 {strides = array<i32>} : memref<256x36xf32, #tpu.memory_space<vmem>>, vector<256x4xf32>,
    %c1_94 = arith.constant 1 : index
    %c2_95 = arith.constant 2 : index
    %c0_96 = arith.constant 0 : index
    %68 = vector.load %arg5[%c1_94, %c2_95, %c0_96] : memref<18x18x4xf32, #tpu.memory_space<vmem>>, vector<16x16x4xf32>
    %69 = vector.shape_cast %68 : vector<16x16x4xf32> to vector<256x4xf32>
    %c0_97 = arith.constant 0 : index
    %c20_98 = arith.constant 20 : index
    %70 = vector.load %arg6[%c0_97, %c20_98] : memref<256x36xf32, #tpu.memory_space<vmem>>, vector<256x4xf32>
    tpu.vector_store %arg6[%c0_97, %c20_98], %69 {strides = array<i32>} : memref<256x36xf32, #tpu.memory_space<vmem>>, vector<256x4xf32>,
    %c2_99 = arith.constant 2 : index
    %c0_100 = arith.constant 0 : index
    %c0_101 = arith.constant 0 : index
    %71 = vector.load %arg5[%c2_99, %c0_100, %c0_101] : memref<18x18x4xf32, #tpu.memory_space<vmem>>, vector<16x16x4xf32>
    %72 = vector.shape_cast %71 : vector<16x16x4xf32> to vector<256x4xf32>
    %c0_102 = arith.constant 0 : index
    %c24_103 = arith.constant 24 : index
    %73 = vector.load %arg6[%c0_102, %c24_103] : memref<256x36xf32, #tpu.memory_space<vmem>>, vector<256x4xf32>
    tpu.vector_store %arg6[%c0_102, %c24_103], %72 {strides = array<i32>} : memref<256x36xf32, #tpu.memory_space<vmem>>, vector<256x4xf32>,
    %c2_104 = arith.constant 2 : index
    %c1_105 = arith.constant 1 : index
    %c0_106 = arith.constant 0 : index
    %74 = vector.load %arg5[%c2_104, %c1_105, %c0_106] : memref<18x18x4xf32, #tpu.memory_space<vmem>>, vector<16x16x4xf32>
    %75 = vector.shape_cast %74 : vector<16x16x4xf32> to vector<256x4xf32>
    %c0_107 = arith.constant 0 : index
    %c28_108 = arith.constant 28 : index
    %76 = vector.load %arg6[%c0_107, %c28_108] : memref<256x36xf32, #tpu.memory_space<vmem>>, vector<256x4xf32>
    tpu.vector_store %arg6[%c0_107, %c28_108], %75 {strides = array<i32>} : memref<256x36xf32, #tpu.memory_space<vmem>>, vector<256x4xf32>,
    %c2_109 = arith.constant 2 : index
    %c2_110 = arith.constant 2 : index
    %c0_111 = arith.constant 0 : index
    %77 = vector.load %arg5[%c2_109, %c2_110, %c0_111] : memref<18x18x4xf32, #tpu.memory_space<vmem>>, vector<16x16x4xf32>
    %78 = vector.shape_cast %77 : vector<16x16x4xf32> to vector<256x4xf32>
    %c0_112 = arith.constant 0 : index
    %c32_113 = arith.constant 32 : index
    %79 = vector.load %arg6[%c0_112, %c32_113] : memref<256x36xf32, #tpu.memory_space<vmem>>, vector<256x4xf32>
    tpu.vector_store %arg6[%c0_112, %c32_113], %78 {strides = array<i32>} : memref<256x36xf32, #tpu.memory_space<vmem>>, vector<256x4xf32>,
    %c0_114 = arith.constant 0 : index
    %c0_115 = arith.constant 0 : index
    %80 = vector.load %arg6[%c0_114, %c0_115] : memref<256x36xf32, #tpu.memory_space<vmem>>, vector<256x36xf32>
    %c1_116 = arith.constant 1 : index
    %c0_117 = arith.constant 0 : index
    %c0_118 = arith.constant 0 : index
    %81 = vector.load %arg2[%c1_116, %c0_117, %c0_118] : memref<3x36x4xf32, #tpu.memory_space<vmem>>, vector<1x36x4xf32>
    %82 = vector.shape_cast %81 : vector<1x36x4xf32> to vector<36x4xf32>
    %cst_119 = arith.constant dense<0.000000e+00> : vector<256x4xf32>
    %83 = tpu.matmul %80, %82, %cst_119 {dimension_numbers = #tpu.dot_dimension_numbers<[1], [0], [0], [1], [0, 0, 1, 1], [], []>} : vector<256x36xf32>, vector<36x4xf32>, vector<256x4xf32> -> vector<256x4xf32>
    %c1_120 = arith.constant 1 : index
    %c0_121 = arith.constant 0 : index
    %c0_122 = arith.constant 0 : index
    %84 = vector.load %arg3[%c1_120, %c0_121, %c0_122] : memref<3x1x4xf32, #tpu.memory_space<vmem>>, vector<1x1x4xf32>
    %85 = vector.shape_cast %84 : vector<1x1x4xf32> to vector<1x4xf32>
    %86 = vector.broadcast %85 : vector<1x4xf32> to vector<256x4xf32>
    %87 = arith.addf %83, %86 : vector<256x4xf32>
    %cst_123 = arith.constant 0.000000e+00 : f32
    %88 = vector.broadcast %cst_123 : f32 to vector<256x4xf32>
    %89 = arith.cmpf ogt, %87, %88 : vector<256x4xf32>
    %cst_124 = arith.constant 2.000000e-01 : f32
    %90 = vector.broadcast %cst_124 : f32 to vector<256x4xf32>
    %91 = arith.mulf %90, %87 : vector<256x4xf32>
    %92 = arith.select %89, %87, %91 : vector<256x4xi1>, vector<256x4xf32>
    %93 = vector.shape_cast %92 : vector<256x4xf32> to vector<16x16x4xf32>
    %c1_125 = arith.constant 1 : index
    %c1_126 = arith.constant 1 : index
    %c0_127 = arith.constant 0 : index
    %94 = vector.load %arg5[%c1_125, %c1_126, %c0_127] : memref<18x18x4xf32, #tpu.memory_space<vmem>>, vector<16x16x4xf32>
    tpu.vector_store %arg5[%c1_125, %c1_126, %c0_127], %93 {strides = array<i32>} : memref<18x18x4xf32, #tpu.memory_space<vmem>>, vector<16x16x4xf32>,
    %c0_128 = arith.constant 0 : index
    %c0_129 = arith.constant 0 : index
    %c0_130 = arith.constant 0 : index
    %95 = vector.load %arg5[%c0_128, %c0_129, %c0_130] : memref<18x18x4xf32, #tpu.memory_space<vmem>>, vector<16x16x4xf32>
    %96 = vector.shape_cast %95 : vector<16x16x4xf32> to vector<256x4xf32>
    %c0_131 = arith.constant 0 : index
    %c0_132 = arith.constant 0 : index
    %97 = vector.load %arg6[%c0_131, %c0_132] : memref<256x36xf32, #tpu.memory_space<vmem>>, vector<256x4xf32>
    tpu.vector_store %arg6[%c0_131, %c0_132], %96 {strides = array<i32>} : memref<256x36xf32, #tpu.memory_space<vmem>>, vector<256x4xf32>,
    %c0_133 = arith.constant 0 : index
    %c1_134 = arith.constant 1 : index
    %c0_135 = arith.constant 0 : index
    %98 = vector.load %arg5[%c0_133, %c1_134, %c0_135] : memref<18x18x4xf32, #tpu.memory_space<vmem>>, vector<16x16x4xf32>
    %99 = vector.shape_cast %98 : vector<16x16x4xf32> to vector<256x4xf32>
    %c0_136 = arith.constant 0 : index
    %c4_137 = arith.constant 4 : index
    %100 = vector.load %arg6[%c0_136, %c4_137] : memref<256x36xf32, #tpu.memory_space<vmem>>, vector<256x4xf32>
    tpu.vector_store %arg6[%c0_136, %c4_137], %99 {strides = array<i32>} : memref<256x36xf32, #tpu.memory_space<vmem>>, vector<256x4xf32>,
    %c0_138 = arith.constant 0 : index
    %c2_139 = arith.constant 2 : index
    %c0_140 = arith.constant 0 : index
    %101 = vector.load %arg5[%c0_138, %c2_139, %c0_140] : memref<18x18x4xf32, #tpu.memory_space<vmem>>, vector<16x16x4xf32>
    %102 = vector.shape_cast %101 : vector<16x16x4xf32> to vector<256x4xf32>
    %c0_141 = arith.constant 0 : index
    %c8_142 = arith.constant 8 : index
    %103 = vector.load %arg6[%c0_141, %c8_142] : memref<256x36xf32, #tpu.memory_space<vmem>>, vector<256x4xf32>
    tpu.vector_store %arg6[%c0_141, %c8_142], %102 {strides = array<i32>} : memref<256x36xf32, #tpu.memory_space<vmem>>, vector<256x4xf32>,
    %c1_143 = arith.constant 1 : index
    %c0_144 = arith.constant 0 : index
    %c0_145 = arith.constant 0 : index
    %104 = vector.load %arg5[%c1_143, %c0_144, %c0_145] : memref<18x18x4xf32, #tpu.memory_space<vmem>>, vector<16x16x4xf32>
    %105 = vector.shape_cast %104 : vector<16x16x4xf32> to vector<256x4xf32>
    %c0_146 = arith.constant 0 : index
    %c12_147 = arith.constant 12 : index
    %106 = vector.load %arg6[%c0_146, %c12_147] : memref<256x36xf32, #tpu.memory_space<vmem>>, vector<256x4xf32>
    tpu.vector_store %arg6[%c0_146, %c12_147], %105 {strides = array<i32>} : memref<256x36xf32, #tpu.memory_space<vmem>>, vector<256x4xf32>,
    %c1_148 = arith.constant 1 : index
    %c1_149 = arith.constant 1 : index
    %c0_150 = arith.constant 0 : index
    %107 = vector.load %arg5[%c1_148, %c1_149, %c0_150] : memref<18x18x4xf32, #tpu.memory_space<vmem>>, vector<16x16x4xf32>
    %108 = vector.shape_cast %107 : vector<16x16x4xf32> to vector<256x4xf32>
    %c0_151 = arith.constant 0 : index
    %c16_152 = arith.constant 16 : index
    %109 = vector.load %arg6[%c0_151, %c16_152] : memref<256x36xf32, #tpu.memory_space<vmem>>, vector<256x4xf32>
    tpu.vector_store %arg6[%c0_151, %c16_152], %108 {strides = array<i32>} : memref<256x36xf32, #tpu.memory_space<vmem>>, vector<256x4xf32>,
    %c1_153 = arith.constant 1 : index
    %c2_154 = arith.constant 2 : index
    %c0_155 = arith.constant 0 : index
    %110 = vector.load %arg5[%c1_153, %c2_154, %c0_155] : memref<18x18x4xf32, #tpu.memory_space<vmem>>, vector<16x16x4xf32>
    %111 = vector.shape_cast %110 : vector<16x16x4xf32> to vector<256x4xf32>
    %c0_156 = arith.constant 0 : index
    %c20_157 = arith.constant 20 : index
    %112 = vector.load %arg6[%c0_156, %c20_157] : memref<256x36xf32, #tpu.memory_space<vmem>>, vector<256x4xf32>
    tpu.vector_store %arg6[%c0_156, %c20_157], %111 {strides = array<i32>} : memref<256x36xf32, #tpu.memory_space<vmem>>, vector<256x4xf32>,
    %c2_158 = arith.constant 2 : index
    %c0_159 = arith.constant 0 : index
    %c0_160 = arith.constant 0 : index
    %113 = vector.load %arg5[%c2_158, %c0_159, %c0_160] : memref<18x18x4xf32, #tpu.memory_space<vmem>>, vector<16x16x4xf32>
    %114 = vector.shape_cast %113 : vector<16x16x4xf32> to vector<256x4xf32>
    %c0_161 = arith.constant 0 : index
    %c24_162 = arith.constant 24 : index
    %115 = vector.load %arg6[%c0_161, %c24_162] : memref<256x36xf32, #tpu.memory_space<vmem>>, vector<256x4xf32>
    tpu.vector_store %arg6[%c0_161, %c24_162], %114 {strides = array<i32>} : memref<256x36xf32, #tpu.memory_space<vmem>>, vector<256x4xf32>,
    %c2_163 = arith.constant 2 : index
    %c1_164 = arith.constant 1 : index
    %c0_165 = arith.constant 0 : index
    %116 = vector.load %arg5[%c2_163, %c1_164, %c0_165] : memref<18x18x4xf32, #tpu.memory_space<vmem>>, vector<16x16x4xf32>
    %117 = vector.shape_cast %116 : vector<16x16x4xf32> to vector<256x4xf32>
    %c0_166 = arith.constant 0 : index
    %c28_167 = arith.constant 28 : index
    %118 = vector.load %arg6[%c0_166, %c28_167] : memref<256x36xf32, #tpu.memory_space<vmem>>, vector<256x4xf32>
    tpu.vector_store %arg6[%c0_166, %c28_167], %117 {strides = array<i32>} : memref<256x36xf32, #tpu.memory_space<vmem>>, vector<256x4xf32>,
    %c2_168 = arith.constant 2 : index
    %c2_169 = arith.constant 2 : index
    %c0_170 = arith.constant 0 : index
    %119 = vector.load %arg5[%c2_168, %c2_169, %c0_170] : memref<18x18x4xf32, #tpu.memory_space<vmem>>, vector<16x16x4xf32>
    %120 = vector.shape_cast %119 : vector<16x16x4xf32> to vector<256x4xf32>
    %c0_171 = arith.constant 0 : index
    %c32_172 = arith.constant 32 : index
    %121 = vector.load %arg6[%c0_171, %c32_172] : memref<256x36xf32, #tpu.memory_space<vmem>>, vector<256x4xf32>
    tpu.vector_store %arg6[%c0_171, %c32_172], %120 {strides = array<i32>} : memref<256x36xf32, #tpu.memory_space<vmem>>, vector<256x4xf32>,
    %c0_173 = arith.constant 0 : index
    %c0_174 = arith.constant 0 : index
    %122 = vector.load %arg6[%c0_173, %c0_174] : memref<256x36xf32, #tpu.memory_space<vmem>>, vector<256x36xf32>
    %c2_175 = arith.constant 2 : index
    %c0_176 = arith.constant 0 : index
    %c0_177 = arith.constant 0 : index
    %123 = vector.load %arg2[%c2_175, %c0_176, %c0_177] : memref<3x36x4xf32, #tpu.memory_space<vmem>>, vector<1x36x4xf32>
    %124 = vector.shape_cast %123 : vector<1x36x4xf32> to vector<36x4xf32>
    %cst_178 = arith.constant dense<0.000000e+00> : vector<256x4xf32>
    %125 = tpu.matmul %122, %124, %cst_178 {dimension_numbers = #tpu.dot_dimension_numbers<[1], [0], [0], [1], [0, 0, 1, 1], [], []>} : vector<256x36xf32>, vector<36x4xf32>, vector<256x4xf32> -> vector<256x4xf32>
    %c2_179 = arith.constant 2 : index
    %c0_180 = arith.constant 0 : index
    %c0_181 = arith.constant 0 : index
    %126 = vector.load %arg3[%c2_179, %c0_180, %c0_181] : memref<3x1x4xf32, #tpu.memory_space<vmem>>, vector<1x1x4xf32>
    %127 = vector.shape_cast %126 : vector<1x1x4xf32> to vector<1x4xf32>
    %128 = vector.broadcast %127 : vector<1x4xf32> to vector<256x4xf32>
    %129 = arith.addf %125, %128 : vector<256x4xf32>
    %130 = vector.shape_cast %129 : vector<256x4xf32> to vector<16x16x4xf32>
    %131 = arith.addf %130, %9 : vector<16x16x4xf32>
    %132 = vector.extract_strided_slice %131 {offsets = [0, 0, 0], sizes = [16, 1, 4], strides = [1, 1, 1]} : vector<16x16x4xf32> to vector<16x1x4xf32>
    %133 = vector.shape_cast %132 : vector<16x1x4xf32> to vector<16x4xf32>
    %c0_182 = arith.constant 0 : index
    %c0_183 = arith.constant 0 : index
    %c0_184 = arith.constant 0 : index
    %134 = vector.load %arg4[%c0_182, %c0_183, %c0_184] : memref<1x16x64xf32, #tpu.memory_space<vmem>>, vector<1x16x4xf32>
    %135 = vector.shape_cast %134 : vector<1x16x4xf32> to vector<16x4xf32>
    %136 = vector.shape_cast %133 : vector<16x4xf32> to vector<1x16x4xf32>
    tpu.vector_store %arg4[%c0_182, %c0_183, %c0_184], %136 {strides = array<i32>} : memref<1x16x64xf32, #tpu.memory_space<vmem>>, vector<1x16x4xf32>,
    %137 = vector.extract_strided_slice %131 {offsets = [0, 1, 0], sizes = [16, 1, 4], strides = [1, 1, 1]} : vector<16x16x4xf32> to vector<16x1x4xf32>
    %138 = vector.shape_cast %137 : vector<16x1x4xf32> to vector<16x4xf32>
    %c0_185 = arith.constant 0 : index
    %c0_186 = arith.constant 0 : index
    %c4_187 = arith.constant 4 : index
    %139 = vector.load %arg4[%c0_185, %c0_186, %c4_187] : memref<1x16x64xf32, #tpu.memory_space<vmem>>, vector<1x16x4xf32>
    %140 = vector.shape_cast %139 : vector<1x16x4xf32> to vector<16x4xf32>
    %141 = vector.shape_cast %138 : vector<16x4xf32> to vector<1x16x4xf32>
    tpu.vector_store %arg4[%c0_185, %c0_186, %c4_187], %141 {strides = array<i32>} : memref<1x16x64xf32, #tpu.memory_space<vmem>>, vector<1x16x4xf32>,
    %142 = vector.extract_strided_slice %131 {offsets = [0, 2, 0], sizes = [16, 1, 4], strides = [1, 1, 1]} : vector<16x16x4xf32> to vector<16x1x4xf32>
    %143 = vector.shape_cast %142 : vector<16x1x4xf32> to vector<16x4xf32>
    %c0_188 = arith.constant 0 : index
    %c0_189 = arith.constant 0 : index
    %c8_190 = arith.constant 8 : index
    %144 = vector.load %arg4[%c0_188, %c0_189, %c8_190] : memref<1x16x64xf32, #tpu.memory_space<vmem>>, vector<1x16x4xf32>
    %145 = vector.shape_cast %144 : vector<1x16x4xf32> to vector<16x4xf32>
    %146 = vector.shape_cast %143 : vector<16x4xf32> to vector<1x16x4xf32>
    tpu.vector_store %arg4[%c0_188, %c0_189, %c8_190], %146 {strides = array<i32>} : memref<1x16x64xf32, #tpu.memory_space<vmem>>, vector<1x16x4xf32>,
    %147 = vector.extract_strided_slice %131 {offsets = [0, 3, 0], sizes = [16, 1, 4], strides = [1, 1, 1]} : vector<16x16x4xf32> to vector<16x1x4xf32>
    %148 = vector.shape_cast %147 : vector<16x1x4xf32> to vector<16x4xf32>
    %c0_191 = arith.constant 0 : index
    %c0_192 = arith.constant 0 : index
    %c12_193 = arith.constant 12 : index
    %149 = vector.load %arg4[%c0_191, %c0_192, %c12_193] : memref<1x16x64xf32, #tpu.memory_space<vmem>>, vector<1x16x4xf32>
    %150 = vector.shape_cast %149 : vector<1x16x4xf32> to vector<16x4xf32>
    %151 = vector.shape_cast %148 : vector<16x4xf32> to vector<1x16x4xf32>
    tpu.vector_store %arg4[%c0_191, %c0_192, %c12_193], %151 {strides = array<i32>} : memref<1x16x64xf32, #tpu.memory_space<vmem>>, vector<1x16x4xf32>,
    %152 = vector.extract_strided_slice %131 {offsets = [0, 4, 0], sizes = [16, 1, 4], strides = [1, 1, 1]} : vector<16x16x4xf32> to vector<16x1x4xf32>
    %153 = vector.shape_cast %152 : vector<16x1x4xf32> to vector<16x4xf32>
    %c0_194 = arith.constant 0 : index
    %c0_195 = arith.constant 0 : index
    %c16_196 = arith.constant 16 : index
    %154 = vector.load %arg4[%c0_194, %c0_195, %c16_196] : memref<1x16x64xf32, #tpu.memory_space<vmem>>, vector<1x16x4xf32>
    %155 = vector.shape_cast %154 : vector<1x16x4xf32> to vector<16x4xf32>
    %156 = vector.shape_cast %153 : vector<16x4xf32> to vector<1x16x4xf32>
    tpu.vector_store %arg4[%c0_194, %c0_195, %c16_196], %156 {strides = array<i32>} : memref<1x16x64xf32, #tpu.memory_space<vmem>>, vector<1x16x4xf32>,
    %157 = vector.extract_strided_slice %131 {offsets = [0, 5, 0], sizes = [16, 1, 4], strides = [1, 1, 1]} : vector<16x16x4xf32> to vector<16x1x4xf32>
    %158 = vector.shape_cast %157 : vector<16x1x4xf32> to vector<16x4xf32>
    %c0_197 = arith.constant 0 : index
    %c0_198 = arith.constant 0 : index
    %c20_199 = arith.constant 20 : index
    %159 = vector.load %arg4[%c0_197, %c0_198, %c20_199] : memref<1x16x64xf32, #tpu.memory_space<vmem>>, vector<1x16x4xf32>
    %160 = vector.shape_cast %159 : vector<1x16x4xf32> to vector<16x4xf32>
    %161 = vector.shape_cast %158 : vector<16x4xf32> to vector<1x16x4xf32>
    tpu.vector_store %arg4[%c0_197, %c0_198, %c20_199], %161 {strides = array<i32>} : memref<1x16x64xf32, #tpu.memory_space<vmem>>, vector<1x16x4xf32>,
    %162 = vector.extract_strided_slice %131 {offsets = [0, 6, 0], sizes = [16, 1, 4], strides = [1, 1, 1]} : vector<16x16x4xf32> to vector<16x1x4xf32>
    %163 = vector.shape_cast %162 : vector<16x1x4xf32> to vector<16x4xf32>
    %c0_200 = arith.constant 0 : index
    %c0_201 = arith.constant 0 : index
    %c24_202 = arith.constant 24 : index
    %164 = vector.load %arg4[%c0_200, %c0_201, %c24_202] : memref<1x16x64xf32, #tpu.memory_space<vmem>>, vector<1x16x4xf32>
    %165 = vector.shape_cast %164 : vector<1x16x4xf32> to vector<16x4xf32>
    %166 = vector.shape_cast %163 : vector<16x4xf32> to vector<1x16x4xf32>
    tpu.vector_store %arg4[%c0_200, %c0_201, %c24_202], %166 {strides = array<i32>} : memref<1x16x64xf32, #tpu.memory_space<vmem>>, vector<1x16x4xf32>,
    %167 = vector.extract_strided_slice %131 {offsets = [0, 7, 0], sizes = [16, 1, 4], strides = [1, 1, 1]} : vector<16x16x4xf32> to vector<16x1x4xf32>
    %168 = vector.shape_cast %167 : vector<16x1x4xf32> to vector<16x4xf32>
    %c0_203 = arith.constant 0 : index
    %c0_204 = arith.constant 0 : index
    %c28_205 = arith.constant 28 : index
    %169 = vector.load %arg4[%c0_203, %c0_204, %c28_205] : memref<1x16x64xf32, #tpu.memory_space<vmem>>, vector<1x16x4xf32>
    %170 = vector.shape_cast %169 : vector<1x16x4xf32> to vector<16x4xf32>
    %171 = vector.shape_cast %168 : vector<16x4xf32> to vector<1x16x4xf32>
    tpu.vector_store %arg4[%c0_203, %c0_204, %c28_205], %171 {strides = array<i32>} : memref<1x16x64xf32, #tpu.memory_space<vmem>>, vector<1x16x4xf32>,
    %172 = vector.extract_strided_slice %131 {offsets = [0, 8, 0], sizes = [16, 1, 4], strides = [1, 1, 1]} : vector<16x16x4xf32> to vector<16x1x4xf32>
    %173 = vector.shape_cast %172 : vector<16x1x4xf32> to vector<16x4xf32>
    %c0_206 = arith.constant 0 : index
    %c0_207 = arith.constant 0 : index
    %c32_208 = arith.constant 32 : index
    %174 = vector.load %arg4[%c0_206, %c0_207, %c32_208] : memref<1x16x64xf32, #tpu.memory_space<vmem>>, vector<1x16x4xf32>
    %175 = vector.shape_cast %174 : vector<1x16x4xf32> to vector<16x4xf32>
    %176 = vector.shape_cast %173 : vector<16x4xf32> to vector<1x16x4xf32>
    tpu.vector_store %arg4[%c0_206, %c0_207, %c32_208], %176 {strides = array<i32>} : memref<1x16x64xf32, #tpu.memory_space<vmem>>, vector<1x16x4xf32>,
    %177 = vector.extract_strided_slice %131 {offsets = [0, 9, 0], sizes = [16, 1, 4], strides = [1, 1, 1]} : vector<16x16x4xf32> to vector<16x1x4xf32>
    %178 = vector.shape_cast %177 : vector<16x1x4xf32> to vector<16x4xf32>
    %c0_209 = arith.constant 0 : index
    %c0_210 = arith.constant 0 : index
    %c36 = arith.constant 36 : index
    %179 = vector.load %arg4[%c0_209, %c0_210, %c36] : memref<1x16x64xf32, #tpu.memory_space<vmem>>, vector<1x16x4xf32>
    %180 = vector.shape_cast %179 : vector<1x16x4xf32> to vector<16x4xf32>
    %181 = vector.shape_cast %178 : vector<16x4xf32> to vector<1x16x4xf32>
    tpu.vector_store %arg4[%c0_209, %c0_210, %c36], %181 {strides = array<i32>} : memref<1x16x64xf32, #tpu.memory_space<vmem>>, vector<1x16x4xf32>,
    %182 = vector.extract_strided_slice %131 {offsets = [0, 10, 0], sizes = [16, 1, 4], strides = [1, 1, 1]} : vector<16x16x4xf32> to vector<16x1x4xf32>
    %183 = vector.shape_cast %182 : vector<16x1x4xf32> to vector<16x4xf32>
    %c0_211 = arith.constant 0 : index
    %c0_212 = arith.constant 0 : index
    %c40 = arith.constant 40 : index
    %184 = vector.load %arg4[%c0_211, %c0_212, %c40] : memref<1x16x64xf32, #tpu.memory_space<vmem>>, vector<1x16x4xf32>
    %185 = vector.shape_cast %184 : vector<1x16x4xf32> to vector<16x4xf32>
    %186 = vector.shape_cast %183 : vector<16x4xf32> to vector<1x16x4xf32>
    tpu.vector_store %arg4[%c0_211, %c0_212, %c40], %186 {strides = array<i32>} : memref<1x16x64xf32, #tpu.memory_space<vmem>>, vector<1x16x4xf32>,
    %187 = vector.extract_strided_slice %131 {offsets = [0, 11, 0], sizes = [16, 1, 4], strides = [1, 1, 1]} : vector<16x16x4xf32> to vector<16x1x4xf32>
    %188 = vector.shape_cast %187 : vector<16x1x4xf32> to vector<16x4xf32>
    %c0_213 = arith.constant 0 : index
    %c0_214 = arith.constant 0 : index
    %c44 = arith.constant 44 : index
    %189 = vector.load %arg4[%c0_213, %c0_214, %c44] : memref<1x16x64xf32, #tpu.memory_space<vmem>>, vector<1x16x4xf32>
    %190 = vector.shape_cast %189 : vector<1x16x4xf32> to vector<16x4xf32>
    %191 = vector.shape_cast %188 : vector<16x4xf32> to vector<1x16x4xf32>
    tpu.vector_store %arg4[%c0_213, %c0_214, %c44], %191 {strides = array<i32>} : memref<1x16x64xf32, #tpu.memory_space<vmem>>, vector<1x16x4xf32>,
    %192 = vector.extract_strided_slice %131 {offsets = [0, 12, 0], sizes = [16, 1, 4], strides = [1, 1, 1]} : vector<16x16x4xf32> to vector<16x1x4xf32>
    %193 = vector.shape_cast %192 : vector<16x1x4xf32> to vector<16x4xf32>
    %c0_215 = arith.constant 0 : index
    %c0_216 = arith.constant 0 : index
    %c48 = arith.constant 48 : index
    %194 = vector.load %arg4[%c0_215, %c0_216, %c48] : memref<1x16x64xf32, #tpu.memory_space<vmem>>, vector<1x16x4xf32>
    %195 = vector.shape_cast %194 : vector<1x16x4xf32> to vector<16x4xf32>
    %196 = vector.shape_cast %193 : vector<16x4xf32> to vector<1x16x4xf32>
    tpu.vector_store %arg4[%c0_215, %c0_216, %c48], %196 {strides = array<i32>} : memref<1x16x64xf32, #tpu.memory_space<vmem>>, vector<1x16x4xf32>,
    %197 = vector.extract_strided_slice %131 {offsets = [0, 13, 0], sizes = [16, 1, 4], strides = [1, 1, 1]} : vector<16x16x4xf32> to vector<16x1x4xf32>
    %198 = vector.shape_cast %197 : vector<16x1x4xf32> to vector<16x4xf32>
    %c0_217 = arith.constant 0 : index
    %c0_218 = arith.constant 0 : index
    %c52 = arith.constant 52 : index
    %199 = vector.load %arg4[%c0_217, %c0_218, %c52] : memref<1x16x64xf32, #tpu.memory_space<vmem>>, vector<1x16x4xf32>
    %200 = vector.shape_cast %199 : vector<1x16x4xf32> to vector<16x4xf32>
    %201 = vector.shape_cast %198 : vector<16x4xf32> to vector<1x16x4xf32>
    tpu.vector_store %arg4[%c0_217, %c0_218, %c52], %201 {strides = array<i32>} : memref<1x16x64xf32, #tpu.memory_space<vmem>>, vector<1x16x4xf32>,
    %202 = vector.extract_strided_slice %131 {offsets = [0, 14, 0], sizes = [16, 1, 4], strides = [1, 1, 1]} : vector<16x16x4xf32> to vector<16x1x4xf32>
    %203 = vector.shape_cast %202 : vector<16x1x4xf32> to vector<16x4xf32>
    %c0_219 = arith.constant 0 : index
    %c0_220 = arith.constant 0 : index
    %c56 = arith.constant 56 : index
    %204 = vector.load %arg4[%c0_219, %c0_220, %c56] : memref<1x16x64xf32, #tpu.memory_space<vmem>>, vector<1x16x4xf32>
    %205 = vector.shape_cast %204 : vector<1x16x4xf32> to vector<16x4xf32>
    %206 = vector.shape_cast %203 : vector<16x4xf32> to vector<1x16x4xf32>
    tpu.vector_store %arg4[%c0_219, %c0_220, %c56], %206 {strides = array<i32>} : memref<1x16x64xf32, #tpu.memory_space<vmem>>, vector<1x16x4xf32>,
    %207 = vector.extract_strided_slice %131 {offsets = [0, 15, 0], sizes = [16, 1, 4], strides = [1, 1, 1]} : vector<16x16x4xf32> to vector<16x1x4xf32>
    %208 = vector.shape_cast %207 : vector<16x1x4xf32> to vector<16x4xf32>
    %c0_221 = arith.constant 0 : index
    %c0_222 = arith.constant 0 : index
    %c60 = arith.constant 60 : index
    %209 = vector.load %arg4[%c0_221, %c0_222, %c60] : memref<1x16x64xf32, #tpu.memory_space<vmem>>, vector<1x16x4xf32>
    %210 = vector.shape_cast %209 : vector<1x16x4xf32> to vector<16x4xf32>
    %211 = vector.shape_cast %208 : vector<16x4xf32> to vector<1x16x4xf32>
    tpu.vector_store %arg4[%c0_221, %c0_222, %c60], %211 {strides = array<i32>} : memref<1x16x64xf32, #tpu.memory_space<vmem>>, vector<1x16x4xf32>,
    return
  }
  func.func @transform_0(%arg0: i32) -> (i32, i32, i32, i32) {
    %c0_i32 = arith.constant 0 : i32
    %c0_i32_0 = arith.constant 0 : i32
    %c0_i32_1 = arith.constant 0 : i32
    %c0_i32_2 = arith.constant 0 : i32
    return %arg0, %c0_i32, %c0_i32_0, %c0_i32_1 : i32, i32, i32, i32
  }
  func.func @transform_1(%arg0: i32) -> (i32, i32, i32) {
    %c0_i32 = arith.constant 0 : i32
    %c0_i32_0 = arith.constant 0 : i32
    %c0_i32_1 = arith.constant 0 : i32
    %c0_i32_2 = arith.constant 0 : i32
    return %c0_i32, %c0_i32_0, %c0_i32_1 : i32, i32, i32
  }
  func.func @transform_2(%arg0: i32) -> (i32, i32, i32) {
    %c0_i32 = arith.constant 0 : i32
    %c0_i32_0 = arith.constant 0 : i32
    %c0_i32_1 = arith.constant 0 : i32
    %c0_i32_2 = arith.constant 0 : i32
    return %c0_i32, %c0_i32_0, %c0_i32_1 : i32, i32, i32
  }
  func.func @transform_3(%arg0: i32) -> (i32, i32, i32) {
    %c0_i32 = arith.constant 0 : i32
    %c0_i32_0 = arith.constant 0 : i32
    %c0_i32_1 = arith.constant 0 : i32
    return %arg0, %c0_i32, %c0_i32_0 : i32, i32, i32
  }
}

</mosaic_0001>

<bundles_post_ra>
// kernel: tpu_custom_call.1
= control target key start
LH: loop header
LB: loop body
LE: loop exit
PB: predicated region body
PF: predicated region fallthrough
CT: control target
= control target key end

     0   :  { %8 = vsyncpa [#allocation5], 0  ;;  %s11442_s0 = inlined_call_operand.vmem [shape: f32[2,16,16,4], index: 0, kind: input, shape index: {}]   ;;  %s11443_s1 = inlined_call_operand.vmem [shape: f32[3,36,4], index: 1, kind: input, shape index: {}]   ;;  %s11444_s2 = inlined_call_operand.vmem [shape: f32[3,1,4], index: 2, kind: input, shape index: {}]   ;;  %s11445_s3 = inlined_call_operand.hbm [shape: f32[2,16,64], index: 3, kind: output, shape index: {}]  }
   0x1   :  { %10 = vsyncpa [#allocation5 + $0x1], 0  ;;  %s7656_s12 = smov 0   ;;  %s7658_s13 = smov 0  }
   0x2   :  { %s7660_s14 = smov 0   ;;  %s7662_s15 = smov 0  }
   0x3 LB: > { %s7677_s16 = sadd.s32 4294967295, %s7616_s15   ;;  %s7055_s17 = sadd.s32 4294967294, %s7616_s15   ;;  %s7616_s15 = sphi %s7662_s15, %s11729_s15   ;;  %s7612_s14 = sphi %s7660_s14, %s11728_s14   ;;  %s7608_s13 = sphi %s7658_s13, %s11727_s13   ;;  %s7604_s12 = sphi %s7656_s12, %s11726_s12  }
   0x4   : > { %s7681_s18 = sadd.s32 1, %s7616_s15   ;;  %s91_s19 = sadd.s32 1, %s7612_s14 }
   0x5   : > { %s88_s20 = ssub.s32 %s7616_s15, %s7681_s18  ;;  %p101_p0 = scmp.ne.s32.totalorder %s7612_s14, %s7608_s13 }
   0x6   : > { %p89_p1 = scmp.eq.s32.totalorder %s88_s20, 0  ;;  %p102_p2 = scmp.eq.s32.totalorder %s7677_s16, 1 }
   0x7   : > { %p107_p3 = scmp.ne.s32.totalorder %s7608_s13, %s7604_s12  ;;  %p108_p4 = scmp.eq.s32.totalorder %s7055_s17, 1 }
   0x8   : > { %s7692_s21 = scalar_select %p89_p1, %s7612_s14, %s91_s19  }
   0x9   : > { %p7694_p5 = por %p102_p2, %p101_p0  ;;  %p7698_p6 = por %p108_p4, %p107_p3 }
   0xa   : > { %p7058_p7 = scmp.ge.s32.totalorder %s7616_s15, 1  ;;  %p140_p8 = scmp.lt.s32.totalorder %s7616_s15, 3 }
   0xc   : > { %p141_p9 = pnand %p7058_p7, %p140_p8 }
   0xe   : > { %144 = sbr.rel (%p141_p9) target bundleno = 2696 (0xa88), region = 32 }
  0x15   : > { %vm169_vm0 = vcmask 31744   ;;  %p164_p10 = scmp.lt.s32.totalorder %s7677_s16, 1  ;;  %vm172_vm1 = vcmask 25600   ;;  %vm178_vm2 = vcmask 24576   ;;  %v7618_v0 = vmov 0.0   ;;  %s7619_s29 = smov 4  }
  0x16   : > { %170 = vst.msk [vmem:[#allocation2] sm:$0xff] %vm169_vm0, %v7618_v0  ;;  %171 = vst.msk [vmem:[#allocation2 + $0x8] sm:$0xff] %vm169_vm0, %v7618_v0  ;;  %s7620_s30 = smov 8   ;;  %vm504_vm3 = vcmask 64544   ;;  %s7621_s4 = smov 12   ;;  %vm11538_vm4 = vcmask 97344  }
  0x17   : > { %175 = vst.msk [vmem:[#allocation2 + $0x198] sm:$0xff] %vm169_vm0, %v7618_v0  ;;  %176 = vst.msk [vmem:[#allocation2 + $0x1a0] sm:$0xff] %vm169_vm0, %v7618_v0  ;;  %s165_s24 = scalar_select %p164_p10, %s7677_s16, 1  ;;  %vm890_vm5 = vcmask 130144   ;;  %vm1083_vm6 = vcmask 162944   ;;  %vm1276_vm7 = vcmask 195744  }
  0x18   : > { %173 = vst.msk [vmem:[#allocation2 + $0x10] sm:$0x3] %vm172_vm1, %v7618_v0  ;;  %177 = vst.msk [vmem:[#allocation2 + $0x1a8] sm:$0x3] %vm172_vm1, %v7618_v0  ;;  %s7622_s5 = smov 16   ;;  %s7623_s6 = smov 20  }
  0x19   : > { %180 = vst.msk [vmem:[#allocation2 + $0x18] sm:$0x1] %vm178_vm2, %v7618_v0  ;;  %181 = vst.msk [vmem:[#allocation2 + $0x30] sm:$0x1] %vm178_vm2, %v7618_v0  ;;  %s7181_s25 = sshll.u32 %s165_s24, 8  ;;  %s7624_s7 = smov 24  }
  0x1a   : > { %182 = vst.msk [vmem:[#allocation2 + $0x48] sm:$0x1] %vm178_vm2, %v7618_v0  ;;  %183 = vst.msk [vmem:[#allocation2 + $0x60] sm:$0x1] %vm178_vm2, %v7618_v0  ;;  %s7751_s28 = scalar_lea.vmem %s11442_s0, %s7181_s25  ;;  %s7625_s8 = smov 28   ;;  %vm1470_vm8 = vcmask 228544  }
  0x1b   : > { %184 = vst.msk [vmem:[#allocation2 + $0x78] sm:$0x1] %vm178_vm2, %v7618_v0  ;;  %185 = vst.msk [vmem:[#allocation2 + $0x90] sm:$0x1] %vm178_vm2, %v7618_v0  ;;  %v7754_v1 = vld [vmem:[%s7751_s28] sm:$0xff]  ;;  %v7757_v2 = vld [vmem:[%s7751_s28 + $0x8] sm:$0xff] }
  0x1c   : > { %186 = vst.msk [vmem:[#allocation2 + $0xa8] sm:$0x1] %vm178_vm2, %v7618_v0  ;;  %187 = vst.msk [vmem:[#allocation2 + $0xc0] sm:$0x1] %vm178_vm2, %v7618_v0  ;;  %v7760_v3 = vld [vmem:[%s7751_s28 + $0x10] sm:$0xff]  ;;  %v7769_v4 = vld [vmem:[%s7751_s28 + $0x18] sm:$0xff] }
  0x1d   : > { %188 = vst.msk [vmem:[#allocation2 + $0xd8] sm:$0x1] %vm178_vm2, %v7618_v0  ;;  %189 = vst.msk [vmem:[#allocation2 + $0xf0] sm:$0x1] %vm178_vm2, %v7618_v0  ;;  %v7772_v5 = vld [vmem:[%s7751_s28 + $0x20] sm:$0xff]  ;;  %v7775_v6 = vld [vmem:[%s7751_s28 + $0x28] sm:$0xff] }
  0x1e   : > { %190 = vst.msk [vmem:[#allocation2 + $0x108] sm:$0x1] %vm178_vm2, %v7618_v0  ;;  %191 = vst.msk [vmem:[#allocation2 + $0x120] sm:$0x1] %vm178_vm2, %v7618_v0  ;;  %v344_v7 = vld [vmem:[#allocation2 + $0x1] sm:$0xff]  ;;  %v7784_v9 = vld [vmem:[%s7751_s28 + $0x30] sm:$0xff] }
  0x1f   : > { %192 = vst.msk [vmem:[#allocation2 + $0x138] sm:$0x1] %vm178_vm2, %v7618_v0  ;;  %193 = vst.msk [vmem:[#allocation2 + $0x150] sm:$0x1] %vm178_vm2, %v7618_v0  ;;  %v345_v8 = vld [vmem:[#allocation2 + $0x9] sm:$0xff]  ;;  %408 = vrot.lane.b32.xlu0 %v344_v7, %s7619_s29  ;;  %v7790_v10 = vld [vmem:[%s7751_s28 + $0x38] sm:$0xff] }
  0x20   : > { %194 = vst.msk [vmem:[#allocation2 + $0x168] sm:$0x1] %vm178_vm2, %v7618_v0  ;;  %195 = vst.msk [vmem:[#allocation2 + $0x180] sm:$0x1] %vm178_vm2, %v7618_v0  ;;  %v7793_v11 = vld [vmem:[%s7751_s28 + $0x40] sm:$0xff]  ;;  %v7796_v12 = vld [vmem:[%s7751_s28 + $0x48] sm:$0xff] }
  0x21   : > { %198 = vst.msk [vmem:[#allocation2 + $0x29] sm:$0x1] %vm178_vm2, %v7618_v0  ;;  %199 = vst.msk [vmem:[#allocation2 + $0x41] sm:$0x1] %vm178_vm2, %v7618_v0  ;;  %v7805_v13 = vld [vmem:[%s7751_s28 + $0x50] sm:$0xff]  ;;  %v7808_v14 = vld [vmem:[%s7751_s28 + $0x58] sm:$0xff] }
  0x22   : > { %200 = vst.msk [vmem:[#allocation2 + $0x59] sm:$0x1] %vm178_vm2, %v7618_v0  ;;  %201 = vst.msk [vmem:[#allocation2 + $0x71] sm:$0x1] %vm178_vm2, %v7618_v0  ;;  %v7811_v15 = vld [vmem:[%s7751_s28 + $0x60] sm:$0xff]  ;;  %v7820_v16 = vld [vmem:[%s7751_s28 + $0x68] sm:$0xff] }
  0x23   : > { %202 = vst.msk [vmem:[#allocation2 + $0x89] sm:$0x1] %vm178_vm2, %v7618_v0  ;;  %203 = vst.msk [vmem:[#allocation2 + $0xa1] sm:$0x1] %vm178_vm2, %v7618_v0  ;;  %v7823_v17 = vld [vmem:[%s7751_s28 + $0x70] sm:$0xff]  ;;  %v7826_v18 = vld [vmem:[%s7751_s28 + $0x78] sm:$0xff]  ;;  %410 = vrot.lane.b32.xlu0 %v345_v8, %s7619_s29 }
  0x24   : > { %204 = vst.msk [vmem:[#allocation2 + $0xb9] sm:$0x1] %vm178_vm2, %v7618_v0  ;;  %205 = vst.msk [vmem:[#allocation2 + $0xd1] sm:$0x1] %vm178_vm2, %v7618_v0  ;;  %v7835_v19 = vld [vmem:[%s7751_s28 + $0x80] sm:$0xff]  ;;  %v7838_v20 = vld [vmem:[%s7751_s28 + $0x88] sm:$0xff] }
  0x25   : > { %206 = vst.msk [vmem:[#allocation2 + $0xe9] sm:$0x1] %vm178_vm2, %v7618_v0  ;;  %207 = vst.msk [vmem:[#allocation2 + $0x101] sm:$0x1] %vm178_vm2, %v7618_v0  ;;  %v7841_v21 = vld [vmem:[%s7751_s28 + $0x90] sm:$0xff]  ;;  %v7851_v22 = vld [vmem:[%s7751_s28 + $0x98] sm:$0xff] }
  0x26   : > { %208 = vst.msk [vmem:[#allocation2 + $0x119] sm:$0x1] %vm178_vm2, %v7618_v0  ;;  %209 = vst.msk [vmem:[#allocation2 + $0x131] sm:$0x1] %vm178_vm2, %v7618_v0  ;;  %v7854_v23 = vld [vmem:[%s7751_s28 + $0xa0] sm:$0xff]  ;;  %v7857_v24 = vld [vmem:[%s7751_s28 + $0xa8] sm:$0xff] }
  0x27   : > { %210 = vst.msk [vmem:[#allocation2 + $0x149] sm:$0x1] %vm178_vm2, %v7618_v0  ;;  %211 = vst.msk [vmem:[#allocation2 + $0x161] sm:$0x1] %vm178_vm2, %v7618_v0  ;;  %v7874_v28 = vld [vmem:[%s7751_s28 + $0xb0] sm:$0xff]  ;;  %v7877_v29 = vld [vmem:[%s7751_s28 + $0xb8] sm:$0xff] }
  0x28   : > { %212 = vst.msk [vmem:[#allocation2 + $0x179] sm:$0x1] %vm178_vm2, %v7618_v0  ;;  %213 = vst.msk [vmem:[#allocation2 + $0x191] sm:$0x1] %vm178_vm2, %v7618_v0  ;;  %v7896_v33 = vld [vmem:[%s7751_s28 + $0xc0] sm:$0xff]  ;;  %v7899_v34 = vld [vmem:[%s7751_s28 + $0xc8] sm:$0xff] }
  0x29   : > { %197 = vst.msk [vmem:[#allocation2 + $0x11] sm:$0x1] %vm178_vm2, %v7618_v0  ;;  %179 = vst.msk [vmem:[#allocation2] sm:$0x1] %vm178_vm2, %v7618_v0  ;;  %v7902_v35 = vld [vmem:[%s7751_s28 + $0xd0] sm:$0xff]  ;;  %v7913_v36 = vld [vmem:[%s7751_s28 + $0xd8] sm:$0xff] }
  0x2a   : > { %196 = vst.msk [vmem:[#allocation2 + $0x198] sm:$0x1] %vm178_vm2, %v7618_v0  ;;  %214 = vst.msk [vmem:[#allocation2 + $0x1a9] sm:$0x1] %vm178_vm2, %v7618_v0  ;;  %v7916_v37 = vld [vmem:[%s7751_s28 + $0xe0] sm:$0xff]  ;;  %v7919_v38 = vld [vmem:[%s7751_s28 + $0xe8] sm:$0xff] }
  0x2b   : > { %11541 = vst [vmem:[#allocation7_spill] sm:$0xff] %v7754_v1  ;;  %11542 = vst [vmem:[#allocation8_spill] sm:$0xff] %v7757_v2  ;;  %v281_v48 = vld [vmem:[#allocation2 + $0x8] sm:$0xff]  ;;  %vm2030_vm9 = vcmask 1043456   ;;  %vm1663_vm10 = vcmask 261344   ;;  %vm1856_vm11 = vcmask 294144  }
  0x2c   : > { %11543 = vst [vmem:[#allocation9_spill] sm:$0xff] %v7760_v3  ;;  %248 = vst.msk [vmem:[#allocation2 + $0x19] sm:$0xff] %vm169_vm0, %v7754_v1  ;;  %vm1933_vm12 = vcmask 293888   ;;  %s161_s24 = sand.u32 1, %s7608_s13   ;;  %s7182_s27 = sshll.u32 %s7677_s16, 8 }
  0x2d   : > { %249 = vst.msk [vmem:[#allocation2 + $0x21] sm:$0xff] %vm169_vm0, %v7757_v2  ;;  %250 = vst.msk [vmem:[#allocation2 + $0x31] sm:$0xff] %vm169_vm0, %v7760_v3  ;;  %v537_v3 = vld [vmem:[#allocation2 + $0x2] sm:$0xff]  ;;  %s7059_s25 = sshll.u32 %s161_s24, 4  ;;  %s11393_s17 = scalar_lea.hbm %s11445_s3, %s7182_s27 }
  0x2e   : > { %11544 = vst [vmem:[#allocation10_spill] sm:$0xff] %v7769_v4  ;;  %11545 = vst [vmem:[#allocation11_spill] sm:$0xff] %v7772_v5  ;;  %s11109_s26 = scalar_lea.vmem [#allocation4], %s7059_s25  ;;  %s11400_s16 = scalar_lea.sflag [#allocation5], %s161_s24 }
  0x2f   : > { %11546 = vst [vmem:[#allocation12_spill] sm:$0xff] %v7775_v6  ;;  %251 = vst.msk [vmem:[#allocation2 + $0x39] sm:$0xff] %vm169_vm0, %v7769_v4  ;;  %s6993_s9 = sshll.u32 %s11109_s26, 4  ;;  %s7634_s20 = smov [#allocation4]   ;;  %s11395_s9 = int_to_ptr.vmem [resolvable:$true] %s6993_s9 }
  0x30   : > { %252 = vst.msk [vmem:[#allocation2 + $0x49] sm:$0xff] %vm169_vm0, %v7772_v5  ;;  %253 = vst.msk [vmem:[#allocation2 + $0x51] sm:$0xff] %vm169_vm0, %v7775_v6  ;;  %v280_v45 = vld [vmem:[#allocation2] sm:$0xff]  ;;  %v8141_v6 = vld [vmem:[%s7751_s28 + $0xf8] sm:$0xff]  ;;  %s7554_s19 = scalar_lea.vmem %s11395_s9, 256  ;;  %s7558_s25 = sshll.u32 %s7634_s20, 4  ;;  %s7559_s25 = int_to_ptr.vmem [resolvable:$false] %s7558_s25 }
  0x31   : > { %11547 = vst [vmem:[#allocation13_spill] sm:$0xff] %v7784_v9  ;;  %254 = vst.msk [vmem:[#allocation2 + $0x61] sm:$0xff] %vm169_vm0, %v7784_v9  ;;  %p7555_p11 = scmp.ne.s32.totalorder %s11395_s9, %s7554_s19  ;;  %p7561_p0 = scmp.lt.s32.totalorder %s11395_s9, %s7559_s25 }
  0x32   : > { %11548 = vst [vmem:[#allocation14_spill] sm:$0xff] %v7790_v10  ;;  %11549 = vst [vmem:[#allocation15_spill] sm:$0xff] %v7793_v11 }
  0x33   : > { %11550 = vst [vmem:[#allocation16_spill] sm:$0xff] %v7796_v12  ;;  %255 = vst.msk [vmem:[#allocation2 + $0x69] sm:$0xff] %vm169_vm0, %v7790_v10  ;;  %v7859_v25 = vld [vmem:[#allocation2 + $0x19] sm:$0xff]  ;;  %v8134_v10 = vld [vmem:[%s7751_s28 + $0xf0] sm:$0xff]  ;;  %s7626_s28 = smov 32   ;;  %p7556_p12 = pnand %p7555_p11, %p7694_p5 }
  0x34   : > { %256 = vst.msk [vmem:[#allocation2 + $0x79] sm:$0xff] %vm169_vm0, %v7793_v11  ;;  %257 = vst.msk [vmem:[#allocation2 + $0x81] sm:$0xff] %vm169_vm0, %v7796_v12  ;;  %v7861_v26 = vld [vmem:[#allocation2 + $0x31] sm:$0xff]  ;;  %412 = vrot.lane.b32.xlu1 %v7859_v25, %s7619_s29  ;;  %v7871_v27 = vld [vmem:[#allocation2 + $0x21] sm:$0xff] }
  0x35   : > { %11551 = vst [vmem:[#allocation17_spill] sm:$0xff] %v7805_v13  ;;  %11552 = vst [vmem:[#allocation18_spill] sm:$0xff] %v7808_v14  ;;  %416 = vrot.lane.b32.xlu0 %v7861_v26, %s7619_s29  ;;  %v7951_v46 = vld [vmem:[#allocation2 + $0x18] sm:$0xff]  ;;  %v7961_v49 = vld [vmem:[#allocation2 + $0x20] sm:$0xff]  ;;  %p7557_p13 = pneg %p7556_p12 }
  0x36   : > { %11553 = vst [vmem:[#allocation19_spill] sm:$0xff] %v7811_v15  ;;  %258 = vst.msk [vmem:[#allocation2 + $0x91] sm:$0xff] %vm169_vm0, %v7805_v13  ;;  %v7889_v31 = vld [vmem:[#allocation2 + $0x39] sm:$0xff]  ;;  %v7967_v51 = vld [vmem:[#allocation2 + $0x30] sm:$0xff] }
  0x37   : > { %259 = vst.msk [vmem:[#allocation2 + $0x99] sm:$0xff] %vm169_vm0, %v7808_v14  ;;  %260 = vst.msk [vmem:[#allocation2 + $0xa9] sm:$0xff] %vm169_vm0, %v7811_v15  ;;  %v7885_v30 = vld [vmem:[#allocation2 + $0x49] sm:$0xff]  ;;  %v7921_v39 = vld [vmem:[#allocation2 + $0x51] sm:$0xff] }
  0x38   : > { %11554 = vst [vmem:[#allocation20_spill] sm:$0xff] %v7820_v16  ;;  %11555 = vst [vmem:[#allocation21_spill] sm:$0xff] %v7823_v17  ;;  %414 = vrot.lane.b32.xlu1 %v7871_v27, %s7619_s29  ;;  %v7893_v32 = vld [vmem:[#allocation2 + $0x61] sm:$0xff]  ;;  %v7969_v52 = vld [vmem:[#allocation2 + $0x38] sm:$0xff] }
  0x39   : > { %11556 = vst [vmem:[#allocation22_spill] sm:$0xff] %v7826_v18  ;;  %261 = vst.msk [vmem:[#allocation2 + $0xb1] sm:$0xff] %vm169_vm0, %v7820_v16  ;;  %420 = vrot.lane.b32.xlu0 %v7885_v30, %s7619_s29  ;;  %v7979_v54 = vld [vmem:[#allocation2 + $0x48] sm:$0xff]  ;;  %v7981_v55 = vld [vmem:[#allocation2 + $0x50] sm:$0xff] }
  0x3a   : > { %262 = vst.msk [vmem:[#allocation2 + $0xc1] sm:$0xff] %vm169_vm0, %v7823_v17  ;;  %263 = vst.msk [vmem:[#allocation2 + $0xc9] sm:$0xff] %vm169_vm0, %v7826_v18  ;;  %v7935_v41 = vld [vmem:[#allocation2 + $0x69] sm:$0xff]  ;;  %v7989_v57 = vld [vmem:[#allocation2 + $0x60] sm:$0xff] }
  0x3b   : > { %11557 = vst [vmem:[#allocation23_spill] sm:$0xff] %v7835_v19  ;;  %11558 = vst [vmem:[#allocation24_spill] sm:$0xff] %v7838_v20  ;;  %v7931_v40 = vld [vmem:[#allocation2 + $0x79] sm:$0xff]  ;;  %v7943_v43 = vld [vmem:[#allocation2 + $0x81] sm:$0xff] }
  0x3c   : > { %11559 = vst [vmem:[#allocation25_spill] sm:$0xff] %v7841_v21  ;;  %264 = vst.msk [vmem:[#allocation2 + $0xd9] sm:$0xff] %vm169_vm0, %v7835_v19  ;;  %418 = vrot.lane.b32.xlu1 %v7889_v31, %s7619_s29  ;;  %v7991_v58 = vld [vmem:[#allocation2 + $0x68] sm:$0xff]  ;;  %v7993_v59 = vld [vmem:[#allocation2 + $0x78] sm:$0xff] }
  0x3d   : > { %265 = vst.msk [vmem:[#allocation2 + $0xe1] sm:$0xff] %vm169_vm0, %v7838_v20  ;;  %266 = vst.msk [vmem:[#allocation2 + $0xf1] sm:$0xff] %vm169_vm0, %v7841_v21  ;;  %424 = vrot.lane.b32.xlu0 %v7893_v32, %s7619_s29  ;;  %v7939_v42 = vld [vmem:[#allocation2 + $0x91] sm:$0xff]  ;;  %v8003_v60 = vld [vmem:[#allocation2 + $0x80] sm:$0xff] }
  0x3e   : > { %11560 = vst [vmem:[#allocation26_spill] sm:$0xff] %v7851_v22  ;;  %11561 = vst [vmem:[#allocation27_spill] sm:$0xff] %v7854_v23  ;;  %v7947_v44 = vld [vmem:[#allocation2 + $0xa9] sm:$0xff]  ;;  %v7953_v47 = vld [vmem:[#allocation2 + $0x99] sm:$0xff] }
  0x3f   : > { %11562 = vst [vmem:[#allocation28_spill] sm:$0xff] %v7857_v24  ;;  %267 = vst.msk [vmem:[#allocation2 + $0xf9] sm:$0xff] %vm169_vm0, %v7851_v22  ;;  %v8005_v61 = vld [vmem:[#allocation2 + $0x90] sm:$0xff]  ;;  %v8007_v62 = vld [vmem:[#allocation2 + $0x98] sm:$0xff] }
  0x40   : > { %268 = vst.msk [vmem:[#allocation2 + $0x109] sm:$0xff] %vm169_vm0, %v7854_v23  ;;  %269 = vst.msk [vmem:[#allocation2 + $0x111] sm:$0xff] %vm169_vm0, %v7857_v24  ;;  %422 = vrot.lane.b32.xlu1 %v7921_v39, %s7619_s29  ;;  %v7973_v53 = vld [vmem:[#allocation2 + $0xb1] sm:$0xff]  ;;  %v8017_v0 = vld [vmem:[#allocation2 + $0xa8] sm:$0xff] }
  0x41   : > { %11563 = vst [vmem:[#allocation29_spill] sm:$0xff] %v7874_v28  ;;  %11564 = vst [vmem:[#allocation30_spill] sm:$0xff] %v7877_v29  ;;  %428 = vrot.lane.b32.xlu0 %v7931_v40, %s7619_s29  ;;  %v7963_v50 = vld [vmem:[#allocation2 + $0xc1] sm:$0xff]  ;;  %v8009_v63 = vld [vmem:[#allocation2 + $0xc9] sm:$0xff] }
  0x42   : > { %270 = vst.msk [vmem:[#allocation2 + $0x121] sm:$0xff] %vm169_vm0, %v7874_v28  ;;  %271 = vst.msk [vmem:[#allocation2 + $0x129] sm:$0xff] %vm169_vm0, %v7877_v29  ;;  %v8019_v7 = vld [vmem:[#allocation2 + $0xb0] sm:$0xff]  ;;  %v8021_v8 = vld [vmem:[#allocation2 + $0xc0] sm:$0xff] }
  0x43   : > { %11565 = vst [vmem:[#allocation31_spill] sm:$0xff] %v7896_v33  ;;  %11566 = vst [vmem:[#allocation32_spill] sm:$0xff] %v7899_v34  ;;  %v7983_v56 = vld [vmem:[#allocation2 + $0xd9] sm:$0xff] }
  0x44   : > { %11567 = vst [vmem:[#allocation33_spill] sm:$0xff] %v7902_v35  ;;  %272 = vst.msk [vmem:[#allocation2 + $0x139] sm:$0xff] %vm169_vm0, %v7896_v33  ;;  %426 = vrot.lane.b32.xlu1 %v7935_v41, %s7619_s29  ;;  %v8069_v23 = vld [vmem:[#allocation2 + $0xe1] sm:$0xff]  ;;  %v8162_v4 = vld [vmem:[#allocation2 + $0x32] sm:$0xff] }
  0x45   : > { %273 = vst.msk [vmem:[#allocation2 + $0x141] sm:$0xff] %vm169_vm0, %v7899_v34  ;;  %274 = vst.msk [vmem:[#allocation2 + $0x151] sm:$0xff] %vm169_vm0, %v7902_v35  ;;  %432 = vrot.lane.b32.xlu0 %v7939_v42, %s7619_s29  ;;  %v8059_v34 = vld [vmem:[#allocation2 + $0xf1] sm:$0xff] }
  0x46   : > { %11568 = vst [vmem:[#allocation34_spill] sm:$0xff] %v7913_v36  ;;  %11569 = vst [vmem:[#allocation35_spill] sm:$0xff] %v7916_v37  ;;  %v8045_v35 = vld [vmem:[#allocation2 + $0xf8] sm:$0xff] }
  0x47   : > { %11570 = vst [vmem:[#allocation36_spill] sm:$0xff] %v7919_v38  ;;  %275 = vst.msk [vmem:[#allocation2 + $0x159] sm:$0xff] %vm169_vm0, %v7913_v36  ;;  %v8047_v36 = vld [vmem:[#allocation2 + $0x108] sm:$0xff]  ;;  %v8057_v33 = vld [vmem:[#allocation2 + $0x110] sm:$0xff] }
  0x48   : > { %276 = vst.msk [vmem:[#allocation2 + $0x169] sm:$0xff] %vm169_vm0, %v7916_v37  ;;  %277 = vst.msk [vmem:[#allocation2 + $0x171] sm:$0xff] %vm169_vm0, %v7919_v38  ;;  %430 = vrot.lane.b32.xlu1 %v7943_v43, %s7619_s29  ;;  %v8035_v37 = vld [vmem:[#allocation2 + $0xe0] sm:$0xff]  ;;  %v8043_v38 = vld [vmem:[#allocation2 + $0xf0] sm:$0xff] }
  0x49   : > { %312 = vst.msk [vmem:[#allocation3] sm:$0xff] %vm169_vm0, %v280_v45  ;;  %314 = vst.msk [vmem:[#allocation3 + $0x10] sm:$0xff] %vm169_vm0, %v7951_v46  ;;  %436 = vrot.lane.b32.xlu0 %v7947_v44, %s7619_s29  ;;  %v8031_v45 = vld [vmem:[#allocation2 + $0xc8] sm:$0xff]  ;;  %v8065_v28 = vld [vmem:[#allocation2 + $0x120] sm:$0xff] }
  0x4a   : > { %313 = vst.msk [vmem:[#allocation3 + $0x8] sm:$0xff] %vm169_vm0, %v281_v48  ;;  %315 = vst.msk [vmem:[#allocation3 + $0x18] sm:$0xff] %vm169_vm0, %v7961_v49  ;;  %v8033_v48 = vld [vmem:[#allocation2 + $0xd8] sm:$0xff]  ;;  %v8067_v29 = vld [vmem:[#allocation2 + $0x128] sm:$0xff] }
  0x4b   : > { %316 = vst.msk [vmem:[#allocation3 + $0x20] sm:$0xff] %vm169_vm0, %v7967_v51  ;;  %317 = vst.msk [vmem:[#allocation3 + $0x28] sm:$0xff] %vm169_vm0, %v7969_v52  ;;  %v8077_v24 = vld [vmem:[#allocation2 + $0x109] sm:$0xff]  ;;  %v8081_v21 = vld [vmem:[#allocation2 + $0x138] sm:$0xff] }
  0x4c   : > { %434 = vrot.lane.b32.xlu1 %v7953_v47, %s7619_s29  ;;  %318 = vst.msk [vmem:[#allocation3 + $0x30] sm:$0xff] %vm169_vm0, %v7979_v54  ;;  %319 = vst.msk [vmem:[#allocation3 + $0x38] sm:$0xff] %vm169_vm0, %v7981_v55  ;;  %v8083_v22 = vld [vmem:[#allocation2 + $0x140] sm:$0xff]  ;;  %v8097_v17 = vld [vmem:[#allocation2 + $0x150] sm:$0xff] }
  0x4d   : > { %440 = vrot.lane.b32.xlu0 %v7963_v50, %s7619_s29  ;;  %320 = vst.msk [vmem:[#allocation3 + $0x40] sm:$0xff] %vm169_vm0, %v7989_v57  ;;  %321 = vst.msk [vmem:[#allocation3 + $0x48] sm:$0xff] %vm169_vm0, %v7991_v58  ;;  %v8085_v19 = vld [vmem:[#allocation2 + $0xf9] sm:$0xff]  ;;  %v8093_v20 = vld [vmem:[#allocation2 + $0x121] sm:$0xff] }
  0x4e   : > { %322 = vst.msk [vmem:[#allocation3 + $0x50] sm:$0xff] %vm169_vm0, %v7993_v59  ;;  %323 = vst.msk [vmem:[#allocation3 + $0x58] sm:$0xff] %vm169_vm0, %v8003_v60  ;;  %v8099_v18 = vld [vmem:[#allocation2 + $0x158] sm:$0xff]  ;;  %v8117_v11 = vld [vmem:[#allocation2 + $0x129] sm:$0xff] }
  0x4f   : > { %324 = vst.msk [vmem:[#allocation3 + $0x60] sm:$0xff] %vm169_vm0, %v8005_v61  ;;  %325 = vst.msk [vmem:[#allocation3 + $0x68] sm:$0xff] %vm169_vm0, %v8007_v62  ;;  %v8101_v15 = vld [vmem:[#allocation2 + $0x111] sm:$0xff]  ;;  %v8109_v16 = vld [vmem:[#allocation2 + $0x139] sm:$0xff] }
  0x50   : > { %438 = vrot.lane.b32.xlu1 %v7973_v53, %s7619_s29  ;;  %326 = vst.msk [vmem:[#allocation3 + $0x70] sm:$0xff] %vm169_vm0, %v8017_v0  ;;  %327 = vst.msk [vmem:[#allocation3 + $0x78] sm:$0xff] %vm169_vm0, %v8019_v7  ;;  %v8113_v13 = vld [vmem:[#allocation2 + $0x168] sm:$0xff]  ;;  %v8115_v14 = vld [vmem:[#allocation2 + $0x170] sm:$0xff] }
  0x51   : > { %328 = vst.msk [vmem:[#allocation3 + $0x80] sm:$0xff] %vm169_vm0, %v8021_v8  ;;  %329 = vst.msk [vmem:[#allocation3 + $0x88] sm:$0xff] %vm169_vm0, %v8031_v45  ;;  %444 = vrot.lane.b32.xlu0 %v7983_v56, %s7619_s29  ;;  %v8125_v12 = vld [vmem:[#allocation2 + $0x151] sm:$0xff]  ;;  %v8129_v9 = vld [vmem:[#allocation2 + $0x141] sm:$0xff] }
  0x52   : > { %330 = vst.msk [vmem:[#allocation3 + $0x90] sm:$0xff] %vm169_vm0, %v8033_v48  ;;  %331 = vst.msk [vmem:[#allocation3 + $0x98] sm:$0xff] %vm169_vm0, %v8035_v37  ;;  %v8136_v5 = vld [vmem:[#allocation2 + $0x169] sm:$0xff]  ;;  %v8147_v1 = vld [vmem:[#allocation2 + $0x159] sm:$0xff] }
  0x53   : > { %332 = vst.msk [vmem:[#allocation3 + $0xa0] sm:$0xff] %vm169_vm0, %v8043_v38  ;;  %333 = vst.msk [vmem:[#allocation3 + $0xa8] sm:$0xff] %vm169_vm0, %v8045_v35  ;;  %v8153_v2 = vld [vmem:[#allocation2 + $0x171] sm:$0xff] }
  0x54   : > { %334 = vst.msk [vmem:[#allocation3 + $0xb0] sm:$0xff] %vm169_vm0, %v8047_v36  ;;  %335 = vst.msk [vmem:[#allocation3 + $0xb8] sm:$0xff] %vm169_vm0, %v8057_v33  ;;  %442 = vrot.lane.b32.xlu1 %v8009_v63, %s7619_s29 }
  0x55   : > { %336 = vst.msk [vmem:[#allocation3 + $0xc0] sm:$0xff] %vm169_vm0, %v8065_v28  ;;  %337 = vst.msk [vmem:[#allocation3 + $0xc8] sm:$0xff] %vm169_vm0, %v8067_v29  ;;  %448 = vrot.lane.b32.xlu0 %v8059_v34, %s7619_s29 }
  0x56   : > { %338 = vst.msk [vmem:[#allocation3 + $0xd0] sm:$0xff] %vm169_vm0, %v8081_v21  ;;  %339 = vst.msk [vmem:[#allocation3 + $0xd8] sm:$0xff] %vm169_vm0, %v8083_v22 }
  0x57   : > { %340 = vst.msk [vmem:[#allocation3 + $0xe0] sm:$0xff] %vm169_vm0, %v8097_v17  ;;  %341 = vst.msk [vmem:[#allocation3 + $0xe8] sm:$0xff] %vm169_vm0, %v8099_v18 }
  0x58   : > { %446 = vrot.lane.b32.xlu1 %v8069_v23, %s7619_s29  ;;  %342 = vst.msk [vmem:[#allocation3 + $0xf0] sm:$0xff] %vm169_vm0, %v8113_v13  ;;  %343 = vst.msk [vmem:[#allocation3 + $0xf8] sm:$0xff] %vm169_vm0, %v8115_v14 }
  0x59   : > { %452 = vrot.lane.b32.xlu0 %v8077_v24, %s7619_s29  ;;  %11571 = vst [vmem:[#allocation37_spill] sm:$0xff] %v8129_v9  ;;  %11572 = vst [vmem:[#allocation38_spill] sm:$0xff] %v8134_v10 }
  0x5a   : > { %11573 = vst [vmem:[#allocation39_spill] sm:$0xff] %v8136_v5  ;;  %278 = vst.msk [vmem:[#allocation2 + $0x181] sm:$0xff] %vm169_vm0, %v8134_v10  ;;  %v8156_v10 = vld [vmem:[#allocation2 + $0x1a] sm:$0xff] }
  0x5b   : > { %11574 = vst [vmem:[#allocation40_spill] sm:$0xff] %v8141_v6  ;;  %279 = vst.msk [vmem:[#allocation2 + $0x189] sm:$0xff] %vm169_vm0, %v8141_v6  ;;  %v538_v6 = vld [vmem:[#allocation2 + $0xa] sm:$0xff] }
  0x5c   : > { %450 = vrot.lane.b32.xlu1 %v8085_v19, %s7619_s29  ;;  %11575 = vst [vmem:[#allocation41_spill] sm:$0xff] %v8147_v1  ;;  %11576 = vst [vmem:[#allocation42_spill] sm:$0xff] %v8153_v2 }
  0x5d   : > { %456 = vrot.lane.b32.xlu0 %v8093_v20, %s7619_s29  ;;  %11577 = vst [vmem:[#allocation43_spill] sm:$0xff] %v8156_v10  ;;  %11578 = vst [vmem:[#allocation44_spill] sm:$0xff] %v8162_v4 }
  0x60   : > { %454 = vrot.lane.b32.xlu1 %v8101_v15, %s7619_s29 }
  0x61   : > { %460 = vrot.lane.b32.xlu0 %v8109_v16, %s7619_s29 }
  0x64   : > { %458 = vrot.lane.b32.xlu1 %v8117_v11, %s7619_s29 }
  0x65   : > { %464 = vrot.lane.b32.xlu0 %v8125_v12, %s7619_s29 }
  0x68   : > { %462 = vrot.lane.b32.xlu1 %v8129_v9, %s7619_s29 }
  0x69   : > { %468 = vrot.lane.b32.xlu0 %v8136_v5, %s7619_s29  ;;  %v8165_v5 = vld [vmem:[#allocation2 + $0x22] sm:$0xff] }
  0x6a   : > { %11579 = vst [vmem:[#allocation45_spill] sm:$0xff] %v8165_v5 }
  0x6c   : > { %466 = vrot.lane.b32.xlu1 %v8147_v1, %s7619_s29  ;;  %v8169_v1 = vld [vmem:[#allocation2 + $0x4a] sm:$0xff] }
  0x6d   : > { %601 = vrot.lane.b32.xlu0 %v537_v3, %s7620_s30  ;;  %11580 = vst [vmem:[#allocation46_spill] sm:$0xff] %v8169_v1  ;;  %v8173_v3 = vld [vmem:[#allocation2 + $0x3a] sm:$0xff] }
  0x6e   : > { %11581 = vst [vmem:[#allocation47_spill] sm:$0xff] %v8173_v3 }
  0x70   : > { %470 = vrot.lane.b32.xlu1 %v8153_v2, %s7619_s29  ;;  %v8253_v2 = vld [vmem:[#allocation2 + $0x12a] sm:$0xff] }
  0x71   : > { %605 = vrot.lane.b32.xlu0 %v8156_v10, %s7620_s30  ;;  %v8177_v10 = vld [vmem:[#allocation2 + $0x62] sm:$0xff]  ;;  %11601 = vst [vmem:[#allocation67_spill] sm:$0xff] %v8253_v2 }
  0x72   : > { %11582 = vst [vmem:[#allocation48_spill] sm:$0xff] %v8177_v10 }
  0x74   : > { %603 = vrot.lane.b32.xlu1 %v538_v6, %s7620_s30  ;;  %v8181_v6 = vld [vmem:[#allocation2 + $0x52] sm:$0xff] }
  0x75   : > { %609 = vrot.lane.b32.xlu0 %v8162_v4, %s7620_s30  ;;  %11583 = vst [vmem:[#allocation49_spill] sm:$0xff] %v8181_v6  ;;  %v8185_v4 = vld [vmem:[#allocation2 + $0x7a] sm:$0xff] }
  0x76   : > { %11584 = vst [vmem:[#allocation50_spill] sm:$0xff] %v8185_v4 }
  0x78   : > { %607 = vrot.lane.b32.xlu1 %v8165_v5, %s7620_s30  ;;  %v8189_v5 = vld [vmem:[#allocation2 + $0x6a] sm:$0xff] }
  0x79   : > { %613 = vrot.lane.b32.xlu0 %v8169_v1, %s7620_s30  ;;  %11585 = vst [vmem:[#allocation51_spill] sm:$0xff] %v8189_v5  ;;  %v8193_v1 = vld [vmem:[#allocation2 + $0x92] sm:$0xff] }
  0x7a   : > { %11586 = vst [vmem:[#allocation52_spill] sm:$0xff] %v8193_v1 }
  0x7c   : > { %611 = vrot.lane.b32.xlu1 %v8173_v3, %s7620_s30  ;;  %v8197_v3 = vld [vmem:[#allocation2 + $0x82] sm:$0xff] }
  0x7d   : > { %617 = vrot.lane.b32.xlu0 %v8177_v10, %s7620_s30  ;;  %11587 = vst [vmem:[#allocation53_spill] sm:$0xff] %v8197_v3  ;;  %v8201_v10 = vld [vmem:[#allocation2 + $0xaa] sm:$0xff] }
  0x7e   : > { %11588 = vst [vmem:[#allocation54_spill] sm:$0xff] %v8201_v10 }
  0x80   : > { %615 = vrot.lane.b32.xlu1 %v8181_v6, %s7620_s30  ;;  %v8205_v6 = vld [vmem:[#allocation2 + $0x9a] sm:$0xff] }
  0x81   : > { %621 = vrot.lane.b32.xlu0 %v8185_v4, %s7620_s30  ;;  %11589 = vst [vmem:[#allocation55_spill] sm:$0xff] %v8205_v6  ;;  %v8209_v4 = vld [vmem:[#allocation2 + $0xc2] sm:$0xff] }
  0x82   : > { %11590 = vst [vmem:[#allocation56_spill] sm:$0xff] %v8209_v4 }
  0x84   : > { %619 = vrot.lane.b32.xlu1 %v8189_v5, %s7620_s30  ;;  %v8213_v5 = vld [vmem:[#allocation2 + $0xb2] sm:$0xff] }
  0x85   : > { %625 = vrot.lane.b32.xlu0 %v8193_v1, %s7620_s30  ;;  %11591 = vst [vmem:[#allocation57_spill] sm:$0xff] %v8213_v5  ;;  %v8217_v1 = vld [vmem:[#allocation2 + $0xda] sm:$0xff] }
  0x86   : > { %11592 = vst [vmem:[#allocation58_spill] sm:$0xff] %v8217_v1 }
  0x88   : > { %623 = vrot.lane.b32.xlu1 %v8197_v3, %s7620_s30  ;;  %v8221_v3 = vld [vmem:[#allocation2 + $0xca] sm:$0xff] }
  0x89   : > { %629 = vrot.lane.b32.xlu0 %v8201_v10, %s7620_s30  ;;  %11593 = vst [vmem:[#allocation59_spill] sm:$0xff] %v8221_v3  ;;  %v8225_v10 = vld [vmem:[#allocation2 + $0xf2] sm:$0xff] }
  0x8a   : > { %11594 = vst [vmem:[#allocation60_spill] sm:$0xff] %v8225_v10 }
  0x8c   : > { %627 = vrot.lane.b32.xlu1 %v8205_v6, %s7620_s30  ;;  %v8229_v6 = vld [vmem:[#allocation2 + $0xe2] sm:$0xff] }
  0x8d   : > { %633 = vrot.lane.b32.xlu0 %v8209_v4, %s7620_s30  ;;  %11595 = vst [vmem:[#allocation61_spill] sm:$0xff] %v8229_v6  ;;  %v8233_v4 = vld [vmem:[#allocation2 + $0x10a] sm:$0xff] }
  0x8e   : > { %11596 = vst [vmem:[#allocation62_spill] sm:$0xff] %v8233_v4 }
  0x90   : > { %631 = vrot.lane.b32.xlu1 %v8213_v5, %s7620_s30  ;;  %v8237_v5 = vld [vmem:[#allocation2 + $0xfa] sm:$0xff] }
  0x91   : > { %637 = vrot.lane.b32.xlu0 %v8217_v1, %s7620_s30  ;;  %11597 = vst [vmem:[#allocation63_spill] sm:$0xff] %v8237_v5  ;;  %v8241_v1 = vld [vmem:[#allocation2 + $0x122] sm:$0xff] }
  0x92   : > { %11598 = vst [vmem:[#allocation64_spill] sm:$0xff] %v8241_v1 }
  0x94   : > { %635 = vrot.lane.b32.xlu1 %v8221_v3, %s7620_s30  ;;  %v8245_v3 = vld [vmem:[#allocation2 + $0x112] sm:$0xff] }
  0x95   : > { %641 = vrot.lane.b32.xlu0 %v8225_v10, %s7620_s30  ;;  %11599 = vst [vmem:[#allocation65_spill] sm:$0xff] %v8245_v3  ;;  %v8249_v10 = vld [vmem:[#allocation2 + $0x13a] sm:$0xff] }
  0x96   : > { %11600 = vst [vmem:[#allocation66_spill] sm:$0xff] %v8249_v10 }
  0x98   : > { %639 = vrot.lane.b32.xlu1 %v8229_v6, %s7620_s30  ;;  %v409_v6 = vpop.permute.xlu0 %408 }
  0x99   : > { %645 = vrot.lane.b32.xlu0 %v8233_v4, %s7620_s30  ;;  %505 = vst.msk [vmem:[#allocation3] sm:$0xff] %vm504_vm3, %v409_v6  ;;  %v8262_v4 = vld [vmem:[#allocation2 + $0x142] sm:$0xff]  ;;  %v8268_v6 = vld [vmem:[#allocation2 + $0x16a] sm:$0xff] }
  0x9a   : > { %11602 = vst [vmem:[#allocation68_spill] sm:$0xff] %v8262_v4 }
  0x9c   : > { %643 = vrot.lane.b32.xlu1 %v8237_v5, %s7620_s30  ;;  %v8258_v5 = vld [vmem:[#allocation2 + $0x152] sm:$0xff] }
  0x9d   : > { %649 = vrot.lane.b32.xlu0 %v8241_v1, %s7620_s30  ;;  %v411_v1 = vpop.permute.xlu0 %410 }
  0x9e   : > { %506 = vst.msk [vmem:[#allocation3 + $0x8] sm:$0xff] %vm504_vm3, %v411_v1 }
  0xa0   : > { %647 = vrot.lane.b32.xlu1 %v8245_v3, %s7620_s30  ;;  %v8272_v3 = vld [vmem:[#allocation2 + $0x15a] sm:$0xff] }
  0xa1   : > { %653 = vrot.lane.b32.xlu0 %v8249_v10, %s7620_s30 }
  0xa4   : > { %651 = vrot.lane.b32.xlu1 %v8253_v2, %s7620_s30 }
  0xa5   : > { %657 = vrot.lane.b32.xlu0 %v8258_v5, %s7620_s30 }
  0xa6   : > { %v413_v9 = vpop.permute.xlu1 %412 }
  0xa7   : > { %507 = vst.msk [vmem:[#allocation3 + $0x10] sm:$0xff] %vm504_vm3, %v413_v9  ;;  %v417_v10 = vpop.permute.xlu0 %416  ;;  %v8280_v9 = vld [vmem:[#allocation2 + $0x172] sm:$0xff] }
  0xa8   : > { %655 = vrot.lane.b32.xlu1 %v8262_v4, %s7620_s30  ;;  %509 = vst.msk [vmem:[#allocation3 + $0x20] sm:$0xff] %vm504_vm3, %v417_v10 }
  0xa9   : > { %661 = vrot.lane.b32.xlu0 %v8268_v6, %s7620_s30 }
  0xaa   : > { %v415_v2 = vpop.permute.xlu1 %414 }
  0xab   : > { %508 = vst.msk [vmem:[#allocation3 + $0x18] sm:$0xff] %vm504_vm3, %v415_v2  ;;  %v421_v1 = vpop.permute.xlu0 %420 }
  0xac   : > { %659 = vrot.lane.b32.xlu1 %v8272_v3, %s7620_s30  ;;  %511 = vst.msk [vmem:[#allocation3 + $0x30] sm:$0xff] %vm504_vm3, %v421_v1 }
  0xad   : > { %794 = vrot.lane.b32.xlu0 %v7951_v46, %s7621_s4 }
  0xae   : > { %v419_v4 = vpop.permute.xlu1 %418 }
  0xaf   : > { %510 = vst.msk [vmem:[#allocation3 + $0x28] sm:$0xff] %vm504_vm3, %v419_v4  ;;  %v425_v10 = vpop.permute.xlu0 %424 }
  0xb0   : > { %663 = vrot.lane.b32.xlu1 %v8280_v9, %s7620_s30  ;;  %513 = vst.msk [vmem:[#allocation3 + $0x40] sm:$0xff] %vm504_vm3, %v425_v10 }
  0xb1   : > { %798 = vrot.lane.b32.xlu0 %v7967_v51, %s7621_s4 }
  0xb2   : > { %v423_v2 = vpop.permute.xlu1 %422 }
  0xb3   : > { %512 = vst.msk [vmem:[#allocation3 + $0x38] sm:$0xff] %vm504_vm3, %v423_v2  ;;  %v429_v1 = vpop.permute.xlu0 %428 }
  0xb4   : > { %796 = vrot.lane.b32.xlu1 %v7961_v49, %s7621_s4  ;;  %515 = vst.msk [vmem:[#allocation3 + $0x50] sm:$0xff] %vm504_vm3, %v429_v1 }
  0xb5   : > { %802 = vrot.lane.b32.xlu0 %v7979_v54, %s7621_s4 }
  0xb6   : > { %v427_v46 = vpop.permute.xlu1 %426 }
  0xb7   : > { %514 = vst.msk [vmem:[#allocation3 + $0x48] sm:$0xff] %vm504_vm3, %v427_v46  ;;  %v433_v4 = vpop.permute.xlu0 %432 }
  0xb8   : > { %800 = vrot.lane.b32.xlu1 %v7969_v52, %s7621_s4  ;;  %517 = vst.msk [vmem:[#allocation3 + $0x60] sm:$0xff] %vm504_vm3, %v433_v4 }
  0xb9   : > { %806 = vrot.lane.b32.xlu0 %v7989_v57, %s7621_s4 }
  0xba   : > { %v431_v10 = vpop.permute.xlu1 %430 }
  0xbb   : > { %516 = vst.msk [vmem:[#allocation3 + $0x58] sm:$0xff] %vm504_vm3, %v431_v10  ;;  %v437_v49 = vpop.permute.xlu0 %436 }
  0xbc   : > { %804 = vrot.lane.b32.xlu1 %v7981_v55, %s7621_s4  ;;  %519 = vst.msk [vmem:[#allocation3 + $0x70] sm:$0xff] %vm504_vm3, %v437_v49 }
  0xbd   : > { %810 = vrot.lane.b32.xlu0 %v7993_v59, %s7621_s4 }
  0xbe   : > { %v435_v2 = vpop.permute.xlu1 %434 }
  0xbf   : > { %518 = vst.msk [vmem:[#allocation3 + $0x68] sm:$0xff] %vm504_vm3, %v435_v2  ;;  %v441_v1 = vpop.permute.xlu0 %440 }
  0xc0   : > { %808 = vrot.lane.b32.xlu1 %v7991_v58, %s7621_s4  ;;  %521 = vst.msk [vmem:[#allocation3 + $0x80] sm:$0xff] %vm504_vm3, %v441_v1 }
  0xc1   : > { %814 = vrot.lane.b32.xlu0 %v8005_v61, %s7621_s4 }
  0xc2   : > { %v439_v46 = vpop.permute.xlu1 %438 }
  0xc3   : > { %520 = vst.msk [vmem:[#allocation3 + $0x78] sm:$0xff] %vm504_vm3, %v439_v46  ;;  %v445_v4 = vpop.permute.xlu0 %444 }
  0xc4   : > { %812 = vrot.lane.b32.xlu1 %v8003_v60, %s7621_s4  ;;  %523 = vst.msk [vmem:[#allocation3 + $0x90] sm:$0xff] %vm504_vm3, %v445_v4 }
  0xc5   : > { %818 = vrot.lane.b32.xlu0 %v8017_v0, %s7621_s4 }
  0xc6   : > { %v443_v10 = vpop.permute.xlu1 %442 }
  0xc7   : > { %522 = vst.msk [vmem:[#allocation3 + $0x88] sm:$0xff] %vm504_vm3, %v443_v10  ;;  %v449_v49 = vpop.permute.xlu0 %448 }
  0xc8   : > { %816 = vrot.lane.b32.xlu1 %v8007_v62, %s7621_s4  ;;  %525 = vst.msk [vmem:[#allocation3 + $0xa0] sm:$0xff] %vm504_vm3, %v449_v49 }
  0xc9   : > { %822 = vrot.lane.b32.xlu0 %v8021_v8, %s7621_s4 }
  0xca   : > { %v447_v2 = vpop.permute.xlu1 %446 }
  0xcb   : > { %524 = vst.msk [vmem:[#allocation3 + $0x98] sm:$0xff] %vm504_vm3, %v447_v2  ;;  %v453_v1 = vpop.permute.xlu0 %452 }
  0xcc   : > { %820 = vrot.lane.b32.xlu1 %v8019_v7, %s7621_s4  ;;  %527 = vst.msk [vmem:[#allocation3 + $0xb0] sm:$0xff] %vm504_vm3, %v453_v1 }
  0xcd   : > { %826 = vrot.lane.b32.xlu0 %v8033_v48, %s7621_s4 }
  0xce   : > { %v451_v46 = vpop.permute.xlu1 %450 }
  0xcf   : > { %526 = vst.msk [vmem:[#allocation3 + $0xa8] sm:$0xff] %vm504_vm3, %v451_v46  ;;  %v457_v4 = vpop.permute.xlu0 %456 }
  0xd0   : > { %824 = vrot.lane.b32.xlu1 %v8031_v45, %s7621_s4  ;;  %529 = vst.msk [vmem:[#allocation3 + $0xc0] sm:$0xff] %vm504_vm3, %v457_v4 }
  0xd1   : > { %830 = vrot.lane.b32.xlu0 %v8043_v38, %s7621_s4 }
  0xd2   : > { %v455_v10 = vpop.permute.xlu1 %454 }
  0xd3   : > { %528 = vst.msk [vmem:[#allocation3 + $0xb8] sm:$0xff] %vm504_vm3, %v455_v10  ;;  %v461_v49 = vpop.permute.xlu0 %460 }
  0xd4   : > { %828 = vrot.lane.b32.xlu1 %v8035_v37, %s7621_s4  ;;  %531 = vst.msk [vmem:[#allocation3 + $0xd0] sm:$0xff] %vm504_vm3, %v461_v49 }
  0xd5   : > { %834 = vrot.lane.b32.xlu0 %v8047_v36, %s7621_s4 }
  0xd6   : > { %v459_v2 = vpop.permute.xlu1 %458 }
  0xd7   : > { %530 = vst.msk [vmem:[#allocation3 + $0xc8] sm:$0xff] %vm504_vm3, %v459_v2  ;;  %v465_v1 = vpop.permute.xlu0 %464 }
  0xd8   : > { %832 = vrot.lane.b32.xlu1 %v8045_v35, %s7621_s4  ;;  %533 = vst.msk [vmem:[#allocation3 + $0xe0] sm:$0xff] %vm504_vm3, %v465_v1 }
  0xd9   : > { %838 = vrot.lane.b32.xlu0 %v8065_v28, %s7621_s4 }
  0xda   : > { %v463_v46 = vpop.permute.xlu1 %462 }
  0xdb   : > { %532 = vst.msk [vmem:[#allocation3 + $0xd8] sm:$0xff] %vm504_vm3, %v463_v46  ;;  %v469_v4 = vpop.permute.xlu0 %468 }
  0xdc   : > { %836 = vrot.lane.b32.xlu1 %v8057_v33, %s7621_s4  ;;  %535 = vst.msk [vmem:[#allocation3 + $0xf0] sm:$0xff] %vm504_vm3, %v469_v4  ;;  %v8370_v4 = vld [vmem:[#allocation2 + $0x180] sm:$0xff] }
  0xdd   : > { %842 = vrot.lane.b32.xlu0 %v8081_v21, %s7621_s4 }
  0xde   : > { %v467_v10 = vpop.permute.xlu1 %466 }
  0xdf   : > { %534 = vst.msk [vmem:[#allocation3 + $0xe8] sm:$0xff] %vm504_vm3, %v467_v10  ;;  %v602_v49 = vpop.permute.xlu0 %601 }
  0xe0   : > { %840 = vrot.lane.b32.xlu1 %v8067_v29, %s7621_s4  ;;  %698 = vst.msk [vmem:[#allocation3] sm:$0xff] %vm11538_vm4, %v602_v49 }
  0xe1   : > { %846 = vrot.lane.b32.xlu0 %v8097_v17, %s7621_s4 }
  0xe2   : > { %v471_v2 = vpop.permute.xlu1 %470 }
  0xe3   : > { %536 = vst.msk [vmem:[#allocation3 + $0xf8] sm:$0xff] %vm504_vm3, %v471_v2  ;;  %v606_v1 = vpop.permute.xlu0 %605 }
  0xe4   : > { %844 = vrot.lane.b32.xlu1 %v8083_v22, %s7621_s4  ;;  %700 = vst.msk [vmem:[#allocation3 + $0x10] sm:$0xff] %vm11538_vm4, %v606_v1  ;;  %v8380_v1 = vld [vmem:[#allocation2 + $0x188] sm:$0xff] }
  0xe5   : > { %850 = vrot.lane.b32.xlu0 %v8113_v13, %s7621_s4 }
  0xe6   : > { %v604_v46 = vpop.permute.xlu1 %603 }
  0xe7   : > { %699 = vst.msk [vmem:[#allocation3 + $0x8] sm:$0xff] %vm11538_vm4, %v604_v46  ;;  %v610_v10 = vpop.permute.xlu0 %609 }
  0xe8   : > { %848 = vrot.lane.b32.xlu1 %v8099_v18, %s7621_s4  ;;  %702 = vst.msk [vmem:[#allocation3 + $0x20] sm:$0xff] %vm11538_vm4, %v610_v10 }
  0xe9   : > { %854 = vrot.lane.b32.xlu0 %v8370_v4, %s7621_s4 }
  0xea   : > { %v608_v49 = vpop.permute.xlu1 %607 }
  0xeb   : > { %701 = vst.msk [vmem:[#allocation3 + $0x18] sm:$0xff] %vm11538_vm4, %v608_v49  ;;  %v614_v2 = vpop.permute.xlu0 %613 }
  0xec   : > { %852 = vrot.lane.b32.xlu1 %v8115_v14, %s7621_s4  ;;  %704 = vst.msk [vmem:[#allocation3 + $0x30] sm:$0xff] %vm11538_vm4, %v614_v2 }
  0xed   : > { %987 = vrot.lane.b32.xlu0 %v7859_v25, %s7622_s5 }
  0xee   : > { %v612_v46 = vpop.permute.xlu1 %611 }
  0xef   : > { %703 = vst.msk [vmem:[#allocation3 + $0x28] sm:$0xff] %vm11538_vm4, %v612_v46  ;;  %v618_v10 = vpop.permute.xlu0 %617 }
  0xf0   : > { %856 = vrot.lane.b32.xlu1 %v8380_v1, %s7621_s4  ;;  %706 = vst.msk [vmem:[#allocation3 + $0x40] sm:$0xff] %vm11538_vm4, %v618_v10 }
  0xf1   : > { %991 = vrot.lane.b32.xlu0 %v7861_v26, %s7622_s5 }
  0xf2   : > { %v616_v49 = vpop.permute.xlu1 %615 }
  0xf3   : > { %705 = vst.msk [vmem:[#allocation3 + $0x38] sm:$0xff] %vm11538_vm4, %v616_v49  ;;  %v622_v2 = vpop.permute.xlu0 %621  ;;  %v11604_v49 = vld [vmem:[#allocation39_spill] sm:$0xff] }
  0xf4   : > { %989 = vrot.lane.b32.xlu1 %v7871_v27, %s7622_s5  ;;  %708 = vst.msk [vmem:[#allocation3 + $0x50] sm:$0xff] %vm11538_vm4, %v622_v2  ;;  %v11605_v2 = vld [vmem:[#allocation41_spill] sm:$0xff] }
  0xf5   : > { %995 = vrot.lane.b32.xlu0 %v7885_v30, %s7622_s5 }
  0xf6   : > { %v620_v25 = vpop.permute.xlu1 %619 }
  0xf7   : > { %707 = vst.msk [vmem:[#allocation3 + $0x48] sm:$0xff] %vm11538_vm4, %v620_v25  ;;  %v626_v46 = vpop.permute.xlu0 %625 }
  0xf8   : > { %993 = vrot.lane.b32.xlu1 %v7889_v31, %s7622_s5  ;;  %710 = vst.msk [vmem:[#allocation3 + $0x60] sm:$0xff] %vm11538_vm4, %v626_v46  ;;  %v11606_v46 = vld [vmem:[#allocation42_spill] sm:$0xff] }
  0xf9   : > { %999 = vrot.lane.b32.xlu0 %v7893_v32, %s7622_s5 }
  0xfa   : > { %v624_v26 = vpop.permute.xlu1 %623 }
  0xfb   : > { %709 = vst.msk [vmem:[#allocation3 + $0x58] sm:$0xff] %vm11538_vm4, %v624_v26  ;;  %v630_v27 = vpop.permute.xlu0 %629 }
  0xfc   : > { %997 = vrot.lane.b32.xlu1 %v7921_v39, %s7622_s5  ;;  %712 = vst.msk [vmem:[#allocation3 + $0x70] sm:$0xff] %vm11538_vm4, %v630_v27  ;;  %v8480_v27 = vld [vmem:[#allocation2 + $0x189] sm:$0xff] }
  0xfd   : > { %1003 = vrot.lane.b32.xlu0 %v7931_v40, %s7622_s5 }
  0xfe   : > { %v628_v30 = vpop.permute.xlu1 %627 }
  0xff   : > { %711 = vst.msk [vmem:[#allocation3 + $0x68] sm:$0xff] %vm11538_vm4, %v628_v30  ;;  %v634_v31 = vpop.permute.xlu0 %633 }
 0x100   : > { %1001 = vrot.lane.b32.xlu1 %v7935_v41, %s7622_s5  ;;  %714 = vst.msk [vmem:[#allocation3 + $0x80] sm:$0xff] %vm11538_vm4, %v634_v31  ;;  %v11607_v31 = vld [vmem:[#allocation43_spill] sm:$0xff] }
 0x101   : > { %1007 = vrot.lane.b32.xlu0 %v7939_v42, %s7622_s5 }
 0x102   : > { %v632_v32 = vpop.permute.xlu1 %631 }
 0x103   : > { %713 = vst.msk [vmem:[#allocation3 + $0x78] sm:$0xff] %vm11538_vm4, %v632_v32  ;;  %v638_v39 = vpop.permute.xlu0 %637 }
 0x104   : > { %1005 = vrot.lane.b32.xlu1 %v7943_v43, %s7622_s5  ;;  %716 = vst.msk [vmem:[#allocation3 + $0x90] sm:$0xff] %vm11538_vm4, %v638_v39 }
 0x105   : > { %1011 = vrot.lane.b32.xlu0 %v7947_v44, %s7622_s5 }
 0x106   : > { %v636_v40 = vpop.permute.xlu1 %635 }
 0x107   : > { %715 = vst.msk [vmem:[#allocation3 + $0x88] sm:$0xff] %vm11538_vm4, %v636_v40  ;;  %v642_v41 = vpop.permute.xlu0 %641  ;;  %v11608_v40 = vld [vmem:[#allocation44_spill] sm:$0xff] }
 0x108   : > { %1009 = vrot.lane.b32.xlu1 %v7953_v47, %s7622_s5  ;;  %718 = vst.msk [vmem:[#allocation3 + $0xa0] sm:$0xff] %vm11538_vm4, %v642_v41  ;;  %v11609_v41 = vld [vmem:[#allocation45_spill] sm:$0xff] }
 0x109   : > { %1015 = vrot.lane.b32.xlu0 %v7963_v50, %s7622_s5 }
 0x10a   : > { %v640_v42 = vpop.permute.xlu1 %639 }
 0x10b   : > { %717 = vst.msk [vmem:[#allocation3 + $0x98] sm:$0xff] %vm11538_vm4, %v640_v42  ;;  %v646_v43 = vpop.permute.xlu0 %645 }
 0x10c   : > { %1013 = vrot.lane.b32.xlu1 %v7973_v53, %s7622_s5  ;;  %720 = vst.msk [vmem:[#allocation3 + $0xb0] sm:$0xff] %vm11538_vm4, %v646_v43 }
 0x10d   : > { %1019 = vrot.lane.b32.xlu0 %v7983_v56, %s7622_s5 }
 0x10e   : > { %v644_v44 = vpop.permute.xlu1 %643 }
 0x10f   : > { %719 = vst.msk [vmem:[#allocation3 + $0xa8] sm:$0xff] %vm11538_vm4, %v644_v44  ;;  %v650_v47 = vpop.permute.xlu0 %649  ;;  %v11610_v44 = vld [vmem:[#allocation46_spill] sm:$0xff] }
 0x110   : > { %1017 = vrot.lane.b32.xlu1 %v8009_v63, %s7622_s5  ;;  %722 = vst.msk [vmem:[#allocation3 + $0xc0] sm:$0xff] %vm11538_vm4, %v650_v47  ;;  %v11611_v47 = vld [vmem:[#allocation47_spill] sm:$0xff] }
 0x111   : > { %1023 = vrot.lane.b32.xlu0 %v8059_v34, %s7622_s5 }
 0x112   : > { %v648_v50 = vpop.permute.xlu1 %647 }
 0x113   : > { %721 = vst.msk [vmem:[#allocation3 + $0xb8] sm:$0xff] %vm11538_vm4, %v648_v50  ;;  %v654_v53 = vpop.permute.xlu0 %653 }
 0x114   : > { %1021 = vrot.lane.b32.xlu1 %v8069_v23, %s7622_s5  ;;  %724 = vst.msk [vmem:[#allocation3 + $0xd0] sm:$0xff] %vm11538_vm4, %v654_v53 }
 0x115   : > { %1027 = vrot.lane.b32.xlu0 %v8077_v24, %s7622_s5 }
 0x116   : > { %v652_v56 = vpop.permute.xlu1 %651 }
 0x117   : > { %723 = vst.msk [vmem:[#allocation3 + $0xc8] sm:$0xff] %vm11538_vm4, %v652_v56  ;;  %v658_v63 = vpop.permute.xlu0 %657  ;;  %v11612_v56 = vld [vmem:[#allocation48_spill] sm:$0xff] }
 0x118   : > { %1025 = vrot.lane.b32.xlu1 %v8085_v19, %s7622_s5  ;;  %726 = vst.msk [vmem:[#allocation3 + $0xe0] sm:$0xff] %vm11538_vm4, %v658_v63  ;;  %v11613_v63 = vld [vmem:[#allocation49_spill] sm:$0xff] }
 0x119   : > { %1031 = vrot.lane.b32.xlu0 %v8093_v20, %s7622_s5 }
 0x11a   : > { %v656_v34 = vpop.permute.xlu1 %655 }
 0x11b   : > { %725 = vst.msk [vmem:[#allocation3 + $0xd8] sm:$0xff] %vm11538_vm4, %v656_v34  ;;  %v662_v23 = vpop.permute.xlu0 %661 }
 0x11c   : > { %1029 = vrot.lane.b32.xlu1 %v8101_v15, %s7622_s5  ;;  %728 = vst.msk [vmem:[#allocation3 + $0xf0] sm:$0xff] %vm11538_vm4, %v662_v23  ;;  %v11603_v15 = vld [vmem:[#allocation37_spill] sm:$0xff] }
 0x11d   : > { %1035 = vrot.lane.b32.xlu0 %v8109_v16, %s7622_s5 }
 0x11e   : > { %v660_v24 = vpop.permute.xlu1 %659 }
 0x11f   : > { %727 = vst.msk [vmem:[#allocation3 + $0xe8] sm:$0xff] %vm11538_vm4, %v660_v24  ;;  %v795_v19 = vpop.permute.xlu0 %794  ;;  %v11614_v24 = vld [vmem:[#allocation50_spill] sm:$0xff] }
 0x120   : > { %1033 = vrot.lane.b32.xlu1 %v8117_v11, %s7622_s5  ;;  %891 = vst.msk [vmem:[#allocation3] sm:$0xff] %vm890_vm5, %v795_v19  ;;  %v8470_v11 = vld [vmem:[#allocation2 + $0x181] sm:$0xff]  ;;  %v11615_v19 = vld [vmem:[#allocation51_spill] sm:$0xff] }
 0x121   : > { %1039 = vrot.lane.b32.xlu0 %v8125_v12, %s7622_s5 }
 0x122   : > { %v664_v20 = vpop.permute.xlu1 %663 }
 0x123   : > { %729 = vst.msk [vmem:[#allocation3 + $0xf8] sm:$0xff] %vm11538_vm4, %v664_v20  ;;  %v799_v10 = vpop.permute.xlu0 %798 }
 0x124   : > { %1037 = vrot.lane.b32.xlu1 %v11603_v15, %s7622_s5  ;;  %893 = vst.msk [vmem:[#allocation3 + $0x10] sm:$0xff] %vm890_vm5, %v799_v10  ;;  %v11616_v10 = vld [vmem:[#allocation52_spill] sm:$0xff] }
 0x125   : > { %1043 = vrot.lane.b32.xlu0 %v11604_v49, %s7622_s5 }
 0x126   : > { %v797_v16 = vpop.permute.xlu1 %796 }
 0x127   : > { %892 = vst.msk [vmem:[#allocation3 + $0x8] sm:$0xff] %vm890_vm5, %v797_v16  ;;  %v803_v12 = vpop.permute.xlu0 %802  ;;  %v11617_v16 = vld [vmem:[#allocation53_spill] sm:$0xff] }
 0x128   : > { %1041 = vrot.lane.b32.xlu1 %v11605_v2, %s7622_s5  ;;  %895 = vst.msk [vmem:[#allocation3 + $0x20] sm:$0xff] %vm890_vm5, %v803_v12  ;;  %v11618_v12 = vld [vmem:[#allocation54_spill] sm:$0xff] }
 0x129   : > { %1047 = vrot.lane.b32.xlu0 %v8470_v11, %s7622_s5 }
 0x12a   : > { %v801_v25 = vpop.permute.xlu1 %800 }
 0x12b   : > { %894 = vst.msk [vmem:[#allocation3 + $0x18] sm:$0xff] %vm890_vm5, %v801_v25  ;;  %v807_v26 = vpop.permute.xlu0 %806  ;;  %v11619_v25 = vld [vmem:[#allocation55_spill] sm:$0xff] }
 0x12c   : > { %1045 = vrot.lane.b32.xlu1 %v11606_v46, %s7622_s5  ;;  %897 = vst.msk [vmem:[#allocation3 + $0x30] sm:$0xff] %vm890_vm5, %v807_v26 }
 0x12d   : > { %1180 = vrot.lane.b32.xlu0 %v11607_v31, %s7623_s6  ;;  %v11621_v31 = vld [vmem:[#allocation57_spill] sm:$0xff] }
 0x12e   : > { %v805_v30 = vpop.permute.xlu1 %804 }
 0x12f   : > { %896 = vst.msk [vmem:[#allocation3 + $0x28] sm:$0xff] %vm890_vm5, %v805_v30  ;;  %v811_v32 = vpop.permute.xlu0 %810  ;;  %v11620_v30 = vld [vmem:[#allocation56_spill] sm:$0xff] }
 0x130   : > { %1049 = vrot.lane.b32.xlu1 %v8480_v27, %s7622_s5  ;;  %899 = vst.msk [vmem:[#allocation3 + $0x40] sm:$0xff] %vm890_vm5, %v811_v32 }
 0x131   : > { %1184 = vrot.lane.b32.xlu0 %v11608_v40, %s7623_s6  ;;  %v11622_v40 = vld [vmem:[#allocation58_spill] sm:$0xff] }
 0x132   : > { %v809_v39 = vpop.permute.xlu1 %808 }
 0x133   : > { %898 = vst.msk [vmem:[#allocation3 + $0x38] sm:$0xff] %vm890_vm5, %v809_v39  ;;  %v815_v42 = vpop.permute.xlu0 %814 }
 0x134   : > { %1182 = vrot.lane.b32.xlu1 %v11609_v41, %s7623_s6  ;;  %901 = vst.msk [vmem:[#allocation3 + $0x50] sm:$0xff] %vm890_vm5, %v815_v42  ;;  %v11623_v41 = vld [vmem:[#allocation59_spill] sm:$0xff] }
 0x135   : > { %1188 = vrot.lane.b32.xlu0 %v11610_v44, %s7623_s6  ;;  %v11624_v44 = vld [vmem:[#allocation60_spill] sm:$0xff] }
 0x136   : > { %v813_v43 = vpop.permute.xlu1 %812 }
 0x137   : > { %900 = vst.msk [vmem:[#allocation3 + $0x48] sm:$0xff] %vm890_vm5, %v813_v43  ;;  %v819_v50 = vpop.permute.xlu0 %818 }
 0x138   : > { %1186 = vrot.lane.b32.xlu1 %v11611_v47, %s7623_s6  ;;  %903 = vst.msk [vmem:[#allocation3 + $0x60] sm:$0xff] %vm890_vm5, %v819_v50  ;;  %v11625_v47 = vld [vmem:[#allocation61_spill] sm:$0xff] }
 0x139   : > { %1192 = vrot.lane.b32.xlu0 %v11612_v56, %s7623_s6  ;;  %v11626_v56 = vld [vmem:[#allocation62_spill] sm:$0xff] }
 0x13a   : > { %v817_v53 = vpop.permute.xlu1 %816 }
 0x13b   : > { %902 = vst.msk [vmem:[#allocation3 + $0x58] sm:$0xff] %vm890_vm5, %v817_v53  ;;  %v823_v34 = vpop.permute.xlu0 %822 }
 0x13c   : > { %1190 = vrot.lane.b32.xlu1 %v11613_v63, %s7623_s6  ;;  %905 = vst.msk [vmem:[#allocation3 + $0x70] sm:$0xff] %vm890_vm5, %v823_v34  ;;  %v11627_v63 = vld [vmem:[#allocation63_spill] sm:$0xff] }
 0x13d   : > { %1196 = vrot.lane.b32.xlu0 %v11614_v24, %s7623_s6  ;;  %v11628_v24 = vld [vmem:[#allocation64_spill] sm:$0xff] }
 0x13e   : > { %v821_v23 = vpop.permute.xlu1 %820 }
 0x13f   : > { %904 = vst.msk [vmem:[#allocation3 + $0x68] sm:$0xff] %vm890_vm5, %v821_v23  ;;  %v827_v20 = vpop.permute.xlu0 %826 }
 0x140   : > { %1194 = vrot.lane.b32.xlu1 %v11615_v19, %s7623_s6  ;;  %907 = vst.msk [vmem:[#allocation3 + $0x80] sm:$0xff] %vm890_vm5, %v827_v20  ;;  %v11629_v19 = vld [vmem:[#allocation65_spill] sm:$0xff] }
 0x141   : > { %1200 = vrot.lane.b32.xlu0 %v11616_v10, %s7623_s6  ;;  %v11630_v10 = vld [vmem:[#allocation66_spill] sm:$0xff] }
 0x142   : > { %v825_v15 = vpop.permute.xlu1 %824 }
 0x143   : > { %906 = vst.msk [vmem:[#allocation3 + $0x78] sm:$0xff] %vm890_vm5, %v825_v15  ;;  %v831_v49 = vpop.permute.xlu0 %830 }
 0x144   : > { %1198 = vrot.lane.b32.xlu1 %v11617_v16, %s7623_s6  ;;  %909 = vst.msk [vmem:[#allocation3 + $0x90] sm:$0xff] %vm890_vm5, %v831_v49  ;;  %v11631_v16 = vld [vmem:[#allocation67_spill] sm:$0xff] }
 0x145   : > { %1204 = vrot.lane.b32.xlu0 %v11618_v12, %s7623_s6  ;;  %v11632_v12 = vld [vmem:[#allocation68_spill] sm:$0xff] }
 0x146   : > { %v829_v2 = vpop.permute.xlu1 %828 }
 0x147   : > { %908 = vst.msk [vmem:[#allocation3 + $0x88] sm:$0xff] %vm890_vm5, %v829_v2  ;;  %v835_v46 = vpop.permute.xlu0 %834 }
 0x148   : > { %1202 = vrot.lane.b32.xlu1 %v11619_v25, %s7623_s6  ;;  %911 = vst.msk [vmem:[#allocation3 + $0xa0] sm:$0xff] %vm890_vm5, %v835_v46 }
 0x149   : > { %1208 = vrot.lane.b32.xlu0 %v11620_v30, %s7623_s6 }
 0x14a   : > { %v833_v26 = vpop.permute.xlu1 %832 }
 0x14b   : > { %910 = vst.msk [vmem:[#allocation3 + $0x98] sm:$0xff] %vm890_vm5, %v833_v26  ;;  %v839_v32 = vpop.permute.xlu0 %838  ;;  %v8570_v26 = vld [vmem:[#allocation2 + $0x182] sm:$0xff] }
 0x14c   : > { %1206 = vrot.lane.b32.xlu1 %v11621_v31, %s7623_s6  ;;  %913 = vst.msk [vmem:[#allocation3 + $0xb0] sm:$0xff] %vm890_vm5, %v839_v32  ;;  %v8580_v31 = vld [vmem:[#allocation2 + $0x18a] sm:$0xff] }
 0x14d   : > { %1212 = vrot.lane.b32.xlu0 %v11622_v40, %s7623_s6 }
 0x14e   : > { %v837_v39 = vpop.permute.xlu1 %836 }
 0x14f   : > { %912 = vst.msk [vmem:[#allocation3 + $0xa8] sm:$0xff] %vm890_vm5, %v837_v39  ;;  %v843_v42 = vpop.permute.xlu0 %842 }
 0x150   : > { %1210 = vrot.lane.b32.xlu1 %v11623_v41, %s7623_s6  ;;  %915 = vst.msk [vmem:[#allocation3 + $0xc0] sm:$0xff] %vm890_vm5, %v843_v42 }
 0x151   : > { %1216 = vrot.lane.b32.xlu0 %v11624_v44, %s7623_s6 }
 0x152   : > { %v841_v43 = vpop.permute.xlu1 %840 }
 0x153   : > { %914 = vst.msk [vmem:[#allocation3 + $0xb8] sm:$0xff] %vm890_vm5, %v841_v43  ;;  %v847_v50 = vpop.permute.xlu0 %846 }
 0x154   : > { %1214 = vrot.lane.b32.xlu1 %v11625_v47, %s7623_s6  ;;  %917 = vst.msk [vmem:[#allocation3 + $0xd0] sm:$0xff] %vm890_vm5, %v847_v50  ;;  %v1504_v47 = vld [vmem:[#allocation2 + $0x39] sm:$0xff] }
 0x155   : > { %1220 = vrot.lane.b32.xlu0 %v11626_v56, %s7623_s6  ;;  %v1506_v56 = vld [vmem:[#allocation2 + $0x51] sm:$0xff] }
 0x156   : > { %v845_v53 = vpop.permute.xlu1 %844 }
 0x157   : > { %916 = vst.msk [vmem:[#allocation3 + $0xc8] sm:$0xff] %vm890_vm5, %v845_v53  ;;  %v851_v34 = vpop.permute.xlu0 %850 }
 0x158   : > { %1218 = vrot.lane.b32.xlu1 %v11627_v63, %s7623_s6  ;;  %919 = vst.msk [vmem:[#allocation3 + $0xe0] sm:$0xff] %vm890_vm5, %v851_v34  ;;  %v1509_v34 = vld [vmem:[#allocation2 + $0x79] sm:$0xff] }
 0x159   : > { %1224 = vrot.lane.b32.xlu0 %v11628_v24, %s7623_s6  ;;  %v1508_v24 = vld [vmem:[#allocation2 + $0x69] sm:$0xff] }
 0x15a   : > { %v849_v23 = vpop.permute.xlu1 %848 }
 0x15b   : > { %918 = vst.msk [vmem:[#allocation3 + $0xd8] sm:$0xff] %vm890_vm5, %v849_v23  ;;  %v855_v20 = vpop.permute.xlu0 %854 }
 0x15c   : > { %1222 = vrot.lane.b32.xlu1 %v11629_v19, %s7623_s6  ;;  %921 = vst.msk [vmem:[#allocation3 + $0xf0] sm:$0xff] %vm890_vm5, %v855_v20  ;;  %v1511_v20 = vld [vmem:[#allocation2 + $0x91] sm:$0xff] }
 0x15d   : > { %1228 = vrot.lane.b32.xlu0 %v11630_v10, %s7623_s6  ;;  %v1510_v10 = vld [vmem:[#allocation2 + $0x81] sm:$0xff] }
 0x15e   : > { %v853_v15 = vpop.permute.xlu1 %852 }
 0x15f   : > { %920 = vst.msk [vmem:[#allocation3 + $0xe8] sm:$0xff] %vm890_vm5, %v853_v15  ;;  %v988_v49 = vpop.permute.xlu0 %987 }
 0x160   : > { %1226 = vrot.lane.b32.xlu1 %v11631_v16, %s7623_s6  ;;  %1084 = vst.msk [vmem:[#allocation3] sm:$0xff] %vm1083_vm6, %v988_v49  ;;  %v1513_v49 = vld [vmem:[#allocation2 + $0xa9] sm:$0xff] }
 0x161   : > { %1232 = vrot.lane.b32.xlu0 %v8258_v5, %s7623_s6 }
 0x162   : > { %v857_v2 = vpop.permute.xlu1 %856 }
 0x163   : > { %922 = vst.msk [vmem:[#allocation3 + $0xf8] sm:$0xff] %vm890_vm5, %v857_v2  ;;  %v992_v25 = vpop.permute.xlu0 %991 }
 0x164   : > { %1230 = vrot.lane.b32.xlu1 %v11632_v12, %s7623_s6  ;;  %1086 = vst.msk [vmem:[#allocation3 + $0x10] sm:$0xff] %vm1083_vm6, %v992_v25  ;;  %v1512_v12 = vld [vmem:[#allocation2 + $0x99] sm:$0xff] }
 0x165   : > { %1236 = vrot.lane.b32.xlu0 %v8268_v6, %s7623_s6 }
 0x166   : > { %v990_v46 = vpop.permute.xlu1 %989 }
 0x167   : > { %1085 = vst.msk [vmem:[#allocation3 + $0x8] sm:$0xff] %vm1083_vm6, %v990_v46  ;;  %v996_v5 = vpop.permute.xlu0 %995  ;;  %v1515_v46 = vld [vmem:[#allocation2 + $0xc1] sm:$0xff] }
 0x168   : > { %1234 = vrot.lane.b32.xlu1 %v8272_v3, %s7623_s6  ;;  %1088 = vst.msk [vmem:[#allocation3 + $0x20] sm:$0xff] %vm1083_vm6, %v996_v5 }
 0x169   : > { %1240 = vrot.lane.b32.xlu0 %v8570_v26, %s7623_s6 }
 0x16a   : > { %v994_v30 = vpop.permute.xlu1 %993 }
 0x16b   : > { %1087 = vst.msk [vmem:[#allocation3 + $0x18] sm:$0xff] %vm1083_vm6, %v994_v30  ;;  %v1000_v6 = vpop.permute.xlu0 %999  ;;  %v1514_v30 = vld [vmem:[#allocation2 + $0xb1] sm:$0xff] }
 0x16c   : > { %1238 = vrot.lane.b32.xlu1 %v8280_v9, %s7623_s6  ;;  %1090 = vst.msk [vmem:[#allocation3 + $0x30] sm:$0xff] %vm1083_vm6, %v1000_v6 }
 0x16d   : > { %1374 = vrot.lane.b32.xlu0 %v7967_v51, %s7624_s7 }
 0x16e   : > { %v998_v32 = vpop.permute.xlu1 %997 }
 0x16f   : > { %1089 = vst.msk [vmem:[#allocation3 + $0x28] sm:$0xff] %vm1083_vm6, %v998_v32  ;;  %v1004_v3 = vpop.permute.xlu0 %1003  ;;  %v1517_v32 = vld [vmem:[#allocation2 + $0xd9] sm:$0xff] }
 0x170   : > { %1242 = vrot.lane.b32.xlu1 %v8580_v31, %s7623_s6  ;;  %1092 = vst.msk [vmem:[#allocation3 + $0x40] sm:$0xff] %vm1083_vm6, %v1004_v3 }
 0x171   : > { %1378 = vrot.lane.b32.xlu0 %v7979_v54, %s7624_s7 }
 0x172   : > { %v1002_v39 = vpop.permute.xlu1 %1001 }
 0x173   : > { %1091 = vst.msk [vmem:[#allocation3 + $0x38] sm:$0xff] %vm1083_vm6, %v1002_v39  ;;  %v1008_v9 = vpop.permute.xlu0 %1007  ;;  %v1516_v39 = vld [vmem:[#allocation2 + $0xc9] sm:$0xff] }
 0x174   : > { %1376 = vrot.lane.b32.xlu1 %v7969_v52, %s7624_s7  ;;  %1094 = vst.msk [vmem:[#allocation3 + $0x50] sm:$0xff] %vm1083_vm6, %v1008_v9 }
 0x175   : > { %1382 = vrot.lane.b32.xlu0 %v7989_v57, %s7624_s7 }
 0x176   : > { %v1006_v51 = vpop.permute.xlu1 %1005 }
 0x177   : > { %1093 = vst.msk [vmem:[#allocation3 + $0x48] sm:$0xff] %vm1083_vm6, %v1006_v51  ;;  %v1012_v40 = vpop.permute.xlu0 %1011  ;;  %v1519_v51 = vld [vmem:[#allocation2 + $0xf1] sm:$0xff] }
 0x178   : > { %1380 = vrot.lane.b32.xlu1 %v7981_v55, %s7624_s7  ;;  %1096 = vst.msk [vmem:[#allocation3 + $0x60] sm:$0xff] %vm1083_vm6, %v1012_v40 }
 0x179   : > { %1386 = vrot.lane.b32.xlu0 %v7993_v59, %s7624_s7 }
 0x17a   : > { %v1010_v54 = vpop.permute.xlu1 %1009 }
 0x17b   : > { %1095 = vst.msk [vmem:[#allocation3 + $0x58] sm:$0xff] %vm1083_vm6, %v1010_v54  ;;  %v1016_v52 = vpop.permute.xlu0 %1015  ;;  %v1518_v54 = vld [vmem:[#allocation2 + $0xe1] sm:$0xff] }
 0x17c   : > { %1384 = vrot.lane.b32.xlu1 %v7991_v58, %s7624_s7  ;;  %1098 = vst.msk [vmem:[#allocation3 + $0x70] sm:$0xff] %vm1083_vm6, %v1016_v52 }
 0x17d   : > { %1390 = vrot.lane.b32.xlu0 %v8005_v61, %s7624_s7 }
 0x17e   : > { %v1014_v57 = vpop.permute.xlu1 %1013 }
 0x17f   : > { %1097 = vst.msk [vmem:[#allocation3 + $0x68] sm:$0xff] %vm1083_vm6, %v1014_v57  ;;  %v1020_v55 = vpop.permute.xlu0 %1019  ;;  %v1521_v57 = vld [vmem:[#allocation2 + $0x109] sm:$0xff] }
 0x180   : > { %1388 = vrot.lane.b32.xlu1 %v8003_v60, %s7624_s7  ;;  %1100 = vst.msk [vmem:[#allocation3 + $0x80] sm:$0xff] %vm1083_vm6, %v1020_v55 }
 0x181   : > { %1394 = vrot.lane.b32.xlu0 %v8017_v0, %s7624_s7 }
 0x182   : > { %v1018_v59 = vpop.permute.xlu1 %1017 }
 0x183   : > { %1099 = vst.msk [vmem:[#allocation3 + $0x78] sm:$0xff] %vm1083_vm6, %v1018_v59  ;;  %v1024_v58 = vpop.permute.xlu0 %1023  ;;  %v1520_v59 = vld [vmem:[#allocation2 + $0xf9] sm:$0xff] }
 0x184   : > { %1392 = vrot.lane.b32.xlu1 %v8007_v62, %s7624_s7  ;;  %1102 = vst.msk [vmem:[#allocation3 + $0x90] sm:$0xff] %vm1083_vm6, %v1024_v58 }
 0x185   : > { %1398 = vrot.lane.b32.xlu0 %v8021_v8, %s7624_s7 }
 0x186   : > { %v1022_v61 = vpop.permute.xlu1 %1021 }
 0x187   : > { %1101 = vst.msk [vmem:[#allocation3 + $0x88] sm:$0xff] %vm1083_vm6, %v1022_v61  ;;  %v1028_v60 = vpop.permute.xlu0 %1027  ;;  %v1523_v61 = vld [vmem:[#allocation2 + $0x121] sm:$0xff] }
 0x188   : > { %1396 = vrot.lane.b32.xlu1 %v8019_v7, %s7624_s7  ;;  %1104 = vst.msk [vmem:[#allocation3 + $0xa0] sm:$0xff] %vm1083_vm6, %v1028_v60 }
 0x189   : > { %1402 = vrot.lane.b32.xlu0 %v8033_v48, %s7624_s7 }
 0x18a   : > { %v1026_v0 = vpop.permute.xlu1 %1025 }
 0x18b   : > { %1103 = vst.msk [vmem:[#allocation3 + $0x98] sm:$0xff] %vm1083_vm6, %v1026_v0  ;;  %v1032_v62 = vpop.permute.xlu0 %1031  ;;  %v1522_v0 = vld [vmem:[#allocation2 + $0x111] sm:$0xff] }
 0x18c   : > { %1400 = vrot.lane.b32.xlu1 %v8031_v45, %s7624_s7  ;;  %1106 = vst.msk [vmem:[#allocation3 + $0xb0] sm:$0xff] %vm1083_vm6, %v1032_v62 }
 0x18d   : > { %1406 = vrot.lane.b32.xlu0 %v8043_v38, %s7624_s7 }
 0x18e   : > { %v1030_v8 = vpop.permute.xlu1 %1029 }
 0x18f   : > { %1105 = vst.msk [vmem:[#allocation3 + $0xa8] sm:$0xff] %vm1083_vm6, %v1030_v8  ;;  %v1036_v7 = vpop.permute.xlu0 %1035  ;;  %v1525_v8 = vld [vmem:[#allocation2 + $0x139] sm:$0xff] }
 0x190   : > { %1404 = vrot.lane.b32.xlu1 %v8035_v37, %s7624_s7  ;;  %1108 = vst.msk [vmem:[#allocation3 + $0xc0] sm:$0xff] %vm1083_vm6, %v1036_v7 }
 0x191   : > { %1410 = vrot.lane.b32.xlu0 %v8047_v36, %s7624_s7 }
 0x192   : > { %v1034_v48 = vpop.permute.xlu1 %1033 }
 0x193   : > { %1107 = vst.msk [vmem:[#allocation3 + $0xb8] sm:$0xff] %vm1083_vm6, %v1034_v48  ;;  %v1040_v45 = vpop.permute.xlu0 %1039  ;;  %v1524_v48 = vld [vmem:[#allocation2 + $0x129] sm:$0xff] }
 0x194   : > { %1408 = vrot.lane.b32.xlu1 %v8045_v35, %s7624_s7  ;;  %1110 = vst.msk [vmem:[#allocation3 + $0xd0] sm:$0xff] %vm1083_vm6, %v1040_v45 }
 0x195   : > { %1414 = vrot.lane.b32.xlu0 %v8065_v28, %s7624_s7 }
 0x196   : > { %v1038_v38 = vpop.permute.xlu1 %1037 }
 0x197   : > { %1109 = vst.msk [vmem:[#allocation3 + $0xc8] sm:$0xff] %vm1083_vm6, %v1038_v38  ;;  %v1044_v37 = vpop.permute.xlu0 %1043  ;;  %v1527_v38 = vld [vmem:[#allocation2 + $0x151] sm:$0xff] }
 0x198   : > { %1412 = vrot.lane.b32.xlu1 %v8057_v33, %s7624_s7  ;;  %1112 = vst.msk [vmem:[#allocation3 + $0xe0] sm:$0xff] %vm1083_vm6, %v1044_v37 }
 0x199   : > { %1418 = vrot.lane.b32.xlu0 %v8081_v21, %s7624_s7 }
 0x19a   : > { %v1042_v36 = vpop.permute.xlu1 %1041 }
 0x19b   : > { %1111 = vst.msk [vmem:[#allocation3 + $0xd8] sm:$0xff] %vm1083_vm6, %v1042_v36  ;;  %v1048_v35 = vpop.permute.xlu0 %1047  ;;  %v1526_v36 = vld [vmem:[#allocation2 + $0x141] sm:$0xff] }
 0x19c   : > { %1416 = vrot.lane.b32.xlu1 %v8067_v29, %s7624_s7  ;;  %1114 = vst.msk [vmem:[#allocation3 + $0xf0] sm:$0xff] %vm1083_vm6, %v1048_v35 }
 0x19d   : > { %1422 = vrot.lane.b32.xlu0 %v8097_v17, %s7624_s7 }
 0x19e   : > { %v1046_v28 = vpop.permute.xlu1 %1045 }
 0x19f   : > { %1113 = vst.msk [vmem:[#allocation3 + $0xe8] sm:$0xff] %vm1083_vm6, %v1046_v28  ;;  %v1181_v33 = vpop.permute.xlu0 %1180  ;;  %v1529_v28 = vld [vmem:[#allocation2 + $0x169] sm:$0xff] }
 0x1a0   : > { %1420 = vrot.lane.b32.xlu1 %v8083_v22, %s7624_s7  ;;  %1277 = vst.msk [vmem:[#allocation3] sm:$0xff] %vm1276_vm7, %v1181_v33  ;;  %v1340_v22 = vld [vmem:[#allocation2 + $0x198] sm:$0xff] }
 0x1a1   : > { %1426 = vrot.lane.b32.xlu0 %v8113_v13, %s7624_s7 }
 0x1a2   : > { %v1050_v21 = vpop.permute.xlu1 %1049 }
 0x1a3   : > { %1115 = vst.msk [vmem:[#allocation3 + $0xf8] sm:$0xff] %vm1083_vm6, %v1050_v21  ;;  %v1185_v29 = vpop.permute.xlu0 %1184  ;;  %v1528_v21 = vld [vmem:[#allocation2 + $0x159] sm:$0xff] }
 0x1a4   : > { %1424 = vrot.lane.b32.xlu1 %v8099_v18, %s7624_s7  ;;  %1279 = vst.msk [vmem:[#allocation3 + $0x10] sm:$0xff] %vm1276_vm7, %v1185_v29  ;;  %v1503_v18 = vld [vmem:[#allocation2 + $0x31] sm:$0xff] }
 0x1a5   : > { %1430 = vrot.lane.b32.xlu0 %v8370_v4, %s7624_s7  ;;  %v1341_v4 = vld [vmem:[#allocation2 + $0x1a0] sm:$0xff] }
 0x1a6   : > { %v1183_v17 = vpop.permute.xlu1 %1182 }
 0x1a7   : > { %1278 = vst.msk [vmem:[#allocation3 + $0x8] sm:$0xff] %vm1276_vm7, %v1183_v17  ;;  %v1189_v41 = vpop.permute.xlu0 %1188  ;;  %v1921_v17 = vld [vmem:[%s11443_s1] sm:$0xff] }
 0x1a8   : > { %1428 = vrot.lane.b32.xlu1 %v8115_v14, %s7624_s7  ;;  %1281 = vst.msk [vmem:[#allocation3 + $0x20] sm:$0xff] %vm1276_vm7, %v1189_v41  ;;  %v1505_v14 = vld [vmem:[#allocation2 + $0x49] sm:$0xff] }
 0x1a9   : > { %1434 = vrot.lane.b32.xlu0 %v1340_v22, %s7624_s7  ;;  %v1922_v22 = vld [vmem:[%s11443_s1 + $0x8] sm:$0xff] }
 0x1aa   : > { %v1187_v13 = vpop.permute.xlu1 %1186  ;;  %v7468_v41 = vpack.c.bf16 %v1922_v22, %v1921_v17  ;;  %v1719_v22 = vld [vmem:[#allocation2 + $0x142] sm:$0xff] }
 0x1ab   : > { %1280 = vst.msk [vmem:[#allocation3 + $0x18] sm:$0xff] %vm1276_vm7, %v1187_v13  ;;  %v1193_v42 = vpop.permute.xlu0 %1192 }
 0x1ac   : > { %1432 = vrot.lane.b32.xlu1 %v8380_v1, %s7624_s7  ;;  %1283 = vst.msk [vmem:[#allocation3 + $0x30] sm:$0xff] %vm1276_vm7, %v1193_v42  ;;  %v1507_v1 = vld [vmem:[#allocation2 + $0x61] sm:$0xff]  ;;  %7469 = vmatprep.subr.bf16.mxu0 %v7468_v41 }
 0x1ad   : > { %1567 = vrot.lane.b32.xlu0 %v1503_v18, %s7625_s8  ;;  %v1530_v18 = vld [vmem:[#allocation2 + $0x171] sm:$0xff]  ;;  %7492 = vmatprep.subr.bf16.mxu1 %v7468_v41 }
 0x1ae   : > { %v1191_v43 = vpop.permute.xlu1 %1190  ;;  %7471 = vmatpush3.bf16.msra.mxu0 %v7468_v41  ;;  %7495 = vmatpush3.bf16.msra.mxu1 %v7468_v41 }
 0x1af   : > { %1282 = vst.msk [vmem:[#allocation3 + $0x28] sm:$0xff] %vm1276_vm7, %v1191_v43  ;;  %v1197_v44 = vpop.permute.xlu0 %1196  ;;  %v1924_v43 = vld [vmem:[%s11443_s1 + $0x18] sm:$0xff] }
 0x1b0   : > { %1436 = vrot.lane.b32.xlu1 %v1341_v4, %s7624_s7  ;;  %1285 = vst.msk [vmem:[#allocation3 + $0x40] sm:$0xff] %vm1276_vm7, %v1197_v44  ;;  %v1923_v4 = vld [vmem:[%s11443_s1 + $0x10] sm:$0xff] }
 0x1b1   : > { %1571 = vrot.lane.b32.xlu0 %v1505_v14, %s7625_s8  ;;  %v1533_v14 = vld [vmem:[#allocation2 + $0x199] sm:$0xff]  ;;  %v7472_v44 = vpack.c.bf16 %v1924_v43, %v1923_v4 }
 0x1b2   : > { %v1195_v50 = vpop.permute.xlu1 %1194 }
 0x1b3   : > { %1284 = vst.msk [vmem:[#allocation3 + $0x38] sm:$0xff] %vm1276_vm7, %v1195_v50  ;;  %v1201_v53 = vpop.permute.xlu0 %1200  ;;  %7473 = vmatprep.subr.bf16.mxu0 %v7472_v44  ;;  %7493 = vmatprep.subr.bf16.mxu1 %v7472_v44  ;;  %v1696_v50 = vld [vmem:[#allocation2 + $0x32] sm:$0xff] }
 0x1b4   : > { %1569 = vrot.lane.b32.xlu1 %v1504_v47, %s7625_s8  ;;  %1287 = vst.msk [vmem:[#allocation3 + $0x50] sm:$0xff] %vm1276_vm7, %v1201_v53  ;;  %7475 = vmatpush3.bf16.msra.mxu0 %v7472_v44 }
 0x1b5   : > { %1575 = vrot.lane.b32.xlu0 %v1507_v1, %s7625_s8  ;;  %v1925_v1 = vld [vmem:[%s11443_s1 + $0x20] sm:$0xf]  ;;  %7496 = vmatpush3.bf16.msra.mxu1 %v7472_v44 }
 0x1b6   : > { %v1199_v63 = vpop.permute.xlu1 %1198  ;;  %7302 = vmatprep.subr.msk.mxu0 %vm2030_vm9, %v1925_v1  ;;  %7494 = vmatprep.subr.msk.mxu1 %vm2030_vm9, %v1925_v1 }
 0x1b7   : > { %1286 = vst.msk [vmem:[#allocation3 + $0x48] sm:$0xff] %vm1276_vm7, %v1199_v63  ;;  %v1205_v23 = vpop.permute.xlu0 %1204 }
 0x1b8   : > { %1573 = vrot.lane.b32.xlu1 %v1506_v56, %s7625_s8  ;;  %1289 = vst.msk [vmem:[#allocation3 + $0x60] sm:$0xff] %vm1276_vm7, %v1205_v23  ;;  %v1534_v56 = vld [vmem:[#allocation2 + $0x1a1] sm:$0xff]  ;;  %7303 = vmatpush3.msk.msra.mxu0 %vm2030_vm9, %v1925_v1 }
 0x1b9   : > { %1579 = vrot.lane.b32.xlu0 %v1509_v34, %s7625_s8  ;;  %v1698_v34 = vld [vmem:[#allocation2 + $0x4a] sm:$0xff]  ;;  %7497 = vmatpush3.msk.msra.mxu1 %vm2030_vm9, %v1925_v1  ;;  %v1697_v23 = vld [vmem:[#allocation2 + $0x3a] sm:$0xff] }
 0x1ba   : > { %v1203_v19 = vpop.permute.xlu1 %1202 }
 0x1bb   : > { %1288 = vst.msk [vmem:[#allocation3 + $0x58] sm:$0xff] %vm1276_vm7, %v1203_v19  ;;  %v1209_v15 = vpop.permute.xlu0 %1208  ;;  %v1700_v19 = vld [vmem:[#allocation2 + $0x62] sm:$0xff] }
 0x1bc   : > { %1577 = vrot.lane.b32.xlu1 %v1508_v24, %s7625_s8  ;;  %1291 = vst.msk [vmem:[#allocation3 + $0x70] sm:$0xff] %vm1276_vm7, %v1209_v15  ;;  %v1699_v15 = vld [vmem:[#allocation2 + $0x52] sm:$0xff] }
 0x1bd   : > { %1583 = vrot.lane.b32.xlu0 %v1511_v20, %s7625_s8 }
 0x1be   : > { %v1207_v16 = vpop.permute.xlu1 %1206 }
 0x1bf   : > { %1290 = vst.msk [vmem:[#allocation3 + $0x68] sm:$0xff] %vm1276_vm7, %v1207_v16  ;;  %v1213_v2 = vpop.permute.xlu0 %1212  ;;  %v1702_v16 = vld [vmem:[#allocation2 + $0x7a] sm:$0xff] }
 0x1c0   : > { %1581 = vrot.lane.b32.xlu1 %v1510_v10, %s7625_s8  ;;  %1293 = vst.msk [vmem:[#allocation3 + $0x80] sm:$0xff] %vm1276_vm7, %v1213_v2  ;;  %v1701_v2 = vld [vmem:[#allocation2 + $0x6a] sm:$0xff] }
 0x1c1   : > { %1587 = vrot.lane.b32.xlu0 %v1513_v49, %s7625_s8 }
 0x1c2   : > { %v1211_v25 = vpop.permute.xlu1 %1210 }
 0x1c3   : > { %1292 = vst.msk [vmem:[#allocation3 + $0x78] sm:$0xff] %vm1276_vm7, %v1211_v25  ;;  %v1217_v5 = vpop.permute.xlu0 %1216  ;;  %v1704_v25 = vld [vmem:[#allocation2 + $0x92] sm:$0xff] }
 0x1c4   : > { %1585 = vrot.lane.b32.xlu1 %v1512_v12, %s7625_s8  ;;  %1295 = vst.msk [vmem:[#allocation3 + $0x90] sm:$0xff] %vm1276_vm7, %v1217_v5  ;;  %v1703_v5 = vld [vmem:[#allocation2 + $0x82] sm:$0xff] }
 0x1c5   : > { %1591 = vrot.lane.b32.xlu0 %v1515_v46, %s7625_s8 }
 0x1c6   : > { %v1215_v6 = vpop.permute.xlu1 %1214 }
 0x1c7   : > { %1294 = vst.msk [vmem:[#allocation3 + $0x88] sm:$0xff] %vm1276_vm7, %v1215_v6  ;;  %v1221_v3 = vpop.permute.xlu0 %1220  ;;  %v1706_v6 = vld [vmem:[#allocation2 + $0xaa] sm:$0xff] }
 0x1c8   : > { %1589 = vrot.lane.b32.xlu1 %v1514_v30, %s7625_s8  ;;  %1297 = vst.msk [vmem:[#allocation3 + $0xa0] sm:$0xff] %vm1276_vm7, %v1221_v3  ;;  %v1705_v3 = vld [vmem:[#allocation2 + $0x9a] sm:$0xff] }
 0x1c9   : > { %1595 = vrot.lane.b32.xlu0 %v1517_v32, %s7625_s8 }
 0x1ca   : > { %v1219_v9 = vpop.permute.xlu1 %1218 }
 0x1cb   : > { %1296 = vst.msk [vmem:[#allocation3 + $0x98] sm:$0xff] %vm1276_vm7, %v1219_v9  ;;  %v1225_v40 = vpop.permute.xlu0 %1224  ;;  %v1708_v9 = vld [vmem:[#allocation2 + $0xc2] sm:$0xff] }
 0x1cc   : > { %1593 = vrot.lane.b32.xlu1 %v1516_v39, %s7625_s8  ;;  %1299 = vst.msk [vmem:[#allocation3 + $0xb0] sm:$0xff] %vm1276_vm7, %v1225_v40  ;;  %v1707_v40 = vld [vmem:[#allocation2 + $0xb2] sm:$0xff] }
 0x1cd   : > { %1599 = vrot.lane.b32.xlu0 %v1519_v51, %s7625_s8 }
 0x1ce   : > { %v1223_v52 = vpop.permute.xlu1 %1222 }
 0x1cf   : > { %1298 = vst.msk [vmem:[#allocation3 + $0xa8] sm:$0xff] %vm1276_vm7, %v1223_v52  ;;  %v1229_v55 = vpop.permute.xlu0 %1228  ;;  %v1710_v52 = vld [vmem:[#allocation2 + $0xda] sm:$0xff] }
 0x1d0   : > { %1597 = vrot.lane.b32.xlu1 %v1518_v54, %s7625_s8  ;;  %1301 = vst.msk [vmem:[#allocation3 + $0xc0] sm:$0xff] %vm1276_vm7, %v1229_v55  ;;  %v1709_v55 = vld [vmem:[#allocation2 + $0xca] sm:$0xff] }
 0x1d1   : > { %1603 = vrot.lane.b32.xlu0 %v1521_v57, %s7625_s8 }
 0x1d2   : > { %v1227_v58 = vpop.permute.xlu1 %1226 }
 0x1d3   : > { %1300 = vst.msk [vmem:[#allocation3 + $0xb8] sm:$0xff] %vm1276_vm7, %v1227_v58  ;;  %v1233_v60 = vpop.permute.xlu0 %1232  ;;  %v1712_v58 = vld [vmem:[#allocation2 + $0xf2] sm:$0xff] }
 0x1d4   : > { %1601 = vrot.lane.b32.xlu1 %v1520_v59, %s7625_s8  ;;  %1303 = vst.msk [vmem:[#allocation3 + $0xd0] sm:$0xff] %vm1276_vm7, %v1233_v60  ;;  %v1711_v60 = vld [vmem:[#allocation2 + $0xe2] sm:$0xff] }
 0x1d5   : > { %1607 = vrot.lane.b32.xlu0 %v1523_v61, %s7625_s8 }
 0x1d6   : > { %v1231_v62 = vpop.permute.xlu1 %1230 }
 0x1d7   : > { %1302 = vst.msk [vmem:[#allocation3 + $0xc8] sm:$0xff] %vm1276_vm7, %v1231_v62  ;;  %v1237_v7 = vpop.permute.xlu0 %1236  ;;  %v1714_v62 = vld [vmem:[#allocation2 + $0x10a] sm:$0xff] }
 0x1d8   : > { %1605 = vrot.lane.b32.xlu1 %v1522_v0, %s7625_s8  ;;  %1305 = vst.msk [vmem:[#allocation3 + $0xe0] sm:$0xff] %vm1276_vm7, %v1237_v7  ;;  %v1713_v7 = vld [vmem:[#allocation2 + $0xfa] sm:$0xff] }
 0x1d9   : > { %1611 = vrot.lane.b32.xlu0 %v1525_v8, %s7625_s8 }
 0x1da   : > { %v1235_v45 = vpop.permute.xlu1 %1234 }
 0x1db   : > { %1304 = vst.msk [vmem:[#allocation3 + $0xd8] sm:$0xff] %vm1276_vm7, %v1235_v45  ;;  %v1241_v37 = vpop.permute.xlu0 %1240  ;;  %v1716_v45 = vld [vmem:[#allocation2 + $0x122] sm:$0xff] }
 0x1dc   : > { %1609 = vrot.lane.b32.xlu1 %v1524_v48, %s7625_s8  ;;  %1307 = vst.msk [vmem:[#allocation3 + $0xf0] sm:$0xff] %vm1276_vm7, %v1241_v37  ;;  %v1715_v37 = vld [vmem:[#allocation2 + $0x112] sm:$0xff] }
 0x1dd   : > { %1615 = vrot.lane.b32.xlu0 %v1527_v38, %s7625_s8 }
 0x1de   : > { %v1239_v35 = vpop.permute.xlu1 %1238 }
 0x1df   : > { %1306 = vst.msk [vmem:[#allocation3 + $0xe8] sm:$0xff] %vm1276_vm7, %v1239_v35  ;;  %v1375_v33 = vpop.permute.xlu0 %1374  ;;  %v1718_v35 = vld [vmem:[#allocation2 + $0x13a] sm:$0xff] }
 0x1e0   : > { %1613 = vrot.lane.b32.xlu1 %v1526_v36, %s7625_s8  ;;  %1471 = vst.msk [vmem:[#allocation3] sm:$0xff] %vm1470_vm8, %v1375_v33  ;;  %v1717_v33 = vld [vmem:[#allocation2 + $0x12a] sm:$0xff] }
 0x1e1   : > { %1619 = vrot.lane.b32.xlu0 %v1529_v28, %s7625_s8 }
 0x1e2   : > { %v1243_v29 = vpop.permute.xlu1 %1242 }
 0x1e3   : > { %1308 = vst.msk [vmem:[#allocation3 + $0xf8] sm:$0xff] %vm1276_vm7, %v1243_v29  ;;  %v1379_v13 = vpop.permute.xlu0 %1378  ;;  %v1720_v29 = vld [vmem:[#allocation2 + $0x152] sm:$0xff] }
 0x1e4   : > { %1617 = vrot.lane.b32.xlu1 %v1528_v21, %s7625_s8  ;;  %1473 = vst.msk [vmem:[#allocation3 + $0x10] sm:$0xff] %vm1470_vm8, %v1379_v13  ;;  %v1722_v13 = vld [vmem:[#allocation2 + $0x16a] sm:$0xff] }
 0x1e5   : > { %1623 = vrot.lane.b32.xlu0 %v8470_v11, %s7625_s8 }
 0x1e6   : > { %v1377_v42 = vpop.permute.xlu1 %1376 }
 0x1e7   : > { %1472 = vst.msk [vmem:[#allocation3 + $0x8] sm:$0xff] %vm1470_vm8, %v1377_v42  ;;  %v1383_v47 = vpop.permute.xlu0 %1382  ;;  %v1721_v42 = vld [vmem:[#allocation2 + $0x15a] sm:$0xff] }
 0x1e8   : > { %1621 = vrot.lane.b32.xlu1 %v1530_v18, %s7625_s8  ;;  %1475 = vst.msk [vmem:[#allocation3 + $0x20] sm:$0xff] %vm1470_vm8, %v1383_v47  ;;  %v1726_v47 = vld [vmem:[#allocation2 + $0x19a] sm:$0xff] }
 0x1e9   : > { %1627 = vrot.lane.b32.xlu0 %v1533_v14, %s7625_s8  ;;  %v1723_v14 = vld [vmem:[#allocation2 + $0x172] sm:$0xff] }
 0x1ea   : > { %v1381_v11 = vpop.permute.xlu1 %1380 }
 0x1eb   : > { %1474 = vst.msk [vmem:[#allocation3 + $0x18] sm:$0xff] %vm1470_vm8, %v1381_v11  ;;  %v1387_v53 = vpop.permute.xlu0 %1386 }
 0x1ec   : > { %1625 = vrot.lane.b32.xlu1 %v8480_v27, %s7625_s8  ;;  %1477 = vst.msk [vmem:[#allocation3 + $0x30] sm:$0xff] %vm1470_vm8, %v1387_v53 }
 0x1ed   : > { %1760 = vrot.lane.b32.xlu0 %v1696_v50, %s7626_s28 }
 0x1ee   : > { %v1385_v63 = vpop.permute.xlu1 %1384 }
 0x1ef   : > { %1476 = vst.msk [vmem:[#allocation3 + $0x28] sm:$0xff] %vm1470_vm8, %v1385_v63  ;;  %v1391_v27 = vpop.permute.xlu0 %1390 }
 0x1f0   : > { %1629 = vrot.lane.b32.xlu1 %v1534_v56, %s7625_s8  ;;  %1479 = vst.msk [vmem:[#allocation3 + $0x40] sm:$0xff] %vm1470_vm8, %v1391_v27 }
 0x1f1   : > { %1764 = vrot.lane.b32.xlu0 %v1698_v34, %s7626_s28 }
 0x1f2   : > { %v1389_v24 = vpop.permute.xlu1 %1388 }
 0x1f3   : > { %1478 = vst.msk [vmem:[#allocation3 + $0x38] sm:$0xff] %vm1470_vm8, %v1389_v24  ;;  %v1395_v20 = vpop.permute.xlu0 %1394 }
 0x1f4   : > { %1762 = vrot.lane.b32.xlu1 %v1697_v23, %s7626_s28  ;;  %1481 = vst.msk [vmem:[#allocation3 + $0x50] sm:$0xff] %vm1470_vm8, %v1395_v20 }
 0x1f5   : > { %1768 = vrot.lane.b32.xlu0 %v1700_v19, %s7626_s28 }
 0x1f6   : > { %v1393_v10 = vpop.permute.xlu1 %1392 }
 0x1f7   : > { %1480 = vst.msk [vmem:[#allocation3 + $0x48] sm:$0xff] %vm1470_vm8, %v1393_v10  ;;  %v1399_v49 = vpop.permute.xlu0 %1398 }
 0x1f8   : > { %1766 = vrot.lane.b32.xlu1 %v1699_v15, %s7626_s28  ;;  %1483 = vst.msk [vmem:[#allocation3 + $0x60] sm:$0xff] %vm1470_vm8, %v1399_v49 }
 0x1f9   : > { %1772 = vrot.lane.b32.xlu0 %v1702_v16, %s7626_s28 }
 0x1fa   : > { %v1397_v12 = vpop.permute.xlu1 %1396 }
 0x1fb   : > { %1482 = vst.msk [vmem:[#allocation3 + $0x58] sm:$0xff] %vm1470_vm8, %v1397_v12  ;;  %v1403_v46 = vpop.permute.xlu0 %1402 }
 0x1fc   : > { %1770 = vrot.lane.b32.xlu1 %v1701_v2, %s7626_s28  ;;  %1485 = vst.msk [vmem:[#allocation3 + $0x70] sm:$0xff] %vm1470_vm8, %v1403_v46 }
 0x1fd   : > { %1776 = vrot.lane.b32.xlu0 %v1704_v25, %s7626_s28 }
 0x1fe   : > { %v1401_v30 = vpop.permute.xlu1 %1400 }
 0x1ff   : > { %1484 = vst.msk [vmem:[#allocation3 + $0x68] sm:$0xff] %vm1470_vm8, %v1401_v30  ;;  %v1407_v32 = vpop.permute.xlu0 %1406 }
 0x200   : > { %1774 = vrot.lane.b32.xlu1 %v1703_v5, %s7626_s28  ;;  %1487 = vst.msk [vmem:[#allocation3 + $0x80] sm:$0xff] %vm1470_vm8, %v1407_v32 }
 0x201   : > { %1780 = vrot.lane.b32.xlu0 %v1706_v6, %s7626_s28 }
 0x202   : > { %v1405_v39 = vpop.permute.xlu1 %1404 }
 0x203   : > { %1486 = vst.msk [vmem:[#allocation3 + $0x78] sm:$0xff] %vm1470_vm8, %v1405_v39  ;;  %v1411_v51 = vpop.permute.xlu0 %1410 }
 0x204   : > { %1778 = vrot.lane.b32.xlu1 %v1705_v3, %s7626_s28  ;;  %1489 = vst.msk [vmem:[#allocation3 + $0x90] sm:$0xff] %vm1470_vm8, %v1411_v51 }
 0x205   : > { %1784 = vrot.lane.b32.xlu0 %v1708_v9, %s7626_s28 }
 0x206   : > { %v1409_v54 = vpop.permute.xlu1 %1408 }
 0x207   : > { %1488 = vst.msk [vmem:[#allocation3 + $0x88] sm:$0xff] %vm1470_vm8, %v1409_v54  ;;  %v1415_v57 = vpop.permute.xlu0 %1414 }
 0x208   : > { %1782 = vrot.lane.b32.xlu1 %v1707_v40, %s7626_s28  ;;  %1491 = vst.msk [vmem:[#allocation3 + $0xa0] sm:$0xff] %vm1470_vm8, %v1415_v57 }
 0x209   : > { %1788 = vrot.lane.b32.xlu0 %v1710_v52, %s7626_s28 }
 0x20a   : > { %v1413_v59 = vpop.permute.xlu1 %1412 }
 0x20b   : > { %1490 = vst.msk [vmem:[#allocation3 + $0x98] sm:$0xff] %vm1470_vm8, %v1413_v59  ;;  %v1419_v61 = vpop.permute.xlu0 %1418 }
 0x20c   : > { %1786 = vrot.lane.b32.xlu1 %v1709_v55, %s7626_s28  ;;  %1493 = vst.msk [vmem:[#allocation3 + $0xb0] sm:$0xff] %vm1470_vm8, %v1419_v61 }
 0x20d   : > { %1792 = vrot.lane.b32.xlu0 %v1712_v58, %s7626_s28 }
 0x20e   : > { %v1417_v0 = vpop.permute.xlu1 %1416 }
 0x20f   : > { %1492 = vst.msk [vmem:[#allocation3 + $0xa8] sm:$0xff] %vm1470_vm8, %v1417_v0  ;;  %v1423_v8 = vpop.permute.xlu0 %1422 }
 0x210   : > { %1790 = vrot.lane.b32.xlu1 %v1711_v60, %s7626_s28  ;;  %1495 = vst.msk [vmem:[#allocation3 + $0xc0] sm:$0xff] %vm1470_vm8, %v1423_v8 }
 0x211   : > { %1796 = vrot.lane.b32.xlu0 %v1714_v62, %s7626_s28 }
 0x212   : > { %v1421_v48 = vpop.permute.xlu1 %1420 }
 0x213   : > { %1494 = vst.msk [vmem:[#allocation3 + $0xb8] sm:$0xff] %vm1470_vm8, %v1421_v48  ;;  %v1427_v38 = vpop.permute.xlu0 %1426 }
 0x214   : > { %1794 = vrot.lane.b32.xlu1 %v1713_v7, %s7626_s28  ;;  %1497 = vst.msk [vmem:[#allocation3 + $0xd0] sm:$0xff] %vm1470_vm8, %v1427_v38 }
 0x215   : > { %1800 = vrot.lane.b32.xlu0 %v1716_v45, %s7626_s28 }
 0x216   : > { %v1425_v36 = vpop.permute.xlu1 %1424 }
 0x217   : > { %1496 = vst.msk [vmem:[#allocation3 + $0xc8] sm:$0xff] %vm1470_vm8, %v1425_v36  ;;  %v1431_v28 = vpop.permute.xlu0 %1430 }
 0x218   : > { %1798 = vrot.lane.b32.xlu1 %v1715_v37, %s7626_s28  ;;  %1499 = vst.msk [vmem:[#allocation3 + $0xe0] sm:$0xff] %vm1470_vm8, %v1431_v28 }
 0x219   : > { %1804 = vrot.lane.b32.xlu0 %v1718_v35, %s7626_s28 }
 0x21a   : > { %v1429_v21 = vpop.permute.xlu1 %1428 }
 0x21b   : > { %1498 = vst.msk [vmem:[#allocation3 + $0xd8] sm:$0xff] %vm1470_vm8, %v1429_v21  ;;  %v1435_v17 = vpop.permute.xlu0 %1434 }
 0x21c   : > { %1802 = vrot.lane.b32.xlu1 %v1717_v33, %s7626_s28  ;;  %1501 = vst.msk [vmem:[#allocation3 + $0xf0] sm:$0xff] %vm1470_vm8, %v1435_v17 }
 0x21d   : > { %1808 = vrot.lane.b32.xlu0 %v1720_v29, %s7626_s28 }
 0x21e   : > { %v1433_v41 = vpop.permute.xlu1 %1432 }
 0x21f   : > { %1500 = vst.msk [vmem:[#allocation3 + $0xe8] sm:$0xff] %vm1470_vm8, %v1433_v41  ;;  %v1568_v18 = vpop.permute.xlu0 %1567 }
 0x220   : > { %1806 = vrot.lane.b32.xlu1 %v1719_v22, %s7626_s28  ;;  %1664 = vst.msk [vmem:[#allocation3] sm:$0xff] %vm1663_vm10, %v1568_v18 }
 0x221   : > { %1812 = vrot.lane.b32.xlu0 %v1722_v13, %s7626_s28 }
 0x222   : > { %v1437_v4 = vpop.permute.xlu1 %1436 }
 0x223   : > { %1502 = vst.msk [vmem:[#allocation3 + $0xf8] sm:$0xff] %vm1470_vm8, %v1437_v4  ;;  %v1572_v43 = vpop.permute.xlu0 %1571 }
 0x224   : > { %1810 = vrot.lane.b32.xlu1 %v1721_v42, %s7626_s28  ;;  %1666 = vst.msk [vmem:[#allocation3 + $0x10] sm:$0xff] %vm1663_vm10, %v1572_v43 }
 0x225   : > { %1816 = vrot.lane.b32.xlu0 %v8570_v26, %s7626_s28  ;;  %v1727_v26 = vld [vmem:[#allocation2 + $0x1a2] sm:$0xff] }
 0x226   : > { %v1570_v44 = vpop.permute.xlu1 %1569 }
 0x227   : > { %1665 = vst.msk [vmem:[#allocation3 + $0x8] sm:$0xff] %vm1663_vm10, %v1570_v44  ;;  %v1576_v11 = vpop.permute.xlu0 %1575 }
 0x228   : > { %1814 = vrot.lane.b32.xlu1 %v1723_v14, %s7626_s28  ;;  %1668 = vst.msk [vmem:[#allocation3 + $0x20] sm:$0xff] %vm1663_vm10, %v1576_v11 }
 0x229   : > { %1820 = vrot.lane.b32.xlu0 %v1726_v47, %s7626_s28 }
 0x22a   : > { %v1574_v50 = vpop.permute.xlu1 %1573 }
 0x22b   : > { %1667 = vst.msk [vmem:[#allocation3 + $0x18] sm:$0xff] %vm1663_vm10, %v1574_v50  ;;  %v1580_v1 = vpop.permute.xlu0 %1579 }
 0x22c   : > { %1818 = vrot.lane.b32.xlu1 %v8580_v31, %s7626_s28  ;;  %1670 = vst.msk [vmem:[#allocation3 + $0x30] sm:$0xff] %vm1663_vm10, %v1580_v1 }
 0x22e   : > { %v1578_v53 = vpop.permute.xlu1 %1577 }
 0x22f   : > { %1669 = vst.msk [vmem:[#allocation3 + $0x28] sm:$0xff] %vm1663_vm10, %v1578_v53  ;;  %v1584_v56 = vpop.permute.xlu0 %1583 }
 0x230   : > { %1822 = vrot.lane.b32.xlu1 %v1727_v26, %s7626_s28  ;;  %1672 = vst.msk [vmem:[#allocation3 + $0x40] sm:$0xff] %vm1663_vm10, %v1584_v56 }
 0x232   : > { %v1582_v63 = vpop.permute.xlu1 %1581 }
 0x233   : > { %1671 = vst.msk [vmem:[#allocation3 + $0x38] sm:$0xff] %vm1663_vm10, %v1582_v63  ;;  %v1588_v34 = vpop.permute.xlu0 %1587 }
 0x234   : > { %1674 = vst.msk [vmem:[#allocation3 + $0x50] sm:$0xff] %vm1663_vm10, %v1588_v34 }
 0x236   : > { %v1586_v27 = vpop.permute.xlu1 %1585 }
 0x237   : > { %1673 = vst.msk [vmem:[#allocation3 + $0x48] sm:$0xff] %vm1663_vm10, %v1586_v27  ;;  %v1592_v31 = vpop.permute.xlu0 %1591 }
 0x238   : > { %1676 = vst.msk [vmem:[#allocation3 + $0x60] sm:$0xff] %vm1663_vm10, %v1592_v31 }
 0x23a   : > { %v1590_v23 = vpop.permute.xlu1 %1589 }
 0x23b   : > { %1675 = vst.msk [vmem:[#allocation3 + $0x58] sm:$0xff] %vm1663_vm10, %v1590_v23  ;;  %v1596_v24 = vpop.permute.xlu0 %1595 }
 0x23c   : > { %1678 = vst.msk [vmem:[#allocation3 + $0x70] sm:$0xff] %vm1663_vm10, %v1596_v24 }
 0x23e   : > { %v1594_v19 = vpop.permute.xlu1 %1593 }
 0x23f   : > { %1677 = vst.msk [vmem:[#allocation3 + $0x68] sm:$0xff] %vm1663_vm10, %v1594_v19  ;;  %v1600_v20 = vpop.permute.xlu0 %1599 }
 0x240   : > { %1680 = vst.msk [vmem:[#allocation3 + $0x80] sm:$0xff] %vm1663_vm10, %v1600_v20 }
 0x242   : > { %v1598_v15 = vpop.permute.xlu1 %1597 }
 0x243   : > { %1679 = vst.msk [vmem:[#allocation3 + $0x78] sm:$0xff] %vm1663_vm10, %v1598_v15  ;;  %v1604_v10 = vpop.permute.xlu0 %1603 }
 0x244   : > { %1682 = vst.msk [vmem:[#allocation3 + $0x90] sm:$0xff] %vm1663_vm10, %v1604_v10 }
 0x246   : > { %v1602_v16 = vpop.permute.xlu1 %1601 }
 0x247   : > { %1681 = vst.msk [vmem:[#allocation3 + $0x88] sm:$0xff] %vm1663_vm10, %v1602_v16  ;;  %v1608_v49 = vpop.permute.xlu0 %1607 }
 0x248   : > { %1684 = vst.msk [vmem:[#allocation3 + $0xa0] sm:$0xff] %vm1663_vm10, %v1608_v49 }
 0x24a   : > { %v1606_v2 = vpop.permute.xlu1 %1605 }
 0x24b   : > { %1683 = vst.msk [vmem:[#allocation3 + $0x98] sm:$0xff] %vm1663_vm10, %v1606_v2  ;;  %v1612_v12 = vpop.permute.xlu0 %1611 }
 0x24c   : > { %1686 = vst.msk [vmem:[#allocation3 + $0xb0] sm:$0xff] %vm1663_vm10, %v1612_v12 }
 0x24e   : > { %v1610_v25 = vpop.permute.xlu1 %1609 }
 0x24f   : > { %1685 = vst.msk [vmem:[#allocation3 + $0xa8] sm:$0xff] %vm1663_vm10, %v1610_v25  ;;  %v1616_v46 = vpop.permute.xlu0 %1615 }
 0x250   : > { %1688 = vst.msk [vmem:[#allocation3 + $0xc0] sm:$0xff] %vm1663_vm10, %v1616_v46 }
 0x252   : > { %v1614_v5 = vpop.permute.xlu1 %1613 }
 0x253   : > { %1687 = vst.msk [vmem:[#allocation3 + $0xb8] sm:$0xff] %vm1663_vm10, %v1614_v5  ;;  %v1620_v30 = vpop.permute.xlu0 %1619 }
 0x254   : > { %1690 = vst.msk [vmem:[#allocation3 + $0xd0] sm:$0xff] %vm1663_vm10, %v1620_v30 }
 0x256   : > { %v1618_v6 = vpop.permute.xlu1 %1617 }
 0x257   : > { %1689 = vst.msk [vmem:[#allocation3 + $0xc8] sm:$0xff] %vm1663_vm10, %v1618_v6  ;;  %v1624_v32 = vpop.permute.xlu0 %1623 }
 0x258   : > { %1692 = vst.msk [vmem:[#allocation3 + $0xe0] sm:$0xff] %vm1663_vm10, %v1624_v32 }
 0x25a   : > { %v1622_v3 = vpop.permute.xlu1 %1621 }
 0x25b   : > { %1691 = vst.msk [vmem:[#allocation3 + $0xd8] sm:$0xff] %vm1663_vm10, %v1622_v3  ;;  %v1628_v39 = vpop.permute.xlu0 %1627 }
 0x25c   : > { %1694 = vst.msk [vmem:[#allocation3 + $0xf0] sm:$0xff] %vm1663_vm10, %v1628_v39 }
 0x25e   : > { %v1626_v9 = vpop.permute.xlu1 %1625 }
 0x25f   : > { %1693 = vst.msk [vmem:[#allocation3 + $0xe8] sm:$0xff] %vm1663_vm10, %v1626_v9  ;;  %v1761_v51 = vpop.permute.xlu0 %1760 }
 0x260   : > { %1857 = vst.msk [vmem:[#allocation3] sm:$0xff] %vm1856_vm11, %v1761_v51 }
 0x262   : > { %v1630_v40 = vpop.permute.xlu1 %1629 }
 0x263   : > { %1695 = vst.msk [vmem:[#allocation3 + $0xf8] sm:$0xff] %vm1663_vm10, %v1630_v40  ;;  %v1765_v54 = vpop.permute.xlu0 %1764  ;;  %v2452_v40 = vld [vmem:[#allocation2 + $0x9] sm:$0xff] }
 0x264   : > { %1859 = vst.msk [vmem:[#allocation3 + $0x10] sm:$0xff] %vm1856_vm11, %v1765_v54  ;;  %2517 = vrot.lane.b32.xlu1 %v2452_v40, %s7619_s29  ;;  %v2451_v54 = vld [vmem:[#allocation2 + $0x1] sm:$0xff] }
 0x265   : > { %2515 = vrot.lane.b32.xlu0 %v2451_v54, %s7619_s29 }
 0x266   : > { %v1763_v52 = vpop.permute.xlu1 %1762 }
 0x267   : > { %1858 = vst.msk [vmem:[#allocation3 + $0x8] sm:$0xff] %vm1856_vm11, %v1763_v52  ;;  %v1769_v57 = vpop.permute.xlu0 %1768  ;;  %v1889_v55 = vld [vmem:[#allocation3] sm:$0xff]  ;;  %v2388_v52 = vld [vmem:[#allocation2 + $0x8] sm:$0xff] }
 0x268   : > { %1861 = vst.msk [vmem:[#allocation3 + $0x20] sm:$0xff] %vm1856_vm11, %v1769_v57  ;;  %7304 = vmatprep.mubr.msk.f32.mxu0 %vm1933_vm12, %v1889_v55  ;;  %v2387_v57 = vld [vmem:[#allocation2] sm:$0xff] }
 0x269   : > { %2419 = vst.msk [vmem:[#allocation3] sm:$0xff] %vm169_vm0, %v2387_v57 }
 0x26a   : > { %v1767_v59 = vpop.permute.xlu1 %1766 }
 0x26b   : > { %1860 = vst.msk [vmem:[#allocation3 + $0x18] sm:$0xff] %vm1856_vm11, %v1767_v59  ;;  %v1773_v58 = vpop.permute.xlu0 %1772  ;;  %v1891_v61 = vld [vmem:[#allocation3 + $0x10] sm:$0xff] }
 0x26c   : > { %1863 = vst.msk [vmem:[#allocation3 + $0x30] sm:$0xff] %vm1856_vm11, %v1773_v58  ;;  %v8928_v58 = vld [vmem:[%s11444_s2] ss:$0 sm:$0xff] }
 0x26e   : > { %v1771_v60 = vpop.permute.xlu1 %1770  ;;  %v1890_v0 = vld [vmem:[#allocation3 + $0x8] sm:$0xff] }
 0x26f   : > { %1862 = vst.msk [vmem:[#allocation3 + $0x28] sm:$0xff] %vm1856_vm11, %v1771_v60  ;;  %7305 = vmatmul.mubr.msk.f32.vlgmr.msra.gmra.mrb[0].mxu0 %vm1933_vm12, %v1890_v0  ;;  %v1777_v62 = vpop.permute.xlu0 %1776  ;;  %v1893_v8 = vld [vmem:[#allocation3 + $0x20] sm:$0xff] }
 0x270   : > { %7307 = vmatprep.mubr.msk.f32.mxu0 %vm1933_vm12, %v1891_v61  ;;  %1865 = vst.msk [vmem:[#allocation3 + $0x40] sm:$0xff] %vm1856_vm11, %v1777_v62 }
 0x271   : > { %2420 = vst.msk [vmem:[#allocation3 + $0x8] sm:$0xff] %vm169_vm0, %v2388_v52 }
 0x272   : > { %v1775_v7 = vpop.permute.xlu1 %1774  ;;  %v1892_v48 = vld [vmem:[#allocation3 + $0x18] sm:$0xff] }
 0x273   : > { %1864 = vst.msk [vmem:[#allocation3 + $0x38] sm:$0xff] %vm1856_vm11, %v1775_v7  ;;  %7308 = vmatmul.mubr.msk.f32.gmra.mrb[2].mxu0 %vm1933_vm12, %v1892_v48  ;;  %v1781_v45 = vpop.permute.xlu0 %1780  ;;  %v1895_v38 = vld [vmem:[#allocation3 + $0x30] sm:$0xff] }
 0x274   : > { %7310 = vmatprep.mubr.msk.f32.mxu0 %vm1933_vm12, %v1893_v8  ;;  %1867 = vst.msk [vmem:[#allocation3 + $0x50] sm:$0xff] %vm1856_vm11, %v1781_v45 }
 0x276   : > { %v1779_v37 = vpop.permute.xlu1 %1778  ;;  %v1894_v36 = vld [vmem:[#allocation3 + $0x28] sm:$0xff] }
 0x277   : > { %1866 = vst.msk [vmem:[#allocation3 + $0x48] sm:$0xff] %vm1856_vm11, %v1779_v37  ;;  %7311 = vmatmul.mubr.msk.f32.gmra.mrb[4].mxu0 %vm1933_vm12, %v1894_v36  ;;  %v1785_v35 = vpop.permute.xlu0 %1784  ;;  %v1897_v28 = vld [vmem:[#allocation3 + $0x40] sm:$0xff] }
 0x278   : > { %7313 = vmatprep.mubr.msk.f32.mxu0 %vm1933_vm12, %v1895_v38  ;;  %1869 = vst.msk [vmem:[#allocation3 + $0x60] sm:$0xff] %vm1856_vm11, %v1785_v35 }
 0x27a   : > { %v1783_v33 = vpop.permute.xlu1 %1782  ;;  %v1896_v21 = vld [vmem:[#allocation3 + $0x38] sm:$0xff] }
 0x27b   : > { %1868 = vst.msk [vmem:[#allocation3 + $0x58] sm:$0xff] %vm1856_vm11, %v1783_v33  ;;  %7314 = vmatmul.mubr.msk.f32.gmra.mrb[6].mxu0 %vm1933_vm12, %v1896_v21  ;;  %v1789_v29 = vpop.permute.xlu0 %1788  ;;  %v1899_v17 = vld [vmem:[#allocation3 + $0x50] sm:$0xff] }
 0x27c   : > { %7316 = vmatprep.mubr.msk.f32.mxu0 %vm1933_vm12, %v1897_v28  ;;  %1871 = vst.msk [vmem:[#allocation3 + $0x70] sm:$0xff] %vm1856_vm11, %v1789_v29 }
 0x27e   : > { %v1787_v22 = vpop.permute.xlu1 %1786  ;;  %v1898_v41 = vld [vmem:[#allocation3 + $0x48] sm:$0xff] }
 0x27f   : > { %1870 = vst.msk [vmem:[#allocation3 + $0x68] sm:$0xff] %vm1856_vm11, %v1787_v22  ;;  %7317 = vmatmul.mubr.msk.f32.gmra.mrb[8].mxu0 %vm1933_vm12, %v1898_v41  ;;  %v1793_v13 = vpop.permute.xlu0 %1792  ;;  %v1901_v18 = vld [vmem:[#allocation3 + $0x60] sm:$0xff] }
 0x280   : > { %7319 = vmatprep.mubr.msk.f32.mxu0 %vm1933_vm12, %v1899_v17  ;;  %1873 = vst.msk [vmem:[#allocation3 + $0x80] sm:$0xff] %vm1856_vm11, %v1793_v13 }
 0x282   : > { %v1791_v42 = vpop.permute.xlu1 %1790  ;;  %v1900_v4 = vld [vmem:[#allocation3 + $0x58] sm:$0xff] }
 0x283   : > { %1872 = vst.msk [vmem:[#allocation3 + $0x78] sm:$0xff] %vm1856_vm11, %v1791_v42  ;;  %7320 = vmatmul.mubr.msk.f32.gmra.mrb[10].mxu0 %vm1933_vm12, %v1900_v4  ;;  %v1797_v43 = vpop.permute.xlu0 %1796  ;;  %v1903_v14 = vld [vmem:[#allocation3 + $0x70] sm:$0xff] }
 0x284   : > { %7322 = vmatprep.mubr.msk.f32.mxu0 %vm1933_vm12, %v1901_v18  ;;  %1875 = vst.msk [vmem:[#allocation3 + $0x90] sm:$0xff] %vm1856_vm11, %v1797_v43 }
 0x286   : > { %v1795_v44 = vpop.permute.xlu1 %1794  ;;  %v1902_v47 = vld [vmem:[#allocation3 + $0x68] sm:$0xff] }
 0x287   : > { %1874 = vst.msk [vmem:[#allocation3 + $0x88] sm:$0xff] %vm1856_vm11, %v1795_v44  ;;  %7323 = vmatmul.mubr.msk.f32.gmra.mrb[12].mxu0 %vm1933_vm12, %v1902_v47  ;;  %v1801_v11 = vpop.permute.xlu0 %1800  ;;  %v1905_v50 = vld [vmem:[#allocation3 + $0x80] sm:$0xff] }
 0x288   : > { %7325 = vmatprep.mubr.msk.f32.mxu0 %vm1933_vm12, %v1903_v14  ;;  %1877 = vst.msk [vmem:[#allocation3 + $0xa0] sm:$0xff] %vm1856_vm11, %v1801_v11  ;;  %7328 = vmatprep.mubr.msk.f32.mxu1 %vm1933_vm12, %v1905_v50 }
 0x28a   : > { %v1799_v1 = vpop.permute.xlu1 %1798  ;;  %v1904_v26 = vld [vmem:[#allocation3 + $0x78] sm:$0xff] }
 0x28b   : > { %1876 = vst.msk [vmem:[#allocation3 + $0x98] sm:$0xff] %vm1856_vm11, %v1799_v1  ;;  %7326 = vmatmul.mubr.msk.f32.gmra.mrb[14].mxu0 %vm1933_vm12, %v1904_v26  ;;  %v1805_v53 = vpop.permute.xlu0 %1804  ;;  %v1907_v56 = vld [vmem:[#allocation3 + $0x90] sm:$0xff] }
 0x28c   : > { %1879 = vst.msk [vmem:[#allocation3 + $0xb0] sm:$0xff] %vm1856_vm11, %v1805_v53 }
 0x28e   : > { %v1803_v63 = vpop.permute.xlu1 %1802  ;;  %v1906_v34 = vld [vmem:[#allocation3 + $0x88] sm:$0xff] }
 0x28f   : > { %1878 = vst.msk [vmem:[#allocation3 + $0xa8] sm:$0xff] %vm1856_vm11, %v1803_v63  ;;  %7329 = vmatmul.mubr.msk.f32.vlgmr.msra.gmra.mrb[0].mxu1 %vm1933_vm12, %v1906_v34  ;;  %v1809_v27 = vpop.permute.xlu0 %1808  ;;  %v1909_v31 = vld [vmem:[#allocation3 + $0xa0] sm:$0xff] }
 0x290   : > { %7331 = vmatprep.mubr.msk.f32.mxu1 %vm1933_vm12, %v1907_v56  ;;  %1881 = vst.msk [vmem:[#allocation3 + $0xc0] sm:$0xff] %vm1856_vm11, %v1809_v27 }
 0x292   : > { %v1807_v23 = vpop.permute.xlu1 %1806  ;;  %v1908_v24 = vld [vmem:[#allocation3 + $0x98] sm:$0xff] }
 0x293   : > { %1880 = vst.msk [vmem:[#allocation3 + $0xb8] sm:$0xff] %vm1856_vm11, %v1807_v23  ;;  %7332 = vmatmul.mubr.msk.f32.gmra.mrb[2].mxu1 %vm1933_vm12, %v1908_v24  ;;  %v1813_v19 = vpop.permute.xlu0 %1812  ;;  %v1911_v20 = vld [vmem:[#allocation3 + $0xb0] sm:$0xff] }
 0x294   : > { %7334 = vmatprep.mubr.msk.f32.mxu1 %vm1933_vm12, %v1909_v31  ;;  %1883 = vst.msk [vmem:[#allocation3 + $0xd0] sm:$0xff] %vm1856_vm11, %v1813_v19 }
 0x296   : > { %v1811_v15 = vpop.permute.xlu1 %1810  ;;  %v1910_v10 = vld [vmem:[#allocation3 + $0xa8] sm:$0xff] }
 0x297   : > { %1882 = vst.msk [vmem:[#allocation3 + $0xc8] sm:$0xff] %vm1856_vm11, %v1811_v15  ;;  %7335 = vmatmul.mubr.msk.f32.gmra.mrb[4].mxu1 %vm1933_vm12, %v1910_v10  ;;  %v1817_v16 = vpop.permute.xlu0 %1816  ;;  %v1913_v49 = vld [vmem:[#allocation3 + $0xc0] sm:$0xff] }
 0x298   : > { %7337 = vmatprep.mubr.msk.f32.mxu1 %vm1933_vm12, %v1911_v20  ;;  %1885 = vst.msk [vmem:[#allocation3 + $0xe0] sm:$0xff] %vm1856_vm11, %v1817_v16 }
 0x29a   : > { %v1815_v2 = vpop.permute.xlu1 %1814  ;;  %v1912_v12 = vld [vmem:[#allocation3 + $0xb8] sm:$0xff] }
 0x29b   : > { %1884 = vst.msk [vmem:[#allocation3 + $0xd8] sm:$0xff] %vm1856_vm11, %v1815_v2  ;;  %7338 = vmatmul.mubr.msk.f32.gmra.mrb[6].mxu1 %vm1933_vm12, %v1912_v12  ;;  %v1821_v25 = vpop.permute.xlu0 %1820  ;;  %v1915_v46 = vld [vmem:[#allocation3 + $0xd0] sm:$0xff] }
 0x29c   : > { %7340 = vmatprep.mubr.msk.f32.mxu1 %vm1933_vm12, %v1913_v49  ;;  %1887 = vst.msk [vmem:[#allocation3 + $0xf0] sm:$0xff] %vm1856_vm11, %v1821_v25 }
 0x29e   : > { %v1819_v5 = vpop.permute.xlu1 %1818  ;;  %v1914_v30 = vld [vmem:[#allocation3 + $0xc8] sm:$0xff] }
 0x29f   : > { %1886 = vst.msk [vmem:[#allocation3 + $0xe8] sm:$0xff] %vm1856_vm11, %v1819_v5  ;;  %7341 = vmatmul.mubr.msk.f32.gmra.mrb[8].mxu1 %vm1933_vm12, %v1914_v30  ;;  %v1917_v6 = vld [vmem:[#allocation3 + $0xe0] sm:$0xff] }
 0x2a0   : > { %7343 = vmatprep.mubr.msk.f32.mxu1 %vm1933_vm12, %v1915_v46 }
 0x2a2   : > { %v1916_v32 = vld [vmem:[#allocation3 + $0xd8] sm:$0xff]  ;;  %v1823_v3 = vpop.permute.xlu1 %1822 }
 0x2a3   : > { %7344 = vmatmul.mubr.msk.f32.gmra.mrb[10].mxu1 %vm1933_vm12, %v1916_v32  ;;  %1888 = vst.msk [vmem:[#allocation3 + $0xf8] sm:$0xff] %vm1856_vm11, %v1823_v3  ;;  %v1919_v39 = vld [vmem:[#allocation3 + $0xf0] sm:$0xff] }
 0x2a4   : > { %7346 = vmatprep.mubr.msk.f32.mxu1 %vm1933_vm12, %v1917_v6 }
 0x2a6   : > { %v1918_v9 = vld [vmem:[#allocation3 + $0xe8] sm:$0xff] }
 0x2a7   : > { %7347 = vmatmul.mubr.msk.f32.gmra.mrb[12].mxu1 %vm1933_vm12, %v1918_v9 }
 0x2a8   : > { %7349 = vmatprep.mubr.msk.f32.mxu1 %vm1933_vm12, %v1919_v39 }
 0x2aa   : > { %v1920_v51 = vld [vmem:[#allocation3 + $0xf8] sm:$0xff] }
 0x2ab   : > { %7350 = vmatmul.mubr.msk.f32.gmra.mrb[14].mxu1 %vm1933_vm12, %v1920_v51 }
 0x2d6   : > { %v2518_v55 = vpop.permute.xlu1 %2517 }
 0x2d7   : > { %2612 = vst.msk [vmem:[#allocation3 + $0x8] sm:$0xff] %vm504_vm3, %v2518_v55  ;;  %v2516_v59 = vpop.permute.xlu0 %2515 }
 0x2d8   : > { %2611 = vst.msk [vmem:[#allocation3] sm:$0xff] %vm504_vm3, %v2516_v59 }
 0x342   : > { %v7306_v61 = vpop.f32.mrb[0].mxu0 }
 0x343   : > { %v2106_v60 = vadd.f32 %v7306_v61, %v8928_v58  ;;  %v2100_v0 = vpop.f32.mrb[1].mxu0 }
 0x344   : > { %v2101_v62 = vadd.f32 %v8928_v58, %v2100_v0 }
 0x345   : > { %vm2260_vm13 = vcmp.gt.f32.partialorder %v2106_v60, 0.0  ;;  %v2292_v8 = vmul.f32 0.2, %v2106_v60 }
 0x346   : > { %vm2259_vm14 = vcmp.gt.f32.partialorder %v2101_v62, 0.0  ;;  %v2291_v7 = vmul.f32 0.2, %v2101_v62  ;;  %v7309_v48 = vpop.f32.mrb[2].mxu0 }
 0x347   : > { %v2324_v45 = vsel %vm2260_vm13, %v2106_v60, %v2292_v8  ;;  %v2116_v38 = vadd.f32 %v7309_v48, %v8928_v58  ;;  %v2110_v37 = vpop.f32.mrb[3].mxu0 }
 0x348   : > { %2356 = vst.msk [vmem:[#allocation2 + $0x21] sm:$0xff] %vm169_vm0, %v2324_v45  ;;  %v2323_v36 = vsel %vm2259_vm14, %v2101_v62, %v2291_v7  ;;  %v2111_v35 = vadd.f32 %v8928_v58, %v2110_v37 }
 0x349   : > { %2355 = vst.msk [vmem:[#allocation2 + $0x19] sm:$0xff] %vm169_vm0, %v2323_v36  ;;  %vm2262_vm15 = vcmp.gt.f32.partialorder %v2116_v38, 0.0  ;;  %v2294_v28 = vmul.f32 0.2, %v2116_v38 }
 0x34a   : > { %vm2261_vm1 = vcmp.gt.f32.partialorder %v2111_v35, 0.0  ;;  %v2293_v33 = vmul.f32 0.2, %v2111_v35  ;;  %v7312_v21 = vpop.f32.mrb[4].mxu0 }
 0x34b   : > { %v2326_v29 = vsel %vm2262_vm15, %v2116_v38, %v2294_v28  ;;  %v2126_v17 = vadd.f32 %v7312_v21, %v8928_v58  ;;  %v2120_v22 = vpop.f32.mrb[5].mxu0 }
 0x34c   : > { %2358 = vst.msk [vmem:[#allocation2 + $0x39] sm:$0xff] %vm169_vm0, %v2326_v29  ;;  %v2325_v41 = vsel %vm2261_vm1, %v2111_v35, %v2293_v33  ;;  %v2121_v13 = vadd.f32 %v8928_v58, %v2120_v22 }
 0x34d   : > { %2357 = vst.msk [vmem:[#allocation2 + $0x31] sm:$0xff] %vm169_vm0, %v2325_v41  ;;  %vm2264_vm2 = vcmp.gt.f32.partialorder %v2126_v17, 0.0  ;;  %v2296_v18 = vmul.f32 0.2, %v2126_v17 }
 0x34e   : > { %vm2263_vm13 = vcmp.gt.f32.partialorder %v2121_v13, 0.0  ;;  %v2295_v42 = vmul.f32 0.2, %v2121_v13  ;;  %v7315_v4 = vpop.f32.mrb[6].mxu0 }
 0x34f   : > { %v2328_v43 = vsel %vm2264_vm2, %v2126_v17, %v2296_v18  ;;  %v2136_v14 = vadd.f32 %v7315_v4, %v8928_v58  ;;  %v2130_v44 = vpop.f32.mrb[7].mxu0  ;;  %v8942_v47 = vld [vmem:[#allocation2 + $0x21] sm:$0xff] }
 0x350   : > { %2360 = vst.msk [vmem:[#allocation2 + $0x51] sm:$0xff] %vm169_vm0, %v2328_v43  ;;  %v2327_v11 = vsel %vm2263_vm13, %v2121_v13, %v2295_v42  ;;  %v2131_v50 = vadd.f32 %v8928_v58, %v2130_v44  ;;  %2521 = vrot.lane.b32.xlu1 %v8942_v47, %s7619_s29  ;;  %v8948_v1 = vld [vmem:[#allocation2 + $0x19] sm:$0xff] }
 0x351   : > { %v8950_v26 = vld [vmem:[#allocation2 + $0x20] sm:$0xff]  ;;  %2359 = vst.msk [vmem:[#allocation2 + $0x49] sm:$0xff] %vm169_vm0, %v2327_v11  ;;  %vm2266_vm14 = vcmp.gt.f32.partialorder %v2136_v14, 0.0  ;;  %v2298_v53 = vmul.f32 0.2, %v2136_v14  ;;  %2519 = vrot.lane.b32.xlu0 %v8948_v1, %s7619_s29  ;;  %v8957_v56 = vld [vmem:[#allocation2 + $0x18] sm:$0xff] }
 0x352   : > { %2422 = vst.msk [vmem:[#allocation3 + $0x18] sm:$0xff] %vm169_vm0, %v8950_v26  ;;  %vm2265_vm15 = vcmp.gt.f32.partialorder %v2131_v50, 0.0  ;;  %v2297_v63 = vmul.f32 0.2, %v2131_v50  ;;  %v7318_v34 = vpop.f32.mrb[8].mxu0  ;;  %2421 = vst.msk [vmem:[#allocation3 + $0x10] sm:$0xff] %vm169_vm0, %v8957_v56 }
 0x353   : > { %v2330_v27 = vsel %vm2266_vm14, %v2136_v14, %v2298_v53  ;;  %v2146_v31 = vadd.f32 %v7318_v34, %v8928_v58  ;;  %v2140_v23 = vpop.f32.mrb[9].mxu0  ;;  %v8962_v24 = vld [vmem:[#allocation2 + $0x39] sm:$0xff] }
 0x354   : > { %2362 = vst.msk [vmem:[#allocation2 + $0x69] sm:$0xff] %vm169_vm0, %v2330_v27  ;;  %v2329_v19 = vsel %vm2265_vm15, %v2131_v50, %v2297_v63  ;;  %v2141_v20 = vadd.f32 %v8928_v58, %v2140_v23  ;;  %2525 = vrot.lane.b32.xlu1 %v8962_v24, %s7619_s29  ;;  %v8968_v15 = vld [vmem:[#allocation2 + $0x31] sm:$0xff] }
 0x355   : > { %v8970_v10 = vld [vmem:[#allocation2 + $0x38] sm:$0xff]  ;;  %2361 = vst.msk [vmem:[#allocation2 + $0x61] sm:$0xff] %vm169_vm0, %v2329_v19  ;;  %vm2268_vm1 = vcmp.gt.f32.partialorder %v2146_v31, 0.0  ;;  %v2300_v16 = vmul.f32 0.2, %v2146_v31  ;;  %2523 = vrot.lane.b32.xlu0 %v8968_v15, %s7619_s29  ;;  %v8977_v49 = vld [vmem:[#allocation2 + $0x30] sm:$0xff] }
 0x356   : > { %2424 = vst.msk [vmem:[#allocation3 + $0x28] sm:$0xff] %vm169_vm0, %v8970_v10  ;;  %vm2267_vm2 = vcmp.gt.f32.partialorder %v2141_v20, 0.0  ;;  %v2299_v2 = vmul.f32 0.2, %v2141_v20  ;;  %v7321_v12 = vpop.f32.mrb[10].mxu0  ;;  %2423 = vst.msk [vmem:[#allocation3 + $0x20] sm:$0xff] %vm169_vm0, %v8977_v49 }
 0x357   : > { %v2332_v25 = vsel %vm2268_vm1, %v2146_v31, %v2300_v16  ;;  %v2156_v46 = vadd.f32 %v7321_v12, %v8928_v58  ;;  %v2150_v5 = vpop.f32.mrb[11].mxu0  ;;  %v8982_v30 = vld [vmem:[#allocation2 + $0x51] sm:$0xff] }
 0x358   : > { %2364 = vst.msk [vmem:[#allocation2 + $0x81] sm:$0xff] %vm169_vm0, %v2332_v25  ;;  %v2331_v6 = vsel %vm2267_vm2, %v2141_v20, %v2299_v2  ;;  %v2151_v32 = vadd.f32 %v8928_v58, %v2150_v5  ;;  %2529 = vrot.lane.b32.xlu1 %v8982_v30, %s7619_s29  ;;  %v8988_v3 = vld [vmem:[#allocation2 + $0x49] sm:$0xff] }
 0x359   : > { %v8990_v39 = vld [vmem:[#allocation2 + $0x50] sm:$0xff]  ;;  %2363 = vst.msk [vmem:[#allocation2 + $0x79] sm:$0xff] %vm169_vm0, %v2331_v6  ;;  %vm2270_vm13 = vcmp.gt.f32.partialorder %v2156_v46, 0.0  ;;  %v2302_v9 = vmul.f32 0.2, %v2156_v46  ;;  %2527 = vrot.lane.b32.xlu0 %v8988_v3, %s7619_s29  ;;  %v8997_v51 = vld [vmem:[#allocation2 + $0x48] sm:$0xff] }
 0x35a   : > { %2426 = vst.msk [vmem:[#allocation3 + $0x38] sm:$0xff] %vm169_vm0, %v8990_v39  ;;  %vm2269_vm14 = vcmp.gt.f32.partialorder %v2151_v32, 0.0  ;;  %v2301_v40 = vmul.f32 0.2, %v2151_v32  ;;  %v7324_v54 = vpop.f32.mrb[12].mxu0  ;;  %2425 = vst.msk [vmem:[#allocation3 + $0x30] sm:$0xff] %vm169_vm0, %v8997_v51 }
 0x35b   : > { %v2334_v52 = vsel %vm2270_vm13, %v2156_v46, %v2302_v9  ;;  %v2166_v57 = vadd.f32 %v7324_v54, %v8928_v58  ;;  %v2160_v55 = vpop.f32.mrb[13].mxu0  ;;  %v9002_v59 = vld [vmem:[#allocation2 + $0x69] sm:$0xff] }
 0x35c   : > { %2366 = vst.msk [vmem:[#allocation2 + $0x99] sm:$0xff] %vm169_vm0, %v2334_v52  ;;  %v2333_v61 = vsel %vm2269_vm14, %v2151_v32, %v2301_v40  ;;  %v2161_v60 = vadd.f32 %v8928_v58, %v2160_v55  ;;  %2533 = vrot.lane.b32.xlu1 %v9002_v59, %s7619_s29  ;;  %v9008_v0 = vld [vmem:[#allocation2 + $0x61] sm:$0xff] }
 0x35d   : > { %v9010_v62 = vld [vmem:[#allocation2 + $0x68] sm:$0xff]  ;;  %2365 = vst.msk [vmem:[#allocation2 + $0x91] sm:$0xff] %vm169_vm0, %v2333_v61  ;;  %vm2272_vm15 = vcmp.gt.f32.partialorder %v2166_v57, 0.0  ;;  %v2304_v8 = vmul.f32 0.2, %v2166_v57  ;;  %2531 = vrot.lane.b32.xlu0 %v9008_v0, %s7619_s29  ;;  %v9017_v7 = vld [vmem:[#allocation2 + $0x60] sm:$0xff] }
 0x35e   : > { %2428 = vst.msk [vmem:[#allocation3 + $0x48] sm:$0xff] %vm169_vm0, %v9010_v62  ;;  %vm2271_vm1 = vcmp.gt.f32.partialorder %v2161_v60, 0.0  ;;  %v2303_v48 = vmul.f32 0.2, %v2161_v60  ;;  %v7327_v45 = vpop.f32.mrb[14].mxu0  ;;  %2427 = vst.msk [vmem:[#allocation3 + $0x40] sm:$0xff] %vm169_vm0, %v9017_v7 }
 0x35f   : > { %v2336_v38 = vsel %vm2272_vm15, %v2166_v57, %v2304_v8  ;;  %v2176_v37 = vadd.f32 %v7327_v45, %v8928_v58  ;;  %v2170_v36 = vpop.f32.mrb[15].mxu0  ;;  %v9022_v35 = vld [vmem:[#allocation2 + $0x81] sm:$0xff] }
 0x360   : > { %2368 = vst.msk [vmem:[#allocation2 + $0xb1] sm:$0xff] %vm169_vm0, %v2336_v38  ;;  %v2335_v28 = vsel %vm2271_vm1, %v2161_v60, %v2303_v48  ;;  %v2171_v33 = vadd.f32 %v8928_v58, %v2170_v36  ;;  %2537 = vrot.lane.b32.xlu1 %v9022_v35, %s7619_s29  ;;  %v9028_v21 = vld [vmem:[#allocation2 + $0x79] sm:$0xff] }
 0x361   : > { %v9030_v29 = vld [vmem:[#allocation2 + $0x80] sm:$0xff]  ;;  %2367 = vst.msk [vmem:[#allocation2 + $0xa9] sm:$0xff] %vm169_vm0, %v2335_v28  ;;  %vm2274_vm2 = vcmp.gt.f32.partialorder %v2176_v37, 0.0  ;;  %v2306_v17 = vmul.f32 0.2, %v2176_v37  ;;  %2535 = vrot.lane.b32.xlu0 %v9028_v21, %s7619_s29  ;;  %v9037_v22 = vld [vmem:[#allocation2 + $0x78] sm:$0xff] }
 0x362   : > { %2430 = vst.msk [vmem:[#allocation3 + $0x58] sm:$0xff] %vm169_vm0, %v9030_v29  ;;  %vm2273_vm13 = vcmp.gt.f32.partialorder %v2171_v33, 0.0  ;;  %v2305_v41 = vmul.f32 0.2, %v2171_v33  ;;  %v7330_v13 = vpop.f32.mrb[0].mxu1  ;;  %2429 = vst.msk [vmem:[#allocation3 + $0x50] sm:$0xff] %vm169_vm0, %v9037_v22 }
 0x363   : > { %v2338_v18 = vsel %vm2274_vm2, %v2176_v37, %v2306_v17  ;;  %v2186_v42 = vadd.f32 %v7330_v13, %v8928_v58  ;;  %v2180_v4 = vpop.f32.mrb[1].mxu1  ;;  %v9042_v43 = vld [vmem:[#allocation2 + $0x99] sm:$0xff] }
 0x364   : > { %2370 = vst.msk [vmem:[#allocation2 + $0xc9] sm:$0xff] %vm169_vm0, %v2338_v18  ;;  %v2337_v14 = vsel %vm2273_vm13, %v2171_v33, %v2305_v41  ;;  %v2181_v44 = vadd.f32 %v8928_v58, %v2180_v4  ;;  %2541 = vrot.lane.b32.xlu1 %v9042_v43, %s7619_s29  ;;  %v9048_v11 = vld [vmem:[#allocation2 + $0x91] sm:$0xff] }
 0x365   : > { %v9050_v50 = vld [vmem:[#allocation2 + $0x98] sm:$0xff]  ;;  %2369 = vst.msk [vmem:[#allocation2 + $0xc1] sm:$0xff] %vm169_vm0, %v2337_v14  ;;  %vm2276_vm14 = vcmp.gt.f32.partialorder %v2186_v42, 0.0  ;;  %v2308_v53 = vmul.f32 0.2, %v2186_v42  ;;  %2539 = vrot.lane.b32.xlu0 %v9048_v11, %s7619_s29  ;;  %v9057_v63 = vld [vmem:[#allocation2 + $0x90] sm:$0xff] }
 0x366   : > { %2432 = vst.msk [vmem:[#allocation3 + $0x68] sm:$0xff] %vm169_vm0, %v9050_v50  ;;  %vm2275_vm15 = vcmp.gt.f32.partialorder %v2181_v44, 0.0  ;;  %v2307_v34 = vmul.f32 0.2, %v2181_v44  ;;  %v7333_v27 = vpop.f32.mrb[2].mxu1  ;;  %2431 = vst.msk [vmem:[#allocation3 + $0x60] sm:$0xff] %vm169_vm0, %v9057_v63 }
 0x367   : > { %v2340_v31 = vsel %vm2276_vm14, %v2186_v42, %v2308_v53  ;;  %v2196_v23 = vadd.f32 %v7333_v27, %v8928_v58  ;;  %v2190_v19 = vpop.f32.mrb[3].mxu1  ;;  %v9062_v20 = vld [vmem:[#allocation2 + $0xb1] sm:$0xff] }
 0x368   : > { %2372 = vst.msk [vmem:[#allocation2 + $0xe1] sm:$0xff] %vm169_vm0, %v2340_v31  ;;  %v2339_v16 = vsel %vm2275_vm15, %v2181_v44, %v2307_v34  ;;  %v2191_v2 = vadd.f32 %v8928_v58, %v2190_v19  ;;  %2545 = vrot.lane.b32.xlu1 %v9062_v20, %s7619_s29  ;;  %v9068_v12 = vld [vmem:[#allocation2 + $0xa9] sm:$0xff] }
 0x369   : > { %v9070_v25 = vld [vmem:[#allocation2 + $0xb0] sm:$0xff]  ;;  %2371 = vst.msk [vmem:[#allocation2 + $0xd9] sm:$0xff] %vm169_vm0, %v2339_v16  ;;  %vm2278_vm1 = vcmp.gt.f32.partialorder %v2196_v23, 0.0  ;;  %v2310_v46 = vmul.f32 0.2, %v2196_v23  ;;  %2543 = vrot.lane.b32.xlu0 %v9068_v12, %s7619_s29  ;;  %v9077_v5 = vld [vmem:[#allocation2 + $0xa8] sm:$0xff] }
 0x36a   : > { %2434 = vst.msk [vmem:[#allocation3 + $0x78] sm:$0xff] %vm169_vm0, %v9070_v25  ;;  %vm2277_vm2 = vcmp.gt.f32.partialorder %v2191_v2, 0.0  ;;  %v2309_v6 = vmul.f32 0.2, %v2191_v2  ;;  %v7336_v32 = vpop.f32.mrb[4].mxu1  ;;  %2433 = vst.msk [vmem:[#allocation3 + $0x70] sm:$0xff] %vm169_vm0, %v9077_v5 }
 0x36b   : > { %v2342_v9 = vsel %vm2278_vm1, %v2196_v23, %v2310_v46  ;;  %v2206_v40 = vadd.f32 %v7336_v32, %v8928_v58  ;;  %v2200_v54 = vpop.f32.mrb[5].mxu1  ;;  %v9082_v52 = vld [vmem:[#allocation2 + $0xc9] sm:$0xff] }
 0x36c   : > { %2374 = vst.msk [vmem:[#allocation2 + $0xf9] sm:$0xff] %vm169_vm0, %v2342_v9  ;;  %v2341_v57 = vsel %vm2277_vm2, %v2191_v2, %v2309_v6  ;;  %v2201_v55 = vadd.f32 %v8928_v58, %v2200_v54  ;;  %2549 = vrot.lane.b32.xlu1 %v9082_v52, %s7619_s29  ;;  %v9088_v61 = vld [vmem:[#allocation2 + $0xc1] sm:$0xff] }
 0x36d   : > { %v9090_v60 = vld [vmem:[#allocation2 + $0xc8] sm:$0xff]  ;;  %2373 = vst.msk [vmem:[#allocation2 + $0xf1] sm:$0xff] %vm169_vm0, %v2341_v57  ;;  %vm2280_vm13 = vcmp.gt.f32.partialorder %v2206_v40, 0.0  ;;  %v2312_v8 = vmul.f32 0.2, %v2206_v40  ;;  %2547 = vrot.lane.b32.xlu0 %v9088_v61, %s7619_s29  ;;  %v9097_v48 = vld [vmem:[#allocation2 + $0xc0] sm:$0xff] }
 0x36e   : > { %2436 = vst.msk [vmem:[#allocation3 + $0x88] sm:$0xff] %vm169_vm0, %v9090_v60  ;;  %vm2279_vm14 = vcmp.gt.f32.partialorder %v2201_v55, 0.0  ;;  %v2311_v45 = vmul.f32 0.2, %v2201_v55  ;;  %v7339_v38 = vpop.f32.mrb[6].mxu1  ;;  %2435 = vst.msk [vmem:[#allocation3 + $0x80] sm:$0xff] %vm169_vm0, %v9097_v48 }
 0x36f   : > { %v2344_v37 = vsel %vm2280_vm13, %v2206_v40, %v2312_v8  ;;  %v2216_v36 = vadd.f32 %v7339_v38, %v8928_v58  ;;  %v2210_v28 = vpop.f32.mrb[7].mxu1  ;;  %v9102_v33 = vld [vmem:[#allocation2 + $0xe1] sm:$0xff] }
 0x370   : > { %2376 = vst.msk [vmem:[#allocation2 + $0x111] sm:$0xff] %vm169_vm0, %v2344_v37  ;;  %v2343_v17 = vsel %vm2279_vm14, %v2201_v55, %v2311_v45  ;;  %v2211_v41 = vadd.f32 %v8928_v58, %v2210_v28  ;;  %2553 = vrot.lane.b32.xlu1 %v9102_v33, %s7619_s29  ;;  %v9108_v13 = vld [vmem:[#allocation2 + $0xd9] sm:$0xff] }
 0x371   : > { %v9110_v18 = vld [vmem:[#allocation2 + $0xe0] sm:$0xff]  ;;  %2375 = vst.msk [vmem:[#allocation2 + $0x109] sm:$0xff] %vm169_vm0, %v2343_v17  ;;  %vm2282_vm15 = vcmp.gt.f32.partialorder %v2216_v36, 0.0  ;;  %v2314_v42 = vmul.f32 0.2, %v2216_v36  ;;  %2551 = vrot.lane.b32.xlu0 %v9108_v13, %s7619_s29  ;;  %v9117_v4 = vld [vmem:[#allocation2 + $0xd8] sm:$0xff] }
 0x372   : > { %2438 = vst.msk [vmem:[#allocation3 + $0x98] sm:$0xff] %vm169_vm0, %v9110_v18  ;;  %vm2281_vm1 = vcmp.gt.f32.partialorder %v2211_v41, 0.0  ;;  %v2313_v14 = vmul.f32 0.2, %v2211_v41  ;;  %v7342_v44 = vpop.f32.mrb[8].mxu1  ;;  %2437 = vst.msk [vmem:[#allocation3 + $0x90] sm:$0xff] %vm169_vm0, %v9117_v4 }
 0x373   : > { %v2346_v53 = vsel %vm2282_vm15, %v2216_v36, %v2314_v42  ;;  %v2226_v34 = vadd.f32 %v7342_v44, %v8928_v58  ;;  %v2220_v27 = vpop.f32.mrb[9].mxu1  ;;  %v9122_v31 = vld [vmem:[#allocation2 + $0xf9] sm:$0xff] }
 0x374   : > { %2378 = vst.msk [vmem:[#allocation2 + $0x129] sm:$0xff] %vm169_vm0, %v2346_v53  ;;  %v2345_v23 = vsel %vm2281_vm1, %v2211_v41, %v2313_v14  ;;  %v2221_v19 = vadd.f32 %v8928_v58, %v2220_v27  ;;  %2557 = vrot.lane.b32.xlu1 %v9122_v31, %s7619_s29  ;;  %v9128_v16 = vld [vmem:[#allocation2 + $0xf1] sm:$0xff] }
 0x375   : > { %v9130_v2 = vld [vmem:[#allocation2 + $0xf8] sm:$0xff]  ;;  %2377 = vst.msk [vmem:[#allocation2 + $0x121] sm:$0xff] %vm169_vm0, %v2345_v23  ;;  %vm2284_vm2 = vcmp.gt.f32.partialorder %v2226_v34, 0.0  ;;  %v2316_v46 = vmul.f32 0.2, %v2226_v34  ;;  %2555 = vrot.lane.b32.xlu0 %v9128_v16, %s7619_s29  ;;  %v9137_v6 = vld [vmem:[#allocation2 + $0xf0] sm:$0xff] }
 0x376   : > { %2440 = vst.msk [vmem:[#allocation3 + $0xa8] sm:$0xff] %vm169_vm0, %v9130_v2  ;;  %vm2283_vm13 = vcmp.gt.f32.partialorder %v2221_v19, 0.0  ;;  %v2315_v32 = vmul.f32 0.2, %v2221_v19  ;;  %v7345_v9 = vpop.f32.mrb[10].mxu1  ;;  %2439 = vst.msk [vmem:[#allocation3 + $0xa0] sm:$0xff] %vm169_vm0, %v9137_v6 }
 0x377   : > { %v2348_v40 = vsel %vm2284_vm2, %v2226_v34, %v2316_v46  ;;  %v2236_v54 = vadd.f32 %v7345_v9, %v8928_v58  ;;  %v2230_v57 = vpop.f32.mrb[11].mxu1  ;;  %v9142_v55 = vld [vmem:[#allocation2 + $0x111] sm:$0xff] }
 0x378   : > { %2380 = vst.msk [vmem:[#allocation2 + $0x141] sm:$0xff] %vm169_vm0, %v2348_v40  ;;  %v2347_v8 = vsel %vm2283_vm13, %v2221_v19, %v2315_v32  ;;  %v2231_v45 = vadd.f32 %v8928_v58, %v2230_v57  ;;  %2561 = vrot.lane.b32.xlu1 %v9142_v55, %s7619_s29  ;;  %v9148_v38 = vld [vmem:[#allocation2 + $0x109] sm:$0xff] }
 0x379   : > { %v9150_v37 = vld [vmem:[#allocation2 + $0x110] sm:$0xff]  ;;  %2379 = vst.msk [vmem:[#allocation2 + $0x139] sm:$0xff] %vm169_vm0, %v2347_v8  ;;  %vm2286_vm14 = vcmp.gt.f32.partialorder %v2236_v54, 0.0  ;;  %v2318_v36 = vmul.f32 0.2, %v2236_v54  ;;  %2559 = vrot.lane.b32.xlu0 %v9148_v38, %s7619_s29  ;;  %v9157_v28 = vld [vmem:[#allocation2 + $0x108] sm:$0xff] }
 0x37a   : > { %2442 = vst.msk [vmem:[#allocation3 + $0xb8] sm:$0xff] %vm169_vm0, %v9150_v37  ;;  %vm2285_vm15 = vcmp.gt.f32.partialorder %v2231_v45, 0.0  ;;  %v2317_v17 = vmul.f32 0.2, %v2231_v45  ;;  %v7348_v41 = vpop.f32.mrb[12].mxu1  ;;  %2441 = vst.msk [vmem:[#allocation3 + $0xb0] sm:$0xff] %vm169_vm0, %v9157_v28 }
 0x37b   : > { %v2350_v42 = vsel %vm2286_vm14, %v2236_v54, %v2318_v36  ;;  %v2246_v14 = vadd.f32 %v7348_v41, %v8928_v58  ;;  %v2240_v44 = vpop.f32.mrb[13].mxu1  ;;  %v9162_v53 = vld [vmem:[#allocation2 + $0x129] sm:$0xff] }
 0x37c   : > { %2382 = vst.msk [vmem:[#allocation2 + $0x159] sm:$0xff] %vm169_vm0, %v2350_v42  ;;  %v2349_v34 = vsel %vm2285_vm15, %v2231_v45, %v2317_v17  ;;  %v2241_v27 = vadd.f32 %v8928_v58, %v2240_v44  ;;  %2565 = vrot.lane.b32.xlu1 %v9162_v53, %s7619_s29  ;;  %v9168_v23 = vld [vmem:[#allocation2 + $0x121] sm:$0xff] }
 0x37d   : > { %v9170_v19 = vld [vmem:[#allocation2 + $0x128] sm:$0xff]  ;;  %2381 = vst.msk [vmem:[#allocation2 + $0x151] sm:$0xff] %vm169_vm0, %v2349_v34  ;;  %vm2288_vm1 = vcmp.gt.f32.partialorder %v2246_v14, 0.0  ;;  %v2320_v46 = vmul.f32 0.2, %v2246_v14  ;;  %2563 = vrot.lane.b32.xlu0 %v9168_v23, %s7619_s29  ;;  %v9177_v32 = vld [vmem:[#allocation2 + $0x120] sm:$0xff] }
 0x37e   : > { %2444 = vst.msk [vmem:[#allocation3 + $0xc8] sm:$0xff] %vm169_vm0, %v9170_v19  ;;  %vm2287_vm2 = vcmp.gt.f32.partialorder %v2241_v27, 0.0  ;;  %v2319_v9 = vmul.f32 0.2, %v2241_v27  ;;  %2443 = vst.msk [vmem:[#allocation3 + $0xc0] sm:$0xff] %vm169_vm0, %v9177_v32  ;;  %v7351_v40 = vpop.f32.mrb[14].mxu1 }
 0x37f   : > { %v2352_v54 = vsel %vm2288_vm1, %v2246_v14, %v2320_v46  ;;  %v9181_v57 = vld [vmem:[#allocation2 + $0x141] sm:$0xff]  ;;  %v2256_v8 = vadd.f32 %v7351_v40, %v8928_v58  ;;  %v2250_v45 = vpop.f32.mrb[15].mxu1 }
 0x380   : > { %2384 = vst.msk [vmem:[#allocation2 + $0x171] sm:$0xff] %vm169_vm0, %v2352_v54  ;;  %v2351_v36 = vsel %vm2287_vm2, %v2241_v27, %v2319_v9  ;;  %2569 = vrot.lane.b32.xlu1 %v9181_v57, %s7619_s29  ;;  %v9187_v17 = vld [vmem:[#allocation2 + $0x139] sm:$0xff]  ;;  %v2251_v42 = vadd.f32 %v8928_v58, %v2250_v45 }
 0x381   : > { %v9189_v41 = vld [vmem:[#allocation2 + $0x140] sm:$0xff]  ;;  %2383 = vst.msk [vmem:[#allocation2 + $0x169] sm:$0xff] %vm169_vm0, %v2351_v36  ;;  %2567 = vrot.lane.b32.xlu0 %v9187_v17, %s7619_s29  ;;  %v9197_v14 = vld [vmem:[#allocation2 + $0x138] sm:$0xff]  ;;  %vm2290_vm13 = vcmp.gt.f32.partialorder %v2256_v8, 0.0  ;;  %v2322_v44 = vmul.f32 0.2, %v2256_v8 }
 0x382   : > { %2446 = vst.msk [vmem:[#allocation3 + $0xd8] sm:$0xff] %vm169_vm0, %v9189_v41  ;;  %2445 = vst.msk [vmem:[#allocation3 + $0xd0] sm:$0xff] %vm169_vm0, %v9197_v14  ;;  %vm2289_vm14 = vcmp.gt.f32.partialorder %v2251_v42, 0.0  ;;  %v2321_v34 = vmul.f32 0.2, %v2251_v42 }
 0x383   : > { %v9201_v27 = vld [vmem:[#allocation2 + $0x159] sm:$0xff]  ;;  %v2354_v58 = vsel %vm2290_vm13, %v2256_v8, %v2322_v44 }
 0x384   : > { %2573 = vrot.lane.b32.xlu1 %v9201_v27, %s7619_s29  ;;  %v9205_v46 = vld [vmem:[#allocation2 + $0x151] sm:$0xff]  ;;  %2386 = vst.msk [vmem:[#allocation2 + $0x189] sm:$0xff] %vm169_vm0, %v2354_v58  ;;  %v2353_v40 = vsel %vm2289_vm14, %v2251_v42, %v2321_v34  ;;  %v2643_v34 = vld [vmem:[#allocation2 + $0x2] sm:$0xff] }
 0x385   : > { %11633 = vst [vmem:[#allocation37_spill] sm:$0xff] %v9205_v46  ;;  %v9207_v9 = vld [vmem:[#allocation2 + $0x158] sm:$0xff]  ;;  %2571 = vrot.lane.b32.xlu0 %v9205_v46, %s7619_s29  ;;  %v9214_v54 = vld [vmem:[#allocation2 + $0x150] sm:$0xff]  ;;  %2385 = vst.msk [vmem:[#allocation2 + $0x181] sm:$0xff] %vm169_vm0, %v2353_v40 }
 0x386   : > { %2448 = vst.msk [vmem:[#allocation3 + $0xe8] sm:$0xff] %vm169_vm0, %v9207_v9  ;;  %2447 = vst.msk [vmem:[#allocation3 + $0xe0] sm:$0xff] %vm169_vm0, %v9214_v54  ;;  %v2644_v42 = vld [vmem:[#allocation2 + $0xa] sm:$0xff]  ;;  %v9237_v58 = vld [vmem:[#allocation2 + $0x22] sm:$0xff] }
 0x387   : > { %v9219_v8 = vld [vmem:[#allocation2 + $0x171] sm:$0xff]  ;;  %11636 = vst [vmem:[#allocation42_spill] sm:$0xff] %v9237_v58  ;;  %v9241_v40 = vld [vmem:[#allocation2 + $0x1a] sm:$0xff] }
 0x388   : > { %11634 = vst [vmem:[#allocation39_spill] sm:$0xff] %v9219_v8  ;;  %2577 = vrot.lane.b32.xlu1 %v9219_v8, %s7619_s29  ;;  %v9223_v45 = vld [vmem:[#allocation2 + $0x169] sm:$0xff]  ;;  %11637 = vst [vmem:[#allocation43_spill] sm:$0xff] %v9241_v40  ;;  %v9249_v8 = vld [vmem:[#allocation2 + $0x32] sm:$0xff] }
 0x389   : > { %11635 = vst [vmem:[#allocation41_spill] sm:$0xff] %v9223_v45  ;;  %v9225_v36 = vld [vmem:[#allocation2 + $0x170] sm:$0xff]  ;;  %2575 = vrot.lane.b32.xlu0 %v9223_v45, %s7619_s29  ;;  %v9231_v44 = vld [vmem:[#allocation2 + $0x168] sm:$0xff]  ;;  %v9245_v45 = vld [vmem:[#allocation2 + $0x3a] sm:$0xff] }
 0x38a   : > { %2450 = vst.msk [vmem:[#allocation3 + $0xf8] sm:$0xff] %vm169_vm0, %v9225_v36  ;;  %2449 = vst.msk [vmem:[#allocation3 + $0xf0] sm:$0xff] %vm169_vm0, %v9231_v44  ;;  %v9352_v46 = vld [vmem:[#allocation2 + $0x172] sm:$0xff] }
 0x38b   : > { %11638 = vst [vmem:[#allocation44_spill] sm:$0xff] %v9245_v45  ;;  %11639 = vst [vmem:[#allocation45_spill] sm:$0xff] %v9249_v8 }
 0x38c   : > { %2709 = vrot.lane.b32.xlu1 %v2644_v42, %s7620_s30  ;;  %v9253_v42 = vld [vmem:[#allocation2 + $0x52] sm:$0xff] }
 0x38d   : > { %2707 = vrot.lane.b32.xlu0 %v2643_v34, %s7620_s30  ;;  %11640 = vst [vmem:[#allocation46_spill] sm:$0xff] %v9253_v42  ;;  %v9257_v34 = vld [vmem:[#allocation2 + $0x4a] sm:$0xff] }
 0x38e   : > { %11641 = vst [vmem:[#allocation47_spill] sm:$0xff] %v9257_v34 }
 0x390   : > { %2713 = vrot.lane.b32.xlu1 %v9237_v58, %s7620_s30 }
 0x391   : > { %2711 = vrot.lane.b32.xlu0 %v9241_v40, %s7620_s30  ;;  %v9261_v40 = vld [vmem:[#allocation2 + $0x6a] sm:$0xff] }
 0x392   : > { %11642 = vst [vmem:[#allocation48_spill] sm:$0xff] %v9261_v40 }
 0x394   : > { %2717 = vrot.lane.b32.xlu1 %v9245_v45, %s7620_s30  ;;  %v9265_v45 = vld [vmem:[#allocation2 + $0x62] sm:$0xff] }
 0x395   : > { %2715 = vrot.lane.b32.xlu0 %v9249_v8, %s7620_s30  ;;  %11643 = vst [vmem:[#allocation49_spill] sm:$0xff] %v9265_v45  ;;  %v9269_v8 = vld [vmem:[#allocation2 + $0x82] sm:$0xff] }
 0x396   : > { %11644 = vst [vmem:[#allocation50_spill] sm:$0xff] %v9269_v8 }
 0x398   : > { %2721 = vrot.lane.b32.xlu1 %v9253_v42, %s7620_s30  ;;  %v9273_v42 = vld [vmem:[#allocation2 + $0x7a] sm:$0xff] }
 0x399   : > { %2719 = vrot.lane.b32.xlu0 %v9257_v34, %s7620_s30  ;;  %11645 = vst [vmem:[#allocation51_spill] sm:$0xff] %v9273_v42  ;;  %v9277_v34 = vld [vmem:[#allocation2 + $0x9a] sm:$0xff] }
 0x39a   : > { %11646 = vst [vmem:[#allocation52_spill] sm:$0xff] %v9277_v34 }
 0x39c   : > { %2725 = vrot.lane.b32.xlu1 %v9261_v40, %s7620_s30  ;;  %v9281_v40 = vld [vmem:[#allocation2 + $0x92] sm:$0xff] }
 0x39d   : > { %2723 = vrot.lane.b32.xlu0 %v9265_v45, %s7620_s30  ;;  %11647 = vst [vmem:[#allocation53_spill] sm:$0xff] %v9281_v40  ;;  %v9285_v45 = vld [vmem:[#allocation2 + $0xb2] sm:$0xff] }
 0x39e   : > { %11648 = vst [vmem:[#allocation54_spill] sm:$0xff] %v9285_v45 }
 0x3a0   : > { %2729 = vrot.lane.b32.xlu1 %v9269_v8, %s7620_s30  ;;  %v9289_v8 = vld [vmem:[#allocation2 + $0xaa] sm:$0xff] }
 0x3a1   : > { %2727 = vrot.lane.b32.xlu0 %v9273_v42, %s7620_s30  ;;  %11649 = vst [vmem:[#allocation55_spill] sm:$0xff] %v9289_v8  ;;  %v9293_v42 = vld [vmem:[#allocation2 + $0xca] sm:$0xff] }
 0x3a2   : > { %11650 = vst [vmem:[#allocation56_spill] sm:$0xff] %v9293_v42 }
 0x3a4   : > { %2733 = vrot.lane.b32.xlu1 %v9277_v34, %s7620_s30  ;;  %v9297_v34 = vld [vmem:[#allocation2 + $0xc2] sm:$0xff] }
 0x3a5   : > { %2731 = vrot.lane.b32.xlu0 %v9281_v40, %s7620_s30  ;;  %11651 = vst [vmem:[#allocation57_spill] sm:$0xff] %v9297_v34  ;;  %v9301_v40 = vld [vmem:[#allocation2 + $0xe2] sm:$0xff] }
 0x3a6   : > { %11652 = vst [vmem:[#allocation58_spill] sm:$0xff] %v9301_v40 }
 0x3a8   : > { %2737 = vrot.lane.b32.xlu1 %v9285_v45, %s7620_s30  ;;  %v9305_v45 = vld [vmem:[#allocation2 + $0xda] sm:$0xff] }
 0x3a9   : > { %2735 = vrot.lane.b32.xlu0 %v9289_v8, %s7620_s30  ;;  %11653 = vst [vmem:[#allocation59_spill] sm:$0xff] %v9305_v45  ;;  %v9309_v8 = vld [vmem:[#allocation2 + $0xfa] sm:$0xff] }
 0x3aa   : > { %11654 = vst [vmem:[#allocation60_spill] sm:$0xff] %v9309_v8 }
 0x3ac   : > { %2741 = vrot.lane.b32.xlu1 %v9293_v42, %s7620_s30  ;;  %v9313_v42 = vld [vmem:[#allocation2 + $0xf2] sm:$0xff] }
 0x3ad   : > { %2739 = vrot.lane.b32.xlu0 %v9297_v34, %s7620_s30  ;;  %11655 = vst [vmem:[#allocation61_spill] sm:$0xff] %v9313_v42  ;;  %v9317_v34 = vld [vmem:[#allocation2 + $0x112] sm:$0xff] }
 0x3ae   : > { %11656 = vst [vmem:[#allocation62_spill] sm:$0xff] %v9317_v34 }
 0x3b0   : > { %2745 = vrot.lane.b32.xlu1 %v9301_v40, %s7620_s30  ;;  %v9321_v40 = vld [vmem:[#allocation2 + $0x10a] sm:$0xff] }
 0x3b1   : > { %2743 = vrot.lane.b32.xlu0 %v9305_v45, %s7620_s30  ;;  %11657 = vst [vmem:[#allocation63_spill] sm:$0xff] %v9321_v40  ;;  %v9325_v45 = vld [vmem:[#allocation2 + $0x12a] sm:$0xff] }
 0x3b2   : > { %11658 = vst [vmem:[#allocation64_spill] sm:$0xff] %v9325_v45 }
 0x3b4   : > { %2749 = vrot.lane.b32.xlu1 %v9309_v8, %s7620_s30  ;;  %v9329_v8 = vld [vmem:[#allocation2 + $0x122] sm:$0xff] }
 0x3b5   : > { %2747 = vrot.lane.b32.xlu0 %v9313_v42, %s7620_s30  ;;  %11659 = vst [vmem:[#allocation65_spill] sm:$0xff] %v9329_v8  ;;  %v9333_v42 = vld [vmem:[#allocation2 + $0x142] sm:$0xff] }
 0x3b6   : > { %11660 = vst [vmem:[#allocation66_spill] sm:$0xff] %v9333_v42 }
 0x3b8   : > { %2753 = vrot.lane.b32.xlu1 %v9317_v34, %s7620_s30  ;;  %v9337_v34 = vld [vmem:[#allocation2 + $0x13a] sm:$0xff] }
 0x3b9   : > { %2751 = vrot.lane.b32.xlu0 %v9321_v40, %s7620_s30  ;;  %11661 = vst [vmem:[#allocation67_spill] sm:$0xff] %v9337_v34 }
 0x3bc   : > { %2757 = vrot.lane.b32.xlu1 %v9325_v45, %s7620_s30  ;;  %v9342_v45 = vld [vmem:[#allocation2 + $0x15a] sm:$0xff] }
 0x3bd   : > { %2755 = vrot.lane.b32.xlu0 %v9329_v8, %s7620_s30  ;;  %v9347_v8 = vld [vmem:[#allocation2 + $0x152] sm:$0xff] }
 0x3be   : > { %11662 = vst [vmem:[#allocation68_spill] sm:$0xff] %v9347_v8 }
 0x3c0   : > { %2761 = vrot.lane.b32.xlu1 %v9333_v42, %s7620_s30 }
 0x3c1   : > { %2759 = vrot.lane.b32.xlu0 %v9337_v34, %s7620_s30 }
 0x3c2   : > { %v2522_v40 = vpop.permute.xlu1 %2521 }
 0x3c3   : > { %2614 = vst.msk [vmem:[#allocation3 + $0x18] sm:$0xff] %vm504_vm3, %v2522_v40  ;;  %v2520_v58 = vpop.permute.xlu0 %2519 }
 0x3c4   : > { %2613 = vst.msk [vmem:[#allocation3 + $0x10] sm:$0xff] %vm504_vm3, %v2520_v58  ;;  %2765 = vrot.lane.b32.xlu1 %v9342_v45, %s7620_s30  ;;  %v9357_v58 = vld [vmem:[#allocation2 + $0x16a] sm:$0xff] }
 0x3c5   : > { %2763 = vrot.lane.b32.xlu0 %v9347_v8, %s7620_s30 }
 0x3c6   : > { %v2526_v42 = vpop.permute.xlu1 %2525 }
 0x3c7   : > { %2616 = vst.msk [vmem:[#allocation3 + $0x28] sm:$0xff] %vm504_vm3, %v2526_v42  ;;  %v2524_v34 = vpop.permute.xlu0 %2523 }
 0x3c8   : > { %2615 = vst.msk [vmem:[#allocation3 + $0x20] sm:$0xff] %vm504_vm3, %v2524_v34  ;;  %2769 = vrot.lane.b32.xlu1 %v9352_v46, %s7620_s30 }
 0x3c9   : > { %2767 = vrot.lane.b32.xlu0 %v9357_v58, %s7620_s30 }
 0x3ca   : > { %v2530_v40 = vpop.permute.xlu1 %2529 }
 0x3cb   : > { %2618 = vst.msk [vmem:[#allocation3 + $0x38] sm:$0xff] %vm504_vm3, %v2530_v40  ;;  %v2528_v8 = vpop.permute.xlu0 %2527 }
 0x3cc   : > { %2617 = vst.msk [vmem:[#allocation3 + $0x30] sm:$0xff] %vm504_vm3, %v2528_v8  ;;  %2901 = vrot.lane.b32.xlu1 %v8950_v26, %s7621_s4 }
 0x3cd   : > { %2899 = vrot.lane.b32.xlu0 %v8957_v56, %s7621_s4 }
 0x3ce   : > { %v2534_v42 = vpop.permute.xlu1 %2533 }
 0x3cf   : > { %2620 = vst.msk [vmem:[#allocation3 + $0x48] sm:$0xff] %vm504_vm3, %v2534_v42  ;;  %v2532_v34 = vpop.permute.xlu0 %2531 }
 0x3d0   : > { %2619 = vst.msk [vmem:[#allocation3 + $0x40] sm:$0xff] %vm504_vm3, %v2532_v34  ;;  %2905 = vrot.lane.b32.xlu1 %v8970_v10, %s7621_s4 }
 0x3d1   : > { %2903 = vrot.lane.b32.xlu0 %v8977_v49, %s7621_s4 }
 0x3d2   : > { %v2538_v40 = vpop.permute.xlu1 %2537 }
 0x3d3   : > { %2622 = vst.msk [vmem:[#allocation3 + $0x58] sm:$0xff] %vm504_vm3, %v2538_v40  ;;  %v2536_v8 = vpop.permute.xlu0 %2535 }
 0x3d4   : > { %2621 = vst.msk [vmem:[#allocation3 + $0x50] sm:$0xff] %vm504_vm3, %v2536_v8  ;;  %2909 = vrot.lane.b32.xlu1 %v8990_v39, %s7621_s4 }
 0x3d5   : > { %2907 = vrot.lane.b32.xlu0 %v8997_v51, %s7621_s4 }
 0x3d6   : > { %v2542_v26 = vpop.permute.xlu1 %2541 }
 0x3d7   : > { %2624 = vst.msk [vmem:[#allocation3 + $0x68] sm:$0xff] %vm504_vm3, %v2542_v26  ;;  %v2540_v56 = vpop.permute.xlu0 %2539 }
 0x3d8   : > { %2623 = vst.msk [vmem:[#allocation3 + $0x60] sm:$0xff] %vm504_vm3, %v2540_v56  ;;  %2913 = vrot.lane.b32.xlu1 %v9010_v62, %s7621_s4 }
 0x3d9   : > { %2911 = vrot.lane.b32.xlu0 %v9017_v7, %s7621_s4 }
 0x3da   : > { %v2546_v42 = vpop.permute.xlu1 %2545 }
 0x3db   : > { %2626 = vst.msk [vmem:[#allocation3 + $0x78] sm:$0xff] %vm504_vm3, %v2546_v42  ;;  %v2544_v34 = vpop.permute.xlu0 %2543 }
 0x3dc   : > { %2625 = vst.msk [vmem:[#allocation3 + $0x70] sm:$0xff] %vm504_vm3, %v2544_v34  ;;  %2917 = vrot.lane.b32.xlu1 %v9030_v29, %s7621_s4 }
 0x3dd   : > { %2915 = vrot.lane.b32.xlu0 %v9037_v22, %s7621_s4 }
 0x3de   : > { %v2550_v40 = vpop.permute.xlu1 %2549 }
 0x3df   : > { %2628 = vst.msk [vmem:[#allocation3 + $0x88] sm:$0xff] %vm504_vm3, %v2550_v40  ;;  %v2548_v8 = vpop.permute.xlu0 %2547 }
 0x3e0   : > { %2627 = vst.msk [vmem:[#allocation3 + $0x80] sm:$0xff] %vm504_vm3, %v2548_v8  ;;  %2921 = vrot.lane.b32.xlu1 %v9050_v50, %s7621_s4 }
 0x3e1   : > { %2919 = vrot.lane.b32.xlu0 %v9057_v63, %s7621_s4 }
 0x3e2   : > { %v2554_v26 = vpop.permute.xlu1 %2553 }
 0x3e3   : > { %2630 = vst.msk [vmem:[#allocation3 + $0x98] sm:$0xff] %vm504_vm3, %v2554_v26  ;;  %v2552_v56 = vpop.permute.xlu0 %2551 }
 0x3e4   : > { %2629 = vst.msk [vmem:[#allocation3 + $0x90] sm:$0xff] %vm504_vm3, %v2552_v56  ;;  %2925 = vrot.lane.b32.xlu1 %v9070_v25, %s7621_s4 }
 0x3e5   : > { %2923 = vrot.lane.b32.xlu0 %v9077_v5, %s7621_s4 }
 0x3e6   : > { %v2558_v42 = vpop.permute.xlu1 %2557 }
 0x3e7   : > { %2632 = vst.msk [vmem:[#allocation3 + $0xa8] sm:$0xff] %vm504_vm3, %v2558_v42  ;;  %v2556_v34 = vpop.permute.xlu0 %2555 }
 0x3e8   : > { %2631 = vst.msk [vmem:[#allocation3 + $0xa0] sm:$0xff] %vm504_vm3, %v2556_v34  ;;  %2929 = vrot.lane.b32.xlu1 %v9090_v60, %s7621_s4 }
 0x3e9   : > { %2927 = vrot.lane.b32.xlu0 %v9097_v48, %s7621_s4 }
 0x3ea   : > { %v2562_v40 = vpop.permute.xlu1 %2561 }
 0x3eb   : > { %2634 = vst.msk [vmem:[#allocation3 + $0xb8] sm:$0xff] %vm504_vm3, %v2562_v40  ;;  %v2560_v8 = vpop.permute.xlu0 %2559 }
 0x3ec   : > { %2633 = vst.msk [vmem:[#allocation3 + $0xb0] sm:$0xff] %vm504_vm3, %v2560_v8  ;;  %2933 = vrot.lane.b32.xlu1 %v9110_v18, %s7621_s4 }
 0x3ed   : > { %2931 = vrot.lane.b32.xlu0 %v9117_v4, %s7621_s4 }
 0x3ee   : > { %v2566_v26 = vpop.permute.xlu1 %2565 }
 0x3ef   : > { %2636 = vst.msk [vmem:[#allocation3 + $0xc8] sm:$0xff] %vm504_vm3, %v2566_v26  ;;  %v2564_v56 = vpop.permute.xlu0 %2563 }
 0x3f0   : > { %2635 = vst.msk [vmem:[#allocation3 + $0xc0] sm:$0xff] %vm504_vm3, %v2564_v56  ;;  %2937 = vrot.lane.b32.xlu1 %v9130_v2, %s7621_s4 }
 0x3f1   : > { %2935 = vrot.lane.b32.xlu0 %v9137_v6, %s7621_s4 }
 0x3f2   : > { %v2570_v42 = vpop.permute.xlu1 %2569 }
 0x3f3   : > { %2638 = vst.msk [vmem:[#allocation3 + $0xd8] sm:$0xff] %vm504_vm3, %v2570_v42  ;;  %v2568_v34 = vpop.permute.xlu0 %2567 }
 0x3f4   : > { %2637 = vst.msk [vmem:[#allocation3 + $0xd0] sm:$0xff] %vm504_vm3, %v2568_v34  ;;  %2941 = vrot.lane.b32.xlu1 %v9150_v37, %s7621_s4 }
 0x3f5   : > { %2939 = vrot.lane.b32.xlu0 %v9157_v28, %s7621_s4 }
 0x3f6   : > { %v2574_v40 = vpop.permute.xlu1 %2573 }
 0x3f7   : > { %2640 = vst.msk [vmem:[#allocation3 + $0xe8] sm:$0xff] %vm504_vm3, %v2574_v40  ;;  %v2572_v8 = vpop.permute.xlu0 %2571 }
 0x3f8   : > { %2639 = vst.msk [vmem:[#allocation3 + $0xe0] sm:$0xff] %vm504_vm3, %v2572_v8  ;;  %2945 = vrot.lane.b32.xlu1 %v9170_v19, %s7621_s4 }
 0x3f9   : > { %2943 = vrot.lane.b32.xlu0 %v9177_v32, %s7621_s4 }
 0x3fa   : > { %v2578_v26 = vpop.permute.xlu1 %2577 }
 0x3fb   : > { %2642 = vst.msk [vmem:[#allocation3 + $0xf8] sm:$0xff] %vm504_vm3, %v2578_v26  ;;  %v2576_v56 = vpop.permute.xlu0 %2575 }
 0x3fc   : > { %2641 = vst.msk [vmem:[#allocation3 + $0xf0] sm:$0xff] %vm504_vm3, %v2576_v56  ;;  %2949 = vrot.lane.b32.xlu1 %v9189_v41, %s7621_s4 }
 0x3fd   : > { %2947 = vrot.lane.b32.xlu0 %v9197_v14, %s7621_s4 }
 0x3fe   : > { %v2710_v42 = vpop.permute.xlu1 %2709 }
 0x3ff   : > { %2804 = vst.msk [vmem:[#allocation3 + $0x8] sm:$0xff] %vm11538_vm4, %v2710_v42  ;;  %v2708_v34 = vpop.permute.xlu0 %2707  ;;  %v9452_v42 = vld [vmem:[#allocation2 + $0x188] sm:$0xff] }
 0x400   : > { %2803 = vst.msk [vmem:[#allocation3] sm:$0xff] %vm11538_vm4, %v2708_v34  ;;  %2953 = vrot.lane.b32.xlu1 %v9207_v9, %s7621_s4  ;;  %v9457_v34 = vld [vmem:[#allocation2 + $0x180] sm:$0xff] }
 0x401   : > { %2951 = vrot.lane.b32.xlu0 %v9214_v54, %s7621_s4 }
 0x402   : > { %v2714_v40 = vpop.permute.xlu1 %2713 }
 0x403   : > { %2806 = vst.msk [vmem:[#allocation3 + $0x18] sm:$0xff] %vm11538_vm4, %v2714_v40  ;;  %v2712_v8 = vpop.permute.xlu0 %2711 }
 0x404   : > { %2805 = vst.msk [vmem:[#allocation3 + $0x10] sm:$0xff] %vm11538_vm4, %v2712_v8  ;;  %2957 = vrot.lane.b32.xlu1 %v9225_v36, %s7621_s4 }
 0x405   : > { %2955 = vrot.lane.b32.xlu0 %v9231_v44, %s7621_s4 }
 0x406   : > { %v2718_v26 = vpop.permute.xlu1 %2717 }
 0x407   : > { %2808 = vst.msk [vmem:[#allocation3 + $0x28] sm:$0xff] %vm11538_vm4, %v2718_v26  ;;  %v2716_v56 = vpop.permute.xlu0 %2715 }
 0x408   : > { %2807 = vst.msk [vmem:[#allocation3 + $0x20] sm:$0xff] %vm11538_vm4, %v2716_v56  ;;  %2961 = vrot.lane.b32.xlu1 %v9452_v42, %s7621_s4 }
 0x409   : > { %2959 = vrot.lane.b32.xlu0 %v9457_v34, %s7621_s4 }
 0x40a   : > { %v2722_v40 = vpop.permute.xlu1 %2721 }
 0x40b   : > { %2810 = vst.msk [vmem:[#allocation3 + $0x38] sm:$0xff] %vm11538_vm4, %v2722_v40  ;;  %v2720_v8 = vpop.permute.xlu0 %2719 }
 0x40c   : > { %2809 = vst.msk [vmem:[#allocation3 + $0x30] sm:$0xff] %vm11538_vm4, %v2720_v8  ;;  %3093 = vrot.lane.b32.xlu1 %v8942_v47, %s7622_s5 }
 0x40d   : > { %3091 = vrot.lane.b32.xlu0 %v8948_v1, %s7622_s5 }
 0x40e   : > { %v2726_v26 = vpop.permute.xlu1 %2725 }
 0x40f   : > { %2812 = vst.msk [vmem:[#allocation3 + $0x48] sm:$0xff] %vm11538_vm4, %v2726_v26  ;;  %v2724_v56 = vpop.permute.xlu0 %2723 }
 0x410   : > { %2811 = vst.msk [vmem:[#allocation3 + $0x40] sm:$0xff] %vm11538_vm4, %v2724_v56  ;;  %3097 = vrot.lane.b32.xlu1 %v8962_v24, %s7622_s5 }
 0x411   : > { %3095 = vrot.lane.b32.xlu0 %v8968_v15, %s7622_s5 }
 0x412   : > { %v2730_v40 = vpop.permute.xlu1 %2729 }
 0x413   : > { %2814 = vst.msk [vmem:[#allocation3 + $0x58] sm:$0xff] %vm11538_vm4, %v2730_v40  ;;  %v2728_v8 = vpop.permute.xlu0 %2727 }
 0x414   : > { %2813 = vst.msk [vmem:[#allocation3 + $0x50] sm:$0xff] %vm11538_vm4, %v2728_v8  ;;  %3101 = vrot.lane.b32.xlu1 %v8982_v30, %s7622_s5  ;;  %v9557_v8 = vld [vmem:[#allocation2 + $0x181] sm:$0xff] }
 0x415   : > { %3099 = vrot.lane.b32.xlu0 %v8988_v3, %s7622_s5 }
 0x416   : > { %v2734_v47 = vpop.permute.xlu1 %2733 }
 0x417   : > { %2816 = vst.msk [vmem:[#allocation3 + $0x68] sm:$0xff] %vm11538_vm4, %v2734_v47  ;;  %v2732_v1 = vpop.permute.xlu0 %2731 }
 0x418   : > { %2815 = vst.msk [vmem:[#allocation3 + $0x60] sm:$0xff] %vm11538_vm4, %v2732_v1  ;;  %3105 = vrot.lane.b32.xlu1 %v9002_v59, %s7622_s5 }
 0x419   : > { %3103 = vrot.lane.b32.xlu0 %v9008_v0, %s7622_s5 }
 0x41a   : > { %v2738_v24 = vpop.permute.xlu1 %2737 }
 0x41b   : > { %2818 = vst.msk [vmem:[#allocation3 + $0x78] sm:$0xff] %vm11538_vm4, %v2738_v24  ;;  %v2736_v15 = vpop.permute.xlu0 %2735  ;;  %v11666_v24 = vld [vmem:[#allocation42_spill] sm:$0xff] }
 0x41c   : > { %2817 = vst.msk [vmem:[#allocation3 + $0x70] sm:$0xff] %vm11538_vm4, %v2736_v15  ;;  %3109 = vrot.lane.b32.xlu1 %v9022_v35, %s7622_s5  ;;  %v11667_v15 = vld [vmem:[#allocation43_spill] sm:$0xff] }
 0x41d   : > { %3107 = vrot.lane.b32.xlu0 %v9028_v21, %s7622_s5 }
 0x41e   : > { %v2742_v30 = vpop.permute.xlu1 %2741 }
 0x41f   : > { %2820 = vst.msk [vmem:[#allocation3 + $0x88] sm:$0xff] %vm11538_vm4, %v2742_v30  ;;  %v2740_v3 = vpop.permute.xlu0 %2739 }
 0x420   : > { %2819 = vst.msk [vmem:[#allocation3 + $0x80] sm:$0xff] %vm11538_vm4, %v2740_v3  ;;  %3113 = vrot.lane.b32.xlu1 %v9042_v43, %s7622_s5 }
 0x421   : > { %3111 = vrot.lane.b32.xlu0 %v9048_v11, %s7622_s5 }
 0x422   : > { %v2746_v59 = vpop.permute.xlu1 %2745 }
 0x423   : > { %2822 = vst.msk [vmem:[#allocation3 + $0x98] sm:$0xff] %vm11538_vm4, %v2746_v59  ;;  %v2744_v0 = vpop.permute.xlu0 %2743  ;;  %v11668_v59 = vld [vmem:[#allocation44_spill] sm:$0xff] }
 0x424   : > { %2821 = vst.msk [vmem:[#allocation3 + $0x90] sm:$0xff] %vm11538_vm4, %v2744_v0  ;;  %3117 = vrot.lane.b32.xlu1 %v9062_v20, %s7622_s5  ;;  %v11669_v0 = vld [vmem:[#allocation45_spill] sm:$0xff] }
 0x425   : > { %3115 = vrot.lane.b32.xlu0 %v9068_v12, %s7622_s5 }
 0x426   : > { %v2750_v35 = vpop.permute.xlu1 %2749 }
 0x427   : > { %2824 = vst.msk [vmem:[#allocation3 + $0xa8] sm:$0xff] %vm11538_vm4, %v2750_v35  ;;  %v2748_v21 = vpop.permute.xlu0 %2747 }
 0x428   : > { %2823 = vst.msk [vmem:[#allocation3 + $0xa0] sm:$0xff] %vm11538_vm4, %v2748_v21  ;;  %3121 = vrot.lane.b32.xlu1 %v9082_v52, %s7622_s5 }
 0x429   : > { %3119 = vrot.lane.b32.xlu0 %v9088_v61, %s7622_s5 }
 0x42a   : > { %v2754_v43 = vpop.permute.xlu1 %2753 }
 0x42b   : > { %2826 = vst.msk [vmem:[#allocation3 + $0xb8] sm:$0xff] %vm11538_vm4, %v2754_v43  ;;  %v2752_v11 = vpop.permute.xlu0 %2751  ;;  %v11670_v43 = vld [vmem:[#allocation46_spill] sm:$0xff] }
 0x42c   : > { %2825 = vst.msk [vmem:[#allocation3 + $0xb0] sm:$0xff] %vm11538_vm4, %v2752_v11  ;;  %3125 = vrot.lane.b32.xlu1 %v9102_v33, %s7622_s5  ;;  %v11671_v11 = vld [vmem:[#allocation47_spill] sm:$0xff] }
 0x42d   : > { %3123 = vrot.lane.b32.xlu0 %v9108_v13, %s7622_s5 }
 0x42e   : > { %v2758_v20 = vpop.permute.xlu1 %2757 }
 0x42f   : > { %2828 = vst.msk [vmem:[#allocation3 + $0xc8] sm:$0xff] %vm11538_vm4, %v2758_v20  ;;  %v2756_v12 = vpop.permute.xlu0 %2755 }
 0x430   : > { %2827 = vst.msk [vmem:[#allocation3 + $0xc0] sm:$0xff] %vm11538_vm4, %v2756_v12  ;;  %3129 = vrot.lane.b32.xlu1 %v9122_v31, %s7622_s5 }
 0x431   : > { %3127 = vrot.lane.b32.xlu0 %v9128_v16, %s7622_s5 }
 0x432   : > { %v2762_v52 = vpop.permute.xlu1 %2761 }
 0x433   : > { %2830 = vst.msk [vmem:[#allocation3 + $0xd8] sm:$0xff] %vm11538_vm4, %v2762_v52  ;;  %v2760_v61 = vpop.permute.xlu0 %2759  ;;  %v11672_v52 = vld [vmem:[#allocation48_spill] sm:$0xff] }
 0x434   : > { %2829 = vst.msk [vmem:[#allocation3 + $0xd0] sm:$0xff] %vm11538_vm4, %v2760_v61  ;;  %3133 = vrot.lane.b32.xlu1 %v9142_v55, %s7622_s5  ;;  %v11673_v61 = vld [vmem:[#allocation49_spill] sm:$0xff] }
 0x435   : > { %3131 = vrot.lane.b32.xlu0 %v9148_v38, %s7622_s5 }
 0x436   : > { %v2766_v33 = vpop.permute.xlu1 %2765 }
 0x437   : > { %2832 = vst.msk [vmem:[#allocation3 + $0xe8] sm:$0xff] %vm11538_vm4, %v2766_v33  ;;  %v2764_v13 = vpop.permute.xlu0 %2763 }
 0x438   : > { %2831 = vst.msk [vmem:[#allocation3 + $0xe0] sm:$0xff] %vm11538_vm4, %v2764_v13  ;;  %3137 = vrot.lane.b32.xlu1 %v9162_v53, %s7622_s5  ;;  %v11663_v53 = vld [vmem:[#allocation37_spill] sm:$0xff] }
 0x439   : > { %3135 = vrot.lane.b32.xlu0 %v9168_v23, %s7622_s5 }
 0x43a   : > { %v2770_v31 = vpop.permute.xlu1 %2769 }
 0x43b   : > { %2834 = vst.msk [vmem:[#allocation3 + $0xf8] sm:$0xff] %vm11538_vm4, %v2770_v31  ;;  %v2768_v16 = vpop.permute.xlu0 %2767  ;;  %v11674_v31 = vld [vmem:[#allocation50_spill] sm:$0xff] }
 0x43c   : > { %2833 = vst.msk [vmem:[#allocation3 + $0xf0] sm:$0xff] %vm11538_vm4, %v2768_v16  ;;  %3141 = vrot.lane.b32.xlu1 %v9181_v57, %s7622_s5  ;;  %v11664_v57 = vld [vmem:[#allocation39_spill] sm:$0xff] }
 0x43d   : > { %3139 = vrot.lane.b32.xlu0 %v9187_v17, %s7622_s5  ;;  %v11665_v17 = vld [vmem:[#allocation41_spill] sm:$0xff]  ;;  %v11675_v16 = vld [vmem:[#allocation51_spill] sm:$0xff] }
 0x43e   : > { %v2902_v55 = vpop.permute.xlu1 %2901 }
 0x43f   : > { %2996 = vst.msk [vmem:[#allocation3 + $0x8] sm:$0xff] %vm890_vm5, %v2902_v55  ;;  %v2900_v38 = vpop.permute.xlu0 %2899 }
 0x440   : > { %2995 = vst.msk [vmem:[#allocation3] sm:$0xff] %vm890_vm5, %v2900_v38  ;;  %3145 = vrot.lane.b32.xlu1 %v9201_v27, %s7622_s5  ;;  %v9552_v27 = vld [vmem:[#allocation2 + $0x189] sm:$0xff] }
 0x441   : > { %3143 = vrot.lane.b32.xlu0 %v11663_v53, %s7622_s5  ;;  %v11676_v53 = vld [vmem:[#allocation52_spill] sm:$0xff] }
 0x442   : > { %v2906_v23 = vpop.permute.xlu1 %2905 }
 0x443   : > { %2998 = vst.msk [vmem:[#allocation3 + $0x18] sm:$0xff] %vm890_vm5, %v2906_v23  ;;  %v2904_v26 = vpop.permute.xlu0 %2903  ;;  %v11677_v23 = vld [vmem:[#allocation53_spill] sm:$0xff] }
 0x444   : > { %2997 = vst.msk [vmem:[#allocation3 + $0x10] sm:$0xff] %vm890_vm5, %v2904_v26  ;;  %3149 = vrot.lane.b32.xlu1 %v11664_v57, %s7622_s5 }
 0x445   : > { %3147 = vrot.lane.b32.xlu0 %v11665_v17, %s7622_s5  ;;  %v11678_v17 = vld [vmem:[#allocation54_spill] sm:$0xff] }
 0x446   : > { %v2910_v56 = vpop.permute.xlu1 %2909 }
 0x447   : > { %3000 = vst.msk [vmem:[#allocation3 + $0x28] sm:$0xff] %vm890_vm5, %v2910_v56  ;;  %v2908_v40 = vpop.permute.xlu0 %2907  ;;  %v11679_v56 = vld [vmem:[#allocation55_spill] sm:$0xff] }
 0x448   : > { %2999 = vst.msk [vmem:[#allocation3 + $0x20] sm:$0xff] %vm890_vm5, %v2908_v40  ;;  %3153 = vrot.lane.b32.xlu1 %v9552_v27, %s7622_s5 }
 0x449   : > { %3151 = vrot.lane.b32.xlu0 %v9557_v8, %s7622_s5 }
 0x44a   : > { %v2914_v47 = vpop.permute.xlu1 %2913 }
 0x44b   : > { %3002 = vst.msk [vmem:[#allocation3 + $0x38] sm:$0xff] %vm890_vm5, %v2914_v47  ;;  %v2912_v1 = vpop.permute.xlu0 %2911 }
 0x44c   : > { %3001 = vst.msk [vmem:[#allocation3 + $0x30] sm:$0xff] %vm890_vm5, %v2912_v1  ;;  %3285 = vrot.lane.b32.xlu1 %v11666_v24, %s7623_s6  ;;  %v11680_v1 = vld [vmem:[#allocation56_spill] sm:$0xff]  ;;  %v11681_v24 = vld [vmem:[#allocation57_spill] sm:$0xff] }
 0x44d   : > { %3283 = vrot.lane.b32.xlu0 %v11667_v15, %s7623_s6 }
 0x44e   : > { %v2918_v30 = vpop.permute.xlu1 %2917 }
 0x44f   : > { %3004 = vst.msk [vmem:[#allocation3 + $0x48] sm:$0xff] %vm890_vm5, %v2918_v30  ;;  %v2916_v3 = vpop.permute.xlu0 %2915 }
 0x450   : > { %3003 = vst.msk [vmem:[#allocation3 + $0x40] sm:$0xff] %vm890_vm5, %v2916_v3  ;;  %3289 = vrot.lane.b32.xlu1 %v11668_v59, %s7623_s6  ;;  %v11682_v3 = vld [vmem:[#allocation58_spill] sm:$0xff]  ;;  %v11683_v59 = vld [vmem:[#allocation59_spill] sm:$0xff] }
 0x451   : > { %3287 = vrot.lane.b32.xlu0 %v11669_v0, %s7623_s6 }
 0x452   : > { %v2922_v35 = vpop.permute.xlu1 %2921 }
 0x453   : > { %3006 = vst.msk [vmem:[#allocation3 + $0x58] sm:$0xff] %vm890_vm5, %v2922_v35  ;;  %v2920_v21 = vpop.permute.xlu0 %2919 }
 0x454   : > { %3005 = vst.msk [vmem:[#allocation3 + $0x50] sm:$0xff] %vm890_vm5, %v2920_v21  ;;  %3293 = vrot.lane.b32.xlu1 %v11670_v43, %s7623_s6  ;;  %v11684_v21 = vld [vmem:[#allocation60_spill] sm:$0xff]  ;;  %v11685_v43 = vld [vmem:[#allocation61_spill] sm:$0xff] }
 0x455   : > { %3291 = vrot.lane.b32.xlu0 %v11671_v11, %s7623_s6 }
 0x456   : > { %v2926_v20 = vpop.permute.xlu1 %2925 }
 0x457   : > { %3008 = vst.msk [vmem:[#allocation3 + $0x68] sm:$0xff] %vm890_vm5, %v2926_v20  ;;  %v2924_v12 = vpop.permute.xlu0 %2923 }
 0x458   : > { %3007 = vst.msk [vmem:[#allocation3 + $0x60] sm:$0xff] %vm890_vm5, %v2924_v12  ;;  %3297 = vrot.lane.b32.xlu1 %v11672_v52, %s7623_s6  ;;  %v11686_v12 = vld [vmem:[#allocation62_spill] sm:$0xff]  ;;  %v11687_v52 = vld [vmem:[#allocation63_spill] sm:$0xff] }
 0x459   : > { %3295 = vrot.lane.b32.xlu0 %v11673_v61, %s7623_s6 }
 0x45a   : > { %v2930_v33 = vpop.permute.xlu1 %2929 }
 0x45b   : > { %3010 = vst.msk [vmem:[#allocation3 + $0x78] sm:$0xff] %vm890_vm5, %v2930_v33  ;;  %v2928_v13 = vpop.permute.xlu0 %2927 }
 0x45c   : > { %3009 = vst.msk [vmem:[#allocation3 + $0x70] sm:$0xff] %vm890_vm5, %v2928_v13  ;;  %3301 = vrot.lane.b32.xlu1 %v11674_v31, %s7623_s6  ;;  %v11688_v13 = vld [vmem:[#allocation64_spill] sm:$0xff]  ;;  %v11689_v31 = vld [vmem:[#allocation65_spill] sm:$0xff] }
 0x45d   : > { %3299 = vrot.lane.b32.xlu0 %v11675_v16, %s7623_s6 }
 0x45e   : > { %v2934_v55 = vpop.permute.xlu1 %2933 }
 0x45f   : > { %3012 = vst.msk [vmem:[#allocation3 + $0x88] sm:$0xff] %vm890_vm5, %v2934_v55  ;;  %v2932_v38 = vpop.permute.xlu0 %2931 }
 0x460   : > { %3011 = vst.msk [vmem:[#allocation3 + $0x80] sm:$0xff] %vm890_vm5, %v2932_v38  ;;  %3305 = vrot.lane.b32.xlu1 %v11676_v53, %s7623_s6  ;;  %v11690_v38 = vld [vmem:[#allocation66_spill] sm:$0xff]  ;;  %v11691_v53 = vld [vmem:[#allocation67_spill] sm:$0xff] }
 0x461   : > { %3303 = vrot.lane.b32.xlu0 %v11677_v23, %s7623_s6 }
 0x462   : > { %v2938_v26 = vpop.permute.xlu1 %2937 }
 0x463   : > { %3014 = vst.msk [vmem:[#allocation3 + $0x98] sm:$0xff] %vm890_vm5, %v2938_v26  ;;  %v2936_v57 = vpop.permute.xlu0 %2935 }
 0x464   : > { %3013 = vst.msk [vmem:[#allocation3 + $0x90] sm:$0xff] %vm890_vm5, %v2936_v57  ;;  %3309 = vrot.lane.b32.xlu1 %v11678_v17, %s7623_s6  ;;  %v11692_v57 = vld [vmem:[#allocation68_spill] sm:$0xff] }
 0x465   : > { %3307 = vrot.lane.b32.xlu0 %v11679_v56, %s7623_s6 }
 0x466   : > { %v2942_v40 = vpop.permute.xlu1 %2941 }
 0x467   : > { %3016 = vst.msk [vmem:[#allocation3 + $0xa8] sm:$0xff] %vm890_vm5, %v2942_v40  ;;  %v2940_v47 = vpop.permute.xlu0 %2939 }
 0x468   : > { %3015 = vst.msk [vmem:[#allocation3 + $0xa0] sm:$0xff] %vm890_vm5, %v2940_v47  ;;  %3313 = vrot.lane.b32.xlu1 %v11680_v1, %s7623_s6  ;;  %v9657_v1 = vld [vmem:[#allocation2 + $0x182] sm:$0xff] }
 0x469   : > { %3311 = vrot.lane.b32.xlu0 %v11681_v24, %s7623_s6 }
 0x46a   : > { %v2946_v15 = vpop.permute.xlu1 %2945 }
 0x46b   : > { %3018 = vst.msk [vmem:[#allocation3 + $0xb8] sm:$0xff] %vm890_vm5, %v2946_v15  ;;  %v2944_v30 = vpop.permute.xlu0 %2943 }
 0x46c   : > { %3017 = vst.msk [vmem:[#allocation3 + $0xb0] sm:$0xff] %vm890_vm5, %v2944_v30  ;;  %3317 = vrot.lane.b32.xlu1 %v11682_v3, %s7623_s6 }
 0x46d   : > { %3315 = vrot.lane.b32.xlu0 %v11683_v59, %s7623_s6  ;;  %v3441_v59 = vld [vmem:[#allocation2 + $0x198] sm:$0xff] }
 0x46e   : > { %v2950_v0 = vpop.permute.xlu1 %2949 }
 0x46f   : > { %3020 = vst.msk [vmem:[#allocation3 + $0xc8] sm:$0xff] %vm890_vm5, %v2950_v0  ;;  %v2948_v35 = vpop.permute.xlu0 %2947 }
 0x470   : > { %3019 = vst.msk [vmem:[#allocation3 + $0xc0] sm:$0xff] %vm890_vm5, %v2948_v35  ;;  %3321 = vrot.lane.b32.xlu1 %v11684_v21, %s7623_s6  ;;  %v3604_v21 = vld [vmem:[#allocation2 + $0x39] sm:$0xff] }
 0x471   : > { %3319 = vrot.lane.b32.xlu0 %v11685_v43, %s7623_s6  ;;  %v3603_v43 = vld [vmem:[#allocation2 + $0x31] sm:$0xff] }
 0x472   : > { %v2954_v11 = vpop.permute.xlu1 %2953 }
 0x473   : > { %3022 = vst.msk [vmem:[#allocation3 + $0xd8] sm:$0xff] %vm890_vm5, %v2954_v11  ;;  %v2952_v20 = vpop.permute.xlu0 %2951  ;;  %v7098_v11 = vld [vmem:[%s11443_s1 + $0x38] sm:$0xff] }
 0x474   : > { %3021 = vst.msk [vmem:[#allocation3 + $0xd0] sm:$0xff] %vm890_vm5, %v2952_v20  ;;  %3325 = vrot.lane.b32.xlu1 %v11686_v12, %s7623_s6  ;;  %v7099_v20 = vld [vmem:[%s11443_s1 + $0x40] sm:$0xff] }
 0x475   : > { %3323 = vrot.lane.b32.xlu0 %v11687_v52, %s7623_s6  ;;  %v7480_v12 = vpack.c.bf16 %v7099_v20, %v7098_v11 }
 0x476   : > { %v2958_v61 = vpop.permute.xlu1 %2957 }
 0x477   : > { %3024 = vst.msk [vmem:[#allocation3 + $0xe8] sm:$0xff] %vm890_vm5, %v2958_v61  ;;  %v2956_v33 = vpop.permute.xlu0 %2955 }
 0x478   : > { %3023 = vst.msk [vmem:[#allocation3 + $0xe0] sm:$0xff] %vm890_vm5, %v2956_v33  ;;  %3329 = vrot.lane.b32.xlu1 %v11688_v13, %s7623_s6  ;;  %v3606_v33 = vld [vmem:[#allocation2 + $0x51] sm:$0xff]  ;;  %v3605_v13 = vld [vmem:[#allocation2 + $0x49] sm:$0xff] }
 0x479   : > { %3327 = vrot.lane.b32.xlu0 %v11689_v31, %s7623_s6  ;;  %v7100_v31 = vld [vmem:[%s11443_s1 + $0x48] sm:$0xf] }
 0x47a   : > { %v2962_v16 = vpop.permute.xlu1 %2961 }
 0x47b   : > { %3026 = vst.msk [vmem:[#allocation3 + $0xf8] sm:$0xff] %vm890_vm5, %v2962_v16  ;;  %v2960_v55 = vpop.permute.xlu0 %2959 }
 0x47c   : > { %3025 = vst.msk [vmem:[#allocation3 + $0xf0] sm:$0xff] %vm890_vm5, %v2960_v55  ;;  %3333 = vrot.lane.b32.xlu1 %v11690_v38, %s7623_s6  ;;  %v3795_v38 = vld [vmem:[#allocation2 + $0x32] sm:$0xff] }
 0x47d   : > { %3331 = vrot.lane.b32.xlu0 %v11691_v53, %s7623_s6  ;;  %v3607_v53 = vld [vmem:[#allocation2 + $0x61] sm:$0xff] }
 0x47e   : > { %v3094_v23 = vpop.permute.xlu1 %3093 }
 0x47f   : > { %3188 = vst.msk [vmem:[#allocation3 + $0x8] sm:$0xff] %vm1083_vm6, %v3094_v23  ;;  %v3092_v26 = vpop.permute.xlu0 %3091 }
 0x480   : > { %3187 = vst.msk [vmem:[#allocation3] sm:$0xff] %vm1083_vm6, %v3092_v26  ;;  %3337 = vrot.lane.b32.xlu1 %v9342_v45, %s7623_s6  ;;  %v9652_v45 = vld [vmem:[#allocation2 + $0x18a] sm:$0xff] }
 0x481   : > { %3335 = vrot.lane.b32.xlu0 %v11692_v57, %s7623_s6  ;;  %v3797_v57 = vld [vmem:[#allocation2 + $0x4a] sm:$0xff] }
 0x482   : > { %v3098_v17 = vpop.permute.xlu1 %3097 }
 0x483   : > { %3190 = vst.msk [vmem:[#allocation3 + $0x18] sm:$0xff] %vm1083_vm6, %v3098_v17  ;;  %v3096_v56 = vpop.permute.xlu0 %3095  ;;  %v3796_v17 = vld [vmem:[#allocation2 + $0x3a] sm:$0xff] }
 0x484   : > { %3189 = vst.msk [vmem:[#allocation3 + $0x10] sm:$0xff] %vm1083_vm6, %v3096_v56  ;;  %3341 = vrot.lane.b32.xlu1 %v9352_v46, %s7623_s6 }
 0x485   : > { %3339 = vrot.lane.b32.xlu0 %v9357_v58, %s7623_s6 }
 0x486   : > { %v3102_v40 = vpop.permute.xlu1 %3101 }
 0x487   : > { %3192 = vst.msk [vmem:[#allocation3 + $0x28] sm:$0xff] %vm1083_vm6, %v3102_v40  ;;  %v3100_v47 = vpop.permute.xlu0 %3099 }
 0x488   : > { %3191 = vst.msk [vmem:[#allocation3 + $0x20] sm:$0xff] %vm1083_vm6, %v3100_v47  ;;  %3345 = vrot.lane.b32.xlu1 %v9652_v45, %s7623_s6  ;;  %v3608_v47 = vld [vmem:[#allocation2 + $0x69] sm:$0xff] }
 0x489   : > { %3343 = vrot.lane.b32.xlu0 %v9657_v1, %s7623_s6 }
 0x48a   : > { %v3106_v46 = vpop.permute.xlu1 %3105 }
 0x48b   : > { %3194 = vst.msk [vmem:[#allocation3 + $0x38] sm:$0xff] %vm1083_vm6, %v3106_v46  ;;  %v3104_v58 = vpop.permute.xlu0 %3103  ;;  %v3798_v46 = vld [vmem:[#allocation2 + $0x52] sm:$0xff] }
 0x48c   : > { %3193 = vst.msk [vmem:[#allocation3 + $0x30] sm:$0xff] %vm1083_vm6, %v3104_v58  ;;  %3477 = vrot.lane.b32.xlu1 %v8970_v10, %s7624_s7 }
 0x48d   : > { %3475 = vrot.lane.b32.xlu0 %v8977_v49, %s7624_s7 }
 0x48e   : > { %v3110_v24 = vpop.permute.xlu1 %3109 }
 0x48f   : > { %3196 = vst.msk [vmem:[#allocation3 + $0x48] sm:$0xff] %vm1083_vm6, %v3110_v24  ;;  %v3108_v15 = vpop.permute.xlu0 %3107 }
 0x490   : > { %3195 = vst.msk [vmem:[#allocation3 + $0x40] sm:$0xff] %vm1083_vm6, %v3108_v15  ;;  %3481 = vrot.lane.b32.xlu1 %v8990_v39, %s7624_s7  ;;  %v3800_v15 = vld [vmem:[#allocation2 + $0x6a] sm:$0xff] }
 0x491   : > { %3479 = vrot.lane.b32.xlu0 %v8997_v51, %s7624_s7 }
 0x492   : > { %v3114_v30 = vpop.permute.xlu1 %3113 }
 0x493   : > { %3198 = vst.msk [vmem:[#allocation3 + $0x58] sm:$0xff] %vm1083_vm6, %v3114_v30  ;;  %v3112_v3 = vpop.permute.xlu0 %3111  ;;  %v3799_v30 = vld [vmem:[#allocation2 + $0x62] sm:$0xff] }
 0x494   : > { %3197 = vst.msk [vmem:[#allocation3 + $0x50] sm:$0xff] %vm1083_vm6, %v3112_v3  ;;  %3485 = vrot.lane.b32.xlu1 %v9010_v62, %s7624_s7 }
 0x495   : > { %3483 = vrot.lane.b32.xlu0 %v9017_v7, %s7624_s7 }
 0x496   : > { %v3118_v10 = vpop.permute.xlu1 %3117 }
 0x497   : > { %3200 = vst.msk [vmem:[#allocation3 + $0x68] sm:$0xff] %vm1083_vm6, %v3118_v10  ;;  %v3116_v49 = vpop.permute.xlu0 %3115 }
 0x498   : > { %3199 = vst.msk [vmem:[#allocation3 + $0x60] sm:$0xff] %vm1083_vm6, %v3116_v49  ;;  %3489 = vrot.lane.b32.xlu1 %v9030_v29, %s7624_s7  ;;  %v3610_v49 = vld [vmem:[#allocation2 + $0x81] sm:$0xff] }
 0x499   : > { %3487 = vrot.lane.b32.xlu0 %v9037_v22, %s7624_s7 }
 0x49a   : > { %v3122_v39 = vpop.permute.xlu1 %3121 }
 0x49b   : > { %3202 = vst.msk [vmem:[#allocation3 + $0x78] sm:$0xff] %vm1083_vm6, %v3122_v39  ;;  %v3120_v51 = vpop.permute.xlu0 %3119  ;;  %v3609_v39 = vld [vmem:[#allocation2 + $0x79] sm:$0xff] }
 0x49c   : > { %3201 = vst.msk [vmem:[#allocation3 + $0x70] sm:$0xff] %vm1083_vm6, %v3120_v51  ;;  %3493 = vrot.lane.b32.xlu1 %v9050_v50, %s7624_s7 }
 0x49d   : > { %3491 = vrot.lane.b32.xlu0 %v9057_v63, %s7624_s7 }
 0x49e   : > { %v3126_v62 = vpop.permute.xlu1 %3125 }
 0x49f   : > { %3204 = vst.msk [vmem:[#allocation3 + $0x88] sm:$0xff] %vm1083_vm6, %v3126_v62  ;;  %v3124_v7 = vpop.permute.xlu0 %3123 }
 0x4a0   : > { %3203 = vst.msk [vmem:[#allocation3 + $0x80] sm:$0xff] %vm1083_vm6, %v3124_v7  ;;  %3497 = vrot.lane.b32.xlu1 %v9070_v25, %s7624_s7  ;;  %v3802_v7 = vld [vmem:[#allocation2 + $0x82] sm:$0xff] }
 0x4a1   : > { %3495 = vrot.lane.b32.xlu0 %v9077_v5, %s7624_s7 }
 0x4a2   : > { %v3130_v29 = vpop.permute.xlu1 %3129 }
 0x4a3   : > { %3206 = vst.msk [vmem:[#allocation3 + $0x98] sm:$0xff] %vm1083_vm6, %v3130_v29  ;;  %v3128_v22 = vpop.permute.xlu0 %3127  ;;  %v3801_v29 = vld [vmem:[#allocation2 + $0x7a] sm:$0xff] }
 0x4a4   : > { %3205 = vst.msk [vmem:[#allocation3 + $0x90] sm:$0xff] %vm1083_vm6, %v3128_v22  ;;  %3501 = vrot.lane.b32.xlu1 %v9090_v60, %s7624_s7 }
 0x4a5   : > { %3499 = vrot.lane.b32.xlu0 %v9097_v48, %s7624_s7 }
 0x4a6   : > { %v3134_v50 = vpop.permute.xlu1 %3133 }
 0x4a7   : > { %3208 = vst.msk [vmem:[#allocation3 + $0xa8] sm:$0xff] %vm1083_vm6, %v3134_v50  ;;  %v3132_v63 = vpop.permute.xlu0 %3131 }
 0x4a8   : > { %3207 = vst.msk [vmem:[#allocation3 + $0xa0] sm:$0xff] %vm1083_vm6, %v3132_v63  ;;  %3505 = vrot.lane.b32.xlu1 %v9110_v18, %s7624_s7  ;;  %v3612_v63 = vld [vmem:[#allocation2 + $0x99] sm:$0xff] }
 0x4a9   : > { %3503 = vrot.lane.b32.xlu0 %v9117_v4, %s7624_s7 }
 0x4aa   : > { %v3138_v25 = vpop.permute.xlu1 %3137 }
 0x4ab   : > { %3210 = vst.msk [vmem:[#allocation3 + $0xb8] sm:$0xff] %vm1083_vm6, %v3138_v25  ;;  %v3136_v5 = vpop.permute.xlu0 %3135  ;;  %v3611_v25 = vld [vmem:[#allocation2 + $0x91] sm:$0xff] }
 0x4ac   : > { %3209 = vst.msk [vmem:[#allocation3 + $0xb0] sm:$0xff] %vm1083_vm6, %v3136_v5  ;;  %3509 = vrot.lane.b32.xlu1 %v9130_v2, %s7624_s7 }
 0x4ad   : > { %3507 = vrot.lane.b32.xlu0 %v9137_v6, %s7624_s7 }
 0x4ae   : > { %v3142_v60 = vpop.permute.xlu1 %3141 }
 0x4af   : > { %3212 = vst.msk [vmem:[#allocation3 + $0xc8] sm:$0xff] %vm1083_vm6, %v3142_v60  ;;  %v3140_v48 = vpop.permute.xlu0 %3139 }
 0x4b0   : > { %3211 = vst.msk [vmem:[#allocation3 + $0xc0] sm:$0xff] %vm1083_vm6, %v3140_v48  ;;  %3513 = vrot.lane.b32.xlu1 %v9150_v37, %s7624_s7  ;;  %v3804_v48 = vld [vmem:[#allocation2 + $0x9a] sm:$0xff] }
 0x4b1   : > { %3511 = vrot.lane.b32.xlu0 %v9157_v28, %s7624_s7 }
 0x4b2   : > { %v3146_v18 = vpop.permute.xlu1 %3145 }
 0x4b3   : > { %3214 = vst.msk [vmem:[#allocation3 + $0xd8] sm:$0xff] %vm1083_vm6, %v3146_v18  ;;  %v3144_v4 = vpop.permute.xlu0 %3143  ;;  %v3803_v18 = vld [vmem:[#allocation2 + $0x92] sm:$0xff] }
 0x4b4   : > { %3213 = vst.msk [vmem:[#allocation3 + $0xd0] sm:$0xff] %vm1083_vm6, %v3144_v4  ;;  %3517 = vrot.lane.b32.xlu1 %v9170_v19, %s7624_s7 }
 0x4b5   : > { %3515 = vrot.lane.b32.xlu0 %v9177_v32, %s7624_s7 }
 0x4b6   : > { %v3150_v2 = vpop.permute.xlu1 %3149 }
 0x4b7   : > { %3216 = vst.msk [vmem:[#allocation3 + $0xe8] sm:$0xff] %vm1083_vm6, %v3150_v2  ;;  %v3148_v6 = vpop.permute.xlu0 %3147 }
 0x4b8   : > { %3215 = vst.msk [vmem:[#allocation3 + $0xe0] sm:$0xff] %vm1083_vm6, %v3148_v6  ;;  %3521 = vrot.lane.b32.xlu1 %v9189_v41, %s7624_s7  ;;  %v3614_v6 = vld [vmem:[#allocation2 + $0xb1] sm:$0xff] }
 0x4b9   : > { %3519 = vrot.lane.b32.xlu0 %v9197_v14, %s7624_s7 }
 0x4ba   : > { %v3154_v37 = vpop.permute.xlu1 %3153 }
 0x4bb   : > { %3218 = vst.msk [vmem:[#allocation3 + $0xf8] sm:$0xff] %vm1083_vm6, %v3154_v37  ;;  %v3152_v28 = vpop.permute.xlu0 %3151  ;;  %v3613_v37 = vld [vmem:[#allocation2 + $0xa9] sm:$0xff] }
 0x4bc   : > { %3217 = vst.msk [vmem:[#allocation3 + $0xf0] sm:$0xff] %vm1083_vm6, %v3152_v28  ;;  %3525 = vrot.lane.b32.xlu1 %v9207_v9, %s7624_s7  ;;  %v3442_v9 = vld [vmem:[#allocation2 + $0x1a0] sm:$0xff] }
 0x4bd   : > { %3523 = vrot.lane.b32.xlu0 %v9214_v54, %s7624_s7 }
 0x4be   : > { %v3286_v19 = vpop.permute.xlu1 %3285 }
 0x4bf   : > { %3380 = vst.msk [vmem:[#allocation3 + $0x8] sm:$0xff] %vm1276_vm7, %v3286_v19  ;;  %v3284_v32 = vpop.permute.xlu0 %3283 }
 0x4c0   : > { %3379 = vst.msk [vmem:[#allocation3] sm:$0xff] %vm1276_vm7, %v3284_v32  ;;  %3529 = vrot.lane.b32.xlu1 %v9225_v36, %s7624_s7  ;;  %v3806_v32 = vld [vmem:[#allocation2 + $0xb2] sm:$0xff] }
 0x4c1   : > { %3527 = vrot.lane.b32.xlu0 %v9231_v44, %s7624_s7  ;;  %v7096_v44 = vld [vmem:[%s11443_s1 + $0x28] sm:$0xff] }
 0x4c2   : > { %v3290_v41 = vpop.permute.xlu1 %3289 }
 0x4c3   : > { %3382 = vst.msk [vmem:[#allocation3 + $0x18] sm:$0xff] %vm1276_vm7, %v3290_v41  ;;  %v3288_v14 = vpop.permute.xlu0 %3287  ;;  %v3805_v41 = vld [vmem:[#allocation2 + $0xaa] sm:$0xff] }
 0x4c4   : > { %3381 = vst.msk [vmem:[#allocation3 + $0x10] sm:$0xff] %vm1276_vm7, %v3288_v14  ;;  %3533 = vrot.lane.b32.xlu1 %v9452_v42, %s7624_s7  ;;  %v7097_v42 = vld [vmem:[%s11443_s1 + $0x30] sm:$0xff] }
 0x4c5   : > { %3531 = vrot.lane.b32.xlu0 %v9457_v34, %s7624_s7  ;;  %v7476_v34 = vpack.c.bf16 %v7097_v42, %v7096_v44  ;;  %v3808_v42 = vld [vmem:[#allocation2 + $0xca] sm:$0xff] }
 0x4c6   : > { %v3294_v54 = vpop.permute.xlu1 %3293 }
 0x4c7   : > { %3384 = vst.msk [vmem:[#allocation3 + $0x28] sm:$0xff] %vm1276_vm7, %v3294_v54  ;;  %v3292_v36 = vpop.permute.xlu0 %3291  ;;  %7477 = vmatprep.subr.bf16.mxu1 %v7476_v34  ;;  %v3616_v54 = vld [vmem:[#allocation2 + $0xc9] sm:$0xff] }
 0x4c8   : > { %3383 = vst.msk [vmem:[#allocation3 + $0x20] sm:$0xff] %vm1276_vm7, %v3292_v36  ;;  %3537 = vrot.lane.b32.xlu1 %v3442_v9, %s7624_s7  ;;  %7479 = vmatpush3.bf16.msra.mxu1 %v7476_v34  ;;  %v3807_v34 = vld [vmem:[#allocation2 + $0xc2] sm:$0xff] }
 0x4c9   : > { %3535 = vrot.lane.b32.xlu0 %v3441_v59, %s7624_s7  ;;  %7481 = vmatprep.subr.bf16.mxu1 %v7480_v12  ;;  %v3615_v59 = vld [vmem:[#allocation2 + $0xc1] sm:$0xff] }
 0x4ca   : > { %v3298_v0 = vpop.permute.xlu1 %3297 }
 0x4cb   : > { %3386 = vst.msk [vmem:[#allocation3 + $0x38] sm:$0xff] %vm1276_vm7, %v3298_v0  ;;  %v3296_v35 = vpop.permute.xlu0 %3295 }
 0x4cc   : > { %3385 = vst.msk [vmem:[#allocation3 + $0x30] sm:$0xff] %vm1276_vm7, %v3296_v35  ;;  %3669 = vrot.lane.b32.xlu1 %v3604_v21, %s7625_s8  ;;  %7483 = vmatpush3.bf16.msra.mxu1 %v7480_v12  ;;  %v3618_v21 = vld [vmem:[#allocation2 + $0xe1] sm:$0xff] }
 0x4cd   : > { %3667 = vrot.lane.b32.xlu0 %v3603_v43, %s7625_s8  ;;  %7360 = vmatprep.subr.msk.mxu1 %vm2030_vm9, %v7100_v31  ;;  %v3617_v43 = vld [vmem:[#allocation2 + $0xd9] sm:$0xff]  ;;  %v3810_v12 = vld [vmem:[#allocation2 + $0xe2] sm:$0xff] }
 0x4ce   : > { %v3302_v52 = vpop.permute.xlu1 %3301 }
 0x4cf   : > { %3388 = vst.msk [vmem:[#allocation3 + $0x48] sm:$0xff] %vm1276_vm7, %v3302_v52  ;;  %v3300_v61 = vpop.permute.xlu0 %3299  ;;  %v3809_v52 = vld [vmem:[#allocation2 + $0xda] sm:$0xff] }
 0x4d0   : > { %3387 = vst.msk [vmem:[#allocation3 + $0x40] sm:$0xff] %vm1276_vm7, %v3300_v61  ;;  %3673 = vrot.lane.b32.xlu1 %v3606_v33, %s7625_s8  ;;  %7361 = vmatpush3.msk.msra.mxu1 %vm2030_vm9, %v7100_v31  ;;  %v3619_v31 = vld [vmem:[#allocation2 + $0xf1] sm:$0xff] }
 0x4d1   : > { %3671 = vrot.lane.b32.xlu0 %v3605_v13, %s7625_s8  ;;  %v3620_v13 = vld [vmem:[#allocation2 + $0xf9] sm:$0xff] }
 0x4d2   : > { %v3306_v16 = vpop.permute.xlu1 %3305 }
 0x4d3   : > { %3390 = vst.msk [vmem:[#allocation3 + $0x58] sm:$0xff] %vm1276_vm7, %v3306_v16  ;;  %v3304_v55 = vpop.permute.xlu0 %3303 }
 0x4d4   : > { %3389 = vst.msk [vmem:[#allocation3 + $0x50] sm:$0xff] %vm1276_vm7, %v3304_v55  ;;  %3859 = vrot.lane.b32.xlu1 %v3795_v38, %s7626_s28  ;;  %v3812_v38 = vld [vmem:[#allocation2 + $0xfa] sm:$0xff] }
 0x4d5   : > { %3675 = vrot.lane.b32.xlu0 %v3607_v53, %s7625_s8  ;;  %v3811_v53 = vld [vmem:[#allocation2 + $0xf2] sm:$0xff] }
 0x4d6   : > { %v3310_v23 = vpop.permute.xlu1 %3309 }
 0x4d7   : > { %3392 = vst.msk [vmem:[#allocation3 + $0x68] sm:$0xff] %vm1276_vm7, %v3310_v23  ;;  %v3308_v26 = vpop.permute.xlu0 %3307 }
 0x4d8   : > { %3391 = vst.msk [vmem:[#allocation3 + $0x60] sm:$0xff] %vm1276_vm7, %v3308_v26  ;;  %3863 = vrot.lane.b32.xlu1 %v3797_v57, %s7626_s28  ;;  %v3622_v57 = vld [vmem:[#allocation2 + $0x111] sm:$0xff] }
 0x4d9   : > { %3861 = vrot.lane.b32.xlu0 %v3796_v17, %s7626_s28  ;;  %v3621_v17 = vld [vmem:[#allocation2 + $0x109] sm:$0xff] }
 0x4da   : > { %v3314_v56 = vpop.permute.xlu1 %3313 }
 0x4db   : > { %3394 = vst.msk [vmem:[#allocation3 + $0x78] sm:$0xff] %vm1276_vm7, %v3314_v56  ;;  %v3312_v40 = vpop.permute.xlu0 %3311 }
 0x4dc   : > { %3393 = vst.msk [vmem:[#allocation3 + $0x70] sm:$0xff] %vm1276_vm7, %v3312_v40  ;;  %3677 = vrot.lane.b32.xlu1 %v3608_v47, %s7625_s8  ;;  %v3814_v47 = vld [vmem:[#allocation2 + $0x112] sm:$0xff] }
 0x4dd   : > { %3865 = vrot.lane.b32.xlu0 %v3798_v46, %s7626_s28  ;;  %v3813_v46 = vld [vmem:[#allocation2 + $0x10a] sm:$0xff] }
 0x4de   : > { %v3318_v58 = vpop.permute.xlu1 %3317 }
 0x4df   : > { %3396 = vst.msk [vmem:[#allocation3 + $0x88] sm:$0xff] %vm1276_vm7, %v3318_v58  ;;  %v3316_v24 = vpop.permute.xlu0 %3315 }
 0x4e0   : > { %3395 = vst.msk [vmem:[#allocation3 + $0x80] sm:$0xff] %vm1276_vm7, %v3316_v24  ;;  %3869 = vrot.lane.b32.xlu1 %v3800_v15, %s7626_s28  ;;  %v3624_v15 = vld [vmem:[#allocation2 + $0x129] sm:$0xff] }
 0x4e1   : > { %3867 = vrot.lane.b32.xlu0 %v3799_v30, %s7626_s28  ;;  %v3623_v30 = vld [vmem:[#allocation2 + $0x121] sm:$0xff] }
 0x4e2   : > { %v3322_v3 = vpop.permute.xlu1 %3321 }
 0x4e3   : > { %3398 = vst.msk [vmem:[#allocation3 + $0x98] sm:$0xff] %vm1276_vm7, %v3322_v3  ;;  %v3320_v10 = vpop.permute.xlu0 %3319 }
 0x4e4   : > { %3397 = vst.msk [vmem:[#allocation3 + $0x90] sm:$0xff] %vm1276_vm7, %v3320_v10  ;;  %3681 = vrot.lane.b32.xlu1 %v3610_v49, %s7625_s8  ;;  %v3816_v49 = vld [vmem:[#allocation2 + $0x12a] sm:$0xff] }
 0x4e5   : > { %3679 = vrot.lane.b32.xlu0 %v3609_v39, %s7625_s8  ;;  %v3815_v39 = vld [vmem:[#allocation2 + $0x122] sm:$0xff] }
 0x4e6   : > { %v3326_v51 = vpop.permute.xlu1 %3325 }
 0x4e7   : > { %3400 = vst.msk [vmem:[#allocation3 + $0xa8] sm:$0xff] %vm1276_vm7, %v3326_v51  ;;  %v3324_v62 = vpop.permute.xlu0 %3323 }
 0x4e8   : > { %3399 = vst.msk [vmem:[#allocation3 + $0xa0] sm:$0xff] %vm1276_vm7, %v3324_v62  ;;  %3873 = vrot.lane.b32.xlu1 %v3802_v7, %s7626_s28  ;;  %v3626_v7 = vld [vmem:[#allocation2 + $0x141] sm:$0xff] }
 0x4e9   : > { %3871 = vrot.lane.b32.xlu0 %v3801_v29, %s7626_s28  ;;  %v3625_v29 = vld [vmem:[#allocation2 + $0x139] sm:$0xff] }
 0x4ea   : > { %v3330_v22 = vpop.permute.xlu1 %3329 }
 0x4eb   : > { %3402 = vst.msk [vmem:[#allocation3 + $0xb8] sm:$0xff] %vm1276_vm7, %v3330_v22  ;;  %v3328_v50 = vpop.permute.xlu0 %3327 }
 0x4ec   : > { %3401 = vst.msk [vmem:[#allocation3 + $0xb0] sm:$0xff] %vm1276_vm7, %v3328_v50  ;;  %3685 = vrot.lane.b32.xlu1 %v3612_v63, %s7625_s8  ;;  %v3818_v63 = vld [vmem:[#allocation2 + $0x142] sm:$0xff] }
 0x4ed   : > { %3683 = vrot.lane.b32.xlu0 %v3611_v25, %s7625_s8  ;;  %v3817_v25 = vld [vmem:[#allocation2 + $0x13a] sm:$0xff] }
 0x4ee   : > { %v3334_v5 = vpop.permute.xlu1 %3333 }
 0x4ef   : > { %3404 = vst.msk [vmem:[#allocation3 + $0xc8] sm:$0xff] %vm1276_vm7, %v3334_v5  ;;  %v3332_v60 = vpop.permute.xlu0 %3331 }
 0x4f0   : > { %3403 = vst.msk [vmem:[#allocation3 + $0xc0] sm:$0xff] %vm1276_vm7, %v3332_v60  ;;  %3877 = vrot.lane.b32.xlu1 %v3804_v48, %s7626_s28  ;;  %v3628_v48 = vld [vmem:[#allocation2 + $0x159] sm:$0xff] }
 0x4f1   : > { %3875 = vrot.lane.b32.xlu0 %v3803_v18, %s7626_s28  ;;  %v3627_v18 = vld [vmem:[#allocation2 + $0x151] sm:$0xff] }
 0x4f2   : > { %v3338_v4 = vpop.permute.xlu1 %3337 }
 0x4f3   : > { %3406 = vst.msk [vmem:[#allocation3 + $0xd8] sm:$0xff] %vm1276_vm7, %v3338_v4  ;;  %v3336_v2 = vpop.permute.xlu0 %3335 }
 0x4f4   : > { %3405 = vst.msk [vmem:[#allocation3 + $0xd0] sm:$0xff] %vm1276_vm7, %v3336_v2  ;;  %3689 = vrot.lane.b32.xlu1 %v3614_v6, %s7625_s8  ;;  %v3820_v6 = vld [vmem:[#allocation2 + $0x15a] sm:$0xff] }
 0x4f5   : > { %3687 = vrot.lane.b32.xlu0 %v3613_v37, %s7625_s8  ;;  %v3819_v37 = vld [vmem:[#allocation2 + $0x152] sm:$0xff] }
 0x4f6   : > { %v3342_v28 = vpop.permute.xlu1 %3341 }
 0x4f7   : > { %3408 = vst.msk [vmem:[#allocation3 + $0xe8] sm:$0xff] %vm1276_vm7, %v3342_v28  ;;  %v3340_v19 = vpop.permute.xlu0 %3339 }
 0x4f8   : > { %3407 = vst.msk [vmem:[#allocation3 + $0xe0] sm:$0xff] %vm1276_vm7, %v3340_v19  ;;  %3881 = vrot.lane.b32.xlu1 %v3806_v32, %s7626_s28  ;;  %v3630_v32 = vld [vmem:[#allocation2 + $0x171] sm:$0xff] }
 0x4f9   : > { %3879 = vrot.lane.b32.xlu0 %v3805_v41, %s7626_s28  ;;  %v3629_v41 = vld [vmem:[#allocation2 + $0x169] sm:$0xff] }
 0x4fa   : > { %v3346_v14 = vpop.permute.xlu1 %3345 }
 0x4fb   : > { %3410 = vst.msk [vmem:[#allocation3 + $0xf8] sm:$0xff] %vm1276_vm7, %v3346_v14  ;;  %v3344_v9 = vpop.permute.xlu0 %3343 }
 0x4fc   : > { %3409 = vst.msk [vmem:[#allocation3 + $0xf0] sm:$0xff] %vm1276_vm7, %v3344_v9  ;;  %3693 = vrot.lane.b32.xlu1 %v3616_v54, %s7625_s8  ;;  %v3822_v54 = vld [vmem:[#allocation2 + $0x172] sm:$0xff] }
 0x4fd   : > { %3691 = vrot.lane.b32.xlu0 %v3615_v59, %s7625_s8  ;;  %v3821_v59 = vld [vmem:[#allocation2 + $0x16a] sm:$0xff] }
 0x4fe   : > { %v3478_v36 = vpop.permute.xlu1 %3477 }
 0x4ff   : > { %3572 = vst.msk [vmem:[#allocation3 + $0x8] sm:$0xff] %vm1470_vm8, %v3478_v36  ;;  %v3476_v44 = vpop.permute.xlu0 %3475 }
 0x500   : > { %3571 = vst.msk [vmem:[#allocation3] sm:$0xff] %vm1470_vm8, %v3476_v44  ;;  %3885 = vrot.lane.b32.xlu1 %v3808_v42, %s7626_s28 }
 0x501   : > { %3883 = vrot.lane.b32.xlu0 %v3807_v34, %s7626_s28 }
 0x502   : > { %v3482_v0 = vpop.permute.xlu1 %3481 }
 0x503   : > { %3574 = vst.msk [vmem:[#allocation3 + $0x18] sm:$0xff] %vm1470_vm8, %v3482_v0  ;;  %v3480_v35 = vpop.permute.xlu0 %3479  ;;  %v3634_v0 = vld [vmem:[#allocation2 + $0x1a1] sm:$0xff] }
 0x504   : > { %3573 = vst.msk [vmem:[#allocation3 + $0x10] sm:$0xff] %vm1470_vm8, %v3480_v35  ;;  %3697 = vrot.lane.b32.xlu1 %v3618_v21, %s7625_s8  ;;  %v3633_v21 = vld [vmem:[#allocation2 + $0x199] sm:$0xff] }
 0x505   : > { %3695 = vrot.lane.b32.xlu0 %v3617_v43, %s7625_s8 }
 0x506   : > { %v3486_v11 = vpop.permute.xlu1 %3485 }
 0x507   : > { %3576 = vst.msk [vmem:[#allocation3 + $0x28] sm:$0xff] %vm1470_vm8, %v3486_v11  ;;  %v3484_v20 = vpop.permute.xlu0 %3483  ;;  %v3825_v11 = vld [vmem:[#allocation2 + $0x19a] sm:$0xff] }
 0x508   : > { %3575 = vst.msk [vmem:[#allocation3 + $0x20] sm:$0xff] %vm1470_vm8, %v3484_v20  ;;  %3889 = vrot.lane.b32.xlu1 %v3810_v12, %s7626_s28 }
 0x509   : > { %3887 = vrot.lane.b32.xlu0 %v3809_v52, %s7626_s28 }
 0x50a   : > { %v3490_v61 = vpop.permute.xlu1 %3489 }
 0x50b   : > { %3578 = vst.msk [vmem:[#allocation3 + $0x38] sm:$0xff] %vm1470_vm8, %v3490_v61  ;;  %v3488_v33 = vpop.permute.xlu0 %3487 }
 0x50c   : > { %3577 = vst.msk [vmem:[#allocation3 + $0x30] sm:$0xff] %vm1470_vm8, %v3488_v33  ;;  %3701 = vrot.lane.b32.xlu1 %v3620_v13, %s7625_s8 }
 0x50d   : > { %3699 = vrot.lane.b32.xlu0 %v3619_v31, %s7625_s8 }
 0x50e   : > { %v3494_v16 = vpop.permute.xlu1 %3493 }
 0x50f   : > { %3580 = vst.msk [vmem:[#allocation3 + $0x48] sm:$0xff] %vm1470_vm8, %v3494_v16  ;;  %v3492_v55 = vpop.permute.xlu0 %3491 }
 0x510   : > { %3579 = vst.msk [vmem:[#allocation3 + $0x40] sm:$0xff] %vm1470_vm8, %v3492_v55  ;;  %3893 = vrot.lane.b32.xlu1 %v3812_v38, %s7626_s28 }
 0x511   : > { %3891 = vrot.lane.b32.xlu0 %v3811_v53, %s7626_s28 }
 0x512   : > { %v3498_v23 = vpop.permute.xlu1 %3497 }
 0x513   : > { %3582 = vst.msk [vmem:[#allocation3 + $0x58] sm:$0xff] %vm1470_vm8, %v3498_v23  ;;  %v3496_v26 = vpop.permute.xlu0 %3495 }
 0x514   : > { %3581 = vst.msk [vmem:[#allocation3 + $0x50] sm:$0xff] %vm1470_vm8, %v3496_v26  ;;  %3705 = vrot.lane.b32.xlu1 %v3622_v57, %s7625_s8 }
 0x515   : > { %3703 = vrot.lane.b32.xlu0 %v3621_v17, %s7625_s8 }
 0x516   : > { %v3502_v56 = vpop.permute.xlu1 %3501 }
 0x517   : > { %3584 = vst.msk [vmem:[#allocation3 + $0x68] sm:$0xff] %vm1470_vm8, %v3502_v56  ;;  %v3500_v40 = vpop.permute.xlu0 %3499 }
 0x518   : > { %3583 = vst.msk [vmem:[#allocation3 + $0x60] sm:$0xff] %vm1470_vm8, %v3500_v40  ;;  %3897 = vrot.lane.b32.xlu1 %v3814_v47, %s7626_s28 }
 0x519   : > { %3895 = vrot.lane.b32.xlu0 %v3813_v46, %s7626_s28 }
 0x51a   : > { %v3506_v58 = vpop.permute.xlu1 %3505 }
 0x51b   : > { %3586 = vst.msk [vmem:[#allocation3 + $0x78] sm:$0xff] %vm1470_vm8, %v3506_v58  ;;  %v3504_v24 = vpop.permute.xlu0 %3503 }
 0x51c   : > { %3585 = vst.msk [vmem:[#allocation3 + $0x70] sm:$0xff] %vm1470_vm8, %v3504_v24  ;;  %3709 = vrot.lane.b32.xlu1 %v3624_v15, %s7625_s8 }
 0x51d   : > { %3707 = vrot.lane.b32.xlu0 %v3623_v30, %s7625_s8 }
 0x51e   : > { %v3510_v3 = vpop.permute.xlu1 %3509 }
 0x51f   : > { %3588 = vst.msk [vmem:[#allocation3 + $0x88] sm:$0xff] %vm1470_vm8, %v3510_v3  ;;  %v3508_v10 = vpop.permute.xlu0 %3507 }
 0x520   : > { %3587 = vst.msk [vmem:[#allocation3 + $0x80] sm:$0xff] %vm1470_vm8, %v3508_v10  ;;  %3901 = vrot.lane.b32.xlu1 %v3816_v49, %s7626_s28 }
 0x521   : > { %3899 = vrot.lane.b32.xlu0 %v3815_v39, %s7626_s28 }
 0x522   : > { %v3514_v51 = vpop.permute.xlu1 %3513 }
 0x523   : > { %3590 = vst.msk [vmem:[#allocation3 + $0x98] sm:$0xff] %vm1470_vm8, %v3514_v51  ;;  %v3512_v62 = vpop.permute.xlu0 %3511 }
 0x524   : > { %3589 = vst.msk [vmem:[#allocation3 + $0x90] sm:$0xff] %vm1470_vm8, %v3512_v62  ;;  %3713 = vrot.lane.b32.xlu1 %v3626_v7, %s7625_s8 }
 0x525   : > { %3711 = vrot.lane.b32.xlu0 %v3625_v29, %s7625_s8 }
 0x526   : > { %v3518_v22 = vpop.permute.xlu1 %3517 }
 0x527   : > { %3592 = vst.msk [vmem:[#allocation3 + $0xa8] sm:$0xff] %vm1470_vm8, %v3518_v22  ;;  %v3516_v50 = vpop.permute.xlu0 %3515 }
 0x528   : > { %3591 = vst.msk [vmem:[#allocation3 + $0xa0] sm:$0xff] %vm1470_vm8, %v3516_v50  ;;  %3905 = vrot.lane.b32.xlu1 %v3818_v63, %s7626_s28 }
 0x529   : > { %3903 = vrot.lane.b32.xlu0 %v3817_v25, %s7626_s28 }
 0x52a   : > { %v3522_v5 = vpop.permute.xlu1 %3521 }
 0x52b   : > { %3594 = vst.msk [vmem:[#allocation3 + $0xb8] sm:$0xff] %vm1470_vm8, %v3522_v5  ;;  %v3520_v60 = vpop.permute.xlu0 %3519 }
 0x52c   : > { %3593 = vst.msk [vmem:[#allocation3 + $0xb0] sm:$0xff] %vm1470_vm8, %v3520_v60  ;;  %3717 = vrot.lane.b32.xlu1 %v3628_v48, %s7625_s8 }
 0x52d   : > { %3715 = vrot.lane.b32.xlu0 %v3627_v18, %s7625_s8 }
 0x52e   : > { %v3526_v4 = vpop.permute.xlu1 %3525 }
 0x52f   : > { %3596 = vst.msk [vmem:[#allocation3 + $0xc8] sm:$0xff] %vm1470_vm8, %v3526_v4  ;;  %v3524_v2 = vpop.permute.xlu0 %3523 }
 0x530   : > { %3595 = vst.msk [vmem:[#allocation3 + $0xc0] sm:$0xff] %vm1470_vm8, %v3524_v2  ;;  %3909 = vrot.lane.b32.xlu1 %v3820_v6, %s7626_s28 }
 0x531   : > { %3907 = vrot.lane.b32.xlu0 %v3819_v37, %s7626_s28 }
 0x532   : > { %v3530_v28 = vpop.permute.xlu1 %3529 }
 0x533   : > { %3598 = vst.msk [vmem:[#allocation3 + $0xd8] sm:$0xff] %vm1470_vm8, %v3530_v28  ;;  %v3528_v19 = vpop.permute.xlu0 %3527 }
 0x534   : > { %3597 = vst.msk [vmem:[#allocation3 + $0xd0] sm:$0xff] %vm1470_vm8, %v3528_v19  ;;  %3721 = vrot.lane.b32.xlu1 %v3630_v32, %s7625_s8 }
 0x535   : > { %3719 = vrot.lane.b32.xlu0 %v3629_v41, %s7625_s8 }
 0x536   : > { %v3534_v14 = vpop.permute.xlu1 %3533 }
 0x537   : > { %3600 = vst.msk [vmem:[#allocation3 + $0xe8] sm:$0xff] %vm1470_vm8, %v3534_v14  ;;  %v3532_v9 = vpop.permute.xlu0 %3531 }
 0x538   : > { %3599 = vst.msk [vmem:[#allocation3 + $0xe0] sm:$0xff] %vm1470_vm8, %v3532_v9  ;;  %3913 = vrot.lane.b32.xlu1 %v3822_v54, %s7626_s28 }
 0x539   : > { %3911 = vrot.lane.b32.xlu0 %v3821_v59, %s7626_s28 }
 0x53a   : > { %v3538_v36 = vpop.permute.xlu1 %3537 }
 0x53b   : > { %3602 = vst.msk [vmem:[#allocation3 + $0xf8] sm:$0xff] %vm1470_vm8, %v3538_v36  ;;  %v3536_v44 = vpop.permute.xlu0 %3535 }
 0x53c   : > { %3601 = vst.msk [vmem:[#allocation3 + $0xf0] sm:$0xff] %vm1470_vm8, %v3536_v44  ;;  %3725 = vrot.lane.b32.xlu1 %v9552_v27, %s7625_s8 }
 0x53d   : > { %3723 = vrot.lane.b32.xlu0 %v9557_v8, %s7625_s8  ;;  %v3826_v8 = vld [vmem:[#allocation2 + $0x1a2] sm:$0xff] }
 0x53e   : > { %v3670_v42 = vpop.permute.xlu1 %3669 }
 0x53f   : > { %3764 = vst.msk [vmem:[#allocation3 + $0x8] sm:$0xff] %vm1663_vm10, %v3670_v42  ;;  %v3668_v34 = vpop.permute.xlu0 %3667 }
 0x540   : > { %3763 = vst.msk [vmem:[#allocation3] sm:$0xff] %vm1663_vm10, %v3668_v34  ;;  %3917 = vrot.lane.b32.xlu1 %v9652_v45, %s7626_s28 }
 0x541   : > { %3915 = vrot.lane.b32.xlu0 %v9657_v1, %s7626_s28 }
 0x542   : > { %v3674_v35 = vpop.permute.xlu1 %3673 }
 0x543   : > { %3766 = vst.msk [vmem:[#allocation3 + $0x18] sm:$0xff] %vm1663_vm10, %v3674_v35  ;;  %v3672_v27 = vpop.permute.xlu0 %3671 }
 0x544   : > { %3765 = vst.msk [vmem:[#allocation3 + $0x10] sm:$0xff] %vm1663_vm10, %v3672_v27  ;;  %3729 = vrot.lane.b32.xlu1 %v3634_v0, %s7625_s8 }
 0x545   : > { %3727 = vrot.lane.b32.xlu0 %v3633_v21, %s7625_s8 }
 0x546   : > { %v3860_v43 = vpop.permute.xlu1 %3859 }
 0x547   : > { %3955 = vst.msk [vmem:[#allocation3] sm:$0xff] %vm1856_vm11, %v3860_v43  ;;  %v3676_v45 = vpop.permute.xlu0 %3675 }
 0x548   : > { %3767 = vst.msk [vmem:[#allocation3 + $0x20] sm:$0xff] %vm1663_vm10, %v3676_v45  ;;  %3921 = vrot.lane.b32.xlu1 %v3826_v8, %s7626_s28 }
 0x549   : > { %3919 = vrot.lane.b32.xlu0 %v3825_v11, %s7626_s28 }
 0x54a   : > { %v3864_v1 = vpop.permute.xlu1 %3863 }
 0x54b   : > { %3957 = vst.msk [vmem:[#allocation3 + $0x10] sm:$0xff] %vm1856_vm11, %v3864_v1  ;;  %v3862_v20 = vpop.permute.xlu0 %3861 }
 0x54c   : > { %3956 = vst.msk [vmem:[#allocation3 + $0x8] sm:$0xff] %vm1856_vm11, %v3862_v20 }
 0x54e   : > { %v3678_v12 = vpop.permute.xlu1 %3677  ;;  %v3987_v52 = vld [vmem:[#allocation3] sm:$0xff] }
 0x54f   : > { %3768 = vst.msk [vmem:[#allocation3 + $0x28] sm:$0xff] %vm1663_vm10, %v3678_v12  ;;  %7362 = vmatprep.mubr.msk.f32.mxu1 %vm1933_vm12, %v3987_v52  ;;  %v3866_v61 = vpop.permute.xlu0 %3865 }
 0x550   : > { %3958 = vst.msk [vmem:[#allocation3 + $0x18] sm:$0xff] %vm1856_vm11, %v3866_v61 }
 0x552   : > { %v3870_v33 = vpop.permute.xlu1 %3869  ;;  %v3989_v16 = vld [vmem:[#allocation3 + $0x10] sm:$0xff] }
 0x553   : > { %3960 = vst.msk [vmem:[#allocation3 + $0x28] sm:$0xff] %vm1856_vm11, %v3870_v33  ;;  %v3868_v13 = vpop.permute.xlu0 %3867  ;;  %v3988_v31 = vld [vmem:[#allocation3 + $0x8] sm:$0xff] }
 0x554   : > { %3959 = vst.msk [vmem:[#allocation3 + $0x20] sm:$0xff] %vm1856_vm11, %v3868_v13  ;;  %7363 = vmatmul.mubr.msk.f32.vlgmr.msra.gmra.mrb[16].mxu1 %vm1933_vm12, %v3988_v31 }
 0x555   : > { %7365 = vmatprep.mubr.msk.f32.mxu1 %vm1933_vm12, %v3989_v16 }
 0x556   : > { %v3682_v55 = vpop.permute.xlu1 %3681 }
 0x557   : > { %3770 = vst.msk [vmem:[#allocation3 + $0x38] sm:$0xff] %vm1663_vm10, %v3682_v55  ;;  %v3680_v38 = vpop.permute.xlu0 %3679  ;;  %v3990_v53 = vld [vmem:[#allocation3 + $0x18] sm:$0xff] }
 0x558   : > { %3769 = vst.msk [vmem:[#allocation3 + $0x30] sm:$0xff] %vm1663_vm10, %v3680_v38  ;;  %7366 = vmatmul.mubr.msk.f32.gmra.mrb[18].mxu1 %vm1933_vm12, %v3990_v53 }
 0x55a   : > { %v3874_v23 = vpop.permute.xlu1 %3873  ;;  %v3992_v17 = vld [vmem:[#allocation3 + $0x28] sm:$0xff] }
 0x55b   : > { %3962 = vst.msk [vmem:[#allocation3 + $0x38] sm:$0xff] %vm1856_vm11, %v3874_v23  ;;  %v3872_v26 = vpop.permute.xlu0 %3871  ;;  %v3991_v57 = vld [vmem:[#allocation3 + $0x20] sm:$0xff] }
 0x55c   : > { %3961 = vst.msk [vmem:[#allocation3 + $0x30] sm:$0xff] %vm1856_vm11, %v3872_v26  ;;  %7368 = vmatprep.mubr.msk.f32.mxu1 %vm1933_vm12, %v3991_v57 }
 0x55d   : > { %7369 = vmatmul.mubr.msk.f32.gmra.mrb[20].mxu1 %vm1933_vm12, %v3992_v17 }
 0x55e   : > { %v3686_v56 = vpop.permute.xlu1 %3685 }
 0x55f   : > { %3772 = vst.msk [vmem:[#allocation3 + $0x48] sm:$0xff] %vm1663_vm10, %v3686_v56  ;;  %v3684_v40 = vpop.permute.xlu0 %3683 }
 0x560   : > { %3771 = vst.msk [vmem:[#allocation3 + $0x40] sm:$0xff] %vm1663_vm10, %v3684_v40  ;;  %v4550_v40 = vld [vmem:[#allocation2 + $0x9] sm:$0xff] }
 0x561   : > { %4615 = vrot.lane.b32.xlu1 %v4550_v40, %s7619_s29 }
 0x562   : > { %v3878_v47 = vpop.permute.xlu1 %3877  ;;  %v3994_v24 = vld [vmem:[#allocation3 + $0x38] sm:$0xff] }
 0x563   : > { %3964 = vst.msk [vmem:[#allocation3 + $0x48] sm:$0xff] %vm1856_vm11, %v3878_v47  ;;  %v3876_v46 = vpop.permute.xlu0 %3875  ;;  %v3993_v58 = vld [vmem:[#allocation3 + $0x30] sm:$0xff] }
 0x564   : > { %3963 = vst.msk [vmem:[#allocation3 + $0x40] sm:$0xff] %vm1856_vm11, %v3876_v46  ;;  %7371 = vmatprep.mubr.msk.f32.mxu1 %vm1933_vm12, %v3993_v58  ;;  %v4549_v46 = vld [vmem:[#allocation2 + $0x1] sm:$0xff] }
 0x565   : > { %7372 = vmatmul.mubr.msk.f32.gmra.mrb[22].mxu1 %vm1933_vm12, %v3994_v24  ;;  %4613 = vrot.lane.b32.xlu0 %v4549_v46, %s7619_s29 }
 0x566   : > { %v3690_v15 = vpop.permute.xlu1 %3689 }
 0x567   : > { %3774 = vst.msk [vmem:[#allocation3 + $0x58] sm:$0xff] %vm1663_vm10, %v3690_v15  ;;  %v3688_v30 = vpop.permute.xlu0 %3687 }
 0x568   : > { %3773 = vst.msk [vmem:[#allocation3 + $0x50] sm:$0xff] %vm1663_vm10, %v3688_v30 }
 0x56a   : > { %v3882_v3 = vpop.permute.xlu1 %3881  ;;  %v3996_v39 = vld [vmem:[#allocation3 + $0x48] sm:$0xff] }
 0x56b   : > { %3966 = vst.msk [vmem:[#allocation3 + $0x58] sm:$0xff] %vm1856_vm11, %v3882_v3  ;;  %v3880_v10 = vpop.permute.xlu0 %3879  ;;  %v3995_v49 = vld [vmem:[#allocation3 + $0x40] sm:$0xff] }
 0x56c   : > { %3965 = vst.msk [vmem:[#allocation3 + $0x50] sm:$0xff] %vm1856_vm11, %v3880_v10  ;;  %7374 = vmatprep.mubr.msk.f32.mxu1 %vm1933_vm12, %v3995_v49 }
 0x56d   : > { %7375 = vmatmul.mubr.msk.f32.gmra.mrb[24].mxu1 %vm1933_vm12, %v3996_v39  ;;  %v4486_v39 = vld [vmem:[#allocation2 + $0x8] sm:$0xff] }
 0x56e   : > { %v3694_v51 = vpop.permute.xlu1 %3693  ;;  %4518 = vst.msk [vmem:[#allocation3 + $0x8] sm:$0xff] %vm169_vm0, %v4486_v39 }
 0x56f   : > { %3776 = vst.msk [vmem:[#allocation3 + $0x68] sm:$0xff] %vm1663_vm10, %v3694_v51  ;;  %v3692_v62 = vpop.permute.xlu0 %3691 }
 0x570   : > { %3775 = vst.msk [vmem:[#allocation3 + $0x60] sm:$0xff] %vm1663_vm10, %v3692_v62  ;;  %v4485_v62 = vld [vmem:[#allocation2] sm:$0xff] }
 0x571   : > { %4517 = vst.msk [vmem:[#allocation3] sm:$0xff] %vm169_vm0, %v4485_v62 }
 0x572   : > { %v3886_v7 = vpop.permute.xlu1 %3885  ;;  %v3998_v50 = vld [vmem:[#allocation3 + $0x58] sm:$0xff] }
 0x573   : > { %3968 = vst.msk [vmem:[#allocation3 + $0x68] sm:$0xff] %vm1856_vm11, %v3886_v7  ;;  %v3884_v29 = vpop.permute.xlu0 %3883  ;;  %v3997_v22 = vld [vmem:[#allocation3 + $0x50] sm:$0xff] }
 0x574   : > { %3967 = vst.msk [vmem:[#allocation3 + $0x60] sm:$0xff] %vm1856_vm11, %v3884_v29  ;;  %7377 = vmatprep.mubr.msk.f32.mxu1 %vm1933_vm12, %v3997_v22  ;;  %v10001_v7 = vld [vmem:[%s11444_s2 + $0x1] ss:$0 sm:$0xff] }
 0x575   : > { %7378 = vmatmul.mubr.msk.f32.gmra.mrb[26].mxu1 %vm1933_vm12, %v3998_v50 }
 0x576   : > { %v3698_v63 = vpop.permute.xlu1 %3697 }
 0x577   : > { %3778 = vst.msk [vmem:[#allocation3 + $0x78] sm:$0xff] %vm1663_vm10, %v3698_v63  ;;  %v3696_v25 = vpop.permute.xlu0 %3695 }
 0x578   : > { %3777 = vst.msk [vmem:[#allocation3 + $0x70] sm:$0xff] %vm1663_vm10, %v3696_v25 }
 0x57a   : > { %v3890_v5 = vpop.permute.xlu1 %3889  ;;  %v4000_v18 = vld [vmem:[#allocation3 + $0x68] sm:$0xff] }
 0x57b   : > { %3970 = vst.msk [vmem:[#allocation3 + $0x78] sm:$0xff] %vm1856_vm11, %v3890_v5  ;;  %v3888_v60 = vpop.permute.xlu0 %3887  ;;  %v3999_v48 = vld [vmem:[#allocation3 + $0x60] sm:$0xff] }
 0x57c   : > { %3969 = vst.msk [vmem:[#allocation3 + $0x70] sm:$0xff] %vm1856_vm11, %v3888_v60  ;;  %7380 = vmatprep.mubr.msk.f32.mxu1 %vm1933_vm12, %v3999_v48 }
 0x57d   : > { %7381 = vmatmul.mubr.msk.f32.gmra.mrb[28].mxu1 %vm1933_vm12, %v4000_v18 }
 0x57e   : > { %v3702_v4 = vpop.permute.xlu1 %3701 }
 0x57f   : > { %3780 = vst.msk [vmem:[#allocation3 + $0x88] sm:$0xff] %vm1663_vm10, %v3702_v4  ;;  %v3700_v2 = vpop.permute.xlu0 %3699 }
 0x580   : > { %3779 = vst.msk [vmem:[#allocation3 + $0x80] sm:$0xff] %vm1663_vm10, %v3700_v2 }
 0x582   : > { %v3894_v6 = vpop.permute.xlu1 %3893  ;;  %v4002_v19 = vld [vmem:[#allocation3 + $0x78] sm:$0xff] }
 0x583   : > { %3972 = vst.msk [vmem:[#allocation3 + $0x88] sm:$0xff] %vm1856_vm11, %v3894_v6  ;;  %v3892_v37 = vpop.permute.xlu0 %3891  ;;  %v4001_v28 = vld [vmem:[#allocation3 + $0x70] sm:$0xff] }
 0x584   : > { %3971 = vst.msk [vmem:[#allocation3 + $0x80] sm:$0xff] %vm1856_vm11, %v3892_v37  ;;  %7383 = vmatprep.mubr.msk.f32.mxu1 %vm1933_vm12, %v4001_v28 }
 0x585   : > { %7384 = vmatmul.mubr.msk.f32.gmra.mrb[30].mxu1 %vm1933_vm12, %v4002_v19 }
 0x586   : > { %v3706_v32 = vpop.permute.xlu1 %3705 }
 0x587   : > { %3782 = vst.msk [vmem:[#allocation3 + $0x98] sm:$0xff] %vm1663_vm10, %v3706_v32  ;;  %v3704_v41 = vpop.permute.xlu0 %3703 }
 0x588   : > { %3781 = vst.msk [vmem:[#allocation3 + $0x90] sm:$0xff] %vm1663_vm10, %v3704_v41 }
 0x58a   : > { %v3898_v14 = vpop.permute.xlu1 %3897  ;;  %v4004_v59 = vld [vmem:[#allocation3 + $0x88] sm:$0xff] }
 0x58b   : > { %3974 = vst.msk [vmem:[#allocation3 + $0x98] sm:$0xff] %vm1856_vm11, %v3898_v14  ;;  %v3896_v9 = vpop.permute.xlu0 %3895  ;;  %v4003_v54 = vld [vmem:[#allocation3 + $0x80] sm:$0xff] }
 0x58c   : > { %3973 = vst.msk [vmem:[#allocation3 + $0x90] sm:$0xff] %vm1856_vm11, %v3896_v9  ;;  %7386 = vmatprep.mubr.msk.f32.mxu1 %vm1933_vm12, %v4003_v54 }
 0x58d   : > { %7387 = vmatmul.mubr.msk.f32.gmra.mrb[32].mxu1 %vm1933_vm12, %v4004_v59 }
 0x58e   : > { %v3710_v36 = vpop.permute.xlu1 %3709 }
 0x58f   : > { %3784 = vst.msk [vmem:[#allocation3 + $0xa8] sm:$0xff] %vm1663_vm10, %v3710_v36  ;;  %v3708_v44 = vpop.permute.xlu0 %3707 }
 0x590   : > { %3783 = vst.msk [vmem:[#allocation3 + $0xa0] sm:$0xff] %vm1663_vm10, %v3708_v44 }
 0x592   : > { %v3902_v42 = vpop.permute.xlu1 %3901  ;;  %v4006_v35 = vld [vmem:[#allocation3 + $0x98] sm:$0xff] }
 0x593   : > { %3976 = vst.msk [vmem:[#allocation3 + $0xa8] sm:$0xff] %vm1856_vm11, %v3902_v42  ;;  %v3900_v34 = vpop.permute.xlu0 %3899  ;;  %v4005_v0 = vld [vmem:[#allocation3 + $0x90] sm:$0xff] }
 0x594   : > { %3975 = vst.msk [vmem:[#allocation3 + $0xa0] sm:$0xff] %vm1856_vm11, %v3900_v34  ;;  %7389 = vmatprep.mubr.msk.f32.mxu1 %vm1933_vm12, %v4005_v0 }
 0x595   : > { %7390 = vmatmul.mubr.msk.f32.gmra.mrb[34].mxu1 %vm1933_vm12, %v4006_v35 }
 0x596   : > { %v3714_v21 = vpop.permute.xlu1 %3713 }
 0x597   : > { %3786 = vst.msk [vmem:[#allocation3 + $0xb8] sm:$0xff] %vm1663_vm10, %v3714_v21  ;;  %v3712_v27 = vpop.permute.xlu0 %3711 }
 0x598   : > { %3785 = vst.msk [vmem:[#allocation3 + $0xb0] sm:$0xff] %vm1663_vm10, %v3712_v27 }
 0x59a   : > { %v3906_v8 = vpop.permute.xlu1 %3905  ;;  %v4008_v45 = vld [vmem:[#allocation3 + $0xa8] sm:$0xff] }
 0x59b   : > { %3978 = vst.msk [vmem:[#allocation3 + $0xb8] sm:$0xff] %vm1856_vm11, %v3906_v8  ;;  %v3904_v43 = vpop.permute.xlu0 %3903  ;;  %v4007_v11 = vld [vmem:[#allocation3 + $0xa0] sm:$0xff] }
 0x59c   : > { %3977 = vst.msk [vmem:[#allocation3 + $0xb0] sm:$0xff] %vm1856_vm11, %v3904_v43  ;;  %7392 = vmatprep.mubr.msk.f32.mxu1 %vm1933_vm12, %v4007_v11 }
 0x59d   : > { %7393 = vmatmul.mubr.msk.f32.gmra.mrb[36].mxu1 %vm1933_vm12, %v4008_v45 }
 0x59e   : > { %v3718_v1 = vpop.permute.xlu1 %3717 }
 0x59f   : > { %3788 = vst.msk [vmem:[#allocation3 + $0xc8] sm:$0xff] %vm1663_vm10, %v3718_v1  ;;  %v3716_v20 = vpop.permute.xlu0 %3715 }
 0x5a0   : > { %3787 = vst.msk [vmem:[#allocation3 + $0xc0] sm:$0xff] %vm1663_vm10, %v3716_v20 }
 0x5a2   : > { %v3910_v12 = vpop.permute.xlu1 %3909  ;;  %v4010_v33 = vld [vmem:[#allocation3 + $0xb8] sm:$0xff] }
 0x5a3   : > { %3980 = vst.msk [vmem:[#allocation3 + $0xc8] sm:$0xff] %vm1856_vm11, %v3910_v12  ;;  %v3908_v52 = vpop.permute.xlu0 %3907  ;;  %v4009_v61 = vld [vmem:[#allocation3 + $0xb0] sm:$0xff] }
 0x5a4   : > { %3979 = vst.msk [vmem:[#allocation3 + $0xc0] sm:$0xff] %vm1856_vm11, %v3908_v52  ;;  %7395 = vmatprep.mubr.msk.f32.mxu1 %vm1933_vm12, %v4009_v61 }
 0x5a5   : > { %7396 = vmatmul.mubr.msk.f32.gmra.mrb[38].mxu1 %vm1933_vm12, %v4010_v33 }
 0x5a6   : > { %v3722_v13 = vpop.permute.xlu1 %3721 }
 0x5a7   : > { %3790 = vst.msk [vmem:[#allocation3 + $0xd8] sm:$0xff] %vm1663_vm10, %v3722_v13  ;;  %v3720_v31 = vpop.permute.xlu0 %3719 }
 0x5a8   : > { %3789 = vst.msk [vmem:[#allocation3 + $0xd0] sm:$0xff] %vm1663_vm10, %v3720_v31 }
 0x5aa   : > { %v3914_v16 = vpop.permute.xlu1 %3913  ;;  %v4012_v53 = vld [vmem:[#allocation3 + $0xc8] sm:$0xff] }
 0x5ab   : > { %3982 = vst.msk [vmem:[#allocation3 + $0xd8] sm:$0xff] %vm1856_vm11, %v3914_v16  ;;  %v3912_v55 = vpop.permute.xlu0 %3911  ;;  %v4011_v38 = vld [vmem:[#allocation3 + $0xc0] sm:$0xff] }
 0x5ac   : > { %3981 = vst.msk [vmem:[#allocation3 + $0xd0] sm:$0xff] %vm1856_vm11, %v3912_v55  ;;  %7398 = vmatprep.mubr.msk.f32.mxu1 %vm1933_vm12, %v4011_v38 }
 0x5ad   : > { %7399 = vmatmul.mubr.msk.f32.gmra.mrb[40].mxu1 %vm1933_vm12, %v4012_v53 }
 0x5ae   : > { %v3726_v23 = vpop.permute.xlu1 %3725 }
 0x5af   : > { %3792 = vst.msk [vmem:[#allocation3 + $0xe8] sm:$0xff] %vm1663_vm10, %v3726_v23  ;;  %v3724_v26 = vpop.permute.xlu0 %3723 }
 0x5b0   : > { %3791 = vst.msk [vmem:[#allocation3 + $0xe0] sm:$0xff] %vm1663_vm10, %v3724_v26 }
 0x5b2   : > { %v3918_v57 = vpop.permute.xlu1 %3917  ;;  %v4014_v47 = vld [vmem:[#allocation3 + $0xd8] sm:$0xff] }
 0x5b3   : > { %3984 = vst.msk [vmem:[#allocation3 + $0xe8] sm:$0xff] %vm1856_vm11, %v3918_v57  ;;  %v3916_v17 = vpop.permute.xlu0 %3915  ;;  %v4013_v56 = vld [vmem:[#allocation3 + $0xd0] sm:$0xff] }
 0x5b4   : > { %3983 = vst.msk [vmem:[#allocation3 + $0xe0] sm:$0xff] %vm1856_vm11, %v3916_v17  ;;  %7401 = vmatprep.mubr.msk.f32.mxu1 %vm1933_vm12, %v4013_v56 }
 0x5b5   : > { %7402 = vmatmul.mubr.msk.f32.gmra.mrb[42].mxu1 %vm1933_vm12, %v4014_v47 }
 0x5b6   : > { %v3730_v15 = vpop.permute.xlu1 %3729 }
 0x5b7   : > { %v3728_v30 = vpop.permute.xlu0 %3727  ;;  %3794 = vst.msk [vmem:[#allocation3 + $0xf8] sm:$0xff] %vm1663_vm10, %v3730_v15 }
 0x5b8   : > { %3793 = vst.msk [vmem:[#allocation3 + $0xf0] sm:$0xff] %vm1663_vm10, %v3728_v30 }
 0x5ba   : > { %v4016_v24 = vld [vmem:[#allocation3 + $0xe8] sm:$0xff]  ;;  %v3922_v3 = vpop.permute.xlu1 %3921 }
 0x5bb   : > { %v4015_v58 = vld [vmem:[#allocation3 + $0xe0] sm:$0xff]  ;;  %v3920_v10 = vpop.permute.xlu0 %3919  ;;  %3986 = vst.msk [vmem:[#allocation3 + $0xf8] sm:$0xff] %vm1856_vm11, %v3922_v3 }
 0x5bc   : > { %7404 = vmatprep.mubr.msk.f32.mxu1 %vm1933_vm12, %v4015_v58  ;;  %3985 = vst.msk [vmem:[#allocation3 + $0xf0] sm:$0xff] %vm1856_vm11, %v3920_v10 }
 0x5bd   : > { %7405 = vmatmul.mubr.msk.f32.gmra.mrb[44].mxu1 %vm1933_vm12, %v4016_v24 }
 0x5c2   : > { %v4018_v51 = vld [vmem:[#allocation3 + $0xf8] sm:$0xff] }
 0x5c3   : > { %v4017_v49 = vld [vmem:[#allocation3 + $0xf0] sm:$0xff] }
 0x5c4   : > { %7407 = vmatprep.mubr.msk.f32.mxu1 %vm1933_vm12, %v4017_v49 }
 0x5c5   : > { %7408 = vmatmul.mubr.msk.f32.gmra.mrb[46].mxu1 %vm1933_vm12, %v4018_v51 }
 0x5d3   : > { %v4616_v29 = vpop.permute.xlu1 %4615 }
 0x5d4   : > { %4710 = vst.msk [vmem:[#allocation3 + $0x8] sm:$0xff] %vm504_vm3, %v4616_v29 }
 0x5d7   : > { %v4614_v50 = vpop.permute.xlu0 %4613 }
 0x5d8   : > { %4709 = vst.msk [vmem:[#allocation3] sm:$0xff] %vm504_vm3, %v4614_v50 }
 0x627   : > { %v7364_v22 = vpop.f32.mrb[16].mxu1 }
 0x628   : > { %v4204_v63 = vadd.f32 %v7364_v22, %v10001_v7  ;;  %v4198_v25 = vpop.f32.mrb[17].mxu1 }
 0x629   : > { %v4199_v5 = vadd.f32 %v10001_v7, %v4198_v25 }
 0x62a   : > { %vm4358_vm15 = vcmp.gt.f32.partialorder %v4204_v63, 0.0  ;;  %v4390_v60 = vmul.f32 0.2, %v4204_v63 }
 0x62b   : > { %vm4357_vm1 = vcmp.gt.f32.partialorder %v4199_v5, 0.0  ;;  %v4389_v48 = vmul.f32 0.2, %v4199_v5  ;;  %v7367_v18 = vpop.f32.mrb[18].mxu1 }
 0x62c   : > { %v4422_v4 = vsel %vm4358_vm15, %v4204_v63, %v4390_v60  ;;  %v4214_v2 = vadd.f32 %v7367_v18, %v10001_v7  ;;  %v4208_v6 = vpop.f32.mrb[19].mxu1 }
 0x62d   : > { %4454 = vst.msk [vmem:[#allocation2 + $0x21] sm:$0xff] %vm169_vm0, %v4422_v4  ;;  %v4421_v37 = vsel %vm4357_vm1, %v4199_v5, %v4389_v48  ;;  %v4209_v28 = vadd.f32 %v10001_v7, %v4208_v6 }
 0x62e   : > { %4453 = vst.msk [vmem:[#allocation2 + $0x19] sm:$0xff] %vm169_vm0, %v4421_v37  ;;  %vm4360_vm2 = vcmp.gt.f32.partialorder %v4214_v2, 0.0  ;;  %v4392_v19 = vmul.f32 0.2, %v4214_v2 }
 0x62f   : > { %vm4359_vm13 = vcmp.gt.f32.partialorder %v4209_v28, 0.0  ;;  %v4391_v32 = vmul.f32 0.2, %v4209_v28 }
 0x630   : > { %v4424_v41 = vsel %vm4360_vm2, %v4214_v2, %v4392_v19  ;;  %v7370_v14 = vpop.f32.mrb[20].mxu1 }
 0x631   : > { %4456 = vst.msk [vmem:[#allocation2 + $0x39] sm:$0xff] %vm169_vm0, %v4424_v41  ;;  %v4423_v9 = vsel %vm4359_vm13, %v4209_v28, %v4391_v32  ;;  %v4224_v54 = vadd.f32 %v7370_v14, %v10001_v7  ;;  %v4218_v59 = vpop.f32.mrb[21].mxu1 }
 0x632   : > { %4455 = vst.msk [vmem:[#allocation2 + $0x31] sm:$0xff] %vm169_vm0, %v4423_v9  ;;  %v4219_v36 = vadd.f32 %v10001_v7, %v4218_v59 }
 0x633   : > { %vm4362_vm14 = vcmp.gt.f32.partialorder %v4224_v54, 0.0  ;;  %v4394_v44 = vmul.f32 0.2, %v4224_v54 }
 0x634   : > { %vm4361_vm15 = vcmp.gt.f32.partialorder %v4219_v36, 0.0  ;;  %v4393_v42 = vmul.f32 0.2, %v4219_v36  ;;  %v10015_v34 = vld [vmem:[#allocation2 + $0x21] sm:$0xff] }
 0x635   : > { %v4426_v0 = vsel %vm4362_vm14, %v4224_v54, %v4394_v44  ;;  %4619 = vrot.lane.b32.xlu1 %v10015_v34, %s7619_s29  ;;  %v10019_v35 = vld [vmem:[#allocation2 + $0x19] sm:$0xff] }
 0x636   : > { %v10021_v21 = vld [vmem:[#allocation2 + $0x20] sm:$0xff]  ;;  %4458 = vst.msk [vmem:[#allocation2 + $0x51] sm:$0xff] %vm169_vm0, %v4426_v0  ;;  %v4425_v27 = vsel %vm4361_vm15, %v4219_v36, %v4393_v42  ;;  %4617 = vrot.lane.b32.xlu0 %v10019_v35, %s7619_s29  ;;  %v10028_v8 = vld [vmem:[#allocation2 + $0x18] sm:$0xff] }
 0x637   : > { %4520 = vst.msk [vmem:[#allocation3 + $0x18] sm:$0xff] %vm169_vm0, %v10021_v21  ;;  %4457 = vst.msk [vmem:[#allocation2 + $0x49] sm:$0xff] %vm169_vm0, %v4425_v27 }
 0x638   : > { %4519 = vst.msk [vmem:[#allocation3 + $0x10] sm:$0xff] %vm169_vm0, %v10028_v8  ;;  %v7373_v43 = vpop.f32.mrb[22].mxu1  ;;  %v10033_v11 = vld [vmem:[#allocation2 + $0x39] sm:$0xff] }
 0x639   : > { %v4234_v45 = vadd.f32 %v7373_v43, %v10001_v7  ;;  %4623 = vrot.lane.b32.xlu1 %v10033_v11, %s7619_s29  ;;  %v4228_v1 = vpop.f32.mrb[23].mxu1  ;;  %v10038_v20 = vld [vmem:[#allocation2 + $0x31] sm:$0xff] }
 0x63a   : > { %v10040_v12 = vld [vmem:[#allocation2 + $0x38] sm:$0xff]  ;;  %v4229_v52 = vadd.f32 %v10001_v7, %v4228_v1  ;;  %4621 = vrot.lane.b32.xlu0 %v10038_v20, %s7619_s29  ;;  %v10047_v61 = vld [vmem:[#allocation2 + $0x30] sm:$0xff] }
 0x63b   : > { %4522 = vst.msk [vmem:[#allocation3 + $0x28] sm:$0xff] %vm169_vm0, %v10040_v12  ;;  %vm4364_vm1 = vcmp.gt.f32.partialorder %v4234_v45, 0.0  ;;  %v4396_v33 = vmul.f32 0.2, %v4234_v45  ;;  %4521 = vst.msk [vmem:[#allocation3 + $0x20] sm:$0xff] %vm169_vm0, %v10047_v61 }
 0x63c   : > { %vm4363_vm2 = vcmp.gt.f32.partialorder %v4229_v52, 0.0  ;;  %v4395_v13 = vmul.f32 0.2, %v4229_v52 }
 0x63d   : > { %v4428_v31 = vsel %vm4364_vm1, %v4234_v45, %v4396_v33  ;;  %v10051_v16 = vld [vmem:[#allocation2 + $0x51] sm:$0xff] }
 0x63e   : > { %4460 = vst.msk [vmem:[#allocation2 + $0x69] sm:$0xff] %vm169_vm0, %v4428_v31  ;;  %v4427_v55 = vsel %vm4363_vm2, %v4229_v52, %v4395_v13  ;;  %4627 = vrot.lane.b32.xlu1 %v10051_v16, %s7619_s29  ;;  %v10056_v38 = vld [vmem:[#allocation2 + $0x49] sm:$0xff] }
 0x63f   : > { %v10058_v53 = vld [vmem:[#allocation2 + $0x50] sm:$0xff]  ;;  %4459 = vst.msk [vmem:[#allocation2 + $0x61] sm:$0xff] %vm169_vm0, %v4427_v55  ;;  %4625 = vrot.lane.b32.xlu0 %v10056_v38, %s7619_s29  ;;  %v10065_v23 = vld [vmem:[#allocation2 + $0x48] sm:$0xff] }
 0x640   : > { %4524 = vst.msk [vmem:[#allocation3 + $0x38] sm:$0xff] %vm169_vm0, %v10058_v53  ;;  %v7376_v26 = vpop.f32.mrb[24].mxu1  ;;  %4523 = vst.msk [vmem:[#allocation3 + $0x30] sm:$0xff] %vm169_vm0, %v10065_v23 }
 0x641   : > { %v4244_v57 = vadd.f32 %v7376_v26, %v10001_v7  ;;  %v4238_v17 = vpop.f32.mrb[25].mxu1 }
 0x642   : > { %v4239_v56 = vadd.f32 %v10001_v7, %v4238_v17 }
 0x643   : > { %vm4366_vm13 = vcmp.gt.f32.partialorder %v4244_v57, 0.0  ;;  %v4398_v40 = vmul.f32 0.2, %v4244_v57 }
 0x644   : > { %vm4365_vm14 = vcmp.gt.f32.partialorder %v4239_v56, 0.0  ;;  %v4397_v47 = vmul.f32 0.2, %v4239_v56 }
 0x645   : > { %v4430_v46 = vsel %vm4366_vm13, %v4244_v57, %v4398_v40  ;;  %v4558_v58 = vld [vmem:[#allocation2 + $0x69] sm:$0xff] }
 0x646   : > { %4462 = vst.msk [vmem:[#allocation2 + $0x81] sm:$0xff] %vm169_vm0, %v4430_v46  ;;  %v4429_v24 = vsel %vm4365_vm14, %v4239_v56, %v4397_v47  ;;  %4631 = vrot.lane.b32.xlu1 %v4558_v58, %s7619_s29  ;;  %v4557_v15 = vld [vmem:[#allocation2 + $0x61] sm:$0xff] }
 0x647   : > { %v10073_v30 = vld [vmem:[#allocation2 + $0x68] sm:$0xff]  ;;  %4461 = vst.msk [vmem:[#allocation2 + $0x79] sm:$0xff] %vm169_vm0, %v4429_v24  ;;  %4629 = vrot.lane.b32.xlu0 %v4557_v15, %s7619_s29  ;;  %v10079_v3 = vld [vmem:[#allocation2 + $0x60] sm:$0xff] }
 0x648   : > { %4526 = vst.msk [vmem:[#allocation3 + $0x48] sm:$0xff] %vm169_vm0, %v10073_v30  ;;  %v7379_v10 = vpop.f32.mrb[26].mxu1  ;;  %4525 = vst.msk [vmem:[#allocation3 + $0x40] sm:$0xff] %vm169_vm0, %v10079_v3 }
 0x649   : > { %v4254_v49 = vadd.f32 %v7379_v10, %v10001_v7  ;;  %v4248_v39 = vpop.f32.mrb[27].mxu1 }
 0x64a   : > { %v4249_v51 = vadd.f32 %v10001_v7, %v4248_v39 }
 0x64b   : > { %vm4368_vm15 = vcmp.gt.f32.partialorder %v4254_v49, 0.0  ;;  %v4400_v62 = vmul.f32 0.2, %v4254_v49 }
 0x64c   : > { %vm4367_vm1 = vcmp.gt.f32.partialorder %v4249_v51, 0.0  ;;  %v4399_v29 = vmul.f32 0.2, %v4249_v51 }
 0x64d   : > { %v4432_v22 = vsel %vm4368_vm15, %v4254_v49, %v4400_v62  ;;  %v4560_v50 = vld [vmem:[#allocation2 + $0x81] sm:$0xff] }
 0x64e   : > { %4464 = vst.msk [vmem:[#allocation2 + $0x99] sm:$0xff] %vm169_vm0, %v4432_v22  ;;  %v4431_v63 = vsel %vm4367_vm1, %v4249_v51, %v4399_v29  ;;  %4635 = vrot.lane.b32.xlu1 %v4560_v50, %s7619_s29  ;;  %v4559_v25 = vld [vmem:[#allocation2 + $0x79] sm:$0xff] }
 0x64f   : > { %v10087_v5 = vld [vmem:[#allocation2 + $0x80] sm:$0xff]  ;;  %4463 = vst.msk [vmem:[#allocation2 + $0x91] sm:$0xff] %vm169_vm0, %v4431_v63  ;;  %4633 = vrot.lane.b32.xlu0 %v4559_v25, %s7619_s29  ;;  %v10093_v60 = vld [vmem:[#allocation2 + $0x78] sm:$0xff] }
 0x650   : > { %4528 = vst.msk [vmem:[#allocation3 + $0x58] sm:$0xff] %vm169_vm0, %v10087_v5  ;;  %v7382_v48 = vpop.f32.mrb[28].mxu1  ;;  %4527 = vst.msk [vmem:[#allocation3 + $0x50] sm:$0xff] %vm169_vm0, %v10093_v60 }
 0x651   : > { %v4264_v18 = vadd.f32 %v7382_v48, %v10001_v7  ;;  %v4258_v4 = vpop.f32.mrb[29].mxu1 }
 0x652   : > { %v4259_v2 = vadd.f32 %v10001_v7, %v4258_v4 }
 0x653   : > { %vm4370_vm2 = vcmp.gt.f32.partialorder %v4264_v18, 0.0  ;;  %v4402_v6 = vmul.f32 0.2, %v4264_v18 }
 0x654   : > { %vm4369_vm13 = vcmp.gt.f32.partialorder %v4259_v2, 0.0  ;;  %v4401_v37 = vmul.f32 0.2, %v4259_v2 }
 0x655   : > { %v4434_v28 = vsel %vm4370_vm2, %v4264_v18, %v4402_v6  ;;  %v4562_v19 = vld [vmem:[#allocation2 + $0x99] sm:$0xff] }
 0x656   : > { %4466 = vst.msk [vmem:[#allocation2 + $0xb1] sm:$0xff] %vm169_vm0, %v4434_v28  ;;  %v4433_v32 = vsel %vm4369_vm13, %v4259_v2, %v4401_v37  ;;  %4639 = vrot.lane.b32.xlu1 %v4562_v19, %s7619_s29  ;;  %v4561_v41 = vld [vmem:[#allocation2 + $0x91] sm:$0xff] }
 0x657   : > { %v10101_v14 = vld [vmem:[#allocation2 + $0x98] sm:$0xff]  ;;  %4465 = vst.msk [vmem:[#allocation2 + $0xa9] sm:$0xff] %vm169_vm0, %v4433_v32  ;;  %4637 = vrot.lane.b32.xlu0 %v4561_v41, %s7619_s29  ;;  %v10107_v9 = vld [vmem:[#allocation2 + $0x90] sm:$0xff] }
 0x658   : > { %4530 = vst.msk [vmem:[#allocation3 + $0x68] sm:$0xff] %vm169_vm0, %v10101_v14  ;;  %v7385_v54 = vpop.f32.mrb[30].mxu1  ;;  %4529 = vst.msk [vmem:[#allocation3 + $0x60] sm:$0xff] %vm169_vm0, %v10107_v9 }
 0x659   : > { %v4274_v59 = vadd.f32 %v7385_v54, %v10001_v7  ;;  %v4268_v36 = vpop.f32.mrb[31].mxu1 }
 0x65a   : > { %v4269_v44 = vadd.f32 %v10001_v7, %v4268_v36 }
 0x65b   : > { %vm4372_vm14 = vcmp.gt.f32.partialorder %v4274_v59, 0.0  ;;  %v4404_v42 = vmul.f32 0.2, %v4274_v59 }
 0x65c   : > { %vm4371_vm15 = vcmp.gt.f32.partialorder %v4269_v44, 0.0  ;;  %v4403_v0 = vmul.f32 0.2, %v4269_v44 }
 0x65d   : > { %v4436_v27 = vsel %vm4372_vm14, %v4274_v59, %v4404_v42  ;;  %v4564_v43 = vld [vmem:[#allocation2 + $0xb1] sm:$0xff] }
 0x65e   : > { %4468 = vst.msk [vmem:[#allocation2 + $0xc9] sm:$0xff] %vm169_vm0, %v4436_v27  ;;  %v4435_v45 = vsel %vm4371_vm15, %v4269_v44, %v4403_v0  ;;  %4643 = vrot.lane.b32.xlu1 %v4564_v43, %s7619_s29  ;;  %v4563_v1 = vld [vmem:[#allocation2 + $0xa9] sm:$0xff] }
 0x65f   : > { %v10115_v52 = vld [vmem:[#allocation2 + $0xb0] sm:$0xff]  ;;  %4467 = vst.msk [vmem:[#allocation2 + $0xc1] sm:$0xff] %vm169_vm0, %v4435_v45  ;;  %4641 = vrot.lane.b32.xlu0 %v4563_v1, %s7619_s29  ;;  %v10121_v33 = vld [vmem:[#allocation2 + $0xa8] sm:$0xff] }
 0x660   : > { %4532 = vst.msk [vmem:[#allocation3 + $0x78] sm:$0xff] %vm169_vm0, %v10115_v52  ;;  %v7388_v13 = vpop.f32.mrb[32].mxu1  ;;  %4531 = vst.msk [vmem:[#allocation3 + $0x70] sm:$0xff] %vm169_vm0, %v10121_v33 }
 0x661   : > { %v4284_v31 = vadd.f32 %v7388_v13, %v10001_v7  ;;  %v4278_v55 = vpop.f32.mrb[33].mxu1 }
 0x662   : > { %v4279_v26 = vadd.f32 %v10001_v7, %v4278_v55 }
 0x663   : > { %vm4374_vm1 = vcmp.gt.f32.partialorder %v4284_v31, 0.0  ;;  %v4406_v57 = vmul.f32 0.2, %v4284_v31 }
 0x664   : > { %vm4373_vm2 = vcmp.gt.f32.partialorder %v4279_v26, 0.0  ;;  %v4405_v17 = vmul.f32 0.2, %v4279_v26 }
 0x665   : > { %v4438_v56 = vsel %vm4374_vm1, %v4284_v31, %v4406_v57  ;;  %v4566_v40 = vld [vmem:[#allocation2 + $0xc9] sm:$0xff] }
 0x666   : > { %4470 = vst.msk [vmem:[#allocation2 + $0xe1] sm:$0xff] %vm169_vm0, %v4438_v56  ;;  %v4437_v47 = vsel %vm4373_vm2, %v4279_v26, %v4405_v17  ;;  %4647 = vrot.lane.b32.xlu1 %v4566_v40, %s7619_s29  ;;  %v4565_v46 = vld [vmem:[#allocation2 + $0xc1] sm:$0xff] }
 0x667   : > { %v10129_v58 = vld [vmem:[#allocation2 + $0xc8] sm:$0xff]  ;;  %4469 = vst.msk [vmem:[#allocation2 + $0xd9] sm:$0xff] %vm169_vm0, %v4437_v47  ;;  %4645 = vrot.lane.b32.xlu0 %v4565_v46, %s7619_s29  ;;  %v10135_v24 = vld [vmem:[#allocation2 + $0xc0] sm:$0xff] }
 0x668   : > { %4534 = vst.msk [vmem:[#allocation3 + $0x88] sm:$0xff] %vm169_vm0, %v10129_v58  ;;  %v7391_v15 = vpop.f32.mrb[34].mxu1  ;;  %4533 = vst.msk [vmem:[#allocation3 + $0x80] sm:$0xff] %vm169_vm0, %v10135_v24 }
 0x669   : > { %v4294_v10 = vadd.f32 %v7391_v15, %v10001_v7  ;;  %v4288_v49 = vpop.f32.mrb[35].mxu1 }
 0x66a   : > { %v4289_v39 = vadd.f32 %v10001_v7, %v4288_v49 }
 0x66b   : > { %vm4376_vm13 = vcmp.gt.f32.partialorder %v4294_v10, 0.0  ;;  %v4408_v51 = vmul.f32 0.2, %v4294_v10 }
 0x66c   : > { %vm4375_vm14 = vcmp.gt.f32.partialorder %v4289_v39, 0.0  ;;  %v4407_v62 = vmul.f32 0.2, %v4289_v39 }
 0x66d   : > { %v4440_v29 = vsel %vm4376_vm13, %v4294_v10, %v4408_v51  ;;  %v4568_v22 = vld [vmem:[#allocation2 + $0xe1] sm:$0xff] }
 0x66e   : > { %4472 = vst.msk [vmem:[#allocation2 + $0xf9] sm:$0xff] %vm169_vm0, %v4440_v29  ;;  %v4439_v50 = vsel %vm4375_vm14, %v4289_v39, %v4407_v62  ;;  %4651 = vrot.lane.b32.xlu1 %v4568_v22, %s7619_s29  ;;  %v4567_v63 = vld [vmem:[#allocation2 + $0xd9] sm:$0xff] }
 0x66f   : > { %v10143_v25 = vld [vmem:[#allocation2 + $0xe0] sm:$0xff]  ;;  %4471 = vst.msk [vmem:[#allocation2 + $0xf1] sm:$0xff] %vm169_vm0, %v4439_v50  ;;  %4649 = vrot.lane.b32.xlu0 %v4567_v63, %s7619_s29  ;;  %v10149_v48 = vld [vmem:[#allocation2 + $0xd8] sm:$0xff] }
 0x670   : > { %4536 = vst.msk [vmem:[#allocation3 + $0x98] sm:$0xff] %vm169_vm0, %v10143_v25  ;;  %v7394_v18 = vpop.f32.mrb[36].mxu1  ;;  %4535 = vst.msk [vmem:[#allocation3 + $0x90] sm:$0xff] %vm169_vm0, %v10149_v48 }
 0x671   : > { %v4304_v4 = vadd.f32 %v7394_v18, %v10001_v7  ;;  %v4298_v2 = vpop.f32.mrb[37].mxu1 }
 0x672   : > { %v4299_v6 = vadd.f32 %v10001_v7, %v4298_v2 }
 0x673   : > { %vm4378_vm15 = vcmp.gt.f32.partialorder %v4304_v4, 0.0  ;;  %v4410_v37 = vmul.f32 0.2, %v4304_v4 }
 0x674   : > { %vm4377_vm1 = vcmp.gt.f32.partialorder %v4299_v6, 0.0  ;;  %v4409_v28 = vmul.f32 0.2, %v4299_v6 }
 0x675   : > { %v4442_v19 = vsel %vm4378_vm15, %v4304_v4, %v4410_v37  ;;  %v4570_v32 = vld [vmem:[#allocation2 + $0xf9] sm:$0xff] }
 0x676   : > { %4474 = vst.msk [vmem:[#allocation2 + $0x111] sm:$0xff] %vm169_vm0, %v4442_v19  ;;  %v4441_v41 = vsel %vm4377_vm1, %v4299_v6, %v4409_v28  ;;  %4655 = vrot.lane.b32.xlu1 %v4570_v32, %s7619_s29  ;;  %v4569_v54 = vld [vmem:[#allocation2 + $0xf1] sm:$0xff] }
 0x677   : > { %v10157_v59 = vld [vmem:[#allocation2 + $0xf8] sm:$0xff]  ;;  %4473 = vst.msk [vmem:[#allocation2 + $0x109] sm:$0xff] %vm169_vm0, %v4441_v41  ;;  %4653 = vrot.lane.b32.xlu0 %v4569_v54, %s7619_s29  ;;  %v10163_v36 = vld [vmem:[#allocation2 + $0xf0] sm:$0xff] }
 0x678   : > { %4538 = vst.msk [vmem:[#allocation3 + $0xa8] sm:$0xff] %vm169_vm0, %v10157_v59  ;;  %v7397_v44 = vpop.f32.mrb[38].mxu1  ;;  %4537 = vst.msk [vmem:[#allocation3 + $0xa0] sm:$0xff] %vm169_vm0, %v10163_v36 }
 0x679   : > { %v4314_v42 = vadd.f32 %v7397_v44, %v10001_v7  ;;  %v4308_v0 = vpop.f32.mrb[39].mxu1 }
 0x67a   : > { %v4309_v27 = vadd.f32 %v10001_v7, %v4308_v0 }
 0x67b   : > { %vm4380_vm2 = vcmp.gt.f32.partialorder %v4314_v42, 0.0  ;;  %v4412_v43 = vmul.f32 0.2, %v4314_v42 }
 0x67c   : > { %vm4379_vm13 = vcmp.gt.f32.partialorder %v4309_v27, 0.0  ;;  %v4411_v45 = vmul.f32 0.2, %v4309_v27 }
 0x67d   : > { %v4444_v1 = vsel %vm4380_vm2, %v4314_v42, %v4412_v43  ;;  %v4572_v13 = vld [vmem:[#allocation2 + $0x111] sm:$0xff] }
 0x67e   : > { %4476 = vst.msk [vmem:[#allocation2 + $0x129] sm:$0xff] %vm169_vm0, %v4444_v1  ;;  %v4443_v31 = vsel %vm4379_vm13, %v4309_v27, %v4411_v45  ;;  %4659 = vrot.lane.b32.xlu1 %v4572_v13, %s7619_s29  ;;  %v4571_v55 = vld [vmem:[#allocation2 + $0x109] sm:$0xff] }
 0x67f   : > { %v10171_v26 = vld [vmem:[#allocation2 + $0x110] sm:$0xff]  ;;  %4475 = vst.msk [vmem:[#allocation2 + $0x121] sm:$0xff] %vm169_vm0, %v4443_v31  ;;  %4657 = vrot.lane.b32.xlu0 %v4571_v55, %s7619_s29  ;;  %v10177_v57 = vld [vmem:[#allocation2 + $0x108] sm:$0xff] }
 0x680   : > { %4540 = vst.msk [vmem:[#allocation3 + $0xb8] sm:$0xff] %vm169_vm0, %v10171_v26  ;;  %v7400_v17 = vpop.f32.mrb[40].mxu1  ;;  %4539 = vst.msk [vmem:[#allocation3 + $0xb0] sm:$0xff] %vm169_vm0, %v10177_v57 }
 0x681   : > { %v4324_v56 = vadd.f32 %v7400_v17, %v10001_v7  ;;  %v4318_v40 = vpop.f32.mrb[41].mxu1 }
 0x682   : > { %v4319_v47 = vadd.f32 %v10001_v7, %v4318_v40 }
 0x683   : > { %vm4382_vm14 = vcmp.gt.f32.partialorder %v4324_v56, 0.0  ;;  %v4414_v46 = vmul.f32 0.2, %v4324_v56 }
 0x684   : > { %vm4381_vm15 = vcmp.gt.f32.partialorder %v4319_v47, 0.0  ;;  %v4413_v15 = vmul.f32 0.2, %v4319_v47 }
 0x685   : > { %v4446_v10 = vsel %vm4382_vm14, %v4324_v56, %v4414_v46  ;;  %v4574_v49 = vld [vmem:[#allocation2 + $0x129] sm:$0xff] }
 0x686   : > { %4478 = vst.msk [vmem:[#allocation2 + $0x141] sm:$0xff] %vm169_vm0, %v4446_v10  ;;  %v4445_v39 = vsel %vm4381_vm15, %v4319_v47, %v4413_v15  ;;  %4663 = vrot.lane.b32.xlu1 %v4574_v49, %s7619_s29  ;;  %v4573_v51 = vld [vmem:[#allocation2 + $0x121] sm:$0xff]  ;;  %v4742_v46 = vld [vmem:[#allocation2 + $0xa] sm:$0xff] }
 0x687   : > { %v10185_v62 = vld [vmem:[#allocation2 + $0x128] sm:$0xff]  ;;  %4477 = vst.msk [vmem:[#allocation2 + $0x139] sm:$0xff] %vm169_vm0, %v4445_v39  ;;  %4661 = vrot.lane.b32.xlu0 %v4573_v51, %s7619_s29  ;;  %v10191_v29 = vld [vmem:[#allocation2 + $0x120] sm:$0xff] }
 0x688   : > { %4542 = vst.msk [vmem:[#allocation3 + $0xc8] sm:$0xff] %vm169_vm0, %v10185_v62  ;;  %v7403_v22 = vpop.f32.mrb[42].mxu1  ;;  %4541 = vst.msk [vmem:[#allocation3 + $0xc0] sm:$0xff] %vm169_vm0, %v10191_v29  ;;  %v4741_v10 = vld [vmem:[#allocation2 + $0x2] sm:$0xff]  ;;  %v10224_v39 = vld [vmem:[#allocation2 + $0x1a] sm:$0xff] }
 0x689   : > { %v4334_v50 = vadd.f32 %v7403_v22, %v10001_v7  ;;  %v4328_v63 = vpop.f32.mrb[43].mxu1  ;;  %v10220_v49 = vld [vmem:[#allocation2 + $0x22] sm:$0xff] }
 0x68a   : > { %v4329_v18 = vadd.f32 %v10001_v7, %v4328_v63  ;;  %v10234_v63 = vld [vmem:[#allocation2 + $0x32] sm:$0xff] }
 0x68b   : > { %vm4384_vm1 = vcmp.gt.f32.partialorder %v4334_v50, 0.0  ;;  %v4416_v4 = vmul.f32 0.2, %v4334_v50 }
 0x68c   : > { %vm4383_vm2 = vcmp.gt.f32.partialorder %v4329_v18, 0.0  ;;  %v4415_v2 = vmul.f32 0.2, %v4329_v18 }
 0x68d   : > { %v4448_v6 = vsel %vm4384_vm1, %v4334_v50, %v4416_v4  ;;  %v4576_v37 = vld [vmem:[#allocation2 + $0x141] sm:$0xff]  ;;  %vm6507_vm1 = vcmask 1042434  }
 0x68e   : > { %4480 = vst.msk [vmem:[#allocation2 + $0x159] sm:$0xff] %vm169_vm0, %v4448_v6  ;;  %v4447_v28 = vsel %vm4383_vm2, %v4329_v18, %v4415_v2  ;;  %4667 = vrot.lane.b32.xlu1 %v4576_v37, %s7619_s29  ;;  %v4575_v19 = vld [vmem:[#allocation2 + $0x139] sm:$0xff]  ;;  %v10244_v6 = vld [vmem:[#allocation2 + $0x4a] sm:$0xff]  ;;  %vm6510_vm2 = vcmask 1043459  }
 0x68f   : > { %v4512_v32 = vld [vmem:[#allocation2 + $0x140] sm:$0xff]  ;;  %4479 = vst.msk [vmem:[#allocation2 + $0x151] sm:$0xff] %vm169_vm0, %v4447_v28  ;;  %4665 = vrot.lane.b32.xlu0 %v4575_v19, %s7619_s29  ;;  %v10202_v41 = vld [vmem:[#allocation2 + $0x138] sm:$0xff]  ;;  %v10249_v19 = vld [vmem:[#allocation2 + $0x6a] sm:$0xff] }
 0x690   : > { %4544 = vst.msk [vmem:[#allocation3 + $0xd8] sm:$0xff] %vm169_vm0, %v4512_v32  ;;  %v7406_v54 = vpop.f32.mrb[44].mxu1  ;;  %4543 = vst.msk [vmem:[#allocation3 + $0xd0] sm:$0xff] %vm169_vm0, %v10202_v41  ;;  %v10230_v50 = vld [vmem:[#allocation2 + $0x3a] sm:$0xff]  ;;  %v10240_v2 = vld [vmem:[#allocation2 + $0x52] sm:$0xff] }
 0x691   : > { %v4344_v44 = vadd.f32 %v7406_v54, %v10001_v7  ;;  %v4338_v42 = vpop.f32.mrb[45].mxu1  ;;  %v10254_v32 = vld [vmem:[#allocation2 + $0x62] sm:$0xff] }
 0x692   : > { %v4339_v0 = vadd.f32 %v10001_v7, %v4338_v42  ;;  %v10258_v54 = vld [vmem:[#allocation2 + $0x82] sm:$0xff] }
 0x693   : > { %vm4386_vm13 = vcmp.gt.f32.partialorder %v4344_v44, 0.0  ;;  %v4418_v27 = vmul.f32 0.2, %v4344_v44 }
 0x694   : > { %vm4385_vm14 = vcmp.gt.f32.partialorder %v4339_v0, 0.0  ;;  %v4417_v43 = vmul.f32 0.2, %v4339_v0 }
 0x695   : > { %v4450_v45 = vsel %vm4386_vm13, %v4344_v44, %v4418_v27  ;;  %v4578_v1 = vld [vmem:[#allocation2 + $0x159] sm:$0xff]  ;;  %vm6513_vm13 = vcmask 1044484  }
 0x696   : > { %4482 = vst.msk [vmem:[#allocation2 + $0x171] sm:$0xff] %vm169_vm0, %v4450_v45  ;;  %v4449_v13 = vsel %vm4385_vm14, %v4339_v0, %v4417_v43  ;;  %4671 = vrot.lane.b32.xlu1 %v4578_v1, %s7619_s29  ;;  %v4577_v31 = vld [vmem:[#allocation2 + $0x151] sm:$0xff]  ;;  %v10262_v44 = vld [vmem:[#allocation2 + $0x7a] sm:$0xff]  ;;  %vm6504_vm14 = vcmask 1041409  }
 0x697   : > { %v4514_v55 = vld [vmem:[#allocation2 + $0x158] sm:$0xff]  ;;  %4481 = vst.msk [vmem:[#allocation2 + $0x169] sm:$0xff] %vm169_vm0, %v4449_v13  ;;  %4669 = vrot.lane.b32.xlu0 %v4577_v31, %s7619_s29  ;;  %v4513_v17 = vld [vmem:[#allocation2 + $0x150] sm:$0xff] }
 0x698   : > { %4546 = vst.msk [vmem:[#allocation3 + $0xe8] sm:$0xff] %vm169_vm0, %v4514_v55  ;;  %4545 = vst.msk [vmem:[#allocation3 + $0xe0] sm:$0xff] %vm169_vm0, %v4513_v17  ;;  %v10267_v27 = vld [vmem:[#allocation2 + $0x9a] sm:$0xff]  ;;  %v10272_v43 = vld [vmem:[#allocation2 + $0x92] sm:$0xff] }
 0x699   : > { %v10276_v45 = vld [vmem:[#allocation2 + $0xb2] sm:$0xff]  ;;  %v10280_v1 = vld [vmem:[#allocation2 + $0xaa] sm:$0xff]  ;;  %v10290_v17 = vld [vmem:[#allocation2 + $0xc2] sm:$0xff] }
 0x69a   : > { %v10285_v55 = vld [vmem:[#allocation2 + $0xca] sm:$0xff] }
 0x69d   : > { %v4580_v56 = vld [vmem:[#allocation2 + $0x171] sm:$0xff] }
 0x69e   : > { %4675 = vrot.lane.b32.xlu1 %v4580_v56, %s7619_s29  ;;  %v4579_v40 = vld [vmem:[#allocation2 + $0x169] sm:$0xff] }
 0x69f   : > { %v4516_v47 = vld [vmem:[#allocation2 + $0x170] sm:$0xff]  ;;  %4673 = vrot.lane.b32.xlu0 %v4579_v40, %s7619_s29  ;;  %v4515_v15 = vld [vmem:[#allocation2 + $0x168] sm:$0xff]  ;;  %v10295_v40 = vld [vmem:[#allocation2 + $0xda] sm:$0xff] }
 0x6a0   : > { %4548 = vst.msk [vmem:[#allocation3 + $0xf8] sm:$0xff] %vm169_vm0, %v4516_v47  ;;  %4547 = vst.msk [vmem:[#allocation3 + $0xf0] sm:$0xff] %vm169_vm0, %v4515_v15  ;;  %v4760_v56 = vld [vmem:[#allocation2 + $0xe2] sm:$0xff]  ;;  %v4762_v15 = vld [vmem:[#allocation2 + $0xfa] sm:$0xff] }
 0x6a2   : > { %4807 = vrot.lane.b32.xlu1 %v4742_v46, %s7620_s30 }
 0x6a3   : > { %4805 = vrot.lane.b32.xlu0 %v4741_v10, %s7620_s30  ;;  %v4761_v10 = vld [vmem:[#allocation2 + $0xf2] sm:$0xff] }
 0x6a6   : > { %4811 = vrot.lane.b32.xlu1 %v10220_v49, %s7620_s30 }
 0x6a7   : > { %v4620_v51 = vpop.permute.xlu1 %4619  ;;  %4809 = vrot.lane.b32.xlu0 %v10224_v39, %s7620_s30 }
 0x6a8   : > { %4712 = vst.msk [vmem:[#allocation3 + $0x18] sm:$0xff] %vm504_vm3, %v4620_v51  ;;  %v4618_v22 = vpop.permute.xlu0 %4617  ;;  %v4764_v51 = vld [vmem:[#allocation2 + $0x112] sm:$0xff] }
 0x6a9   : > { %4711 = vst.msk [vmem:[#allocation3 + $0x10] sm:$0xff] %vm504_vm3, %v4618_v22  ;;  %v4763_v22 = vld [vmem:[#allocation2 + $0x10a] sm:$0xff] }
 0x6aa   : > { %4815 = vrot.lane.b32.xlu1 %v10230_v50, %s7620_s30 }
 0x6ab   : > { %v4624_v18 = vpop.permute.xlu1 %4623  ;;  %4813 = vrot.lane.b32.xlu0 %v10234_v63, %s7620_s30 }
 0x6ac   : > { %4714 = vst.msk [vmem:[#allocation3 + $0x28] sm:$0xff] %vm504_vm3, %v4624_v18  ;;  %v4622_v4 = vpop.permute.xlu0 %4621 }
 0x6ad   : > { %4713 = vst.msk [vmem:[#allocation3 + $0x20] sm:$0xff] %vm504_vm3, %v4622_v4 }
 0x6ae   : > { %4819 = vrot.lane.b32.xlu1 %v10240_v2, %s7620_s30 }
 0x6af   : > { %4817 = vrot.lane.b32.xlu0 %v10244_v6, %s7620_s30 }
 0x6b0   : > { %v4628_v37 = vpop.permute.xlu1 %4627 }
 0x6b1   : > { %4716 = vst.msk [vmem:[#allocation3 + $0x38] sm:$0xff] %vm504_vm3, %v4628_v37  ;;  %v4626_v28 = vpop.permute.xlu0 %4625  ;;  %v4766_v37 = vld [vmem:[#allocation2 + $0x12a] sm:$0xff] }
 0x6b2   : > { %4715 = vst.msk [vmem:[#allocation3 + $0x30] sm:$0xff] %vm504_vm3, %v4626_v28  ;;  %4823 = vrot.lane.b32.xlu1 %v10249_v19, %s7620_s30  ;;  %v4765_v28 = vld [vmem:[#allocation2 + $0x122] sm:$0xff] }
 0x6b3   : > { %4821 = vrot.lane.b32.xlu0 %v10254_v32, %s7620_s30 }
 0x6b6   : > { %4827 = vrot.lane.b32.xlu1 %v10258_v54, %s7620_s30 }
 0x6b7   : > { %4825 = vrot.lane.b32.xlu0 %v10262_v44, %s7620_s30 }
 0x6b8   : > { %v4632_v42 = vpop.permute.xlu1 %4631 }
 0x6b9   : > { %4718 = vst.msk [vmem:[#allocation3 + $0x48] sm:$0xff] %vm504_vm3, %v4632_v42  ;;  %v4630_v0 = vpop.permute.xlu0 %4629  ;;  %v4768_v42 = vld [vmem:[#allocation2 + $0x142] sm:$0xff] }
 0x6ba   : > { %4717 = vst.msk [vmem:[#allocation3 + $0x40] sm:$0xff] %vm504_vm3, %v4630_v0  ;;  %4831 = vrot.lane.b32.xlu1 %v10267_v27, %s7620_s30  ;;  %v4767_v0 = vld [vmem:[#allocation2 + $0x13a] sm:$0xff] }
 0x6bb   : > { %4829 = vrot.lane.b32.xlu0 %v10272_v43, %s7620_s30 }
 0x6be   : > { %4835 = vrot.lane.b32.xlu1 %v10276_v45, %s7620_s30 }
 0x6bf   : > { %4833 = vrot.lane.b32.xlu0 %v10280_v1, %s7620_s30 }
 0x6c0   : > { %v4636_v13 = vpop.permute.xlu1 %4635 }
 0x6c1   : > { %4720 = vst.msk [vmem:[#allocation3 + $0x58] sm:$0xff] %vm504_vm3, %v4636_v13  ;;  %v4634_v31 = vpop.permute.xlu0 %4633 }
 0x6c2   : > { %4719 = vst.msk [vmem:[#allocation3 + $0x50] sm:$0xff] %vm504_vm3, %v4634_v31  ;;  %4839 = vrot.lane.b32.xlu1 %v10285_v55, %s7620_s30 }
 0x6c3   : > { %4837 = vrot.lane.b32.xlu0 %v10290_v17, %s7620_s30 }
 0x6c6   : > { %4843 = vrot.lane.b32.xlu1 %v4760_v56, %s7620_s30  ;;  %v4770_v56 = vld [vmem:[#allocation2 + $0x15a] sm:$0xff] }
 0x6c7   : > { %4841 = vrot.lane.b32.xlu0 %v10295_v40, %s7620_s30 }
 0x6c8   : > { %v4640_v47 = vpop.permute.xlu1 %4639 }
 0x6c9   : > { %4722 = vst.msk [vmem:[#allocation3 + $0x68] sm:$0xff] %vm504_vm3, %v4640_v47  ;;  %v4638_v46 = vpop.permute.xlu0 %4637  ;;  %v4769_v47 = vld [vmem:[#allocation2 + $0x152] sm:$0xff] }
 0x6ca   : > { %4721 = vst.msk [vmem:[#allocation3 + $0x60] sm:$0xff] %vm504_vm3, %v4638_v46  ;;  %4847 = vrot.lane.b32.xlu1 %v4762_v15, %s7620_s30  ;;  %v4772_v46 = vld [vmem:[#allocation2 + $0x172] sm:$0xff]  ;;  %v4771_v15 = vld [vmem:[#allocation2 + $0x16a] sm:$0xff] }
 0x6cb   : > { %4845 = vrot.lane.b32.xlu0 %v4761_v10, %s7620_s30 }
 0x6ce   : > { %4851 = vrot.lane.b32.xlu1 %v4764_v51, %s7620_s30 }
 0x6cf   : > { %4849 = vrot.lane.b32.xlu0 %v4763_v22, %s7620_s30 }
 0x6d0   : > { %v4644_v18 = vpop.permute.xlu1 %4643 }
 0x6d1   : > { %4724 = vst.msk [vmem:[#allocation3 + $0x78] sm:$0xff] %vm504_vm3, %v4644_v18  ;;  %v4642_v4 = vpop.permute.xlu0 %4641 }
 0x6d2   : > { %4723 = vst.msk [vmem:[#allocation3 + $0x70] sm:$0xff] %vm504_vm3, %v4642_v4  ;;  %4855 = vrot.lane.b32.xlu1 %v4766_v37, %s7620_s30 }
 0x6d3   : > { %4853 = vrot.lane.b32.xlu0 %v4765_v28, %s7620_s30 }
 0x6d6   : > { %4859 = vrot.lane.b32.xlu1 %v4768_v42, %s7620_s30 }
 0x6d7   : > { %4857 = vrot.lane.b32.xlu0 %v4767_v0, %s7620_s30 }
 0x6d8   : > { %v4648_v13 = vpop.permute.xlu1 %4647 }
 0x6d9   : > { %4726 = vst.msk [vmem:[#allocation3 + $0x88] sm:$0xff] %vm504_vm3, %v4648_v13  ;;  %v4646_v31 = vpop.permute.xlu0 %4645 }
 0x6da   : > { %4725 = vst.msk [vmem:[#allocation3 + $0x80] sm:$0xff] %vm504_vm3, %v4646_v31  ;;  %4863 = vrot.lane.b32.xlu1 %v4770_v56, %s7620_s30 }
 0x6db   : > { %4861 = vrot.lane.b32.xlu0 %v4769_v47, %s7620_s30 }
 0x6de   : > { %4867 = vrot.lane.b32.xlu1 %v4772_v46, %s7620_s30 }
 0x6df   : > { %4865 = vrot.lane.b32.xlu0 %v4771_v15, %s7620_s30 }
 0x6e0   : > { %v4652_v10 = vpop.permute.xlu1 %4651 }
 0x6e1   : > { %4728 = vst.msk [vmem:[#allocation3 + $0x98] sm:$0xff] %vm504_vm3, %v4652_v10  ;;  %v4650_v51 = vpop.permute.xlu0 %4649 }
 0x6e2   : > { %4727 = vst.msk [vmem:[#allocation3 + $0x90] sm:$0xff] %vm504_vm3, %v4650_v51  ;;  %4999 = vrot.lane.b32.xlu1 %v10021_v21, %s7621_s4 }
 0x6e3   : > { %4997 = vrot.lane.b32.xlu0 %v10028_v8, %s7621_s4 }
 0x6e6   : > { %5003 = vrot.lane.b32.xlu1 %v10040_v12, %s7621_s4 }
 0x6e7   : > { %5001 = vrot.lane.b32.xlu0 %v10047_v61, %s7621_s4 }
 0x6e8   : > { %v4656_v22 = vpop.permute.xlu1 %4655 }
 0x6e9   : > { %4730 = vst.msk [vmem:[#allocation3 + $0xa8] sm:$0xff] %vm504_vm3, %v4656_v22  ;;  %v4654_v18 = vpop.permute.xlu0 %4653 }
 0x6ea   : > { %4729 = vst.msk [vmem:[#allocation3 + $0xa0] sm:$0xff] %vm504_vm3, %v4654_v18  ;;  %5007 = vrot.lane.b32.xlu1 %v10058_v53, %s7621_s4 }
 0x6eb   : > { %5005 = vrot.lane.b32.xlu0 %v10065_v23, %s7621_s4 }
 0x6ee   : > { %5011 = vrot.lane.b32.xlu1 %v10073_v30, %s7621_s4 }
 0x6ef   : > { %5009 = vrot.lane.b32.xlu0 %v10079_v3, %s7621_s4 }
 0x6f0   : > { %v4660_v21 = vpop.permute.xlu1 %4659 }
 0x6f1   : > { %4732 = vst.msk [vmem:[#allocation3 + $0xb8] sm:$0xff] %vm504_vm3, %v4660_v21  ;;  %v4658_v8 = vpop.permute.xlu0 %4657  ;;  %v7140_v21 = vld [vmem:[%s11443_s1 + $0x70] sm:$0xf] }
 0x6f2   : > { %4731 = vst.msk [vmem:[#allocation3 + $0xb0] sm:$0xff] %vm504_vm3, %v4658_v8  ;;  %5015 = vrot.lane.b32.xlu1 %v10087_v5, %s7621_s4 }
 0x6f3   : > { %5013 = vrot.lane.b32.xlu0 %v10093_v60, %s7621_s4 }
 0x6f6   : > { %5019 = vrot.lane.b32.xlu1 %v10101_v14, %s7621_s4 }
 0x6f7   : > { %5017 = vrot.lane.b32.xlu0 %v10107_v9, %s7621_s4 }
 0x6f8   : > { %v4664_v4 = vpop.permute.xlu1 %4663 }
 0x6f9   : > { %4734 = vst.msk [vmem:[#allocation3 + $0xc8] sm:$0xff] %vm504_vm3, %v4664_v4  ;;  %v4662_v37 = vpop.permute.xlu0 %4661 }
 0x6fa   : > { %4733 = vst.msk [vmem:[#allocation3 + $0xc0] sm:$0xff] %vm504_vm3, %v4662_v37  ;;  %5023 = vrot.lane.b32.xlu1 %v10115_v52, %s7621_s4  ;;  %v7409_v37 = vpop.f32.mrb[46].mxu1 }
 0x6fb   : > { %5021 = vrot.lane.b32.xlu0 %v10121_v33, %s7621_s4 }
 0x6fe   : > { %5027 = vrot.lane.b32.xlu1 %v10129_v58, %s7621_s4 }
 0x6ff   : > { %5025 = vrot.lane.b32.xlu0 %v10135_v24, %s7621_s4 }
 0x700   : > { %v4668_v28 = vpop.permute.xlu1 %4667 }
 0x701   : > { %4736 = vst.msk [vmem:[#allocation3 + $0xd8] sm:$0xff] %vm504_vm3, %v4668_v28  ;;  %v4666_v42 = vpop.permute.xlu0 %4665  ;;  %v4348_v28 = vpop.f32.mrb[47].mxu1 }
 0x702   : > { %4735 = vst.msk [vmem:[#allocation3 + $0xd0] sm:$0xff] %vm504_vm3, %v4666_v42  ;;  %5031 = vrot.lane.b32.xlu1 %v10143_v25, %s7621_s4 }
 0x703   : > { %5029 = vrot.lane.b32.xlu0 %v10149_v48, %s7621_s4 }
 0x706   : > { %5035 = vrot.lane.b32.xlu1 %v10157_v59, %s7621_s4 }
 0x707   : > { %5033 = vrot.lane.b32.xlu0 %v10163_v36, %s7621_s4 }
 0x708   : > { %v4672_v0 = vpop.permute.xlu1 %4671 }
 0x709   : > { %4738 = vst.msk [vmem:[#allocation3 + $0xe8] sm:$0xff] %vm504_vm3, %v4672_v0  ;;  %v4670_v13 = vpop.permute.xlu0 %4669  ;;  %v4349_v0 = vadd.f32 %v10001_v7, %v4348_v28 }
 0x70a   : > { %4737 = vst.msk [vmem:[#allocation3 + $0xe0] sm:$0xff] %vm504_vm3, %v4670_v13  ;;  %5039 = vrot.lane.b32.xlu1 %v10171_v26, %s7621_s4 }
 0x70b   : > { %5037 = vrot.lane.b32.xlu0 %v10177_v57, %s7621_s4  ;;  %vm4387_vm15 = vcmp.gt.f32.partialorder %v4349_v0, 0.0 }
 0x70e   : > { %5043 = vrot.lane.b32.xlu1 %v10185_v62, %s7621_s4 }
 0x70f   : > { %5041 = vrot.lane.b32.xlu0 %v10191_v29, %s7621_s4 }
 0x710   : > { %v4676_v31 = vpop.permute.xlu1 %4675 }
 0x711   : > { %4740 = vst.msk [vmem:[#allocation3 + $0xf8] sm:$0xff] %vm504_vm3, %v4676_v31  ;;  %v4674_v56 = vpop.permute.xlu0 %4673 }
 0x712   : > { %4739 = vst.msk [vmem:[#allocation3 + $0xf0] sm:$0xff] %vm504_vm3, %v4674_v56  ;;  %5189 = vrot.lane.b32.xlu1 %v10019_v35, %s7622_s5  ;;  %v7136_v35 = vld [vmem:[%s11443_s1 + $0x50] sm:$0xff]  ;;  %v4419_v56 = vmul.f32 0.2, %v4349_v0 }
 0x713   : > { %5045 = vrot.lane.b32.xlu0 %v10202_v41, %s7621_s4  ;;  %v7137_v41 = vld [vmem:[%s11443_s1 + $0x58] sm:$0xff] }
 0x714   : > { %v4808_v47 = vpop.permute.xlu1 %4807 }
 0x715   : > { %4902 = vst.msk [vmem:[#allocation3 + $0x8] sm:$0xff] %vm11538_vm4, %v4808_v47  ;;  %v4806_v46 = vpop.permute.xlu0 %4805 }
 0x716   : > { %4901 = vst.msk [vmem:[#allocation3] sm:$0xff] %vm11538_vm4, %v4806_v46  ;;  %5381 = vrot.lane.b32.xlu1 %v10224_v39, %s7623_s6 }
 0x717   : > { %5191 = vrot.lane.b32.xlu0 %v10015_v34, %s7622_s5  ;;  %v7484_v34 = vpack.c.bf16 %v7137_v41, %v7136_v35  ;;  %v5130_v35 = vld [vmem:[#allocation2 + $0x51] sm:$0xff] }
 0x718   : > { %v4812_v62 = vpop.permute.xlu1 %4811 }
 0x719   : > { %4904 = vst.msk [vmem:[#allocation3 + $0x18] sm:$0xff] %vm11538_vm4, %v4812_v62  ;;  %v4810_v15 = vpop.permute.xlu0 %4809  ;;  %7485 = vmatprep.subr.bf16.mxu0 %v7484_v34 }
 0x71a   : > { %4903 = vst.msk [vmem:[#allocation3 + $0x10] sm:$0xff] %vm11538_vm4, %v4810_v15  ;;  %5573 = vrot.lane.b32.xlu1 %v10047_v61, %s7624_s7  ;;  %7487 = vmatpush3.bf16.msra.mxu0 %v7484_v34  ;;  %v7138_v61 = vld [vmem:[%s11443_s1 + $0x60] sm:$0xff] }
 0x71b   : > { %5383 = vrot.lane.b32.xlu0 %v10220_v49, %s7623_s6  ;;  %v7139_v49 = vld [vmem:[%s11443_s1 + $0x68] sm:$0xff] }
 0x71c   : > { %v4816_v39 = vpop.permute.xlu1 %4815  ;;  %v7488_v51 = vpack.c.bf16 %v7139_v49, %v7138_v61 }
 0x71d   : > { %4906 = vst.msk [vmem:[#allocation3 + $0x28] sm:$0xff] %vm11538_vm4, %v4816_v39  ;;  %v4814_v10 = vpop.permute.xlu0 %4813 }
 0x71e   : > { %4905 = vst.msk [vmem:[#allocation3 + $0x20] sm:$0xff] %vm11538_vm4, %v4814_v10  ;;  %5765 = vrot.lane.b32.xlu1 %v10038_v20, %s7625_s8  ;;  %7489 = vmatprep.subr.bf16.mxu0 %v7488_v51  ;;  %v5705_v10 = vld [vmem:[#allocation2 + $0x61] sm:$0xff] }
 0x71f   : > { %5575 = vrot.lane.b32.xlu0 %v10040_v12, %s7624_s7  ;;  %7491 = vmatpush3.bf16.msra.mxu0 %v7488_v51 }
 0x720   : > { %v4820_v22 = vpop.permute.xlu1 %4819  ;;  %7418 = vmatprep.subr.msk.mxu0 %vm2030_vm9, %v7140_v21 }
 0x721   : > { %4908 = vst.msk [vmem:[#allocation3 + $0x38] sm:$0xff] %vm11538_vm4, %v4820_v22  ;;  %v4818_v18 = vpop.permute.xlu0 %4817 }
 0x722   : > { %4907 = vst.msk [vmem:[#allocation3 + $0x30] sm:$0xff] %vm11538_vm4, %v4818_v18  ;;  %5767 = vrot.lane.b32.xlu1 %v10033_v11, %s7625_s8 }
 0x723   : > { %5193 = vrot.lane.b32.xlu0 %v10038_v20, %s7622_s5  ;;  %7419 = vmatpush3.msk.msra.mxu0 %vm2030_vm9, %v7140_v21 }
 0x724   : > { %v4824_v12 = vpop.permute.xlu1 %4823 }
 0x725   : > { %4910 = vst.msk [vmem:[#allocation3 + $0x48] sm:$0xff] %vm11538_vm4, %v4824_v12  ;;  %v4822_v8 = vpop.permute.xlu0 %4821 }
 0x726   : > { %4909 = vst.msk [vmem:[#allocation3 + $0x40] sm:$0xff] %vm11538_vm4, %v4822_v8  ;;  %5195 = vrot.lane.b32.xlu1 %v10033_v11, %s7622_s5  ;;  %v4354_v11 = vadd.f32 %v7409_v37, %v10001_v7  ;;  %v4451_v7 = vsel %vm4387_vm15, %v4349_v0, %v4419_v56  ;;  %v5707_v8 = vld [vmem:[#allocation2 + $0x79] sm:$0xff]  ;;  %vm6519_vm15 = vcmask 1046534  }
 0x727   : > { %5957 = vrot.lane.b32.xlu0 %v10234_v63, %s7626_s28  ;;  %4483 = vst.msk [vmem:[#allocation2 + $0x181] sm:$0xff] %vm169_vm0, %v4451_v7 }
 0x728   : > { %v4828_v4 = vpop.permute.xlu1 %4827  ;;  %vm4388_vm9 = vcmp.gt.f32.partialorder %v4354_v11, 0.0  ;;  %v4420_v31 = vmul.f32 0.2, %v4354_v11 }
 0x729   : > { %4912 = vst.msk [vmem:[#allocation3 + $0x58] sm:$0xff] %vm11538_vm4, %v4828_v4  ;;  %v4826_v20 = vpop.permute.xlu0 %4825 }
 0x72a   : > { %4911 = vst.msk [vmem:[#allocation3 + $0x50] sm:$0xff] %vm11538_vm4, %v4826_v20  ;;  %5959 = vrot.lane.b32.xlu1 %v10230_v50, %s7626_s28 }
 0x72b   : > { %5385 = vrot.lane.b32.xlu0 %v10234_v63, %s7623_s6  ;;  %v4452_v63 = vsel %vm4388_vm9, %v4354_v11, %v4420_v31  ;;  %vm6516_vm9 = vcmask 1045509  }
 0x72c   : > { %v4832_v42 = vpop.permute.xlu1 %4831  ;;  %4484 = vst.msk [vmem:[#allocation2 + $0x189] sm:$0xff] %vm169_vm0, %v4452_v63 }
 0x72d   : > { %4914 = vst.msk [vmem:[#allocation3 + $0x68] sm:$0xff] %vm11538_vm4, %v4832_v42  ;;  %v4830_v13 = vpop.permute.xlu0 %4829 }
 0x72e   : > { %4913 = vst.msk [vmem:[#allocation3 + $0x60] sm:$0xff] %vm11538_vm4, %v4830_v13  ;;  %5577 = vrot.lane.b32.xlu1 %v10065_v23, %s7624_s7  ;;  %v5709_v13 = vld [vmem:[#allocation2 + $0x91] sm:$0xff] }
 0x72f   : > { %5387 = vrot.lane.b32.xlu0 %v10230_v50, %s7623_s6 }
 0x730   : > { %v4836_v47 = vpop.permute.xlu1 %4835 }
 0x731   : > { %4916 = vst.msk [vmem:[#allocation3 + $0x78] sm:$0xff] %vm11538_vm4, %v4836_v47  ;;  %v4834_v46 = vpop.permute.xlu0 %4833 }
 0x732   : > { %4915 = vst.msk [vmem:[#allocation3 + $0x70] sm:$0xff] %vm11538_vm4, %v4834_v46  ;;  %5769 = vrot.lane.b32.xlu1 %v10056_v38, %s7625_s8 }
 0x733   : > { %5579 = vrot.lane.b32.xlu0 %v10058_v53, %s7624_s7 }
 0x734   : > { %v4840_v23 = vpop.permute.xlu1 %4839 }
 0x735   : > { %4918 = vst.msk [vmem:[#allocation3 + $0x88] sm:$0xff] %vm11538_vm4, %v4840_v23  ;;  %v4838_v50 = vpop.permute.xlu0 %4837 }
 0x736   : > { %4917 = vst.msk [vmem:[#allocation3 + $0x80] sm:$0xff] %vm11538_vm4, %v4838_v50  ;;  %5771 = vrot.lane.b32.xlu1 %v10051_v16, %s7625_s8  ;;  %v5711_v50 = vld [vmem:[#allocation2 + $0xa9] sm:$0xff] }
 0x737   : > { %5197 = vrot.lane.b32.xlu0 %v10056_v38, %s7622_s5 }
 0x738   : > { %v4844_v62 = vpop.permute.xlu1 %4843 }
 0x739   : > { %4920 = vst.msk [vmem:[#allocation3 + $0x98] sm:$0xff] %vm11538_vm4, %v4844_v62  ;;  %v4842_v15 = vpop.permute.xlu0 %4841 }
 0x73a   : > { %4919 = vst.msk [vmem:[#allocation3 + $0x90] sm:$0xff] %vm11538_vm4, %v4842_v15  ;;  %5199 = vrot.lane.b32.xlu1 %v5130_v35, %s7622_s5 }
 0x73b   : > { %5961 = vrot.lane.b32.xlu0 %v10244_v6, %s7626_s28 }
 0x73c   : > { %v4848_v53 = vpop.permute.xlu1 %4847 }
 0x73d   : > { %4922 = vst.msk [vmem:[#allocation3 + $0xa8] sm:$0xff] %vm11538_vm4, %v4848_v53  ;;  %v4846_v41 = vpop.permute.xlu0 %4845 }
 0x73e   : > { %4921 = vst.msk [vmem:[#allocation3 + $0xa0] sm:$0xff] %vm11538_vm4, %v4846_v41  ;;  %5963 = vrot.lane.b32.xlu1 %v10240_v2, %s7626_s28 }
 0x73f   : > { %5389 = vrot.lane.b32.xlu0 %v10244_v6, %s7623_s6 }
 0x740   : > { %v4852_v16 = vpop.permute.xlu1 %4851 }
 0x741   : > { %4924 = vst.msk [vmem:[#allocation3 + $0xb8] sm:$0xff] %vm11538_vm4, %v4852_v16  ;;  %v4850_v38 = vpop.permute.xlu0 %4849 }
 0x742   : > { %4923 = vst.msk [vmem:[#allocation3 + $0xb0] sm:$0xff] %vm11538_vm4, %v4850_v38  ;;  %5581 = vrot.lane.b32.xlu1 %v10079_v3, %s7624_s7  ;;  %v5706_v3 = vld [vmem:[#allocation2 + $0x69] sm:$0xff] }
 0x743   : > { %5391 = vrot.lane.b32.xlu0 %v10240_v2, %s7623_s6 }
 0x744   : > { %v4856_v34 = vpop.permute.xlu1 %4855 }
 0x745   : > { %4926 = vst.msk [vmem:[#allocation3 + $0xc8] sm:$0xff] %vm11538_vm4, %v4856_v34  ;;  %v4854_v39 = vpop.permute.xlu0 %4853  ;;  %v5713_v34 = vld [vmem:[#allocation2 + $0xc1] sm:$0xff] }
 0x746   : > { %4925 = vst.msk [vmem:[#allocation3 + $0xc0] sm:$0xff] %vm11538_vm4, %v4854_v39  ;;  %5773 = vrot.lane.b32.xlu1 %v5705_v10, %s7625_s8 }
 0x747   : > { %5583 = vrot.lane.b32.xlu0 %v10073_v30, %s7624_s7 }
 0x748   : > { %v4860_v6 = vpop.permute.xlu1 %4859 }
 0x749   : > { %4928 = vst.msk [vmem:[#allocation3 + $0xd8] sm:$0xff] %vm11538_vm4, %v4860_v6  ;;  %v4858_v61 = vpop.permute.xlu0 %4857 }
 0x74a   : > { %4927 = vst.msk [vmem:[#allocation3 + $0xd0] sm:$0xff] %vm11538_vm4, %v4858_v61  ;;  %5775 = vrot.lane.b32.xlu1 %v5706_v3, %s7625_s8 }
 0x74b   : > { %5201 = vrot.lane.b32.xlu0 %v5705_v10, %s7622_s5 }
 0x74c   : > { %v4864_v2 = vpop.permute.xlu1 %4863 }
 0x74d   : > { %4930 = vst.msk [vmem:[#allocation3 + $0xe8] sm:$0xff] %vm11538_vm4, %v4864_v2  ;;  %v4862_v49 = vpop.permute.xlu0 %4861 }
 0x74e   : > { %4929 = vst.msk [vmem:[#allocation3 + $0xe0] sm:$0xff] %vm11538_vm4, %v4862_v49  ;;  %5203 = vrot.lane.b32.xlu1 %v5706_v3, %s7622_s5 }
 0x74f   : > { %5965 = vrot.lane.b32.xlu0 %v10254_v32, %s7626_s28 }
 0x750   : > { %v4868_v30 = vpop.permute.xlu1 %4867 }
 0x751   : > { %4932 = vst.msk [vmem:[#allocation3 + $0xf8] sm:$0xff] %vm11538_vm4, %v4868_v30  ;;  %v4866_v51 = vpop.permute.xlu0 %4865 }
 0x752   : > { %4931 = vst.msk [vmem:[#allocation3 + $0xf0] sm:$0xff] %vm11538_vm4, %v4866_v51  ;;  %5967 = vrot.lane.b32.xlu1 %v10249_v19, %s7626_s28  ;;  %vm6522_vm4 = vcmask 1047559  }
 0x753   : > { %5393 = vrot.lane.b32.xlu0 %v10254_v32, %s7623_s6 }
 0x754   : > { %v5000_v22 = vpop.permute.xlu1 %4999 }
 0x755   : > { %5094 = vst.msk [vmem:[#allocation3 + $0x8] sm:$0xff] %vm890_vm5, %v5000_v22  ;;  %v4998_v18 = vpop.permute.xlu0 %4997 }
 0x756   : > { %5093 = vst.msk [vmem:[#allocation3] sm:$0xff] %vm890_vm5, %v4998_v18  ;;  %5585 = vrot.lane.b32.xlu1 %v10093_v60, %s7624_s7  ;;  %v5708_v60 = vld [vmem:[#allocation2 + $0x81] sm:$0xff] }
 0x757   : > { %5395 = vrot.lane.b32.xlu0 %v10249_v19, %s7623_s6 }
 0x758   : > { %v5004_v21 = vpop.permute.xlu1 %5003 }
 0x759   : > { %5096 = vst.msk [vmem:[#allocation3 + $0x18] sm:$0xff] %vm890_vm5, %v5004_v21  ;;  %v5002_v12 = vpop.permute.xlu0 %5001 }
 0x75a   : > { %5095 = vst.msk [vmem:[#allocation3 + $0x10] sm:$0xff] %vm890_vm5, %v5002_v12  ;;  %5777 = vrot.lane.b32.xlu1 %v5707_v8, %s7625_s8 }
 0x75b   : > { %5587 = vrot.lane.b32.xlu0 %v10087_v5, %s7624_s7 }
 0x75c   : > { %v5008_v32 = vpop.permute.xlu1 %5007 }
 0x75d   : > { %5098 = vst.msk [vmem:[#allocation3 + $0x28] sm:$0xff] %vm890_vm5, %v5008_v32  ;;  %v5006_v4 = vpop.permute.xlu0 %5005 }
 0x75e   : > { %5097 = vst.msk [vmem:[#allocation3 + $0x20] sm:$0xff] %vm890_vm5, %v5006_v4  ;;  %5779 = vrot.lane.b32.xlu1 %v5708_v60, %s7625_s8  ;;  %v5333_v4 = vld [vmem:[#allocation2 + $0xda] sm:$0xff] }
 0x75f   : > { %5205 = vrot.lane.b32.xlu0 %v5707_v8, %s7622_s5  ;;  %v5908_v8 = vld [vmem:[#allocation2 + $0xe2] sm:$0xff] }
 0x760   : > { %v5012_v19 = vpop.permute.xlu1 %5011 }
 0x761   : > { %5100 = vst.msk [vmem:[#allocation3 + $0x38] sm:$0xff] %vm890_vm5, %v5012_v19  ;;  %v5010_v20 = vpop.permute.xlu0 %5009 }
 0x762   : > { %5099 = vst.msk [vmem:[#allocation3 + $0x30] sm:$0xff] %vm890_vm5, %v5010_v20  ;;  %5207 = vrot.lane.b32.xlu1 %v5708_v60, %s7622_s5 }
 0x763   : > { %5969 = vrot.lane.b32.xlu0 %v10262_v44, %s7626_s28 }
 0x764   : > { %v5016_v5 = vpop.permute.xlu1 %5015 }
 0x765   : > { %5102 = vst.msk [vmem:[#allocation3 + $0x48] sm:$0xff] %vm890_vm5, %v5016_v5  ;;  %v5014_v37 = vpop.permute.xlu0 %5013 }
 0x766   : > { %5101 = vst.msk [vmem:[#allocation3 + $0x40] sm:$0xff] %vm890_vm5, %v5014_v37  ;;  %5971 = vrot.lane.b32.xlu1 %v10258_v54, %s7626_s28  ;;  %v5717_v37 = vld [vmem:[#allocation2 + $0xf1] sm:$0xff] }
 0x767   : > { %5397 = vrot.lane.b32.xlu0 %v10262_v44, %s7623_s6 }
 0x768   : > { %v5020_v11 = vpop.permute.xlu1 %5019 }
 0x769   : > { %5104 = vst.msk [vmem:[#allocation3 + $0x58] sm:$0xff] %vm890_vm5, %v5020_v11  ;;  %v5018_v28 = vpop.permute.xlu0 %5017 }
 0x76a   : > { %5103 = vst.msk [vmem:[#allocation3 + $0x50] sm:$0xff] %vm890_vm5, %v5018_v28  ;;  %5589 = vrot.lane.b32.xlu1 %v10107_v9, %s7624_s7  ;;  %v5710_v9 = vld [vmem:[#allocation2 + $0x99] sm:$0xff] }
 0x76b   : > { %5399 = vrot.lane.b32.xlu0 %v10258_v54, %s7623_s6 }
 0x76c   : > { %v5024_v42 = vpop.permute.xlu1 %5023 }
 0x76d   : > { %5106 = vst.msk [vmem:[#allocation3 + $0x68] sm:$0xff] %vm890_vm5, %v5024_v42  ;;  %v5022_v0 = vpop.permute.xlu0 %5021  ;;  %v5718_v42 = vld [vmem:[#allocation2 + $0xf9] sm:$0xff] }
 0x76e   : > { %5105 = vst.msk [vmem:[#allocation3 + $0x60] sm:$0xff] %vm890_vm5, %v5022_v0  ;;  %5781 = vrot.lane.b32.xlu1 %v5709_v13, %s7625_s8 }
 0x76f   : > { %5591 = vrot.lane.b32.xlu0 %v10101_v14, %s7624_s7 }
 0x770   : > { %v5028_v44 = vpop.permute.xlu1 %5027 }
 0x771   : > { %5108 = vst.msk [vmem:[#allocation3 + $0x78] sm:$0xff] %vm890_vm5, %v5028_v44  ;;  %v5026_v31 = vpop.permute.xlu0 %5025 }
 0x772   : > { %5107 = vst.msk [vmem:[#allocation3 + $0x70] sm:$0xff] %vm890_vm5, %v5026_v31  ;;  %5783 = vrot.lane.b32.xlu1 %v5710_v9, %s7625_s8  ;;  %v5910_v31 = vld [vmem:[#allocation2 + $0xfa] sm:$0xff] }
 0x773   : > { %5209 = vrot.lane.b32.xlu0 %v5709_v13, %s7622_s5 }
 0x774   : > { %v5032_v54 = vpop.permute.xlu1 %5031 }
 0x775   : > { %5110 = vst.msk [vmem:[#allocation3 + $0x88] sm:$0xff] %vm890_vm5, %v5032_v54  ;;  %v5030_v56 = vpop.permute.xlu0 %5029 }
 0x776   : > { %5109 = vst.msk [vmem:[#allocation3 + $0x80] sm:$0xff] %vm890_vm5, %v5030_v56  ;;  %5211 = vrot.lane.b32.xlu1 %v5710_v9, %s7622_s5 }
 0x777   : > { %5973 = vrot.lane.b32.xlu0 %v10272_v43, %s7626_s28 }
 0x778   : > { %v5036_v14 = vpop.permute.xlu1 %5035 }
 0x779   : > { %5112 = vst.msk [vmem:[#allocation3 + $0x98] sm:$0xff] %vm890_vm5, %v5036_v14  ;;  %v5034_v63 = vpop.permute.xlu0 %5033 }
 0x77a   : > { %5111 = vst.msk [vmem:[#allocation3 + $0x90] sm:$0xff] %vm890_vm5, %v5034_v63  ;;  %5975 = vrot.lane.b32.xlu1 %v10267_v27, %s7626_s28 }
 0x77b   : > { %5401 = vrot.lane.b32.xlu0 %v10272_v43, %s7623_s6 }
 0x77c   : > { %v5040_v47 = vpop.permute.xlu1 %5039 }
 0x77d   : > { %5114 = vst.msk [vmem:[#allocation3 + $0xa8] sm:$0xff] %vm890_vm5, %v5040_v47  ;;  %v5038_v7 = vpop.permute.xlu0 %5037 }
 0x77e   : > { %5113 = vst.msk [vmem:[#allocation3 + $0xa0] sm:$0xff] %vm890_vm5, %v5038_v7  ;;  %5593 = vrot.lane.b32.xlu1 %v10121_v33, %s7624_s7  ;;  %v5712_v33 = vld [vmem:[#allocation2 + $0xb1] sm:$0xff]  ;;  %v5719_v7 = vld [vmem:[#allocation2 + $0x109] sm:$0xff] }
 0x77f   : > { %5403 = vrot.lane.b32.xlu0 %v10267_v27, %s7623_s6 }
 0x780   : > { %v5044_v46 = vpop.permute.xlu1 %5043 }
 0x781   : > { %5116 = vst.msk [vmem:[#allocation3 + $0xb8] sm:$0xff] %vm890_vm5, %v5044_v46  ;;  %v5042_v23 = vpop.permute.xlu0 %5041 }
 0x782   : > { %5115 = vst.msk [vmem:[#allocation3 + $0xb0] sm:$0xff] %vm890_vm5, %v5042_v23  ;;  %5785 = vrot.lane.b32.xlu1 %v5711_v50, %s7625_s8 }
 0x783   : > { %5595 = vrot.lane.b32.xlu0 %v10115_v52, %s7624_s7 }
 0x784   : > { %v5190_v43 = vpop.permute.xlu1 %5189 }
 0x785   : > { %5285 = vst.msk [vmem:[#allocation3] sm:$0xff] %vm1083_vm6, %v5190_v43  ;;  %v5046_v62 = vpop.permute.xlu0 %5045 }
 0x786   : > { %5117 = vst.msk [vmem:[#allocation3 + $0xc0] sm:$0xff] %vm890_vm5, %v5046_v62  ;;  %5787 = vrot.lane.b32.xlu1 %v5712_v33, %s7625_s8 }
 0x787   : > { %5213 = vrot.lane.b32.xlu0 %v5711_v50, %s7622_s5  ;;  %v5720_v50 = vld [vmem:[#allocation2 + $0x111] sm:$0xff] }
 0x788   : > { %v5382_v27 = vpop.permute.xlu1 %5381 }
 0x789   : > { %5477 = vst.msk [vmem:[#allocation3] sm:$0xff] %vm1276_vm7, %v5382_v27  ;;  %v5192_v15 = vpop.permute.xlu0 %5191  ;;  %v5912_v27 = vld [vmem:[#allocation2 + $0x112] sm:$0xff] }
 0x78a   : > { %5286 = vst.msk [vmem:[#allocation3 + $0x8] sm:$0xff] %vm1083_vm6, %v5192_v15  ;;  %5215 = vrot.lane.b32.xlu1 %v5712_v33, %s7622_s5 }
 0x78b   : > { %5977 = vrot.lane.b32.xlu0 %v10280_v1, %s7626_s28 }
 0x78c   : > { %v5574_v52 = vpop.permute.xlu1 %5573 }
 0x78d   : > { %5669 = vst.msk [vmem:[#allocation3] sm:$0xff] %vm1470_vm8, %v5574_v52  ;;  %v5384_v35 = vpop.permute.xlu0 %5383 }
 0x78e   : > { %5478 = vst.msk [vmem:[#allocation3 + $0x8] sm:$0xff] %vm1276_vm7, %v5384_v35  ;;  %5979 = vrot.lane.b32.xlu1 %v10276_v45, %s7626_s28 }
 0x78f   : > { %5405 = vrot.lane.b32.xlu0 %v10280_v1, %s7623_s6 }
 0x790   : > { %v5766_v53 = vpop.permute.xlu1 %5765 }
 0x791   : > { %5861 = vst.msk [vmem:[#allocation3] sm:$0xff] %vm1663_vm10, %v5766_v53  ;;  %v5576_v41 = vpop.permute.xlu0 %5575 }
 0x792   : > { %5670 = vst.msk [vmem:[#allocation3 + $0x8] sm:$0xff] %vm1470_vm8, %v5576_v41  ;;  %5597 = vrot.lane.b32.xlu1 %v10135_v24, %s7624_s7  ;;  %v5714_v24 = vld [vmem:[#allocation2 + $0xc9] sm:$0xff] }
 0x793   : > { %5407 = vrot.lane.b32.xlu0 %v10276_v45, %s7623_s6 }
 0x794   : > { %v5768_v16 = vpop.permute.xlu1 %5767 }
 0x795   : > { %5862 = vst.msk [vmem:[#allocation3 + $0x8] sm:$0xff] %vm1663_vm10, %v5768_v16  ;;  %v5194_v38 = vpop.permute.xlu0 %5193 }
 0x796   : > { %5287 = vst.msk [vmem:[#allocation3 + $0x10] sm:$0xff] %vm1083_vm6, %v5194_v38  ;;  %5789 = vrot.lane.b32.xlu1 %v5713_v34, %s7625_s8  ;;  %v5721_v38 = vld [vmem:[#allocation2 + $0x121] sm:$0xff] }
 0x797   : > { %5599 = vrot.lane.b32.xlu0 %v10129_v58, %s7624_s7 }
 0x798   : > { %v5196_v1 = vpop.permute.xlu1 %5195 }
 0x799   : > { %5288 = vst.msk [vmem:[#allocation3 + $0x18] sm:$0xff] %vm1083_vm6, %v5196_v1  ;;  %v5958_v39 = vpop.permute.xlu0 %5957 }
 0x79a   : > { %6053 = vst.msk [vmem:[#allocation3] sm:$0xff] %vm1856_vm11, %v5958_v39  ;;  %5791 = vrot.lane.b32.xlu1 %v5714_v24, %s7625_s8 }
 0x79b   : > { %5217 = vrot.lane.b32.xlu0 %v5713_v34, %s7622_s5  ;;  %v5530_v34 = vld [vmem:[#allocation2 + $0x128] sm:$0xff] }
 0x79c   : > { %v5960_v45 = vpop.permute.xlu1 %5959 }
 0x79d   : > { %6054 = vst.msk [vmem:[#allocation3 + $0x8] sm:$0xff] %vm1856_vm11, %v5960_v45  ;;  %v5386_v10 = vpop.permute.xlu0 %5385 }
 0x79e   : > { %5479 = vst.msk [vmem:[#allocation3 + $0x10] sm:$0xff] %vm1276_vm7, %v5386_v10  ;;  %5219 = vrot.lane.b32.xlu1 %v5714_v24, %s7622_s5  ;;  %v5722_v24 = vld [vmem:[#allocation2 + $0x129] sm:$0xff] }
 0x79f   : > { %5981 = vrot.lane.b32.xlu0 %v10290_v17, %s7626_s28  ;;  %v5913_v10 = vld [vmem:[#allocation2 + $0x122] sm:$0xff] }
 0x7a0   : > { %v5578_v58 = vpop.permute.xlu1 %5577 }
 0x7a1   : > { %5671 = vst.msk [vmem:[#allocation3 + $0x10] sm:$0xff] %vm1470_vm8, %v5578_v58  ;;  %v5388_v6 = vpop.permute.xlu0 %5387  ;;  %v6085_v61 = vld [vmem:[#allocation3] sm:$0xff] }
 0x7a2   : > { %5480 = vst.msk [vmem:[#allocation3 + $0x18] sm:$0xff] %vm1276_vm7, %v5388_v6  ;;  %5983 = vrot.lane.b32.xlu1 %v10285_v55, %s7626_s28  ;;  %7420 = vmatprep.mubr.msk.f32.mxu0 %vm1933_vm12, %v6085_v61  ;;  %v5914_v61 = vld [vmem:[#allocation2 + $0x12a] sm:$0xff] }
 0x7a3   : > { %5409 = vrot.lane.b32.xlu0 %v10290_v17, %s7623_s6  ;;  %v5715_v17 = vld [vmem:[#allocation2 + $0xd9] sm:$0xff] }
 0x7a4   : > { %v5770_v3 = vpop.permute.xlu1 %5769  ;;  %v6086_v2 = vld [vmem:[#allocation3 + $0x8] sm:$0xff] }
 0x7a5   : > { %5863 = vst.msk [vmem:[#allocation3 + $0x10] sm:$0xff] %vm1663_vm10, %v5770_v3  ;;  %7421 = vmatmul.mubr.msk.f32.vlgmr.msra.gmra.mrb[16].mxu0 %vm1933_vm12, %v6086_v2  ;;  %v5580_v49 = vpop.permute.xlu0 %5579 }
 0x7a6   : > { %5672 = vst.msk [vmem:[#allocation3 + $0x18] sm:$0xff] %vm1470_vm8, %v5580_v49  ;;  %5601 = vrot.lane.b32.xlu1 %v10149_v48, %s7624_s7  ;;  %v5716_v48 = vld [vmem:[#allocation2 + $0xe1] sm:$0xff] }
 0x7a7   : > { %5411 = vrot.lane.b32.xlu0 %v10285_v55, %s7623_s6 }
 0x7a8   : > { %v5772_v30 = vpop.permute.xlu1 %5771 }
 0x7a9   : > { %5864 = vst.msk [vmem:[#allocation3 + $0x18] sm:$0xff] %vm1663_vm10, %v5772_v30  ;;  %v5198_v51 = vpop.permute.xlu0 %5197 }
 0x7aa   : > { %5289 = vst.msk [vmem:[#allocation3 + $0x20] sm:$0xff] %vm1083_vm6, %v5198_v51  ;;  %5793 = vrot.lane.b32.xlu1 %v5715_v17, %s7625_s8  ;;  %v5531_v51 = vld [vmem:[#allocation2 + $0x138] sm:$0xff] }
 0x7ab   : > { %5603 = vrot.lane.b32.xlu0 %v10143_v25, %s7624_s7 }
 0x7ac   : > { %v5200_v22 = vpop.permute.xlu1 %5199 }
 0x7ad   : > { %5290 = vst.msk [vmem:[#allocation3 + $0x28] sm:$0xff] %vm1083_vm6, %v5200_v22  ;;  %v5962_v18 = vpop.permute.xlu0 %5961 }
 0x7ae   : > { %6055 = vst.msk [vmem:[#allocation3 + $0x10] sm:$0xff] %vm1856_vm11, %v5962_v18  ;;  %5795 = vrot.lane.b32.xlu1 %v5716_v48, %s7625_s8  ;;  %v5723_v18 = vld [vmem:[#allocation2 + $0x139] sm:$0xff] }
 0x7af   : > { %5221 = vrot.lane.b32.xlu0 %v5715_v17, %s7622_s5 }
 0x7b0   : > { %v5964_v55 = vpop.permute.xlu1 %5963 }
 0x7b1   : > { %6056 = vst.msk [vmem:[#allocation3 + $0x18] sm:$0xff] %vm1856_vm11, %v5964_v55  ;;  %v5390_v21 = vpop.permute.xlu0 %5389 }
 0x7b2   : > { %5481 = vst.msk [vmem:[#allocation3 + $0x20] sm:$0xff] %vm1276_vm7, %v5390_v21  ;;  %5223 = vrot.lane.b32.xlu1 %v5716_v48, %s7622_s5  ;;  %v5532_v48 = vld [vmem:[#allocation2 + $0x140] sm:$0xff] }
 0x7b3   : > { %5985 = vrot.lane.b32.xlu0 %v10295_v40, %s7626_s28 }
 0x7b4   : > { %v5582_v25 = vpop.permute.xlu1 %5581 }
 0x7b5   : > { %5673 = vst.msk [vmem:[#allocation3 + $0x20] sm:$0xff] %vm1470_vm8, %v5582_v25  ;;  %v5392_v12 = vpop.permute.xlu0 %5391  ;;  %v6087_v32 = vld [vmem:[#allocation3 + $0x10] sm:$0xff] }
 0x7b6   : > { %5482 = vst.msk [vmem:[#allocation3 + $0x28] sm:$0xff] %vm1276_vm7, %v5392_v12  ;;  %5987 = vrot.lane.b32.xlu1 %v5908_v8, %s7626_s28  ;;  %7423 = vmatprep.mubr.msk.f32.mxu0 %vm1933_vm12, %v6087_v32  ;;  %v5724_v32 = vld [vmem:[#allocation2 + $0x141] sm:$0xff] }
 0x7b7   : > { %5413 = vrot.lane.b32.xlu0 %v5333_v4, %s7623_s6 }
 0x7b8   : > { %v5774_v60 = vpop.permute.xlu1 %5773  ;;  %v6088_v19 = vld [vmem:[#allocation3 + $0x18] sm:$0xff] }
 0x7b9   : > { %5865 = vst.msk [vmem:[#allocation3 + $0x20] sm:$0xff] %vm1663_vm10, %v5774_v60  ;;  %7424 = vmatmul.mubr.msk.f32.gmra.mrb[18].mxu0 %vm1933_vm12, %v6088_v19  ;;  %v5584_v40 = vpop.permute.xlu0 %5583 }
 0x7ba   : > { %5674 = vst.msk [vmem:[#allocation3 + $0x28] sm:$0xff] %vm1470_vm8, %v5584_v40  ;;  %5605 = vrot.lane.b32.xlu1 %v10163_v36, %s7624_s7 }
 0x7bb   : > { %5415 = vrot.lane.b32.xlu0 %v5908_v8, %s7623_s6  ;;  %v5915_v8 = vld [vmem:[#allocation2 + $0x13a] sm:$0xff] }
 0x7bc   : > { %v5776_v20 = vpop.permute.xlu1 %5775 }
 0x7bd   : > { %5866 = vst.msk [vmem:[#allocation3 + $0x28] sm:$0xff] %vm1663_vm10, %v5776_v20  ;;  %v5202_v5 = vpop.permute.xlu0 %5201 }
 0x7be   : > { %5291 = vst.msk [vmem:[#allocation3 + $0x30] sm:$0xff] %vm1083_vm6, %v5202_v5  ;;  %5797 = vrot.lane.b32.xlu1 %v5717_v37, %s7625_s8 }
 0x7bf   : > { %5607 = vrot.lane.b32.xlu0 %v10157_v59, %s7624_s7  ;;  %v5909_v59 = vld [vmem:[#allocation2 + $0xf2] sm:$0xff] }
 0x7c0   : > { %v5204_v11 = vpop.permute.xlu1 %5203 }
 0x7c1   : > { %5292 = vst.msk [vmem:[#allocation3 + $0x38] sm:$0xff] %vm1083_vm6, %v5204_v11  ;;  %v5966_v28 = vpop.permute.xlu0 %5965 }
 0x7c2   : > { %6057 = vst.msk [vmem:[#allocation3 + $0x20] sm:$0xff] %vm1856_vm11, %v5966_v28  ;;  %5799 = vrot.lane.b32.xlu1 %v5718_v42, %s7625_s8 }
 0x7c3   : > { %5225 = vrot.lane.b32.xlu0 %v5717_v37, %s7622_s5  ;;  %v5342_v37 = vld [vmem:[#allocation2 + $0x142] sm:$0xff] }
 0x7c4   : > { %v5968_v36 = vpop.permute.xlu1 %5967 }
 0x7c5   : > { %6058 = vst.msk [vmem:[#allocation3 + $0x28] sm:$0xff] %vm1856_vm11, %v5968_v36  ;;  %v5394_v0 = vpop.permute.xlu0 %5393 }
 0x7c6   : > { %5483 = vst.msk [vmem:[#allocation3 + $0x30] sm:$0xff] %vm1276_vm7, %v5394_v0  ;;  %5227 = vrot.lane.b32.xlu1 %v5718_v42, %s7622_s5  ;;  %v4959_v42 = vld [vmem:[#allocation2 + $0x150] sm:$0xff] }
 0x7c7   : > { %5989 = vrot.lane.b32.xlu0 %v5909_v59, %s7626_s28 }
 0x7c8   : > { %v5586_v13 = vpop.permute.xlu1 %5585 }
 0x7c9   : > { %5675 = vst.msk [vmem:[#allocation3 + $0x30] sm:$0xff] %vm1470_vm8, %v5586_v13  ;;  %v5396_v44 = vpop.permute.xlu0 %5395  ;;  %v6089_v9 = vld [vmem:[#allocation3 + $0x20] sm:$0xff]  ;;  %v5534_v13 = vld [vmem:[#allocation2 + $0x158] sm:$0xff] }
 0x7ca   : > { %5484 = vst.msk [vmem:[#allocation3 + $0x38] sm:$0xff] %vm1276_vm7, %v5396_v44  ;;  %5991 = vrot.lane.b32.xlu1 %v5910_v31, %s7626_s28  ;;  %7426 = vmatprep.mubr.msk.f32.mxu0 %vm1933_vm12, %v6089_v9 }
 0x7cb   : > { %5417 = vrot.lane.b32.xlu0 %v5909_v59, %s7623_s6  ;;  %v5725_v59 = vld [vmem:[#allocation2 + $0x151] sm:$0xff] }
 0x7cc   : > { %v5778_v54 = vpop.permute.xlu1 %5777  ;;  %v6090_v56 = vld [vmem:[#allocation3 + $0x28] sm:$0xff] }
 0x7cd   : > { %5867 = vst.msk [vmem:[#allocation3 + $0x30] sm:$0xff] %vm1663_vm10, %v5778_v54  ;;  %7427 = vmatmul.mubr.msk.f32.gmra.mrb[20].mxu0 %vm1933_vm12, %v6090_v56  ;;  %v5588_v14 = vpop.permute.xlu0 %5587  ;;  %v5917_v56 = vld [vmem:[#allocation2 + $0x152] sm:$0xff] }
 0x7ce   : > { %5676 = vst.msk [vmem:[#allocation3 + $0x38] sm:$0xff] %vm1470_vm8, %v5588_v14  ;;  %5609 = vrot.lane.b32.xlu1 %v10177_v57, %s7624_s7 }
 0x7cf   : > { %5419 = vrot.lane.b32.xlu0 %v5910_v31, %s7623_s6 }
 0x7d0   : > { %v5780_v63 = vpop.permute.xlu1 %5779 }
 0x7d1   : > { %5868 = vst.msk [vmem:[#allocation3 + $0x38] sm:$0xff] %vm1663_vm10, %v5780_v63  ;;  %v5206_v47 = vpop.permute.xlu0 %5205  ;;  %v5726_v63 = vld [vmem:[#allocation2 + $0x159] sm:$0xff] }
 0x7d2   : > { %5293 = vst.msk [vmem:[#allocation3 + $0x40] sm:$0xff] %vm1083_vm6, %v5206_v47  ;;  %5801 = vrot.lane.b32.xlu1 %v5719_v7, %s7625_s8 }
 0x7d3   : > { %5611 = vrot.lane.b32.xlu0 %v10171_v26, %s7624_s7  ;;  %v5911_v26 = vld [vmem:[#allocation2 + $0x10a] sm:$0xff] }
 0x7d4   : > { %v5208_v46 = vpop.permute.xlu1 %5207 }
 0x7d5   : > { %5294 = vst.msk [vmem:[#allocation3 + $0x48] sm:$0xff] %vm1083_vm6, %v5208_v46  ;;  %v5970_v23 = vpop.permute.xlu0 %5969 }
 0x7d6   : > { %6059 = vst.msk [vmem:[#allocation3 + $0x30] sm:$0xff] %vm1856_vm11, %v5970_v23  ;;  %5803 = vrot.lane.b32.xlu1 %v5720_v50, %s7625_s8 }
 0x7d7   : > { %5229 = vrot.lane.b32.xlu0 %v5719_v7, %s7622_s5 }
 0x7d8   : > { %v5972_v57 = vpop.permute.xlu1 %5971 }
 0x7d9   : > { %6060 = vst.msk [vmem:[#allocation3 + $0x38] sm:$0xff] %vm1856_vm11, %v5972_v57  ;;  %v5398_v43 = vpop.permute.xlu0 %5397  ;;  %v5344_v57 = vld [vmem:[#allocation2 + $0x15a] sm:$0xff] }
 0x7da   : > { %5485 = vst.msk [vmem:[#allocation3 + $0x40] sm:$0xff] %vm1276_vm7, %v5398_v43  ;;  %5231 = vrot.lane.b32.xlu1 %v5720_v50, %s7622_s5 }
 0x7db   : > { %5993 = vrot.lane.b32.xlu0 %v5911_v26, %s7626_s28 }
 0x7dc   : > { %v5590_v62 = vpop.permute.xlu1 %5589 }
 0x7dd   : > { %5677 = vst.msk [vmem:[#allocation3 + $0x40] sm:$0xff] %vm1470_vm8, %v5590_v62  ;;  %v5400_v33 = vpop.permute.xlu0 %5399  ;;  %v6091_v15 = vld [vmem:[#allocation3 + $0x30] sm:$0xff]  ;;  %v4961_v62 = vld [vmem:[#allocation2 + $0x168] sm:$0xff] }
 0x7de   : > { %5486 = vst.msk [vmem:[#allocation3 + $0x48] sm:$0xff] %vm1276_vm7, %v5400_v33  ;;  %5995 = vrot.lane.b32.xlu1 %v5912_v27, %s7626_s28  ;;  %7429 = vmatprep.mubr.msk.f32.mxu0 %vm1933_vm12, %v6091_v15  ;;  %v5727_v15 = vld [vmem:[#allocation2 + $0x169] sm:$0xff] }
 0x7df   : > { %5421 = vrot.lane.b32.xlu0 %v5911_v26, %s7623_s6 }
 0x7e0   : > { %v5782_v52 = vpop.permute.xlu1 %5781  ;;  %v6092_v35 = vld [vmem:[#allocation3 + $0x38] sm:$0xff] }
 0x7e1   : > { %5869 = vst.msk [vmem:[#allocation3 + $0x40] sm:$0xff] %vm1663_vm10, %v5782_v52  ;;  %v5592_v53 = vpop.permute.xlu0 %5591  ;;  %7430 = vmatmul.mubr.msk.f32.gmra.mrb[22].mxu0 %vm1933_vm12, %v6092_v35  ;;  %v5536_v52 = vld [vmem:[#allocation2 + $0x170] sm:$0xff] }
 0x7e2   : > { %5678 = vst.msk [vmem:[#allocation3 + $0x48] sm:$0xff] %vm1470_vm8, %v5592_v53  ;;  %5613 = vrot.lane.b32.xlu1 %v10191_v29, %s7624_s7 }
 0x7e3   : > { %5423 = vrot.lane.b32.xlu0 %v5912_v27, %s7623_s6 }
 0x7e4   : > { %v5784_v41 = vpop.permute.xlu1 %5783 }
 0x7e5   : > { %5870 = vst.msk [vmem:[#allocation3 + $0x48] sm:$0xff] %vm1663_vm10, %v5784_v41  ;;  %v5210_v16 = vpop.permute.xlu0 %5209 }
 0x7e6   : > { %5295 = vst.msk [vmem:[#allocation3 + $0x50] sm:$0xff] %vm1083_vm6, %v5210_v16  ;;  %5805 = vrot.lane.b32.xlu1 %v5721_v38, %s7625_s8 }
 0x7e7   : > { %5615 = vrot.lane.b32.xlu0 %v5530_v34, %s7624_s7 }
 0x7e8   : > { %v5212_v1 = vpop.permute.xlu1 %5211 }
 0x7e9   : > { %5296 = vst.msk [vmem:[#allocation3 + $0x58] sm:$0xff] %vm1083_vm6, %v5212_v1  ;;  %v5974_v39 = vpop.permute.xlu0 %5973  ;;  %v5919_v1 = vld [vmem:[#allocation2 + $0x16a] sm:$0xff] }
 0x7ea   : > { %6061 = vst.msk [vmem:[#allocation3 + $0x40] sm:$0xff] %vm1856_vm11, %v5974_v39  ;;  %5807 = vrot.lane.b32.xlu1 %v5722_v24, %s7625_s8  ;;  %v5728_v39 = vld [vmem:[#allocation2 + $0x171] sm:$0xff] }
 0x7eb   : > { %5233 = vrot.lane.b32.xlu0 %v5721_v38, %s7622_s5 }
 0x7ec   : > { %v5976_v29 = vpop.permute.xlu1 %5975 }
 0x7ed   : > { %6062 = vst.msk [vmem:[#allocation3 + $0x48] sm:$0xff] %vm1856_vm11, %v5976_v29  ;;  %v5402_v45 = vpop.permute.xlu0 %5401 }
 0x7ee   : > { %5487 = vst.msk [vmem:[#allocation3 + $0x50] sm:$0xff] %vm1276_vm7, %v5402_v45  ;;  %5235 = vrot.lane.b32.xlu1 %v5722_v24, %s7622_s5 }
 0x7ef   : > { %5997 = vrot.lane.b32.xlu0 %v5913_v10, %s7626_s28 }
 0x7f0   : > { %v5594_v58 = vpop.permute.xlu1 %5593 }
 0x7f1   : > { %5679 = vst.msk [vmem:[#allocation3 + $0x50] sm:$0xff] %vm1470_vm8, %v5594_v58  ;;  %v5404_v6 = vpop.permute.xlu0 %5403  ;;  %v6093_v3 = vld [vmem:[#allocation3 + $0x40] sm:$0xff] }
 0x7f2   : > { %5488 = vst.msk [vmem:[#allocation3 + $0x58] sm:$0xff] %vm1276_vm7, %v5404_v6  ;;  %5999 = vrot.lane.b32.xlu1 %v5914_v61, %s7626_s28  ;;  %7432 = vmatprep.mubr.msk.f32.mxu0 %vm1933_vm12, %v6093_v3  ;;  %v5346_v58 = vld [vmem:[#allocation2 + $0x172] sm:$0xff]  ;;  %v4963_v3 = vld [vmem:[#allocation2 + $0x180] sm:$0xff] }
 0x7f3   : > { %5425 = vrot.lane.b32.xlu0 %v5913_v10, %s7623_s6 }
 0x7f4   : > { %v5786_v2 = vpop.permute.xlu1 %5785  ;;  %v6094_v49 = vld [vmem:[#allocation3 + $0x48] sm:$0xff] }
 0x7f5   : > { %5871 = vst.msk [vmem:[#allocation3 + $0x50] sm:$0xff] %vm1663_vm10, %v5786_v2  ;;  %v5596_v30 = vpop.permute.xlu0 %5595  ;;  %7433 = vmatmul.mubr.msk.f32.gmra.mrb[24].mxu0 %vm1933_vm12, %v6094_v49 }
 0x7f6   : > { %5680 = vst.msk [vmem:[#allocation3 + $0x58] sm:$0xff] %vm1470_vm8, %v5596_v30  ;;  %5617 = vrot.lane.b32.xlu1 %v5531_v51, %s7624_s7  ;;  %v5729_v30 = vld [vmem:[#allocation2 + $0x181] sm:$0xff] }
 0x7f7   : > { %5427 = vrot.lane.b32.xlu0 %v5914_v61, %s7623_s6 }
 0x7f8   : > { %v5788_v17 = vpop.permute.xlu1 %5787 }
 0x7f9   : > { %5872 = vst.msk [vmem:[#allocation3 + $0x58] sm:$0xff] %vm1663_vm10, %v5788_v17  ;;  %v5214_v22 = vpop.permute.xlu0 %5213  ;;  %v5538_v17 = vld [vmem:[#allocation2 + $0x188] sm:$0xff] }
 0x7fa   : > { %5297 = vst.msk [vmem:[#allocation3 + $0x60] sm:$0xff] %vm1083_vm6, %v5214_v22  ;;  %5809 = vrot.lane.b32.xlu1 %v5723_v18, %s7625_s8 }
 0x7fb   : > { %5619 = vrot.lane.b32.xlu0 %v5532_v48, %s7624_s7 }
 0x7fc   : > { %v5216_v55 = vpop.permute.xlu1 %5215 }
 0x7fd   : > { %5298 = vst.msk [vmem:[#allocation3 + $0x68] sm:$0xff] %vm1083_vm6, %v5216_v55  ;;  %v5978_v21 = vpop.permute.xlu0 %5977 }
 0x7fe   : > { %6063 = vst.msk [vmem:[#allocation3 + $0x50] sm:$0xff] %vm1856_vm11, %v5978_v21  ;;  %5237 = vrot.lane.b32.xlu1 %v5723_v18, %s7622_s5 }
 0x7ff   : > { %5047 = vrot.lane.b32.xlu0 %v5532_v48, %s7621_s4 }
 0x800   : > { %v5980_v25 = vpop.permute.xlu1 %5979 }
 0x801   : > { %6064 = vst.msk [vmem:[#allocation3 + $0x58] sm:$0xff] %vm1856_vm11, %v5980_v25  ;;  %v5406_v12 = vpop.permute.xlu0 %5405  ;;  %v5921_v25 = vld [vmem:[#allocation2 + $0x182] sm:$0xff] }
 0x802   : > { %5489 = vst.msk [vmem:[#allocation3 + $0x60] sm:$0xff] %vm1276_vm7, %v5406_v12  ;;  %6001 = vrot.lane.b32.xlu1 %v5915_v8, %s7626_s28  ;;  %v5730_v12 = vld [vmem:[#allocation2 + $0x189] sm:$0xff] }
 0x803   : > { %5811 = vrot.lane.b32.xlu0 %v5724_v32, %s7625_s8 }
 0x804   : > { %v5598_v4 = vpop.permute.xlu1 %5597 }
 0x805   : > { %5681 = vst.msk [vmem:[#allocation3 + $0x60] sm:$0xff] %vm1470_vm8, %v5598_v4  ;;  %v5408_v60 = vpop.permute.xlu0 %5407  ;;  %v6095_v19 = vld [vmem:[#allocation3 + $0x50] sm:$0xff] }
 0x806   : > { %5490 = vst.msk [vmem:[#allocation3 + $0x68] sm:$0xff] %vm1276_vm7, %v5408_v60  ;;  %5429 = vrot.lane.b32.xlu1 %v5915_v8, %s7623_s6  ;;  %7435 = vmatprep.mubr.msk.f32.mxu0 %vm1933_vm12, %v6095_v19  ;;  %v5348_v19 = vld [vmem:[#allocation2 + $0x18a] sm:$0xff] }
 0x807   : > { %5239 = vrot.lane.b32.xlu0 %v5724_v32, %s7622_s5 }
 0x808   : > { %v5790_v40 = vpop.permute.xlu1 %5789  ;;  %v6096_v20 = vld [vmem:[#allocation3 + $0x58] sm:$0xff] }
 0x809   : > { %5873 = vst.msk [vmem:[#allocation3 + $0x60] sm:$0xff] %vm1663_vm10, %v5790_v40  ;;  %v5600_v5 = vpop.permute.xlu0 %5599  ;;  %7436 = vmatmul.mubr.msk.f32.gmra.mrb[26].mxu0 %vm1933_vm12, %v6096_v20  ;;  %v5540_v40 = vld [vmem:[#allocation2 + $0x1a0] sm:$0xff] }
 0x80a   : > { %5682 = vst.msk [vmem:[#allocation3 + $0x68] sm:$0xff] %vm1470_vm8, %v5600_v5  ;;  %5431 = vrot.lane.b32.xlu1 %v5342_v37, %s7623_s6  ;;  %v5539_v5 = vld [vmem:[#allocation2 + $0x198] sm:$0xff] }
 0x80b   : > { %6003 = vrot.lane.b32.xlu0 %v5342_v37, %s7626_s28 }
 0x80c   : > { %v5792_v11 = vpop.permute.xlu1 %5791 }
 0x80d   : > { %5874 = vst.msk [vmem:[#allocation3 + $0x68] sm:$0xff] %vm1663_vm10, %v5792_v11  ;;  %v5218_v28 = vpop.permute.xlu0 %5217 }
 0x80e   : > { %5299 = vst.msk [vmem:[#allocation3 + $0x70] sm:$0xff] %vm1083_vm6, %v5218_v28  ;;  %5049 = vrot.lane.b32.xlu1 %v4959_v42, %s7621_s4  ;;  %v5732_v28 = vld [vmem:[#allocation2 + $0x1a1] sm:$0xff] }
 0x80f   : > { %5621 = vrot.lane.b32.xlu0 %v4959_v42, %s7624_s7 }
 0x810   : > { %v5220_v36 = vpop.permute.xlu1 %5219 }
 0x811   : > { %5300 = vst.msk [vmem:[#allocation3 + $0x78] sm:$0xff] %vm1083_vm6, %v5220_v36  ;;  %v5982_v0 = vpop.permute.xlu0 %5981 }
 0x812   : > { %6065 = vst.msk [vmem:[#allocation3 + $0x60] sm:$0xff] %vm1856_vm11, %v5982_v0  ;;  %5813 = vrot.lane.b32.xlu1 %v5725_v59, %s7625_s8  ;;  %v5731_v0 = vld [vmem:[#allocation2 + $0x199] sm:$0xff] }
 0x813   : > { %5623 = vrot.lane.b32.xlu0 %v5534_v13, %s7624_s7 }
 0x814   : > { %v5984_v44 = vpop.permute.xlu1 %5983 }
 0x815   : > { %6066 = vst.msk [vmem:[#allocation3 + $0x68] sm:$0xff] %vm1856_vm11, %v5984_v44  ;;  %v5410_v31 = vpop.permute.xlu0 %5409 }
 0x816   : > { %5491 = vst.msk [vmem:[#allocation3 + $0x70] sm:$0xff] %vm1276_vm7, %v5410_v31  ;;  %5241 = vrot.lane.b32.xlu1 %v5725_v59, %s7622_s5  ;;  %v5923_v31 = vld [vmem:[#allocation2 + $0x19a] sm:$0xff] }
 0x817   : > { %5051 = vrot.lane.b32.xlu0 %v5534_v13, %s7621_s4  ;;  %v5924_v13 = vld [vmem:[#allocation2 + $0x1a2] sm:$0xff] }
 0x818   : > { %v5602_v9 = vpop.permute.xlu1 %5601 }
 0x819   : > { %5683 = vst.msk [vmem:[#allocation3 + $0x70] sm:$0xff] %vm1470_vm8, %v5602_v9  ;;  %v5412_v54 = vpop.permute.xlu0 %5411  ;;  %v6097_v14 = vld [vmem:[#allocation3 + $0x60] sm:$0xff] }
 0x81a   : > { %5492 = vst.msk [vmem:[#allocation3 + $0x78] sm:$0xff] %vm1276_vm7, %v5412_v54  ;;  %6005 = vrot.lane.b32.xlu1 %v5917_v56, %s7626_s28  ;;  %7438 = vmatprep.mubr.msk.f32.mxu0 %vm1933_vm12, %v6097_v14 }
 0x81b   : > { %5815 = vrot.lane.b32.xlu0 %v5726_v63, %s7625_s8 }
 0x81c   : > { %v5794_v47 = vpop.permute.xlu1 %5793  ;;  %v6098_v7 = vld [vmem:[#allocation3 + $0x68] sm:$0xff] }
 0x81d   : > { %5875 = vst.msk [vmem:[#allocation3 + $0x70] sm:$0xff] %vm1663_vm10, %v5794_v47  ;;  %v5604_v46 = vpop.permute.xlu0 %5603  ;;  %7439 = vmatmul.mubr.msk.f32.gmra.mrb[28].mxu0 %vm1933_vm12, %v6098_v7 }
 0x81e   : > { %5684 = vst.msk [vmem:[#allocation3 + $0x78] sm:$0xff] %vm1470_vm8, %v5604_v46  ;;  %5433 = vrot.lane.b32.xlu1 %v5917_v56, %s7623_s6 }
 0x81f   : > { %5243 = vrot.lane.b32.xlu0 %v5726_v63, %s7622_s5 }
 0x820   : > { %v5796_v23 = vpop.permute.xlu1 %5795 }
 0x821   : > { %5876 = vst.msk [vmem:[#allocation3 + $0x78] sm:$0xff] %vm1663_vm10, %v5796_v23  ;;  %v5222_v50 = vpop.permute.xlu0 %5221 }
 0x822   : > { %5301 = vst.msk [vmem:[#allocation3 + $0x80] sm:$0xff] %vm1083_vm6, %v5222_v50  ;;  %5435 = vrot.lane.b32.xlu1 %v5344_v57, %s7623_s6 }
 0x823   : > { %6007 = vrot.lane.b32.xlu0 %v5344_v57, %s7626_s28 }
 0x824   : > { %v5224_v43 = vpop.permute.xlu1 %5223 }
 0x825   : > { %5302 = vst.msk [vmem:[#allocation3 + $0x88] sm:$0xff] %vm1083_vm6, %v5224_v43  ;;  %v5986_v26 = vpop.permute.xlu0 %5985 }
 0x826   : > { %6067 = vst.msk [vmem:[#allocation3 + $0x70] sm:$0xff] %vm1856_vm11, %v5986_v26  ;;  %5053 = vrot.lane.b32.xlu1 %v4961_v62, %s7621_s4 }
 0x827   : > { %5625 = vrot.lane.b32.xlu0 %v4961_v62, %s7624_s7 }
 0x828   : > { %v5988_v33 = vpop.permute.xlu1 %5987 }
 0x829   : > { %6068 = vst.msk [vmem:[#allocation3 + $0x78] sm:$0xff] %vm1856_vm11, %v5988_v33  ;;  %v5414_v27 = vpop.permute.xlu0 %5413 }
 0x82a   : > { %5493 = vst.msk [vmem:[#allocation3 + $0x80] sm:$0xff] %vm1276_vm7, %v5414_v27  ;;  %5817 = vrot.lane.b32.xlu1 %v5727_v15, %s7625_s8 }
 0x82b   : > { %5627 = vrot.lane.b32.xlu0 %v5536_v52, %s7624_s7 }
 0x82c   : > { %v5606_v35 = vpop.permute.xlu1 %5605 }
 0x82d   : > { %5685 = vst.msk [vmem:[#allocation3 + $0x80] sm:$0xff] %vm1470_vm8, %v5606_v35  ;;  %v5416_v53 = vpop.permute.xlu0 %5415  ;;  %v6099_v41 = vld [vmem:[#allocation3 + $0x70] sm:$0xff] }
 0x82e   : > { %5494 = vst.msk [vmem:[#allocation3 + $0x88] sm:$0xff] %vm1276_vm7, %v5416_v53  ;;  %5245 = vrot.lane.b32.xlu1 %v5727_v15, %s7622_s5  ;;  %7441 = vmatprep.mubr.msk.f32.mxu0 %vm1933_vm12, %v6099_v41 }
 0x82f   : > { %5055 = vrot.lane.b32.xlu0 %v5536_v52, %s7621_s4 }
 0x830   : > { %v5798_v16 = vpop.permute.xlu1 %5797  ;;  %v6100_v38 = vld [vmem:[#allocation3 + $0x78] sm:$0xff] }
 0x831   : > { %5877 = vst.msk [vmem:[#allocation3 + $0x80] sm:$0xff] %vm1663_vm10, %v5798_v16  ;;  %v5608_v34 = vpop.permute.xlu0 %5607  ;;  %7442 = vmatmul.mubr.msk.f32.gmra.mrb[30].mxu0 %vm1933_vm12, %v6100_v38 }
 0x832   : > { %5686 = vst.msk [vmem:[#allocation3 + $0x88] sm:$0xff] %vm1470_vm8, %v5608_v34  ;;  %6009 = vrot.lane.b32.xlu1 %v5919_v1, %s7626_s28 }
 0x833   : > { %5819 = vrot.lane.b32.xlu0 %v5728_v39, %s7625_s8 }
 0x834   : > { %v5800_v24 = vpop.permute.xlu1 %5799 }
 0x835   : > { %5878 = vst.msk [vmem:[#allocation3 + $0x88] sm:$0xff] %vm1663_vm10, %v5800_v24  ;;  %v5226_v29 = vpop.permute.xlu0 %5225 }
 0x836   : > { %5303 = vst.msk [vmem:[#allocation3 + $0x90] sm:$0xff] %vm1083_vm6, %v5226_v29  ;;  %5437 = vrot.lane.b32.xlu1 %v5919_v1, %s7623_s6 }
 0x837   : > { %5247 = vrot.lane.b32.xlu0 %v5728_v39, %s7622_s5 }
 0x838   : > { %v5228_v45 = vpop.permute.xlu1 %5227 }
 0x839   : > { %5304 = vst.msk [vmem:[#allocation3 + $0x98] sm:$0xff] %vm1083_vm6, %v5228_v45  ;;  %v5990_v10 = vpop.permute.xlu0 %5989 }
 0x83a   : > { %6069 = vst.msk [vmem:[#allocation3 + $0x80] sm:$0xff] %vm1856_vm11, %v5990_v10  ;;  %5439 = vrot.lane.b32.xlu1 %v5346_v58, %s7623_s6  ;;  %v10846_v10 = vld [vmem:[%s11444_s2 + $0x2] ss:$0 sm:$0xff] }
 0x83b   : > { %6011 = vrot.lane.b32.xlu0 %v5346_v58, %s7626_s28 }
 0x83c   : > { %v5992_v6 = vpop.permute.xlu1 %5991 }
 0x83d   : > { %6070 = vst.msk [vmem:[#allocation3 + $0x88] sm:$0xff] %vm1856_vm11, %v5992_v6  ;;  %v5418_v61 = vpop.permute.xlu0 %5417 }
 0x83e   : > { %5495 = vst.msk [vmem:[#allocation3 + $0x90] sm:$0xff] %vm1276_vm7, %v5418_v61  ;;  %5057 = vrot.lane.b32.xlu1 %v4963_v3, %s7621_s4 }
 0x83f   : > { %5629 = vrot.lane.b32.xlu0 %v4963_v3, %s7624_s7 }
 0x840   : > { %v5610_v2 = vpop.permute.xlu1 %5609 }
 0x841   : > { %5687 = vst.msk [vmem:[#allocation3 + $0x90] sm:$0xff] %vm1470_vm8, %v5610_v2  ;;  %v5420_v49 = vpop.permute.xlu0 %5419  ;;  %v6101_v51 = vld [vmem:[#allocation3 + $0x80] sm:$0xff] }
 0x842   : > { %5496 = vst.msk [vmem:[#allocation3 + $0x98] sm:$0xff] %vm1276_vm7, %v5420_v49  ;;  %5821 = vrot.lane.b32.xlu1 %v5729_v30, %s7625_s8  ;;  %7444 = vmatprep.mubr.msk.f32.mxu0 %vm1933_vm12, %v6101_v51 }
 0x843   : > { %5631 = vrot.lane.b32.xlu0 %v5538_v17, %s7624_s7 }
 0x844   : > { %v5802_v22 = vpop.permute.xlu1 %5801  ;;  %v6102_v18 = vld [vmem:[#allocation3 + $0x88] sm:$0xff] }
 0x845   : > { %5879 = vst.msk [vmem:[#allocation3 + $0x90] sm:$0xff] %vm1663_vm10, %v5802_v22  ;;  %v5612_v48 = vpop.permute.xlu0 %5611  ;;  %7445 = vmatmul.mubr.msk.f32.gmra.mrb[32].mxu0 %vm1933_vm12, %v6102_v18  ;;  %v11694_v22 = vld [vmem:[#allocation8_spill] sm:$0xff] }
 0x846   : > { %5688 = vst.msk [vmem:[#allocation3 + $0x98] sm:$0xff] %vm1470_vm8, %v5612_v48  ;;  %5249 = vrot.lane.b32.xlu1 %v5729_v30, %s7622_s5  ;;  %v11693_v30 = vld [vmem:[#allocation10_spill] sm:$0xff] }
 0x847   : > { %5059 = vrot.lane.b32.xlu0 %v5538_v17, %s7621_s4 }
 0x848   : > { %v5804_v55 = vpop.permute.xlu1 %5803 }
 0x849   : > { %5880 = vst.msk [vmem:[#allocation3 + $0x98] sm:$0xff] %vm1663_vm10, %v5804_v55  ;;  %v5230_v21 = vpop.permute.xlu0 %5229 }
 0x84a   : > { %5305 = vst.msk [vmem:[#allocation3 + $0xa0] sm:$0xff] %vm1083_vm6, %v5230_v21  ;;  %6013 = vrot.lane.b32.xlu1 %v5921_v25, %s7626_s28 }
 0x84b   : > { %5823 = vrot.lane.b32.xlu0 %v5730_v12, %s7625_s8 }
 0x84c   : > { %v5232_v8 = vpop.permute.xlu1 %5231 }
 0x84d   : > { %5306 = vst.msk [vmem:[#allocation3 + $0xa8] sm:$0xff] %vm1083_vm6, %v5232_v8  ;;  %v5994_v32 = vpop.permute.xlu0 %5993 }
 0x84e   : > { %6071 = vst.msk [vmem:[#allocation3 + $0x90] sm:$0xff] %vm1856_vm11, %v5994_v32  ;;  %5441 = vrot.lane.b32.xlu1 %v5921_v25, %s7623_s6 }
 0x84f   : > { %5251 = vrot.lane.b32.xlu0 %v5730_v12, %s7622_s5 }
 0x850   : > { %v5996_v4 = vpop.permute.xlu1 %5995 }
 0x851   : > { %6072 = vst.msk [vmem:[#allocation3 + $0x98] sm:$0xff] %vm1856_vm11, %v5996_v4  ;;  %v5422_v60 = vpop.permute.xlu0 %5421 }
 0x852   : > { %5497 = vst.msk [vmem:[#allocation3 + $0xa0] sm:$0xff] %vm1276_vm7, %v5422_v60  ;;  %5443 = vrot.lane.b32.xlu1 %v5348_v19, %s7623_s6 }
 0x853   : > { %6015 = vrot.lane.b32.xlu0 %v5348_v19, %s7626_s28 }
 0x854   : > { %v5614_v20 = vpop.permute.xlu1 %5613 }
 0x855   : > { %5689 = vst.msk [vmem:[#allocation3 + $0xa0] sm:$0xff] %vm1470_vm8, %v5614_v20  ;;  %v5424_v37 = vpop.permute.xlu0 %5423  ;;  %v6103_v11 = vld [vmem:[#allocation3 + $0x90] sm:$0xff] }
 0x856   : > { %5498 = vst.msk [vmem:[#allocation3 + $0xa8] sm:$0xff] %vm1276_vm7, %v5424_v37  ;;  %7447 = vmatprep.mubr.msk.f32.mxu0 %vm1933_vm12, %v6103_v11  ;;  %5635 = vrot.lane.b32.xlu1 %v5540_v40, %s7624_s7 }
 0x857   : > { %5633 = vrot.lane.b32.xlu0 %v5539_v5, %s7624_s7 }
 0x858   : > { %v5806_v42 = vpop.permute.xlu1 %5805  ;;  %v6104_v36 = vld [vmem:[#allocation3 + $0x98] sm:$0xff] }
 0x859   : > { %5881 = vst.msk [vmem:[#allocation3 + $0xa0] sm:$0xff] %vm1663_vm10, %v5806_v42  ;;  %v5616_v59 = vpop.permute.xlu0 %5615  ;;  %7448 = vmatmul.mubr.msk.f32.gmra.mrb[34].mxu0 %vm1933_vm12, %v6104_v36  ;;  %v11695_v42 = vld [vmem:[#allocation9_spill] sm:$0xff] }
 0x85a   : > { %5690 = vst.msk [vmem:[#allocation3 + $0xa8] sm:$0xff] %vm1470_vm8, %v5616_v59  ;;  %5827 = vrot.lane.b32.xlu1 %v5732_v28, %s7625_s8 }
 0x85b   : > { %5825 = vrot.lane.b32.xlu0 %v5731_v0, %s7625_s8 }
 0x85c   : > { %v5808_v44 = vpop.permute.xlu1 %5807 }
 0x85d   : > { %5882 = vst.msk [vmem:[#allocation3 + $0xa8] sm:$0xff] %vm1663_vm10, %v5808_v44  ;;  %v5234_v9 = vpop.permute.xlu0 %5233 }
 0x85e   : > { %5307 = vst.msk [vmem:[#allocation3 + $0xb0] sm:$0xff] %vm1083_vm6, %v5234_v9  ;;  %6019 = vrot.lane.b32.xlu1 %v5924_v13, %s7626_s28 }
 0x85f   : > { %6017 = vrot.lane.b32.xlu0 %v5923_v31, %s7626_s28 }
 0x860   : > { %v5236_v54 = vpop.permute.xlu1 %5235 }
 0x861   : > { %5308 = vst.msk [vmem:[#allocation3 + $0xb8] sm:$0xff] %vm1083_vm6, %v5236_v54  ;;  %v5998_v56 = vpop.permute.xlu0 %5997 }
 0x862   : > { %6073 = vst.msk [vmem:[#allocation3 + $0xa0] sm:$0xff] %vm1856_vm11, %v5998_v56 }
 0x864   : > { %v6000_v14 = vpop.permute.xlu1 %5999 }
 0x865   : > { %6074 = vst.msk [vmem:[#allocation3 + $0xa8] sm:$0xff] %vm1856_vm11, %v6000_v14  ;;  %v5426_v63 = vpop.permute.xlu0 %5425 }
 0x866   : > { %5499 = vst.msk [vmem:[#allocation3 + $0xb0] sm:$0xff] %vm1276_vm7, %v5426_v63 }
 0x868   : > { %v5618_v47 = vpop.permute.xlu1 %5617 }
 0x869   : > { %5691 = vst.msk [vmem:[#allocation3 + $0xb0] sm:$0xff] %vm1470_vm8, %v5618_v47  ;;  %v5428_v7 = vpop.permute.xlu0 %5427  ;;  %v6105_v46 = vld [vmem:[#allocation3 + $0xa0] sm:$0xff] }
 0x86a   : > { %5500 = vst.msk [vmem:[#allocation3 + $0xb8] sm:$0xff] %vm1276_vm7, %v5428_v7  ;;  %7450 = vmatprep.mubr.msk.f32.mxu0 %vm1933_vm12, %v6105_v46  ;;  %v11696_v47 = vld [vmem:[#allocation7_spill] sm:$0xff]  ;;  %v11697_v46 = vld [vmem:[#allocation12_spill] sm:$0xff] }
 0x86c   : > { %v5810_v23 = vpop.permute.xlu1 %5809  ;;  %v6106_v50 = vld [vmem:[#allocation3 + $0xa8] sm:$0xff] }
 0x86d   : > { %5883 = vst.msk [vmem:[#allocation3 + $0xb0] sm:$0xff] %vm1663_vm10, %v5810_v23  ;;  %v5620_v57 = vpop.permute.xlu0 %5619  ;;  %7451 = vmatmul.mubr.msk.f32.gmra.mrb[36].mxu0 %vm1933_vm12, %v6106_v50  ;;  %v11698_v50 = vld [vmem:[#allocation11_spill] sm:$0xff] }
 0x86e   : > { %5692 = vst.msk [vmem:[#allocation3 + $0xb8] sm:$0xff] %vm1470_vm8, %v5620_v57 }
 0x870   : > { %v5238_v43 = vpop.permute.xlu1 %5237 }
 0x871   : > { %5309 = vst.msk [vmem:[#allocation3 + $0xc0] sm:$0xff] %vm1083_vm6, %v5238_v43  ;;  %v5048_v26 = vpop.permute.xlu0 %5047 }
 0x872   : > { %5118 = vst.msk [vmem:[#allocation3 + $0xc8] sm:$0xff] %vm890_vm5, %v5048_v26 }
 0x874   : > { %v6002_v62 = vpop.permute.xlu1 %6001 }
 0x875   : > { %6075 = vst.msk [vmem:[#allocation3 + $0xb0] sm:$0xff] %vm1856_vm11, %v6002_v62  ;;  %v5812_v33 = vpop.permute.xlu0 %5811 }
 0x876   : > { %5884 = vst.msk [vmem:[#allocation3 + $0xb8] sm:$0xff] %vm1663_vm10, %v5812_v33 }
 0x878   : > { %v5430_v27 = vpop.permute.xlu1 %5429  ;;  %v7422_v15 = vpop.f32.mrb[16].mxu0 }
 0x879   : > { %5501 = vst.msk [vmem:[#allocation3 + $0xc0] sm:$0xff] %vm1276_vm7, %v5430_v27  ;;  %v10831_v52 = vpop.f32.mrb[17].mxu0  ;;  %v5240_v35 = vpop.permute.xlu0 %5239  ;;  %v6302_v61 = vadd.f32 %v7422_v15, %v10846_v10 }
 0x87a   : > { %5310 = vst.msk [vmem:[#allocation3 + $0xc8] sm:$0xff] %vm1083_vm6, %v5240_v35  ;;  %v6297_v13 = vadd.f32 %v10846_v10, %v10831_v52 }
 0x87b   : > { %v10855_v18 = vadd.f32 %v6302_v61, %v11694_v22 }
 0x87c   : > { %v5432_v53 = vpop.permute.xlu1 %5431  ;;  %v6107_v41 = vld [vmem:[#allocation3 + $0xb0] sm:$0xff]  ;;  %v10903_v7 = vadd.f32 %v6297_v13, %v11696_v47 }
 0x87d   : > { %5502 = vst.msk [vmem:[#allocation3 + $0xc8] sm:$0xff] %vm1276_vm7, %v5432_v53  ;;  %v6004_v16 = vpop.permute.xlu0 %6003  ;;  %7453 = vmatprep.mubr.msk.f32.mxu0 %vm1933_vm12, %v6107_v41 }
 0x87e   : > { %6076 = vst.msk [vmem:[#allocation3 + $0xb8] sm:$0xff] %vm1856_vm11, %v6004_v16 }
 0x880   : > { %v5050_v38 = vpop.permute.xlu1 %5049 }
 0x881   : > { %5119 = vst.msk [vmem:[#allocation3 + $0xd0] sm:$0xff] %vm890_vm5, %v5050_v38  ;;  %v5622_v34 = vpop.permute.xlu0 %5621 }
 0x882   : > { %5693 = vst.msk [vmem:[#allocation3 + $0xc0] sm:$0xff] %vm1470_vm8, %v5622_v34 }
 0x884   : > { %v5814_v1 = vpop.permute.xlu1 %5813 }
 0x885   : > { %5885 = vst.msk [vmem:[#allocation3 + $0xc0] sm:$0xff] %vm1663_vm10, %v5814_v1  ;;  %v5624_v39 = vpop.permute.xlu0 %5623  ;;  %v6108_v24 = vld [vmem:[#allocation3 + $0xb8] sm:$0xff] }
 0x886   : > { %5694 = vst.msk [vmem:[#allocation3 + $0xc8] sm:$0xff] %vm1470_vm8, %v5624_v39  ;;  %7454 = vmatmul.mubr.msk.f32.gmra.mrb[38].mxu0 %vm1933_vm12, %v6108_v24 }
 0x888   : > { %v5242_v29 = vpop.permute.xlu1 %5241 }
 0x889   : > { %5311 = vst.msk [vmem:[#allocation3 + $0xd0] sm:$0xff] %vm1083_vm6, %v5242_v29  ;;  %v5052_v45 = vpop.permute.xlu0 %5051 }
 0x88a   : > { %5120 = vst.msk [vmem:[#allocation3 + $0xd8] sm:$0xff] %vm890_vm5, %v5052_v45 }
 0x88c   : > { %v6006_v58 = vpop.permute.xlu1 %6005  ;;  %v7425_v6 = vpop.f32.mrb[18].mxu0 }
 0x88d   : > { %6077 = vst.msk [vmem:[#allocation3 + $0xc0] sm:$0xff] %vm1856_vm11, %v6006_v58  ;;  %v6312_v3 = vadd.f32 %v7425_v6, %v10846_v10  ;;  %v6306_v2 = vpop.f32.mrb[19].mxu0  ;;  %v5816_v49 = vpop.permute.xlu0 %5815 }
 0x88e   : > { %5886 = vst.msk [vmem:[#allocation3 + $0xc8] sm:$0xff] %vm1663_vm10, %v5816_v49  ;;  %v6307_v37 = vadd.f32 %v10846_v10, %v6306_v2 }
 0x88f   : > { %v6458_v51 = vadd.f32 %v6312_v3, %v11693_v30 }
 0x890   : > { %v5434_v17 = vpop.permute.xlu1 %5433  ;;  %v6457_v36 = vadd.f32 %v6307_v37, %v11695_v42  ;;  %v11700_v37 = vld [vmem:[#allocation13_spill] sm:$0xff] }
 0x891   : > { %v10857_v48 = vrot.slane %v6458_v51, 7  ;;  %5503 = vst.msk [vmem:[#allocation3 + $0xd0] sm:$0xff] %vm1276_vm7, %v5434_v17  ;;  %v5244_v55 = vpop.permute.xlu0 %5243 }
 0x892   : > { %5312 = vst.msk [vmem:[#allocation3 + $0xd8] sm:$0xff] %vm1083_vm6, %v5244_v55  ;;  %v10896_v9 = vrot.slane %v6457_v36, 7 }
 0x893   : > { %v6748_v21 = vsel %vm6504_vm14, %v10857_v48, %v10855_v18  ;;  %v6783_v25 = vsel %vm6507_vm1, %v10857_v48, %v10855_v18  ;;  %v6811_v12 = vsel %vm6510_vm2, %v10857_v48, %v10855_v18  ;;  %v6839_v8 = vsel %vm6513_vm13, %v10857_v48, %v10855_v18 }
 0x894   : > { %v5436_v32 = vpop.permute.xlu1 %5435  ;;  %v6109_v4 = vld [vmem:[#allocation3 + $0xc0] sm:$0xff]  ;;  %v6867_v19 = vsel %vm6516_vm9, %v10857_v48, %v10855_v18  ;;  %v6895_v40 = vsel %vm6519_vm15, %v10857_v48, %v10855_v18  ;;  %v10885_v20 = vsel %vm6522_vm4, %v10857_v48, %v10855_v18  ;;  %v6542_v33 = vsel %vm6507_vm1, %v10896_v9, %v10903_v7 }
 0x895   : > { %5504 = vst.msk [vmem:[#allocation3 + $0xd8] sm:$0xff] %vm1276_vm7, %v5436_v32  ;;  %v6008_v60 = vpop.permute.xlu0 %6007  ;;  %7456 = vmatprep.mubr.msk.f32.mxu0 %vm1933_vm12, %v6109_v4  ;;  %v6505_v27 = vsel %vm6504_vm14, %v10896_v9, %v10903_v7  ;;  %v6569_v15 = vsel %vm6510_vm2, %v10896_v9, %v10903_v7  ;;  %v6596_v35 = vsel %vm6513_vm13, %v10896_v9, %v10903_v7 }
 0x896   : > { %6078 = vst.msk [vmem:[#allocation3 + $0xc8] sm:$0xff] %vm1856_vm11, %v6008_v60  ;;  %v6623_v53 = vsel %vm6516_vm9, %v10896_v9, %v10903_v7  ;;  %v6650_v41 = vsel %vm6519_vm15, %v10896_v9, %v10903_v7 }
 0x898   : > { %v5054_v5 = vpop.permute.xlu1 %5053 }
 0x899   : > { %5121 = vst.msk [vmem:[#allocation3 + $0xe0] sm:$0xff] %vm890_vm5, %v5054_v5  ;;  %v5626_v11 = vpop.permute.xlu0 %5625 }
 0x89a   : > { %5695 = vst.msk [vmem:[#allocation3 + $0xd0] sm:$0xff] %vm1470_vm8, %v5626_v11 }
 0x89c   : > { %v5818_v28 = vpop.permute.xlu1 %5817 }
 0x89d   : > { %5887 = vst.msk [vmem:[#allocation3 + $0xd0] sm:$0xff] %vm1663_vm10, %v5818_v28  ;;  %v5628_v0 = vpop.permute.xlu0 %5627  ;;  %v6110_v59 = vld [vmem:[#allocation3 + $0xc8] sm:$0xff] }
 0x89e   : > { %5696 = vst.msk [vmem:[#allocation3 + $0xd8] sm:$0xff] %vm1470_vm8, %v5628_v0  ;;  %7457 = vmatmul.mubr.msk.f32.gmra.mrb[40].mxu0 %vm1933_vm12, %v6110_v59 }
 0x8a0   : > { %v5246_v44 = vpop.permute.xlu1 %5245  ;;  %v7428_v31 = vpop.f32.mrb[20].mxu0 }
 0x8a1   : > { %5313 = vst.msk [vmem:[#allocation3 + $0xe0] sm:$0xff] %vm1083_vm6, %v5246_v44  ;;  %v6322_v54 = vadd.f32 %v7428_v31, %v10846_v10  ;;  %v6316_v56 = vpop.f32.mrb[21].mxu0  ;;  %v5056_v14 = vpop.permute.xlu0 %5055 }
 0x8a2   : > { %v6317_v63 = vadd.f32 %v10846_v10, %v6316_v56  ;;  %5122 = vst.msk [vmem:[#allocation3 + $0xe8] sm:$0xff] %vm890_vm5, %v5056_v14 }
 0x8a3   : > { %v6460_v23 = vadd.f32 %v6322_v54, %v11697_v46 }
 0x8a4   : > { %v6459_v57 = vadd.f32 %v6317_v63, %v11698_v50  ;;  %v6010_v43 = vpop.permute.xlu1 %6009 }
 0x8a5   : > { %v10907_v26 = vrot.slane %v6460_v23, 6  ;;  %6079 = vst.msk [vmem:[#allocation3 + $0xd0] sm:$0xff] %vm1856_vm11, %v6010_v43  ;;  %v5820_v62 = vpop.permute.xlu0 %5819 }
 0x8a6   : > { %v10919_v52 = vrot.slane %v6459_v57, 6  ;;  %5888 = vst.msk [vmem:[#allocation3 + $0xd8] sm:$0xff] %vm1663_vm10, %v5820_v62 }
 0x8a7   : > { %v6750_v16 = vsel %vm6507_vm1, %v10907_v26, %v6748_v21  ;;  %v6784_v38 = vsel %vm6510_vm2, %v10907_v26, %v6783_v25  ;;  %v6812_v34 = vsel %vm6513_vm13, %v10907_v26, %v6811_v12  ;;  %v6840_v1 = vsel %vm6516_vm9, %v10907_v26, %v6839_v8 }
 0x8a8   : > { %v5438_v39 = vpop.permute.xlu1 %5437  ;;  %v6543_v24 = vsel %vm6510_vm2, %v10919_v52, %v6542_v33  ;;  %v6508_v29 = vsel %vm6507_vm1, %v10919_v52, %v6505_v27  ;;  %v6570_v45 = vsel %vm6513_vm13, %v10919_v52, %v6569_v15  ;;  %v6597_v58 = vsel %vm6516_vm9, %v10919_v52, %v6596_v35 }
 0x8a9   : > { %5505 = vst.msk [vmem:[#allocation3 + $0xe0] sm:$0xff] %vm1276_vm7, %v5438_v39  ;;  %v5248_v6 = vpop.permute.xlu0 %5247  ;;  %v6624_v61 = vsel %vm6519_vm15, %v10919_v52, %v6623_v53  ;;  %v10952_v3 = vsel %vm6522_vm4, %v10919_v52, %v6650_v41  ;;  %v6704_v2 = vsel %vm6504_vm14, %v10919_v52, %v10896_v9  ;;  %v6868_v49 = vsel %vm6519_vm15, %v10907_v26, %v6867_v19  ;;  %v11701_v39 = vld [vmem:[#allocation16_spill] sm:$0xff] }
 0x8aa   : > { %5314 = vst.msk [vmem:[#allocation3 + $0xe8] sm:$0xff] %vm1083_vm6, %v5248_v6  ;;  %v10962_v30 = vsel %vm6522_vm4, %v10907_v26, %v6895_v40  ;;  %v6951_v51 = vsel %vm6504_vm14, %v10907_v26, %v10857_v48  ;;  %v11699_v40 = vld [vmem:[#allocation14_spill] sm:$0xff] }
 0x8ac   : > { %v5440_v17 = vpop.permute.xlu1 %5439  ;;  %v6111_v22 = vld [vmem:[#allocation3 + $0xd0] sm:$0xff] }
 0x8ad   : > { %5506 = vst.msk [vmem:[#allocation3 + $0xe8] sm:$0xff] %vm1276_vm7, %v5440_v17  ;;  %v6012_v55 = vpop.permute.xlu0 %6011  ;;  %7459 = vmatprep.mubr.msk.f32.mxu0 %vm1933_vm12, %v6111_v22 }
 0x8ae   : > { %6080 = vst.msk [vmem:[#allocation3 + $0xd8] sm:$0xff] %vm1856_vm11, %v6012_v55 }
 0x8b0   : > { %v5058_v21 = vpop.permute.xlu1 %5057 }
 0x8b1   : > { %5123 = vst.msk [vmem:[#allocation3 + $0xf0] sm:$0xff] %vm890_vm5, %v5058_v21  ;;  %v5630_v25 = vpop.permute.xlu0 %5629 }
 0x8b2   : > { %5697 = vst.msk [vmem:[#allocation3 + $0xe0] sm:$0xff] %vm1470_vm8, %v5630_v25 }
 0x8b4   : > { %v5822_v12 = vpop.permute.xlu1 %5821  ;;  %v7431_v8 = vpop.f32.mrb[22].mxu0 }
 0x8b5   : > { %5889 = vst.msk [vmem:[#allocation3 + $0xe0] sm:$0xff] %vm1663_vm10, %v5822_v12  ;;  %v6332_v48 = vadd.f32 %v7431_v8, %v10846_v10  ;;  %v5632_v32 = vpop.permute.xlu0 %5631  ;;  %v6326_v4 = vpop.f32.mrb[23].mxu0  ;;  %v6112_v60 = vld [vmem:[#allocation3 + $0xd8] sm:$0xff] }
 0x8b6   : > { %5698 = vst.msk [vmem:[#allocation3 + $0xe8] sm:$0xff] %vm1470_vm8, %v5632_v32  ;;  %v6327_v19 = vadd.f32 %v10846_v10, %v6326_v4  ;;  %7460 = vmatmul.mubr.msk.f32.gmra.mrb[42].mxu0 %vm1933_vm12, %v6112_v60 }
 0x8b7   : > { %v6462_v5 = vadd.f32 %v6332_v48, %v11699_v40 }
 0x8b8   : > { %v6461_v11 = vadd.f32 %v6327_v19, %v11700_v37  ;;  %v5250_v28 = vpop.permute.xlu1 %5249 }
 0x8b9   : > { %v10979_v42 = vrot.slane %v6462_v5, 5  ;;  %5315 = vst.msk [vmem:[#allocation3 + $0xf0] sm:$0xff] %vm1083_vm6, %v5250_v28  ;;  %v5060_v36 = vpop.permute.xlu0 %5059 }
 0x8ba   : > { %v6509_v0 = vrot.slane %v6461_v11, 5  ;;  %5124 = vst.msk [vmem:[#allocation3 + $0xf8] sm:$0xff] %vm890_vm5, %v5060_v36 }
 0x8bb   : > { %v6752_v59 = vsel %vm6510_vm2, %v10979_v42, %v6750_v16  ;;  %v6785_v13 = vsel %vm6513_vm13, %v10979_v42, %v6784_v38  ;;  %v6813_v44 = vsel %vm6516_vm9, %v10979_v42, %v6812_v34  ;;  %v6841_v31 = vsel %vm6519_vm15, %v10979_v42, %v6840_v1 }
 0x8bc   : > { %v6014_v54 = vpop.permute.xlu1 %6013  ;;  %v6544_v56 = vsel %vm6513_vm13, %v6509_v0, %v6543_v24  ;;  %v6511_v14 = vsel %vm6510_vm2, %v6509_v0, %v6508_v29  ;;  %v6571_v63 = vsel %vm6516_vm9, %v6509_v0, %v6570_v45  ;;  %v6598_v47 = vsel %vm6519_vm15, %v6509_v0, %v6597_v58  ;;  %v11702_v29 = vld [vmem:[#allocation15_spill] sm:$0xff] }
 0x8bd   : > { %6081 = vst.msk [vmem:[#allocation3 + $0xe0] sm:$0xff] %vm1856_vm11, %v6014_v54  ;;  %v5824_v46 = vpop.permute.xlu0 %5823  ;;  %v10997_v23 = vsel %vm6522_vm4, %v6509_v0, %v6624_v61  ;;  %v6678_v50 = vsel %vm6504_vm14, %v6509_v0, %v10919_v52  ;;  %v6705_v57 = vsel %vm6507_vm1, %v6509_v0, %v6704_v2  ;;  %v11004_v43 = vsel %vm6522_vm4, %v10979_v42, %v6868_v49 }
 0x8be   : > { %5890 = vst.msk [vmem:[#allocation3 + $0xe8] sm:$0xff] %vm1663_vm10, %v5824_v46  ;;  %v6924_v62 = vsel %vm6504_vm14, %v10979_v42, %v10907_v26  ;;  %v6952_v33 = vsel %vm6507_vm1, %v10979_v42, %v6951_v51 }
 0x8c0   : > { %v5442_v27 = vpop.permute.xlu1 %5441 }
 0x8c1   : > { %5507 = vst.msk [vmem:[#allocation3 + $0xf0] sm:$0xff] %vm1276_vm7, %v5442_v27  ;;  %v5252_v15 = vpop.permute.xlu0 %5251 }
 0x8c2   : > { %5316 = vst.msk [vmem:[#allocation3 + $0xf8] sm:$0xff] %vm1083_vm6, %v5252_v15 }
 0x8c4   : > { %v5444_v52 = vpop.permute.xlu1 %5443  ;;  %v6113_v35 = vld [vmem:[#allocation3 + $0xe0] sm:$0xff] }
 0x8c5   : > { %5508 = vst.msk [vmem:[#allocation3 + $0xf8] sm:$0xff] %vm1276_vm7, %v5444_v52  ;;  %v6016_v53 = vpop.permute.xlu0 %6015  ;;  %7462 = vmatprep.mubr.msk.f32.mxu0 %vm1933_vm12, %v6113_v35 }
 0x8c6   : > { %6082 = vst.msk [vmem:[#allocation3 + $0xe8] sm:$0xff] %vm1856_vm11, %v6016_v53 }
 0x8c8   : > { %v7434_v41 = vpop.f32.mrb[24].mxu0  ;;  %v5636_v26 = vpop.permute.xlu1 %5635 }
 0x8c9   : > { %v6342_v16 = vadd.f32 %v7434_v41, %v10846_v10  ;;  %v5634_v38 = vpop.permute.xlu0 %5633  ;;  %v6336_v34 = vpop.f32.mrb[25].mxu0  ;;  %5700 = vst.msk [vmem:[#allocation3 + $0xf8] sm:$0xff] %vm1470_vm8, %v5636_v26 }
 0x8ca   : > { %5699 = vst.msk [vmem:[#allocation3 + $0xf0] sm:$0xff] %vm1470_vm8, %v5634_v38  ;;  %v6337_v1 = vadd.f32 %v10846_v10, %v6336_v34 }
 0x8cb   : > { %v6464_v24 = vadd.f32 %v6342_v16, %v11701_v39  ;;  %v11705_v39 = vld [vmem:[#allocation20_spill] sm:$0xff] }
 0x8cc   : > { %v6463_v45 = vadd.f32 %v6337_v1, %v11702_v29  ;;  %v5828_v58 = vpop.permute.xlu1 %5827  ;;  %v11706_v29 = vld [vmem:[#allocation19_spill] sm:$0xff] }
 0x8cd   : > { %v6753_v6 = vrot.slane %v6464_v24, 4  ;;  %v5826_v61 = vpop.permute.xlu0 %5825  ;;  %5892 = vst.msk [vmem:[#allocation3 + $0xf8] sm:$0xff] %vm1663_vm10, %v5828_v58  ;;  %v6114_v2 = vld [vmem:[#allocation3 + $0xe8] sm:$0xff] }
 0x8ce   : > { %v6512_v49 = vrot.slane %v6463_v45, 4  ;;  %5891 = vst.msk [vmem:[#allocation3 + $0xf0] sm:$0xff] %vm1663_vm10, %v5826_v61  ;;  %7463 = vmatmul.mubr.msk.f32.gmra.mrb[44].mxu0 %vm1933_vm12, %v6114_v2 }
 0x8cf   : > { %v6754_v51 = vsel %vm6513_vm13, %v6753_v6, %v6752_v59  ;;  %v6786_v17 = vsel %vm6516_vm9, %v6753_v6, %v6785_v13  ;;  %v6814_v22 = vsel %vm6519_vm15, %v6753_v6, %v6813_v44  ;;  %v11030_v55 = vsel %vm6522_vm4, %v6753_v6, %v6841_v31  ;;  %v11703_v44 = vld [vmem:[#allocation18_spill] sm:$0xff]  ;;  %v11704_v31 = vld [vmem:[#allocation17_spill] sm:$0xff] }
 0x8d0   : > { %v6020_v21 = vpop.permute.xlu1 %6019  ;;  %v6545_v25 = vsel %vm6516_vm9, %v6512_v49, %v6544_v56  ;;  %v6514_v12 = vsel %vm6513_vm13, %v6512_v49, %v6511_v14  ;;  %v6572_v8 = vsel %vm6519_vm15, %v6512_v49, %v6571_v63  ;;  %v11036_v48 = vsel %vm6522_vm4, %v6512_v49, %v6598_v47 }
 0x8d1   : > { %v6018_v32 = vpop.permute.xlu0 %6017  ;;  %6084 = vst.msk [vmem:[#allocation3 + $0xf8] sm:$0xff] %vm1856_vm11, %v6020_v21  ;;  %v6652_v4 = vsel %vm6504_vm14, %v6512_v49, %v6509_v0  ;;  %v6679_v60 = vsel %vm6507_vm1, %v6512_v49, %v6678_v50  ;;  %v6706_v19 = vsel %vm6510_vm2, %v6512_v49, %v6705_v57  ;;  %v6897_v40 = vsel %vm6504_vm14, %v6753_v6, %v10979_v42 }
 0x8d2   : > { %6083 = vst.msk [vmem:[#allocation3 + $0xf0] sm:$0xff] %vm1856_vm11, %v6018_v32  ;;  %v6925_v5 = vsel %vm6507_vm1, %v6753_v6, %v6924_v62  ;;  %v6953_v37 = vsel %vm6510_vm2, %v6753_v6, %v6952_v33 }
 0x8d8   : > { %v6116_v11 = vld [vmem:[#allocation3 + $0xf8] sm:$0xff] }
 0x8d9   : > { %v6115_v28 = vld [vmem:[#allocation3 + $0xf0] sm:$0xff] }
 0x8da   : > { %7465 = vmatprep.mubr.msk.f32.mxu0 %vm1933_vm12, %v6115_v28  ;;  %v11707_v28 = vld [vmem:[#allocation22_spill] sm:$0xff] }
 0x8db   : > { %7466 = vmatmul.mubr.msk.f32.gmra.mrb[46].mxu0 %vm1933_vm12, %v6116_v11  ;;  %vm6564_vm12 = vcmask 64545  }
 0x8dc   : > { %v7437_v36 = vpop.f32.mrb[26].mxu0 }
 0x8dd   : > { %v6352_v0 = vadd.f32 %v7437_v36, %v10846_v10  ;;  %v6346_v59 = vpop.f32.mrb[27].mxu0 }
 0x8de   : > { %v6347_v13 = vadd.f32 %v10846_v10, %v6346_v59 }
 0x8df   : > { %v6466_v42 = vadd.f32 %v6352_v0, %v11703_v44  ;;  %v11708_v0 = vld [vmem:[#allocation21_spill] sm:$0xff] }
 0x8e0   : > { %v6465_v54 = vadd.f32 %v6347_v13, %v11704_v31 }
 0x8e1   : > { %v6755_v56 = vrot.slane %v6466_v42, 3 }
 0x8e2   : > { %v6515_v14 = vrot.slane %v6465_v54, 3 }
 0x8e3   : > { %v6756_v63 = vsel %vm6516_vm9, %v6755_v56, %v6754_v51  ;;  %v6787_v47 = vsel %vm6519_vm15, %v6755_v56, %v6786_v17  ;;  %v11056_v46 = vsel %vm6522_vm4, %v6755_v56, %v6814_v22  ;;  %v6870_v50 = vsel %vm6504_vm14, %v6755_v56, %v6753_v6 }
 0x8e4   : > { %v6546_v57 = vsel %vm6519_vm15, %v6515_v14, %v6545_v25  ;;  %v6517_v62 = vsel %vm6516_vm9, %v6515_v14, %v6514_v12  ;;  %v11062_v33 = vsel %vm6522_vm4, %v6515_v14, %v6572_v8  ;;  %v6626_v27 = vsel %vm6504_vm14, %v6515_v14, %v6512_v49 }
 0x8e5   : > { %v6653_v15 = vsel %vm6507_vm1, %v6515_v14, %v6652_v4  ;;  %v6680_v52 = vsel %vm6510_vm2, %v6515_v14, %v6679_v60  ;;  %v6707_v35 = vsel %vm6513_vm13, %v6515_v14, %v6706_v19  ;;  %v6898_v53 = vsel %vm6507_vm1, %v6755_v56, %v6897_v40 }
 0x8e6   : > { %v6926_v41 = vsel %vm6510_vm2, %v6755_v56, %v6925_v5  ;;  %v6954_v26 = vsel %vm6513_vm13, %v6755_v56, %v6953_v37 }
 0x8f0   : > { %v7440_v16 = vpop.f32.mrb[28].mxu0 }
 0x8f1   : > { %v6362_v38 = vadd.f32 %v7440_v16, %v10846_v10  ;;  %v6356_v34 = vpop.f32.mrb[29].mxu0 }
 0x8f2   : > { %v6357_v1 = vadd.f32 %v10846_v10, %v6356_v34 }
 0x8f3   : > { %v6468_v24 = vadd.f32 %v6362_v38, %v11705_v39  ;;  %v11709_v38 = vld [vmem:[#allocation24_spill] sm:$0xff] }
 0x8f4   : > { %v6467_v45 = vadd.f32 %v6357_v1, %v11706_v29  ;;  %v11710_v1 = vld [vmem:[#allocation23_spill] sm:$0xff] }
 0x8f5   : > { %v6757_v58 = vrot.slane %v6468_v24, 2 }
 0x8f6   : > { %v6518_v6 = vrot.slane %v6467_v45, 2 }
 0x8f7   : > { %v6758_v61 = vsel %vm6519_vm15, %v6757_v58, %v6756_v63  ;;  %v11077_v2 = vsel %vm6522_vm4, %v6757_v58, %v6787_v47  ;;  %v6843_v49 = vsel %vm6504_vm14, %v6757_v58, %v6755_v56  ;;  %v6871_v51 = vsel %vm6507_vm1, %v6757_v58, %v6870_v50 }
 0x8f8   : > { %v6547_v17 = vsel %vm6522_vm4, %v6518_v6, %v6546_v57  ;;  %v6520_v22 = vsel %vm6519_vm15, %v6518_v6, %v6517_v62  ;;  %v6600_v21 = vsel %vm6504_vm14, %v6518_v6, %v6515_v14  ;;  %v6627_v25 = vsel %vm6507_vm1, %v6518_v6, %v6626_v27 }
 0x8f9   : > { %6555 = vrot.lane.b32.xlu0 %v6547_v17, %s7619_s29  ;;  %v6654_v12 = vsel %vm6510_vm2, %v6518_v6, %v6653_v15  ;;  %v6681_v8 = vsel %vm6513_vm13, %v6518_v6, %v6680_v52  ;;  %v6708_v32 = vsel %vm6516_vm9, %v6518_v6, %v6707_v35  ;;  %v6899_v4 = vsel %vm6510_vm2, %v6757_v58, %v6898_v53 }
 0x8fa   : > { %v6927_v60 = vsel %vm6513_vm13, %v6757_v58, %v6926_v41  ;;  %v6955_v19 = vsel %vm6516_vm9, %v6757_v58, %v6954_v26 }
 0x904   : > { %v7443_v40 = vpop.f32.mrb[30].mxu0 }
 0x905   : > { %v6372_v5 = vadd.f32 %v7443_v40, %v10846_v10  ;;  %v6366_v37 = vpop.f32.mrb[31].mxu0  ;;  %v11711_v40 = vld [vmem:[#allocation26_spill] sm:$0xff] }
 0x906   : > { %v6367_v11 = vadd.f32 %v10846_v10, %v6366_v37  ;;  %v11712_v37 = vld [vmem:[#allocation25_spill] sm:$0xff] }
 0x907   : > { %v6470_v36 = vadd.f32 %v6372_v5, %v11707_v28 }
 0x908   : > { %v6469_v59 = vadd.f32 %v6367_v11, %v11708_v0 }
 0x909   : > { %v6759_v13 = vrot.slane %v6470_v36, 1 }
 0x90a   : > { %v6521_v44 = vrot.slane %v6469_v59, 1 }
 0x90b   : > { %v11100_v42 = vsel %vm6522_vm4, %v6759_v13, %v6758_v61  ;;  %v6816_v31 = vsel %vm6504_vm14, %v6759_v13, %v6757_v58  ;;  %v6844_v54 = vsel %vm6507_vm1, %v6759_v13, %v6843_v49  ;;  %v6872_v56 = vsel %vm6510_vm2, %v6759_v13, %v6871_v51 }
 0x90c   : > { %v6523_v14 = vsel %vm6522_vm4, %v6521_v44, %v6520_v22  ;;  %v6574_v63 = vsel %vm6504_vm14, %v6521_v44, %v6518_v6  ;;  %v6601_v47 = vsel %vm6507_vm1, %v6521_v44, %v6600_v21  ;;  %v6628_v50 = vsel %vm6510_vm2, %v6521_v44, %v6627_v25 }
 0x90d   : > { %6540 = vst.msk [vmem:[%s11109_s26] sm:$0xff] %vm169_vm0, %v6523_v14  ;;  %v6655_v57 = vsel %vm6513_vm13, %v6521_v44, %v6654_v12  ;;  %v6682_v62 = vsel %vm6516_vm9, %v6521_v44, %v6681_v8  ;;  %v6709_v27 = vsel %vm6519_vm15, %v6521_v44, %v6708_v32  ;;  %v6900_v15 = vsel %vm6513_vm13, %v6759_v13, %v6899_v4 }
 0x90e   : > { %v6928_v52 = vsel %vm6516_vm9, %v6759_v13, %v6927_v60  ;;  %v6956_v35 = vsel %vm6519_vm15, %v6759_v13, %v6955_v19 }
 0x918   : > { %v7446_v53 = vpop.f32.mrb[32].mxu0 }
 0x919   : > { %v6382_v41 = vadd.f32 %v7446_v53, %v10846_v10  ;;  %v6376_v26 = vpop.f32.mrb[33].mxu0 }
 0x91a   : > { %v6377_v16 = vadd.f32 %v10846_v10, %v6376_v26 }
 0x91b   : > { %v6472_v34 = vadd.f32 %v6382_v41, %v11709_v38  ;;  %v11713_v41 = vld [vmem:[#allocation28_spill] sm:$0xff] }
 0x91c   : > { %v6471_v39 = vadd.f32 %v6377_v16, %v11710_v1  ;;  %v11714_v16 = vld [vmem:[#allocation27_spill] sm:$0xff] }
 0x91d   : > { %v6789_v24 = vsel %vm6504_vm14, %v6472_v34, %v6759_v13  ;;  %v6817_v29 = vsel %vm6507_vm1, %v6472_v34, %v6816_v31  ;;  %v6845_v45 = vsel %vm6510_vm2, %v6472_v34, %v6844_v54  ;;  %v6873_v58 = vsel %vm6513_vm13, %v6472_v34, %v6872_v56 }
 0x91e   : > { %v6548_v6 = vsel %vm6504_vm14, %v6471_v39, %v6521_v44  ;;  %v6575_v61 = vsel %vm6507_vm1, %v6471_v39, %v6574_v63  ;;  %v6602_v49 = vsel %vm6510_vm2, %v6471_v39, %v6601_v47  ;;  %v6629_v51 = vsel %vm6513_vm13, %v6471_v39, %v6628_v50 }
 0x91f   : > { %v6656_v17 = vsel %vm6516_vm9, %v6471_v39, %v6655_v57  ;;  %v6683_v22 = vsel %vm6519_vm15, %v6471_v39, %v6682_v62  ;;  %v11134_v21 = vsel %vm6522_vm4, %v6471_v39, %v6709_v27  ;;  %v6901_v25 = vsel %vm6516_vm9, %v6472_v34, %v6900_v15 }
 0x920   : > { %v6929_v12 = vsel %vm6519_vm15, %v6472_v34, %v6928_v52  ;;  %v11139_v8 = vsel %vm6522_vm4, %v6472_v34, %v6956_v35 }
 0x92c   : > { %v7449_v32 = vpop.f32.mrb[34].mxu0 }
 0x92d   : > { %v6392_v4 = vadd.f32 %v7449_v32, %v10846_v10  ;;  %v6386_v60 = vpop.f32.mrb[35].mxu0 }
 0x92e   : > { %v6387_v19 = vadd.f32 %v10846_v10, %v6386_v60 }
 0x92f   : > { %v6474_v5 = vadd.f32 %v6392_v4, %v11711_v40 }
 0x930   : > { %v6473_v11 = vadd.f32 %v6387_v19, %v11712_v37 }
 0x931   : > { %v6761_v28 = vrot.slane %v6474_v5, 7  ;;  %v11715_v5 = vld [vmem:[#allocation30_spill] sm:$0xff] }
 0x932   : > { %v6524_v36 = vrot.slane %v6473_v11, 7  ;;  %v11716_v11 = vld [vmem:[#allocation29_spill] sm:$0xff] }
 0x933   : > { %v6762_v0 = vsel %vm6504_vm14, %v6761_v28, %v6472_v34  ;;  %v6790_v59 = vsel %vm6507_vm1, %v6761_v28, %v6789_v24  ;;  %v6818_v13 = vsel %vm6510_vm2, %v6761_v28, %v6817_v29  ;;  %v6846_v44 = vsel %vm6513_vm13, %v6761_v28, %v6845_v45 }
 0x934   : > { %v6549_v31 = vsel %vm6507_vm1, %v6524_v36, %v6548_v6  ;;  %v6576_v54 = vsel %vm6510_vm2, %v6524_v36, %v6575_v61  ;;  %v6603_v56 = vsel %vm6513_vm13, %v6524_v36, %v6602_v49  ;;  %v6630_v14 = vsel %vm6516_vm9, %v6524_v36, %v6629_v51 }
 0x935   : > { %v6657_v63 = vsel %vm6519_vm15, %v6524_v36, %v6656_v17  ;;  %v11155_v47 = vsel %vm6522_vm4, %v6524_v36, %v6683_v22  ;;  %v6874_v50 = vsel %vm6516_vm9, %v6761_v28, %v6873_v58  ;;  %v6902_v57 = vsel %vm6519_vm15, %v6761_v28, %v6901_v25 }
 0x936   : > { %v11160_v62 = vsel %vm6522_vm4, %v6761_v28, %v6929_v12  ;;  %v6525_v27 = vsel %vm6504_vm14, %v6524_v36, %v6471_v39 }
 0x940   : > { %v7452_v15 = vpop.f32.mrb[36].mxu0 }
 0x941   : > { %v6402_v52 = vadd.f32 %v7452_v15, %v10846_v10  ;;  %v6396_v35 = vpop.f32.mrb[37].mxu0 }
 0x942   : > { %v6397_v53 = vadd.f32 %v10846_v10, %v6396_v35 }
 0x943   : > { %v6476_v26 = vadd.f32 %v6402_v52, %v11713_v41 }
 0x944   : > { %v6475_v38 = vadd.f32 %v6397_v53, %v11714_v16 }
 0x945   : > { %v6763_v34 = vrot.slane %v6476_v26, 6 }
 0x946   : > { %v6526_v1 = vrot.slane %v6475_v38, 6 }
 0x947   : > { %v6764_v24 = vsel %vm6507_vm1, %v6763_v34, %v6762_v0  ;;  %v6791_v29 = vsel %vm6510_vm2, %v6763_v34, %v6790_v59  ;;  %v6819_v45 = vsel %vm6513_vm13, %v6763_v34, %v6818_v13  ;;  %v6847_v39 = vsel %vm6516_vm9, %v6763_v34, %v6846_v44 }
 0x948   : > { %v6550_v58 = vsel %vm6510_vm2, %v6526_v1, %v6549_v31  ;;  %v6577_v6 = vsel %vm6513_vm13, %v6526_v1, %v6576_v54  ;;  %v6604_v61 = vsel %vm6516_vm9, %v6526_v1, %v6603_v56  ;;  %v6631_v49 = vsel %vm6519_vm15, %v6526_v1, %v6630_v14 }
 0x949   : > { %v11176_v51 = vsel %vm6522_vm4, %v6526_v1, %v6657_v63  ;;  %v6711_v17 = vsel %vm6504_vm14, %v6526_v1, %v6524_v36  ;;  %v6875_v22 = vsel %vm6519_vm15, %v6763_v34, %v6874_v50  ;;  %v11181_v25 = vsel %vm6522_vm4, %v6763_v34, %v6902_v57 }
 0x94a   : > { %v6958_v12 = vsel %vm6504_vm14, %v6763_v34, %v6761_v28  ;;  %v6527_v32 = vsel %vm6507_vm1, %v6526_v1, %v6525_v27 }
 0x959   : > { %v7455_v4 = vpop.f32.mrb[38].mxu0 }
 0x95a   : > { %v6412_v60 = vadd.f32 %v7455_v4, %v10846_v10  ;;  %v6406_v19 = vpop.f32.mrb[39].mxu0 }
 0x95b   : > { %v6407_v40 = vadd.f32 %v10846_v10, %v6406_v19 }
 0x95c   : > { %v6478_v37 = vadd.f32 %v6412_v60, %v11715_v5 }
 0x95d   : > { %v6477_v0 = vadd.f32 %v6407_v40, %v11716_v11 }
 0x95e   : > { %v6765_v36 = vrot.slane %v6478_v37, 5 }
 0x95f   : > { %v6528_v59 = vrot.slane %v6477_v0, 5 }
 0x960   : > { %v6766_v13 = vsel %vm6510_vm2, %v6765_v36, %v6764_v24  ;;  %v6792_v44 = vsel %vm6513_vm13, %v6765_v36, %v6791_v29  ;;  %v6820_v28 = vsel %vm6516_vm9, %v6765_v36, %v6819_v45  ;;  %v6848_v31 = vsel %vm6519_vm15, %v6765_v36, %v6847_v39  ;;  %v11718_v29 = vld [vmem:[#allocation31_spill] sm:$0xff] }
 0x961   : > { %v6551_v54 = vsel %vm6513_vm13, %v6528_v59, %v6550_v58  ;;  %v6578_v56 = vsel %vm6516_vm9, %v6528_v59, %v6577_v6  ;;  %v6605_v14 = vsel %vm6519_vm15, %v6528_v59, %v6604_v61  ;;  %v11197_v63 = vsel %vm6522_vm4, %v6528_v59, %v6631_v49 }
 0x962   : > { %v6685_v50 = vsel %vm6504_vm14, %v6528_v59, %v6526_v1  ;;  %v6712_v57 = vsel %vm6507_vm1, %v6528_v59, %v6711_v17  ;;  %v11202_v27 = vsel %vm6522_vm4, %v6765_v36, %v6875_v22  ;;  %v6931_v15 = vsel %vm6504_vm14, %v6765_v36, %v6763_v34  ;;  %v11717_v1 = vld [vmem:[#allocation32_spill] sm:$0xff] }
 0x963   : > { %v6959_v52 = vsel %vm6507_vm1, %v6765_v36, %v6958_v12  ;;  %v6529_v35 = vsel %vm6510_vm2, %v6528_v59, %v6527_v32 }
 0x96b   : > { %v6556_v53 = vpop.permute.xlu0 %6555 }
 0x96c   : > { %6565 = vst.msk [vmem:[%s11109_s26 - $0x1] sm:$0xfe] %vm6564_vm12, %v6556_v53  ;;  %vm6675_vm12 = vcmask 192672  }
 0x971   : > { %v7458_v41 = vpop.f32.mrb[40].mxu0 }
 0x972   : > { %v6422_v26 = vadd.f32 %v7458_v41, %v10846_v10  ;;  %v6416_v16 = vpop.f32.mrb[41].mxu0 }
 0x973   : > { %v6417_v38 = vadd.f32 %v10846_v10, %v6416_v16 }
 0x974   : > { %v6480_v24 = vadd.f32 %v6422_v26, %v11717_v1 }
 0x975   : > { %v6479_v45 = vadd.f32 %v6417_v38, %v11718_v29 }
 0x976   : > { %v6767_v39 = vrot.slane %v6480_v24, 4 }
 0x977   : > { %v6530_v58 = vrot.slane %v6479_v45, 4 }
 0x978   : > { %v6768_v34 = vsel %vm6513_vm13, %v6767_v39, %v6766_v13  ;;  %v6793_v6 = vsel %vm6516_vm9, %v6767_v39, %v6792_v44  ;;  %v6821_v61 = vsel %vm6519_vm15, %v6767_v39, %v6820_v28  ;;  %v11216_v49 = vsel %vm6522_vm4, %v6767_v39, %v6848_v31  ;;  %v11719_v28 = vld [vmem:[#allocation34_spill] sm:$0xff]  ;;  %v11720_v31 = vld [vmem:[#allocation33_spill] sm:$0xff] }
 0x979   : > { %v6552_v17 = vsel %vm6516_vm9, %v6530_v58, %v6551_v54  ;;  %v6579_v22 = vsel %vm6519_vm15, %v6530_v58, %v6578_v56  ;;  %v11221_v12 = vsel %vm6522_vm4, %v6530_v58, %v6605_v14  ;;  %v6659_v32 = vsel %vm6504_vm14, %v6530_v58, %v6528_v59 }
 0x97a   : > { %v6686_v4 = vsel %vm6507_vm1, %v6530_v58, %v6685_v50  ;;  %v6713_v60 = vsel %vm6510_vm2, %v6530_v58, %v6712_v57  ;;  %v6904_v19 = vsel %vm6504_vm14, %v6767_v39, %v6765_v36  ;;  %v6932_v40 = vsel %vm6507_vm1, %v6767_v39, %v6931_v15 }
 0x97b   : > { %v6960_v5 = vsel %vm6510_vm2, %v6767_v39, %v6959_v52  ;;  %v6531_v37 = vsel %vm6513_vm13, %v6530_v58, %v6529_v35 }
 0x989   : > { %v7461_v11 = vpop.f32.mrb[42].mxu0 }
 0x98a   : > { %v6432_v0 = vadd.f32 %v7461_v11, %v10846_v10  ;;  %v6426_v13 = vpop.f32.mrb[43].mxu0 }
 0x98b   : > { %v6427_v44 = vadd.f32 %v10846_v10, %v6426_v13 }
 0x98c   : > { %v6482_v59 = vadd.f32 %v6432_v0, %v11719_v28 }
 0x98d   : > { %v6481_v54 = vadd.f32 %v6427_v44, %v11720_v31 }
 0x98e   : > { %v6769_v56 = vrot.slane %v6482_v59, 3 }
 0x98f   : > { %v6532_v14 = vrot.slane %v6481_v54, 3 }
 0x990   : > { %v6770_v36 = vsel %vm6516_vm9, %v6769_v56, %v6768_v34  ;;  %v6794_v50 = vsel %vm6519_vm15, %v6769_v56, %v6793_v6  ;;  %v11237_v57 = vsel %vm6522_vm4, %v6769_v56, %v6821_v61  ;;  %v6877_v15 = vsel %vm6504_vm14, %v6769_v56, %v6767_v39  ;;  %v11721_v6 = vld [vmem:[#allocation36_spill] sm:$0xff] }
 0x991   : > { %v6553_v52 = vsel %vm6519_vm15, %v6532_v14, %v6552_v17  ;;  %v6580_v35 = vsel %vm6522_vm4, %v6532_v14, %v6579_v22  ;;  %v6633_v53 = vsel %vm6504_vm14, %v6532_v14, %v6530_v58  ;;  %v6660_v41 = vsel %vm6507_vm1, %v6532_v14, %v6659_v32  ;;  %v11722_v17 = vld [vmem:[#allocation35_spill] sm:$0xff] }
 0x992   : > { %v6687_v26 = vsel %vm6510_vm2, %v6532_v14, %v6686_v4  ;;  %v6714_v16 = vsel %vm6513_vm13, %v6532_v14, %v6713_v60  ;;  %v6905_v38 = vsel %vm6507_vm1, %v6769_v56, %v6904_v19  ;;  %v6933_v1 = vsel %vm6510_vm2, %v6769_v56, %v6932_v40 }
 0x993   : > { %v6961_v24 = vsel %vm6513_vm13, %v6769_v56, %v6960_v5  ;;  %v6533_v29 = vsel %vm6516_vm9, %v6532_v14, %v6531_v37 }
 0x9a1   : > { %v7464_v45 = vpop.f32.mrb[44].mxu0 }
 0x9a2   : > { %v6442_v39 = vadd.f32 %v7464_v45, %v10846_v10  ;;  %v6436_v34 = vpop.f32.mrb[45].mxu0 }
 0x9a3   : > { %v6437_v58 = vadd.f32 %v10846_v10, %v6436_v34 }
 0x9a4   : > { %v6484_v61 = vadd.f32 %v6442_v39, %v11721_v6 }
 0x9a5   : > { %v6483_v22 = vadd.f32 %v6437_v58, %v11722_v17 }
 0x9a6   : > { %v6771_v32 = vrot.slane %v6484_v61, 2 }
 0x9a7   : > { %v6534_v4 = vrot.slane %v6483_v22, 2 }
 0x9a8   : > { %v6772_v60 = vsel %vm6519_vm15, %v6771_v32, %v6770_v36  ;;  %v6795_v19 = vsel %vm6522_vm4, %v6771_v32, %v6794_v50  ;;  %v6850_v40 = vsel %vm6504_vm14, %v6771_v32, %v6769_v56  ;;  %v6878_v5 = vsel %vm6507_vm1, %v6771_v32, %v6877_v15 }
 0x9a9   : > { %v6554_v37 = vsel %vm6522_vm4, %v6534_v4, %v6553_v52  ;;  %v6607_v11 = vsel %vm6504_vm14, %v6534_v4, %v6532_v14  ;;  %v6634_v0 = vsel %vm6507_vm1, %v6534_v4, %v6633_v53  ;;  %v6661_v13 = vsel %vm6510_vm2, %v6534_v4, %v6660_v41  ;;  %v11723_v52 = vld [vmem:[#allocation40_spill] sm:$0xff]  ;;  %v11724_v41 = vld [vmem:[#allocation38_spill] sm:$0xff] }
 0x9aa   : > { %6557 = vrot.lane.b32.xlu1 %v6554_v37, %s7619_s29  ;;  %v6688_v44 = vsel %vm6513_vm13, %v6534_v4, %v6687_v26  ;;  %v6715_v28 = vsel %vm6516_vm9, %v6534_v4, %v6714_v16  ;;  %v6906_v59 = vsel %vm6510_vm2, %v6771_v32, %v6905_v38  ;;  %v6934_v31 = vsel %vm6513_vm13, %v6771_v32, %v6933_v1 }
 0x9ab   : > { %v6962_v54 = vsel %vm6516_vm9, %v6771_v32, %v6961_v24  ;;  %v6535_v56 = vsel %vm6519_vm15, %v6534_v4, %v6533_v29 }
 0x9ae   : > { %v7467_v36 = vpop.f32.mrb[46].mxu0  ;;  %6582 = vrot.lane.b32.xlu1 %v11062_v33, %s7620_s30 }
 0x9af   : > { %v6452_v14 = vadd.f32 %v7467_v36, %v10846_v10  ;;  %v6446_v50 = vpop.f32.mrb[47].mxu0 }
 0x9b0   : > { %v6447_v15 = vadd.f32 %v10846_v10, %v6446_v50 }
 0x9b1   : > { %v6486_v53 = vadd.f32 %v6452_v14, %v11723_v52 }
 0x9b2   : > { %v6485_v26 = vadd.f32 %v6447_v15, %v11724_v41 }
 0x9b3   : > { %v6773_v16 = vrot.slane %v6486_v53, 1 }
 0x9b4   : > { %v6536_v38 = vrot.slane %v6485_v26, 1 }
 0x9b5   : > { %v6774_v1 = vsel %vm6522_vm4, %v6773_v16, %v6772_v60  ;;  %v6823_v24 = vsel %vm6504_vm14, %v6773_v16, %v6771_v32  ;;  %v6851_v29 = vsel %vm6507_vm1, %v6773_v16, %v6850_v40  ;;  %v6879_v33 = vsel %vm6510_vm2, %v6773_v16, %v6878_v5 }
 0x9b6   : > { %6559 = vrot.lane.b32.xlu0 %v6536_v38, %s7619_s29  ;;  %v6581_v45 = vsel %vm6504_vm14, %v6536_v38, %v6534_v4  ;;  %v6608_v10 = vsel %vm6507_vm1, %v6536_v38, %v6607_v11  ;;  %v6635_v39 = vsel %vm6510_vm2, %v6536_v38, %v6634_v0  ;;  %v6662_v34 = vsel %vm6513_vm13, %v6536_v38, %v6661_v13  ;;  %s7627_s29 = smov 36  }
 0x9b7   : > { %6586 = vrot.lane.b32.xlu1 %v6581_v45, %s7620_s30  ;;  %v6689_v58 = vsel %vm6516_vm9, %v6536_v38, %v6688_v44  ;;  %v6716_v6 = vsel %vm6519_vm15, %v6536_v38, %v6715_v28  ;;  %v6907_v61 = vsel %vm6513_vm13, %v6773_v16, %v6906_v59  ;;  %v6935_v17 = vsel %vm6516_vm9, %v6773_v16, %v6934_v31 }
 0x9b8   : > { %v6963_v22 = vsel %vm6519_vm15, %v6773_v16, %v6962_v54  ;;  %v6537_v32 = vsel %vm6522_vm4, %v6536_v38, %v6535_v56  ;;  %vm6594_vm1 = vcmask 91200   ;;  %vm11725_vm2 = vcmask 97344  }
 0x9b9   : > { %6541 = vst.msk [vmem:[%s11109_s26 + $0x8] sm:$0xff] %vm169_vm0, %v6537_v32  ;;  %vm6591_vm0 = vcmask 97346   ;;  %vm6645_vm13 = vcmask 162948   ;;  %vm6621_vm14 = vcmask 125024   ;;  %vm6648_vm9 = vcmask 158848  }
 0x9ba   : > { %6584 = vrot.lane.b32.xlu0 %v6580_v35, %s7620_s30  ;;  %vm6699_vm15 = vcmask 228550  }
 0x9bb   : > { %6611 = vrot.lane.b32.xlu1 %v11221_v12, %s7621_s4 }
 0x9be   : > { %6609 = vrot.lane.b32.xlu0 %v11036_v48, %s7621_s4  ;;  %v6677_v48 = vsel %vm6522_vm4, %v10896_v9, %v10903_v7  ;;  %vm6567_vm4 = vcmask 57376  }
 0x9bf   : > { %6636 = vrot.lane.b32.xlu1 %v10997_v23, %s7622_s5 }
 0x9c2   : > { %6613 = vrot.lane.b32.xlu0 %v6608_v10, %s7621_s4  ;;  %s7628_s4 = smov 40  }
 0x9c3   : > { %6640 = vrot.lane.b32.xlu1 %v6635_v39, %s7622_s5 }
 0x9c6   : > { %6638 = vrot.lane.b32.xlu0 %v11197_v63, %s7622_s5  ;;  %s7629_s5 = smov 44  }
 0x9c7   : > { %6665 = vrot.lane.b32.xlu1 %v11176_v51, %s7623_s6 }
 0x9ca   : > { %6663 = vrot.lane.b32.xlu0 %v10952_v3, %s7623_s6 }
 0x9cb   : > { %6690 = vrot.lane.b32.xlu1 %v6677_v48, %s7624_s7 }
 0x9ce   : > { %6667 = vrot.lane.b32.xlu0 %v6662_v34, %s7623_s6  ;;  %s7630_s6 = smov 48  }
 0x9cf   : > { %6694 = vrot.lane.b32.xlu1 %v6689_v58, %s7624_s7 }
 0x9d2   : > { %6692 = vrot.lane.b32.xlu0 %v11155_v47, %s7624_s7  ;;  %s7631_s7 = smov 52  }
 0x9d3   : > { %6719 = vrot.lane.b32.xlu1 %v11134_v21, %s7625_s8 }
 0x9d6   : > { %6717 = vrot.lane.b32.xlu0 %v10903_v7, %s7625_s8 }
 0x9d7   : > { %6775 = vrot.lane.b32.xlu1 %v11100_v42, %s7626_s28 }
 0x9da   : > { %6721 = vrot.lane.b32.xlu0 %v6716_v6, %s7625_s8  ;;  %s7632_s8 = smov 56  }
 0x9db   : > { %6796 = vrot.lane.b32.xlu1 %v11077_v2, %s7627_s29 }
 0x9de   : > { %6777 = vrot.lane.b32.xlu0 %v6774_v1, %s7626_s28  ;;  %s7633_s28 = smov 60  }
 0x9df   : > { %6800 = vrot.lane.b32.xlu1 %v6773_v16, %s7627_s29 }
 0x9e2   : > { %6798 = vrot.lane.b32.xlu0 %v6795_v19, %s7627_s29  ;;  %s7560_s29 = scalar_lea.vmem %s7559_s25, 512 }
 0x9e3   : > { %6826 = vrot.lane.b32.xlu1 %v11237_v57, %s7628_s4  ;;  %p7562_p1 = scmp.lt.s32.totalorder %s7560_s29, %s7554_s19 }
 0x9e5   : > { %p7563_p2 = por %p7562_p1, %p7561_p0 }
 0x9e6   : > { %6824 = vrot.lane.b32.xlu0 %v11056_v46, %s7628_s4 }
 0x9e7   : > { %6852 = vrot.lane.b32.xlu1 %v11030_v55, %s7629_s5  ;;  %p7564_p3 = pnand %p7563_p2, %p7557_p13 }
 0x9ea   : > { %6828 = vrot.lane.b32.xlu0 %v6823_v24, %s7628_s4 }
 0x9eb   : > { %6856 = vrot.lane.b32.xlu1 %v6851_v29, %s7629_s5 }
 0x9ee   : > { %6854 = vrot.lane.b32.xlu0 %v11216_v49, %s7629_s5 }
 0x9ef   : > { %6882 = vrot.lane.b32.xlu1 %v11202_v27, %s7630_s6 }
 0x9f2   : > { %6880 = vrot.lane.b32.xlu0 %v11004_v43, %s7630_s6 }
 0x9f3   : > { %6908 = vrot.lane.b32.xlu1 %v10962_v30, %s7631_s7 }
 0x9f6   : > { %6884 = vrot.lane.b32.xlu0 %v6879_v33, %s7630_s6 }
 0x9f7   : > { %6912 = vrot.lane.b32.xlu1 %v6907_v61, %s7631_s7 }
 0x9fa   : > { %6910 = vrot.lane.b32.xlu0 %v11181_v25, %s7631_s7 }
 0x9fb   : > { %6938 = vrot.lane.b32.xlu1 %v11160_v62, %s7632_s8 }
 0x9fe   : > { %6936 = vrot.lane.b32.xlu0 %v10885_v20, %s7632_s8 }
 0x9ff   : > { %6964 = vrot.lane.b32.xlu1 %v10855_v18, %s7633_s28 }
 0xa02   : > { %6940 = vrot.lane.b32.xlu0 %v6935_v17, %s7632_s8 }
 0xa03   : > { %6968 = vrot.lane.b32.xlu1 %v6963_v22, %s7633_s28 }
 0xa06   : > { %6966 = vrot.lane.b32.xlu0 %v11139_v8, %s7633_s28 }
 0xa1c   : > { %v6558_v9 = vpop.permute.xlu1 %6557 }
 0xa1d   : > { %6566 = vst.msk [vmem:[%s11109_s26 + $0x7] sm:$0xff] %vm504_vm3, %v6558_v9  ;;  %vm6618_vm3 = vcmask 130147  }
 0xa20   : > { %v6583_v7 = vpop.permute.xlu1 %6582 }
 0xa21   : > { %6592 = vst.msk [vmem:[%s11109_s26 - $0x2] sm:$0xfc] %vm6591_vm0, %v6583_v7  ;;  %vm6702_vm0 = vcmask 226496  }
 0xa28   : > { %v6560_v20 = vpop.permute.xlu0 %6559 }
 0xa29   : > { %6568 = vst.msk [vmem:[%s11109_s26 + $0xf] sm:$0x1] %vm6567_vm4, %v6560_v20  ;;  %v6587_v18 = vpop.permute.xlu1 %6586  ;;  %vm6805_vm4 = vcmask 326945  }
 0xa2a   : > { %6595 = vst.msk [vmem:[%s11109_s26 + $0xe] sm:$0x3] %vm6594_vm1, %v6587_v18  ;;  %vm6835_vm1 = vcmask 359744  }
 0xa2c   : > { %v6585_v3 = vpop.permute.xlu0 %6584 }
 0xa2d   : > { %6593 = vst.msk [vmem:[%s11109_s26 + $0x6] sm:$0xff] %vm11725_vm2, %v6585_v3  ;;  %v6612_v30 = vpop.permute.xlu1 %6611  ;;  %vm6833_vm2 = vcmask 359746  }
 0xa2e   : > { %6620 = vst.msk [vmem:[%s11109_s26 + $0x5] sm:$0xff] %vm890_vm5, %v6612_v30  ;;  %vm6672_vm5 = vcmask 195749  }
 0xa30   : > { %v6610_v23 = vpop.permute.xlu0 %6609 }
 0xa31   : > { %6619 = vst.msk [vmem:[%s11109_s26 - $0x3] sm:$0xf8] %vm6618_vm3, %v6610_v23  ;;  %v6637_v43 = vpop.permute.xlu1 %6636  ;;  %vm6861_vm3 = vcmask 392547  }
 0xa32   : > { %6646 = vst.msk [vmem:[%s11109_s26 - $0x4] sm:$0xf0] %vm6645_vm13, %v6637_v43  ;;  %vm6865_vm13 = vcmask 387424  }
 0xa34   : > { %v6614_v55 = vpop.permute.xlu0 %6613 }
 0xa35   : > { %6622 = vst.msk [vmem:[%s11109_s26 + $0xd] sm:$0x7] %vm6621_vm14, %v6614_v55  ;;  %v6641_v46 = vpop.permute.xlu1 %6640  ;;  %vm6863_vm14 = vcmask 392544  }
 0xa36   : > { %6649 = vst.msk [vmem:[%s11109_s26 + $0xc] sm:$0xf] %vm6648_vm9, %v6641_v46  ;;  %vm6891_vm9 = vcmask 425344  }
 0xa38   : > { %v6639_v2 = vpop.permute.xlu0 %6638 }
 0xa39   : > { %6647 = vst.msk [vmem:[%s11109_s26 + $0x4] sm:$0xff] %vm1083_vm6, %v6639_v2  ;;  %v6666_v42 = vpop.permute.xlu1 %6665  ;;  %vm6726_vm6 = vcmask 261351  }
 0xa3a   : > { %6674 = vst.msk [vmem:[%s11109_s26 + $0x3] sm:$0xff] %vm1276_vm7, %v6666_v42  ;;  %vm6729_vm7 = vcmask 260320  }
 0xa3c   : > { %v6664_v21 = vpop.permute.xlu0 %6663 }
 0xa3d   : > { %6673 = vst.msk [vmem:[%s11109_s26 - $0x5] sm:$0xe0] %vm6672_vm5, %v6664_v21  ;;  %v6691_v8 = vpop.permute.xlu1 %6690  ;;  %vm6889_vm5 = vcmask 425348  }
 0xa3e   : > { %6700 = vst.msk [vmem:[%s11109_s26 - $0x6] sm:$0xc0] %vm6699_vm15, %v6691_v8  ;;  %vm6917_vm15 = vcmask 458149  }
 0xa40   : > { %v6668_v47 = vpop.permute.xlu0 %6667 }
 0xa41   : > { %6676 = vst.msk [vmem:[%s11109_s26 + $0xb] sm:$0x1f] %vm6675_vm12, %v6668_v47  ;;  %v6695_v62 = vpop.permute.xlu1 %6694  ;;  %vm6893_vm12 = vcmask 421248  }
 0xa42   : > { %6703 = vst.msk [vmem:[%s11109_s26 + $0xa] sm:$0x3f] %vm6702_vm0, %v6695_v62  ;;  %vm6921_vm0 = vcmask 455072  }
 0xa44   : > { %v6693_v51 = vpop.permute.xlu0 %6692 }
 0xa45   : > { %6701 = vst.msk [vmem:[%s11109_s26 + $0x2] sm:$0xff] %vm1470_vm8, %v6693_v51  ;;  %v6720_v25 = vpop.permute.xlu1 %6719  ;;  %vm6809_vm8 = vcmask 319776  }
 0xa46   : > { %6728 = vst.msk [vmem:[%s11109_s26 + $0x1] sm:$0xff] %vm1663_vm10, %v6720_v25  ;;  %vm6807_vm10 = vcmask 326944  }
 0xa48   : > { %v6718_v63 = vpop.permute.xlu0 %6717 }
 0xa49   : > { %6727 = vst.msk [vmem:[%s11109_s26 - $0x7] sm:$0x80] %vm6726_vm6, %v6718_v63  ;;  %v6776_v27 = vpop.permute.xlu1 %6775  ;;  %vm6919_vm6 = vcmask 458144  }
 0xa4a   : > { %6781 = vst.msk [vmem:[%s11109_s26] sm:$0xff] %vm1856_vm11, %v6776_v27 }
 0xa4c   : > { %v6722_v49 = vpop.permute.xlu0 %6721 }
 0xa4d   : > { %6730 = vst.msk [vmem:[%s11109_s26 + $0x9] sm:$0x7f] %vm6729_vm7, %v6722_v49  ;;  %v6797_v12 = vpop.permute.xlu1 %6796  ;;  %vm6947_vm7 = vcmask 490944  }
 0xa4e   : > { %6806 = vst.msk [vmem:[%s11109_s26 - $0x1] sm:$0xfe] %vm6805_vm4, %v6797_v12  ;;  %vm6945_vm4 = vcmask 490950  }
 0xa50   : > { %v6778_v57 = vpop.permute.xlu0 %6777 }
 0xa51   : > { %6782 = vst.msk [vmem:[%s11109_s26 + $0x8] sm:$0xff] %vm1856_vm11, %v6778_v57  ;;  %v6801_v35 = vpop.permute.xlu1 %6800  ;;  %vm6837_vm11 = vcmask 353600  }
 0xa52   : > { %6810 = vst.msk [vmem:[%s11109_s26 + $0xf] sm:$0x1] %vm6809_vm8, %v6801_v35  ;;  %vm6973_vm8 = vcmask 523751  }
 0xa54   : > { %v6799_v4 = vpop.permute.xlu0 %6798 }
 0xa55   : > { %6808 = vst.msk [vmem:[%s11109_s26 + $0x7] sm:$0xff] %vm6807_vm10, %v6799_v4  ;;  %v6827_v60 = vpop.permute.xlu1 %6826  ;;  %vm6949_vm10 = vcmask 488896  }
 0xa56   : > { %6836 = vst.msk [vmem:[%s11109_s26 + $0x6] sm:$0xff] %vm6835_vm1, %v6827_v60  ;;  %vm6977_vm1 = vcmask 522720  }
 0xa58   : > { %v6825_v19 = vpop.permute.xlu0 %6824 }
 0xa59   : > { %6834 = vst.msk [vmem:[%s11109_s26 - $0x2] sm:$0xfc] %vm6833_vm2, %v6825_v19  ;;  %v6853_v40 = vpop.permute.xlu1 %6852  ;;  %vm6975_vm2 = vcmask 523744  }
 0xa5a   : > { %6862 = vst.msk [vmem:[%s11109_s26 - $0x3] sm:$0xf8] %vm6861_vm3, %v6853_v40 }
 0xa5c   : > { %v6829_v5 = vpop.permute.xlu0 %6828 }
 0xa5d   : > { %6838 = vst.msk [vmem:[%s11109_s26 + $0xe] sm:$0x3] %vm6837_vm11, %v6829_v5  ;;  %v6857_v37 = vpop.permute.xlu1 %6856 }
 0xa5e   : > { %6866 = vst.msk [vmem:[%s11109_s26 + $0xd] sm:$0x7] %vm6865_vm13, %v6857_v37 }
 0xa60   : > { %v6855_v11 = vpop.permute.xlu0 %6854 }
 0xa61   : > { %6864 = vst.msk [vmem:[%s11109_s26 + $0x5] sm:$0xff] %vm6863_vm14, %v6855_v11  ;;  %v6883_v0 = vpop.permute.xlu1 %6882 }
 0xa62   : > { %6892 = vst.msk [vmem:[%s11109_s26 + $0x4] sm:$0xff] %vm6891_vm9, %v6883_v0 }
 0xa64   : > { %v6881_v13 = vpop.permute.xlu0 %6880 }
 0xa65   : > { %6890 = vst.msk [vmem:[%s11109_s26 - $0x4] sm:$0xf0] %vm6889_vm5, %v6881_v13  ;;  %v6909_v44 = vpop.permute.xlu1 %6908 }
 0xa66   : > { %6918 = vst.msk [vmem:[%s11109_s26 - $0x5] sm:$0xe0] %vm6917_vm15, %v6909_v44 }
 0xa68   : > { %v6885_v28 = vpop.permute.xlu0 %6884 }
 0xa69   : > { %6894 = vst.msk [vmem:[%s11109_s26 + $0xc] sm:$0xf] %vm6893_vm12, %v6885_v28  ;;  %v6913_v59 = vpop.permute.xlu1 %6912 }
 0xa6a   : > { %6922 = vst.msk [vmem:[%s11109_s26 + $0xb] sm:$0x1f] %vm6921_vm0, %v6913_v59 }
 0xa6c   : > { %v6911_v31 = vpop.permute.xlu0 %6910 }
 0xa6d   : > { %6920 = vst.msk [vmem:[%s11109_s26 + $0x3] sm:$0xff] %vm6919_vm6, %v6911_v31  ;;  %v6939_v54 = vpop.permute.xlu1 %6938 }
 0xa6e   : > { %6948 = vst.msk [vmem:[%s11109_s26 + $0x2] sm:$0xff] %vm6947_vm7, %v6939_v54 }
 0xa70   : > { %v6937_v56 = vpop.permute.xlu0 %6936 }
 0xa71   : > { %6946 = vst.msk [vmem:[%s11109_s26 - $0x6] sm:$0xc0] %vm6945_vm4, %v6937_v56  ;;  %v6965_v36 = vpop.permute.xlu1 %6964 }
 0xa72   : > { %6974 = vst.msk [vmem:[%s11109_s26 - $0x7] sm:$0x80] %vm6973_vm8, %v6965_v36 }
 0xa74   : > { %v6941_v14 = vpop.permute.xlu0 %6940 }
 0xa75   : > { %6950 = vst.msk [vmem:[%s11109_s26 + $0xa] sm:$0x3f] %vm6949_vm10, %v6941_v14  ;;  %v6969_v50 = vpop.permute.xlu1 %6968 }
 0xa76   : > { %6978 = vst.msk [vmem:[%s11109_s26 + $0x9] sm:$0x7f] %vm6977_vm1, %v6969_v50 }
 0xa78   : > { %v6967_v15 = vpop.permute.xlu0 %6966 }
 0xa79   : > { %6976 = vst.msk [vmem:[%s11109_s26 + $0x1] sm:$0xff] %vm6975_vm2, %v6967_v15 }
 0xa7a   : > { %7567 = shalt.err (!%p7564_p3)
}
 0xa7b   : > { %s7568_s24 = scalar_lea.hbm %s11393_s17, 256  ;;  %s7572_s5 = scalar_lea.hbm %s11445_s3, 512 }
 0xa7c   : > { %p7569_p4 = scmp.ne.s32.totalorder %s11393_s17, %s7568_s24  ;;  %p7573_p9 = scmp.lt.u32.totalorder %s11393_s17, %s11445_s3 }
 0xa7d   : > { %p7574_p10 = scmp.lt.u32.totalorder %s7572_s5, %s7568_s24  ;;  %p7576_p12 = scmp.lt.u32.totalorder %s7568_s24, %s11393_s17 }
 0xa7e   : > { %p7570_p7 = pnand %p7569_p4, %p7694_p5 }
 0xa7f   : > { %p7575_p11 = por %p7574_p10, %p7573_p9 }
 0xa80   : > { %p7571_p8 = pneg %p7570_p7 }
 0xa81   : > { %p7577_p13 = por %p7576_p12, %p7575_p11 }
 0xa83   : > { %p7578_p0 = pnand %p7577_p13, %p7571_p8 }
 0xa85   : > { %7581 = shalt.err (!%p7578_p0)
}
 0xa86   : > { %s7635_s8 = smov 128  }
 0xa87   : > { %7498 = dma.vmem_to_hbm [thread:$0]  (%p7694_p5), %s11395_s9, 256, %s11393_s17, %s11400_s16, %s7635_s8, %s7635_s8, %s7620_s30  }
 0xa88 PF: > { %p7504_p1 = scmp.ge.s32.totalorder %s7616_s15, 2  ;;  %s7008_s28 = sand.u32 1, %s7604_s12  }
 0xa89   : > { %s7009_s27 = scalar_lea.sflag [#allocation5], %s7008_s28 }
 0xa8a   : > { %p7501_p2 = pnand %p7504_p1, %p7698_p6 }
 0xa8c   : > { %7599 = dma.done.wait (!%p7501_p2), %s7009_s27, 256  }
 0xa8d   : > { %7601 = vsyncadd (!%p7501_p2), %s7009_s27, 4294967040  ;;  %p13_p3 = scmp.ge.s32.totalorder %s7681_s18, 4   ;;  %s11726_s12 = smov %s7608_s13 }
 0xa8e   : > { %s11727_s13 = smov %s7612_s14  ;;  %s11728_s14 = smov %s7692_s21 }
 0xa8f   : > { %s11729_s15 = smov %s7681_s18  ;;  %15 = sbr.rel (!%p13_p3) target bundleno = 3 (0x3), region = 74 }
 0xa96   :  { %7014 = vsyncpa [#allocation5], 1 }
 0xa97   :  { %7016 = vsyncpa [#allocation5 + $0x1], 1 }

</bundles_post_ra>
